<compile_context>
chip_gen: v5e
topology: v5e:2x2
jax: 0.10.0
libtpu: 0.0.40
codegen_flags: <defaults>
</compile_context>

<pallas_src>
import jax
import jax.numpy as jnp
from jax.experimental import pallas as pl
from jax.experimental.pallas import tpu as pltpu

DIM = 32
NUM_FEATURES_XD = 78
NUM_FEATURES_XT = 25
N_FILTERS = 32
EMBED_DIM = 128
OUTPUT_DIM = 128
N_OUTPUT = 1
SEQ_LEN = 1000               # Conv1d in_channels
CONV_K = 8
CONV_OUT_LEN = EMBED_DIM - CONV_K + 1   # 121
BN_EPS = 1e-5
N_GIN_LAYERS = 5

_VMEM_LIMIT = 32 * 1024 * 1024
_CPARAMS = pltpu.CompilerParams(vmem_limit_bytes=_VMEM_LIMIT)


def _vspec(shape):
    nd = len(shape)
    return pl.BlockSpec(shape, lambda *_: (0,) * nd)


# ------------------------- Pallas kernels -------------------------

def _gin_fused_kernel(a_ref, x_ref, w1_0_ref, w1_r_ref, w2_ref,
                      b1_ref, b2_ref, scale_ref, shift_ref,
                      p_ref, wxd_ref, bxd_ref, o_ref):
    """5 x (GINConv + ReLU + BatchNorm eval) + global_add_pool + fc1_xd + ReLU."""
    a = a_ref[...]                       # (N, N)
    h = x_ref[...]                       # (N, 78)
    b1 = b1_ref[...]                     # (5, 32)
    b2 = b2_ref[...]
    scale = scale_ref[...]
    shift = shift_ref[...]
    for i in range(N_GIN_LAYERS):        # statically unrolled
        w1 = w1_0_ref[...] if i == 0 else w1_r_ref[i - 1]
        # GINConv (eps = 0): nn((1 + eps) * x_i + sum_{j in N(i)} x_j)
        agg = jnp.dot(a, h, preferred_element_type=jnp.float32) + h
        t = jnp.dot(agg, w1, preferred_element_type=jnp.float32) + b1[i:i + 1, :]
        t = jnp.maximum(t, 0.0)
        t = jnp.dot(t, w2_ref[i], preferred_element_type=jnp.float32) + b2[i:i + 1, :]
        t = jnp.maximum(t, 0.0)          # outer F.relu(...)
        # BatchNorm1d eval mode folded into scale/shift
        h = t * scale[i:i + 1, :] + shift[i:i + 1, :]
    # global_add_pool as one-hot pooling matmul, then fc1_xd + ReLU
    pooled = jnp.dot(p_ref[...], h, preferred_element_type=jnp.float32)
    xd = jnp.dot(pooled, wxd_ref[...], preferred_element_type=jnp.float32) + bxd_ref[...]
    o_ref[...] = jnp.maximum(xd, 0.0)    # lane-dense (B, 128) store


def _protein_kernel(emb_ref, wconv_ref, wxt_ref, bxt_ref, o_ref):
    """Per-graph Conv1d(1000->32, k=8) fused with fc1_xt (conv bias pre-folded)."""
    emb = emb_ref[0]                                          # (1000, 128) bf16
    # conv[o, t] = sum_k (W[:, :, k] @ emb)[o, t + k]
    acc = jnp.zeros((N_FILTERS, CONV_OUT_LEN), jnp.float32)   # (32, 121)
    for k in range(CONV_K):
        full = jnp.dot(wconv_ref[k], emb,
                       preferred_element_type=jnp.float32)    # (32, 128) f32
        acc = acc + full[:, k:k + CONV_OUT_LEN]
    # fc1_xt over the PyTorch flatten order (o * 121 + t), decomposed per o
    xt = bxt_ref[...]                                         # (1, 128), conv bias folded in
    for o in range(N_FILTERS):
        xt = xt + jnp.dot(acc[o:o + 1, :], wxt_ref[o],
                          preferred_element_type=jnp.float32)
    o_ref[0] = xt                                             # lane-dense (1, 128) store


def _head_kernel(xd_ref, xt_ref, w1_ref, b1_ref, w2_ref, b2_ref,
                 w3_ref, b3_ref, o_ref):
    """cat(xd, xt) -> fc1 -> ReLU -> fc2 -> ReLU -> out, all fused."""
    w1 = w1_ref[...]                                          # (256, 1024)
    h = (jnp.dot(xd_ref[...], w1[:OUTPUT_DIM, :], preferred_element_type=jnp.float32)
         + jnp.dot(xt_ref[...], w1[OUTPUT_DIM:, :], preferred_element_type=jnp.float32)
         + b1_ref[...])
    h = jnp.maximum(h, 0.0)                                   # dropout = identity (eval)
    h = jnp.dot(h, w2_ref[...], preferred_element_type=jnp.float32) + b2_ref[...]
    h = jnp.maximum(h, 0.0)
    o_ref[...] = jnp.dot(h, w3_ref[...], preferred_element_type=jnp.float32) + b3_ref[...]


# ------------------------- wrappers -------------------------

def gin_graph_branch(A, x, P, gp, fc1_xd_w, fc1_xd_b):
    B = P.shape[0]
    args = (A, x, gp["w1_0"], gp["w1_rest"], gp["w2"], gp["b1"], gp["b2"],
            gp["scale"], gp["shift"], P, fc1_xd_w, fc1_xd_b)
    return pl.pallas_call(
        _gin_fused_kernel,
        out_shape=jax.ShapeDtypeStruct((B, OUTPUT_DIM), jnp.float32),
        in_specs=[_vspec(a.shape) for a in args],
        out_specs=_vspec((B, OUTPUT_DIM)),
        compiler_params=_CPARAMS,
    )(*args)


def protein_branch(emb_bf16, wconv_bf16, wxt3, bxt_eff):
    B = emb_bf16.shape[0]
    out = pl.pallas_call(
        _protein_kernel,
        out_shape=jax.ShapeDtypeStruct((B, 1, OUTPUT_DIM), jnp.float32),
        grid=(B,),
        in_specs=[
            pl.BlockSpec((1, SEQ_LEN, EMBED_DIM), lambda b: (b, 0, 0)),
            pl.BlockSpec((CONV_K, N_FILTERS, SEQ_LEN), lambda b: (0, 0, 0)),
            pl.BlockSpec((N_FILTERS, CONV_OUT_LEN, OUTPUT_DIM), lambda b: (0, 0, 0)),
            pl.BlockSpec((1, OUTPUT_DIM), lambda b: (0, 0)),
        ],
        out_specs=pl.BlockSpec((1, 1, OUTPUT_DIM), lambda b: (b, 0, 0)),
        compiler_params=pltpu.CompilerParams(
            dimension_semantics=("parallel",),       # use both TCs on v7x
            vmem_limit_bytes=_VMEM_LIMIT),
    )(emb_bf16, wconv_bf16, wxt3, bxt_eff)
    return out[:, 0, :]


def head(xd, xt, p):
    B = xd.shape[0]
    args = (xd, xt, p["fc1_w"], p["fc1_b"], p["fc2_w"], p["fc2_b"],
            p["out_w"], p["out_b"])
    return pl.pallas_call(
        _head_kernel,
        out_shape=jax.ShapeDtypeStruct((B, N_OUTPUT), jnp.float32),
        in_specs=[_vspec(a.shape) for a in args],
        out_specs=_vspec((B, N_OUTPUT)),
        compiler_params=_CPARAMS,
    )(*args)


# ------------------------- parameter init -------------------------

def _init_linear(key, fan_in, fan_out):
    kw, kb = jax.random.split(key)
    bound = 1.0 / jnp.sqrt(jnp.float32(fan_in))
    w = jax.random.uniform(kw, (fan_in, fan_out), jnp.float32, -bound, bound)
    b = jax.random.uniform(kb, (1, fan_out), jnp.float32, -bound, bound)
    return w, b


def init_params(key):
    keys = jax.random.split(key, 16)
    params = {}

    # 5 GIN layers, weights stacked so the fused kernel gets single DMAs.
    w1_rest, w2_all, b1_all, b2_all = [], [], [], []
    w1_0 = None
    for i in range(N_GIN_LAYERS):
        fan_in = NUM_FEATURES_XD if i == 0 else DIM
        k1, k2 = jax.random.split(keys[i])
        w1, b1 = _init_linear(k1, fan_in, DIM)
        w2, b2 = _init_linear(k2, DIM, DIM)
        if i == 0:
            w1_0 = w1
        else:
            w1_rest.append(w1)
        w2_all.append(w2)
        b1_all.append(b1[0])
        b2_all.append(b2[0])
    # BN eval-mode affine folded with fresh running stats (mean=0, var=1, gamma=1, beta=0).
    # TODO(synk): if trained running stats are loaded, recompute scale/shift from them.
    params["gin"] = {
        "w1_0": w1_0,                                       # (78, 32)
        "w1_rest": jnp.stack(w1_rest),                      # (4, 32, 32)
        "w2": jnp.stack(w2_all),                            # (5, 32, 32)
        "b1": jnp.stack(b1_all),                            # (5, 32)
        "b2": jnp.stack(b2_all),                            # (5, 32)
        "scale": jnp.full((N_GIN_LAYERS, DIM), 1.0 / jnp.sqrt(1.0 + BN_EPS), jnp.float32),
        "shift": jnp.zeros((N_GIN_LAYERS, DIM), jnp.float32),
    }

    params["fc1_xd_w"], params["fc1_xd_b"] = _init_linear(keys[5], DIM, OUTPUT_DIM)

    # Embedding(num_features_xt + 1, embed_dim)
    params["embedding"] = jax.random.normal(
        keys[6], (NUM_FEATURES_XT + 1, EMBED_DIM), jnp.float32)

    # Conv1d(in=1000, out=32, k=8): torch weight (out, C, K)
    kcw, kcb = jax.random.split(keys[7])
    cbound = 1.0 / jnp.sqrt(jnp.float32(SEQ_LEN * CONV_K))
    conv_w = jax.random.uniform(kcw, (N_FILTERS, SEQ_LEN, CONV_K), jnp.float32,
                                -cbound, cbound)
    conv_b = jax.random.uniform(kcb, (N_FILTERS,), jnp.float32, -cbound, cbound)
    # per-tap weights W[:, :, k] stacked -> (8, 32, 1000), bf16 for MXU throughput
    params["wconv"] = jnp.transpose(conv_w, (2, 0, 1)).astype(jnp.bfloat16)

    # fc1_xt: (3872, 128) stored transposed vs torch; reshaped to (32, 121, 128)
    # so the kernel can contract against the PyTorch flatten order o*121+t.
    fc1_xt_w, fc1_xt_b = _init_linear(keys[8], N_FILTERS * CONV_OUT_LEN, OUTPUT_DIM)
    wxt3 = fc1_xt_w.reshape(N_FILTERS, CONV_OUT_LEN, OUTPUT_DIM)
    params["wxt3"] = wxt3
    # Fold the conv bias into the fc1_xt bias (exact: no nonlinearity between them).
    params["bxt_eff"] = fc1_xt_b + conv_b @ wxt3.sum(axis=1)   # (1, 128)

    params["fc1_w"], params["fc1_b"] = _init_linear(keys[9], 2 * OUTPUT_DIM, 1024)
    params["fc2_w"], params["fc2_b"] = _init_linear(keys[10], 1024, 256)
    params["out_w"], params["out_b"] = _init_linear(keys[11], 256, N_OUTPUT)
    return params


# ------------------------- forward -------------------------

def gin_forward(params, x, edge_index, batch, target, *, n_graphs):
    n_nodes = x.shape[0]
    src, dst = edge_index[0], edge_index[1]
    # Dense adjacency for message passing: agg[i] = sum_{(j->i) in E} x[j]
    # TODO(synk): dense N x N adjacency / pooling only scales to small graphs;
    # large graphs need scalar-prefetched CSR / segment aggregation.
    A = jnp.zeros((n_nodes, n_nodes), jnp.float32).at[dst, src].add(1.0)
    P = jnp.zeros((n_graphs, n_nodes), jnp.float32).at[
        batch, jnp.arange(n_nodes)].set(1.0)

    # Drug branch: fused GIN stack + pool + fc1_xd (one kernel, one HBM store).
    xd = gin_graph_branch(A, x, P, params["gin"],
                          params["fc1_xd_w"], params["fc1_xd_b"])
    # F.dropout(p=0.2) -> identity (inference mode)

    # Protein branch: embedding lookup (XLA gather), then one fused
    # Conv1d + fc1_xt kernel; conv expressed as 8 shifted bf16 matmuls.
    emb = params["embedding"][target].astype(jnp.bfloat16)     # (B, 1000, 128) NCL
    xt = protein_branch(emb, params["wconv"], params["wxt3"], params["bxt_eff"])

    # Combined head: fc1 -> ReLU -> fc2 -> ReLU -> out in one kernel.
    out = head(xd, xt, params)
    # TODO(synk): original forward() has a bare `return` (returns None); we return `out`.
    return out


gin_forward_jit = jax.jit(gin_forward, static_argnames=("n_graphs",))


# ------------------------- main -------------------------

if __name__ == "__main__":
    key = jax.random.PRNGKey(0)
    kp, kx, kt = jax.random.split(key, 3)

    params = init_params(kp)

    # Small synthetic graph batch: 2 graphs x 12 nodes, chain edges both directions.
    n_per_graph, n_graphs = 12, 2
    n_nodes = n_per_graph * n_graphs
    x = jax.random.normal(kx, (n_nodes, NUM_FEATURES_XD), jnp.float32)

    srcs, dsts = [], []
    for g in range(n_graphs):
        base = g * n_per_graph
        for i in range(n_per_graph - 1):
            srcs += [base + i, base + i + 1]
            dsts += [base + i + 1, base + i]
    edge_index = jnp.array([srcs, dsts], dtype=jnp.int32)                   # (2, 44)
    batch = jnp.repeat(jnp.arange(n_graphs, dtype=jnp.int32), n_per_graph)  # (24,)

    # Protein sequence tokens in [0, 25], length 1000 (Conv1d in_channels).
    target = jax.random.randint(kt, (n_graphs, SEQ_LEN), 0, NUM_FEATURES_XT + 1,
                                dtype=jnp.int32)

    out = gin_forward_jit(params, x, edge_index, batch, target, n_graphs=n_graphs)
    jax.block_until_ready(out)
    assert out.shape == (n_graphs, N_OUTPUT)
    assert bool(jnp.all(jnp.isfinite(out)))
    print("KERNEL_OK")
</pallas_src>

<mosaic_0001>
module attributes {stable_mosaic.version = 11 : i64} {
  func.func @_gin_fused_kernel(%arg0: memref<24x24xf32, #tpu.memory_space<vmem>>, %arg1: memref<24x78xf32, #tpu.memory_space<vmem>>, %arg2: memref<78x32xf32, #tpu.memory_space<vmem>>, %arg3: memref<4x32x32xf32, #tpu.memory_space<vmem>>, %arg4: memref<5x32x32xf32, #tpu.memory_space<vmem>>, %arg5: memref<5x32xf32, #tpu.memory_space<vmem>>, %arg6: memref<5x32xf32, #tpu.memory_space<vmem>>, %arg7: memref<5x32xf32, #tpu.memory_space<vmem>>, %arg8: memref<5x32xf32, #tpu.memory_space<vmem>>, %arg9: memref<2x24xf32, #tpu.memory_space<vmem>>, %arg10: memref<32x128xf32, #tpu.memory_space<vmem>>, %arg11: memref<1x128xf32, #tpu.memory_space<vmem>>, %arg12: memref<2x128xf32, #tpu.memory_space<vmem>>) attributes {dimension_semantics = [], scalar_prefetch = 0 : i64, scratch_operands = 0 : i64, tpu.core_type = #tpu.core_type<tc>} {
    %c0 = arith.constant 0 : index
    %c0_0 = arith.constant 0 : index
    %0 = vector.load %arg0[%c0, %c0_0] : memref<24x24xf32, #tpu.memory_space<vmem>>, vector<24x24xf32>
    %c0_1 = arith.constant 0 : index
    %c0_2 = arith.constant 0 : index
    %1 = vector.load %arg1[%c0_1, %c0_2] : memref<24x78xf32, #tpu.memory_space<vmem>>, vector<24x78xf32>
    %c0_3 = arith.constant 0 : index
    %c0_4 = arith.constant 0 : index
    %2 = vector.load %arg5[%c0_3, %c0_4] : memref<5x32xf32, #tpu.memory_space<vmem>>, vector<5x32xf32>
    %c0_5 = arith.constant 0 : index
    %c0_6 = arith.constant 0 : index
    %3 = vector.load %arg6[%c0_5, %c0_6] : memref<5x32xf32, #tpu.memory_space<vmem>>, vector<5x32xf32>
    %c0_7 = arith.constant 0 : index
    %c0_8 = arith.constant 0 : index
    %4 = vector.load %arg7[%c0_7, %c0_8] : memref<5x32xf32, #tpu.memory_space<vmem>>, vector<5x32xf32>
    %c0_9 = arith.constant 0 : index
    %c0_10 = arith.constant 0 : index
    %5 = vector.load %arg8[%c0_9, %c0_10] : memref<5x32xf32, #tpu.memory_space<vmem>>, vector<5x32xf32>
    %c0_11 = arith.constant 0 : index
    %c0_12 = arith.constant 0 : index
    %6 = vector.load %arg2[%c0_11, %c0_12] : memref<78x32xf32, #tpu.memory_space<vmem>>, vector<78x32xf32>
    %cst = arith.constant dense<0.000000e+00> : vector<24x78xf32>
    %7 = tpu.matmul %0, %1, %cst {dimension_numbers = #tpu.dot_dimension_numbers<[1], [0], [0], [1], [0, 0, 1, 1], [], []>} : vector<24x24xf32>, vector<24x78xf32>, vector<24x78xf32> -> vector<24x78xf32>
    %8 = arith.addf %7, %1 : vector<24x78xf32>
    %cst_13 = arith.constant dense<0.000000e+00> : vector<24x32xf32>
    %9 = tpu.matmul %8, %6, %cst_13 {dimension_numbers = #tpu.dot_dimension_numbers<[1], [0], [0], [1], [0, 0, 1, 1], [], []>} : vector<24x78xf32>, vector<78x32xf32>, vector<24x32xf32> -> vector<24x32xf32>
    %10 = vector.extract_strided_slice %2 {offsets = [0, 0], sizes = [1, 32], strides = [1, 1]} : vector<5x32xf32> to vector<1x32xf32>
    %11 = vector.broadcast %10 : vector<1x32xf32> to vector<24x32xf32>
    %12 = arith.addf %9, %11 : vector<24x32xf32>
    %cst_14 = arith.constant 0.000000e+00 : f32
    %13 = vector.broadcast %cst_14 : f32 to vector<24x32xf32>
    %14 = arith.maximumf %12, %13 : vector<24x32xf32>
    %c0_15 = arith.constant 0 : index
    %c0_16 = arith.constant 0 : index
    %c0_17 = arith.constant 0 : index
    %15 = vector.load %arg4[%c0_15, %c0_16, %c0_17] : memref<5x32x32xf32, #tpu.memory_space<vmem>>, vector<1x32x32xf32>
    %16 = vector.shape_cast %15 : vector<1x32x32xf32> to vector<32x32xf32>
    %cst_18 = arith.constant dense<0.000000e+00> : vector<24x32xf32>
    %17 = tpu.matmul %14, %16, %cst_18 {dimension_numbers = #tpu.dot_dimension_numbers<[1], [0], [0], [1], [0, 0, 1, 1], [], []>} : vector<24x32xf32>, vector<32x32xf32>, vector<24x32xf32> -> vector<24x32xf32>
    %18 = vector.extract_strided_slice %3 {offsets = [0, 0], sizes = [1, 32], strides = [1, 1]} : vector<5x32xf32> to vector<1x32xf32>
    %19 = vector.broadcast %18 : vector<1x32xf32> to vector<24x32xf32>
    %20 = arith.addf %17, %19 : vector<24x32xf32>
    %cst_19 = arith.constant 0.000000e+00 : f32
    %21 = vector.broadcast %cst_19 : f32 to vector<24x32xf32>
    %22 = arith.maximumf %20, %21 : vector<24x32xf32>
    %23 = vector.extract_strided_slice %4 {offsets = [0, 0], sizes = [1, 32], strides = [1, 1]} : vector<5x32xf32> to vector<1x32xf32>
    %24 = vector.broadcast %23 : vector<1x32xf32> to vector<24x32xf32>
    %25 = arith.mulf %22, %24 : vector<24x32xf32>
    %26 = vector.extract_strided_slice %5 {offsets = [0, 0], sizes = [1, 32], strides = [1, 1]} : vector<5x32xf32> to vector<1x32xf32>
    %27 = vector.broadcast %26 : vector<1x32xf32> to vector<24x32xf32>
    %28 = arith.addf %25, %27 : vector<24x32xf32>
    %c0_20 = arith.constant 0 : index
    %c0_21 = arith.constant 0 : index
    %c0_22 = arith.constant 0 : index
    %29 = vector.load %arg3[%c0_20, %c0_21, %c0_22] : memref<4x32x32xf32, #tpu.memory_space<vmem>>, vector<1x32x32xf32>
    %30 = vector.shape_cast %29 : vector<1x32x32xf32> to vector<32x32xf32>
    %cst_23 = arith.constant dense<0.000000e+00> : vector<24x32xf32>
    %31 = tpu.matmul %0, %28, %cst_23 {dimension_numbers = #tpu.dot_dimension_numbers<[1], [0], [0], [1], [0, 0, 1, 1], [], []>} : vector<24x24xf32>, vector<24x32xf32>, vector<24x32xf32> -> vector<24x32xf32>
    %32 = arith.addf %31, %28 : vector<24x32xf32>
    %cst_24 = arith.constant dense<0.000000e+00> : vector<24x32xf32>
    %33 = tpu.matmul %32, %30, %cst_24 {dimension_numbers = #tpu.dot_dimension_numbers<[1], [0], [0], [1], [0, 0, 1, 1], [], []>} : vector<24x32xf32>, vector<32x32xf32>, vector<24x32xf32> -> vector<24x32xf32>
    %34 = vector.extract_strided_slice %2 {offsets = [1, 0], sizes = [1, 32], strides = [1, 1]} : vector<5x32xf32> to vector<1x32xf32>
    %35 = vector.broadcast %34 : vector<1x32xf32> to vector<24x32xf32>
    %36 = arith.addf %33, %35 : vector<24x32xf32>
    %cst_25 = arith.constant 0.000000e+00 : f32
    %37 = vector.broadcast %cst_25 : f32 to vector<24x32xf32>
    %38 = arith.maximumf %36, %37 : vector<24x32xf32>
    %c1 = arith.constant 1 : index
    %c0_26 = arith.constant 0 : index
    %c0_27 = arith.constant 0 : index
    %39 = vector.load %arg4[%c1, %c0_26, %c0_27] : memref<5x32x32xf32, #tpu.memory_space<vmem>>, vector<1x32x32xf32>
    %40 = vector.shape_cast %39 : vector<1x32x32xf32> to vector<32x32xf32>
    %cst_28 = arith.constant dense<0.000000e+00> : vector<24x32xf32>
    %41 = tpu.matmul %38, %40, %cst_28 {dimension_numbers = #tpu.dot_dimension_numbers<[1], [0], [0], [1], [0, 0, 1, 1], [], []>} : vector<24x32xf32>, vector<32x32xf32>, vector<24x32xf32> -> vector<24x32xf32>
    %42 = vector.extract_strided_slice %3 {offsets = [1, 0], sizes = [1, 32], strides = [1, 1]} : vector<5x32xf32> to vector<1x32xf32>
    %43 = vector.broadcast %42 : vector<1x32xf32> to vector<24x32xf32>
    %44 = arith.addf %41, %43 : vector<24x32xf32>
    %cst_29 = arith.constant 0.000000e+00 : f32
    %45 = vector.broadcast %cst_29 : f32 to vector<24x32xf32>
    %46 = arith.maximumf %44, %45 : vector<24x32xf32>
    %47 = vector.extract_strided_slice %4 {offsets = [1, 0], sizes = [1, 32], strides = [1, 1]} : vector<5x32xf32> to vector<1x32xf32>
    %48 = vector.broadcast %47 : vector<1x32xf32> to vector<24x32xf32>
    %49 = arith.mulf %46, %48 : vector<24x32xf32>
    %50 = vector.extract_strided_slice %5 {offsets = [1, 0], sizes = [1, 32], strides = [1, 1]} : vector<5x32xf32> to vector<1x32xf32>
    %51 = vector.broadcast %50 : vector<1x32xf32> to vector<24x32xf32>
    %52 = arith.addf %49, %51 : vector<24x32xf32>
    %c1_30 = arith.constant 1 : index
    %c0_31 = arith.constant 0 : index
    %c0_32 = arith.constant 0 : index
    %53 = vector.load %arg3[%c1_30, %c0_31, %c0_32] : memref<4x32x32xf32, #tpu.memory_space<vmem>>, vector<1x32x32xf32>
    %54 = vector.shape_cast %53 : vector<1x32x32xf32> to vector<32x32xf32>
    %cst_33 = arith.constant dense<0.000000e+00> : vector<24x32xf32>
    %55 = tpu.matmul %0, %52, %cst_33 {dimension_numbers = #tpu.dot_dimension_numbers<[1], [0], [0], [1], [0, 0, 1, 1], [], []>} : vector<24x24xf32>, vector<24x32xf32>, vector<24x32xf32> -> vector<24x32xf32>
    %56 = arith.addf %55, %52 : vector<24x32xf32>
    %cst_34 = arith.constant dense<0.000000e+00> : vector<24x32xf32>
    %57 = tpu.matmul %56, %54, %cst_34 {dimension_numbers = #tpu.dot_dimension_numbers<[1], [0], [0], [1], [0, 0, 1, 1], [], []>} : vector<24x32xf32>, vector<32x32xf32>, vector<24x32xf32> -> vector<24x32xf32>
    %58 = vector.extract_strided_slice %2 {offsets = [2, 0], sizes = [1, 32], strides = [1, 1]} : vector<5x32xf32> to vector<1x32xf32>
    %59 = vector.broadcast %58 : vector<1x32xf32> to vector<24x32xf32>
    %60 = arith.addf %57, %59 : vector<24x32xf32>
    %cst_35 = arith.constant 0.000000e+00 : f32
    %61 = vector.broadcast %cst_35 : f32 to vector<24x32xf32>
    %62 = arith.maximumf %60, %61 : vector<24x32xf32>
    %c2 = arith.constant 2 : index
    %c0_36 = arith.constant 0 : index
    %c0_37 = arith.constant 0 : index
    %63 = vector.load %arg4[%c2, %c0_36, %c0_37] : memref<5x32x32xf32, #tpu.memory_space<vmem>>, vector<1x32x32xf32>
    %64 = vector.shape_cast %63 : vector<1x32x32xf32> to vector<32x32xf32>
    %cst_38 = arith.constant dense<0.000000e+00> : vector<24x32xf32>
    %65 = tpu.matmul %62, %64, %cst_38 {dimension_numbers = #tpu.dot_dimension_numbers<[1], [0], [0], [1], [0, 0, 1, 1], [], []>} : vector<24x32xf32>, vector<32x32xf32>, vector<24x32xf32> -> vector<24x32xf32>
    %66 = vector.extract_strided_slice %3 {offsets = [2, 0], sizes = [1, 32], strides = [1, 1]} : vector<5x32xf32> to vector<1x32xf32>
    %67 = vector.broadcast %66 : vector<1x32xf32> to vector<24x32xf32>
    %68 = arith.addf %65, %67 : vector<24x32xf32>
    %cst_39 = arith.constant 0.000000e+00 : f32
    %69 = vector.broadcast %cst_39 : f32 to vector<24x32xf32>
    %70 = arith.maximumf %68, %69 : vector<24x32xf32>
    %71 = vector.extract_strided_slice %4 {offsets = [2, 0], sizes = [1, 32], strides = [1, 1]} : vector<5x32xf32> to vector<1x32xf32>
    %72 = vector.broadcast %71 : vector<1x32xf32> to vector<24x32xf32>
    %73 = arith.mulf %70, %72 : vector<24x32xf32>
    %74 = vector.extract_strided_slice %5 {offsets = [2, 0], sizes = [1, 32], strides = [1, 1]} : vector<5x32xf32> to vector<1x32xf32>
    %75 = vector.broadcast %74 : vector<1x32xf32> to vector<24x32xf32>
    %76 = arith.addf %73, %75 : vector<24x32xf32>
    %c2_40 = arith.constant 2 : index
    %c0_41 = arith.constant 0 : index
    %c0_42 = arith.constant 0 : index
    %77 = vector.load %arg3[%c2_40, %c0_41, %c0_42] : memref<4x32x32xf32, #tpu.memory_space<vmem>>, vector<1x32x32xf32>
    %78 = vector.shape_cast %77 : vector<1x32x32xf32> to vector<32x32xf32>
    %cst_43 = arith.constant dense<0.000000e+00> : vector<24x32xf32>
    %79 = tpu.matmul %0, %76, %cst_43 {dimension_numbers = #tpu.dot_dimension_numbers<[1], [0], [0], [1], [0, 0, 1, 1], [], []>} : vector<24x24xf32>, vector<24x32xf32>, vector<24x32xf32> -> vector<24x32xf32>
    %80 = arith.addf %79, %76 : vector<24x32xf32>
    %cst_44 = arith.constant dense<0.000000e+00> : vector<24x32xf32>
    %81 = tpu.matmul %80, %78, %cst_44 {dimension_numbers = #tpu.dot_dimension_numbers<[1], [0], [0], [1], [0, 0, 1, 1], [], []>} : vector<24x32xf32>, vector<32x32xf32>, vector<24x32xf32> -> vector<24x32xf32>
    %82 = vector.extract_strided_slice %2 {offsets = [3, 0], sizes = [1, 32], strides = [1, 1]} : vector<5x32xf32> to vector<1x32xf32>
    %83 = vector.broadcast %82 : vector<1x32xf32> to vector<24x32xf32>
    %84 = arith.addf %81, %83 : vector<24x32xf32>
    %cst_45 = arith.constant 0.000000e+00 : f32
    %85 = vector.broadcast %cst_45 : f32 to vector<24x32xf32>
    %86 = arith.maximumf %84, %85 : vector<24x32xf32>
    %c3 = arith.constant 3 : index
    %c0_46 = arith.constant 0 : index
    %c0_47 = arith.constant 0 : index
    %87 = vector.load %arg4[%c3, %c0_46, %c0_47] : memref<5x32x32xf32, #tpu.memory_space<vmem>>, vector<1x32x32xf32>
    %88 = vector.shape_cast %87 : vector<1x32x32xf32> to vector<32x32xf32>
    %cst_48 = arith.constant dense<0.000000e+00> : vector<24x32xf32>
    %89 = tpu.matmul %86, %88, %cst_48 {dimension_numbers = #tpu.dot_dimension_numbers<[1], [0], [0], [1], [0, 0, 1, 1], [], []>} : vector<24x32xf32>, vector<32x32xf32>, vector<24x32xf32> -> vector<24x32xf32>
    %90 = vector.extract_strided_slice %3 {offsets = [3, 0], sizes = [1, 32], strides = [1, 1]} : vector<5x32xf32> to vector<1x32xf32>
    %91 = vector.broadcast %90 : vector<1x32xf32> to vector<24x32xf32>
    %92 = arith.addf %89, %91 : vector<24x32xf32>
    %cst_49 = arith.constant 0.000000e+00 : f32
    %93 = vector.broadcast %cst_49 : f32 to vector<24x32xf32>
    %94 = arith.maximumf %92, %93 : vector<24x32xf32>
    %95 = vector.extract_strided_slice %4 {offsets = [3, 0], sizes = [1, 32], strides = [1, 1]} : vector<5x32xf32> to vector<1x32xf32>
    %96 = vector.broadcast %95 : vector<1x32xf32> to vector<24x32xf32>
    %97 = arith.mulf %94, %96 : vector<24x32xf32>
    %98 = vector.extract_strided_slice %5 {offsets = [3, 0], sizes = [1, 32], strides = [1, 1]} : vector<5x32xf32> to vector<1x32xf32>
    %99 = vector.broadcast %98 : vector<1x32xf32> to vector<24x32xf32>
    %100 = arith.addf %97, %99 : vector<24x32xf32>
    %c3_50 = arith.constant 3 : index
    %c0_51 = arith.constant 0 : index
    %c0_52 = arith.constant 0 : index
    %101 = vector.load %arg3[%c3_50, %c0_51, %c0_52] : memref<4x32x32xf32, #tpu.memory_space<vmem>>, vector<1x32x32xf32>
    %102 = vector.shape_cast %101 : vector<1x32x32xf32> to vector<32x32xf32>
    %cst_53 = arith.constant dense<0.000000e+00> : vector<24x32xf32>
    %103 = tpu.matmul %0, %100, %cst_53 {dimension_numbers = #tpu.dot_dimension_numbers<[1], [0], [0], [1], [0, 0, 1, 1], [], []>} : vector<24x24xf32>, vector<24x32xf32>, vector<24x32xf32> -> vector<24x32xf32>
    %104 = arith.addf %103, %100 : vector<24x32xf32>
    %cst_54 = arith.constant dense<0.000000e+00> : vector<24x32xf32>
    %105 = tpu.matmul %104, %102, %cst_54 {dimension_numbers = #tpu.dot_dimension_numbers<[1], [0], [0], [1], [0, 0, 1, 1], [], []>} : vector<24x32xf32>, vector<32x32xf32>, vector<24x32xf32> -> vector<24x32xf32>
    %106 = vector.extract_strided_slice %2 {offsets = [4, 0], sizes = [1, 32], strides = [1, 1]} : vector<5x32xf32> to vector<1x32xf32>
    %107 = vector.broadcast %106 : vector<1x32xf32> to vector<24x32xf32>
    %108 = arith.addf %105, %107 : vector<24x32xf32>
    %cst_55 = arith.constant 0.000000e+00 : f32
    %109 = vector.broadcast %cst_55 : f32 to vector<24x32xf32>
    %110 = arith.maximumf %108, %109 : vector<24x32xf32>
    %c4 = arith.constant 4 : index
    %c0_56 = arith.constant 0 : index
    %c0_57 = arith.constant 0 : index
    %111 = vector.load %arg4[%c4, %c0_56, %c0_57] : memref<5x32x32xf32, #tpu.memory_space<vmem>>, vector<1x32x32xf32>
    %112 = vector.shape_cast %111 : vector<1x32x32xf32> to vector<32x32xf32>
    %cst_58 = arith.constant dense<0.000000e+00> : vector<24x32xf32>
    %113 = tpu.matmul %110, %112, %cst_58 {dimension_numbers = #tpu.dot_dimension_numbers<[1], [0], [0], [1], [0, 0, 1, 1], [], []>} : vector<24x32xf32>, vector<32x32xf32>, vector<24x32xf32> -> vector<24x32xf32>
    %114 = vector.extract_strided_slice %3 {offsets = [4, 0], sizes = [1, 32], strides = [1, 1]} : vector<5x32xf32> to vector<1x32xf32>
    %115 = vector.broadcast %114 : vector<1x32xf32> to vector<24x32xf32>
    %116 = arith.addf %113, %115 : vector<24x32xf32>
    %cst_59 = arith.constant 0.000000e+00 : f32
    %117 = vector.broadcast %cst_59 : f32 to vector<24x32xf32>
    %118 = arith.maximumf %116, %117 : vector<24x32xf32>
    %119 = vector.extract_strided_slice %4 {offsets = [4, 0], sizes = [1, 32], strides = [1, 1]} : vector<5x32xf32> to vector<1x32xf32>
    %120 = vector.broadcast %119 : vector<1x32xf32> to vector<24x32xf32>
    %121 = arith.mulf %118, %120 : vector<24x32xf32>
    %122 = vector.extract_strided_slice %5 {offsets = [4, 0], sizes = [1, 32], strides = [1, 1]} : vector<5x32xf32> to vector<1x32xf32>
    %123 = vector.broadcast %122 : vector<1x32xf32> to vector<24x32xf32>
    %124 = arith.addf %121, %123 : vector<24x32xf32>
    %c0_60 = arith.constant 0 : index
    %c0_61 = arith.constant 0 : index
    %125 = vector.load %arg9[%c0_60, %c0_61] : memref<2x24xf32, #tpu.memory_space<vmem>>, vector<2x24xf32>
    %cst_62 = arith.constant dense<0.000000e+00> : vector<2x32xf32>
    %126 = tpu.matmul %125, %124, %cst_62 {dimension_numbers = #tpu.dot_dimension_numbers<[1], [0], [0], [1], [0, 0, 1, 1], [], []>} : vector<2x24xf32>, vector<24x32xf32>, vector<2x32xf32> -> vector<2x32xf32>
    %c0_63 = arith.constant 0 : index
    %c0_64 = arith.constant 0 : index
    %127 = vector.load %arg10[%c0_63, %c0_64] : memref<32x128xf32, #tpu.memory_space<vmem>>, vector<32x128xf32>
    %cst_65 = arith.constant dense<0.000000e+00> : vector<2x128xf32>
    %128 = tpu.matmul %126, %127, %cst_65 {dimension_numbers = #tpu.dot_dimension_numbers<[1], [0], [0], [1], [0, 0, 1, 1], [], []>} : vector<2x32xf32>, vector<32x128xf32>, vector<2x128xf32> -> vector<2x128xf32>
    %c0_66 = arith.constant 0 : index
    %c0_67 = arith.constant 0 : index
    %129 = vector.load %arg11[%c0_66, %c0_67] : memref<1x128xf32, #tpu.memory_space<vmem>>, vector<1x128xf32>
    %130 = vector.broadcast %129 : vector<1x128xf32> to vector<2x128xf32>
    %131 = arith.addf %128, %130 : vector<2x128xf32>
    %cst_68 = arith.constant 0.000000e+00 : f32
    %132 = vector.broadcast %cst_68 : f32 to vector<2x128xf32>
    %133 = arith.maximumf %131, %132 : vector<2x128xf32>
    %c0_69 = arith.constant 0 : index
    %c0_70 = arith.constant 0 : index
    %134 = vector.load %arg12[%c0_69, %c0_70] : memref<2x128xf32, #tpu.memory_space<vmem>>, vector<2x128xf32>
    tpu.vector_store %arg12[%c0_69, %c0_70], %133 {strides = array<i32>} : memref<2x128xf32, #tpu.memory_space<vmem>>, vector<2x128xf32>,
    return
  }
}

module attributes {stable_mosaic.version = 11 : i64} {
  func.func @_protein_kernel(%arg0: i32, %arg1: memref<1x1000x128xbf16, #tpu.memory_space<vmem>>, %arg2: memref<8x32x1000xbf16, #tpu.memory_space<vmem>>, %arg3: memref<32x121x128xf32, #tpu.memory_space<vmem>>, %arg4: memref<1x128xf32, #tpu.memory_space<vmem>>, %arg5: memref<1x1x128xf32, #tpu.memory_space<vmem>>) attributes {dimension_semantics = [#tpu.dimension_semantics<parallel>], iteration_bounds = array<i64: 2>, scalar_prefetch = 0 : i64, scratch_operands = 0 : i64, tpu.core_type = #tpu.core_type<tc>, window_params = [{transform_indices = @transform_0, window_bounds = array<i64: 1, 1000, 128>}, {pipeline_mode = #tpu.pipeline_mode<synchronous>, transform_indices = @transform_1, window_bounds = array<i64: 8, 32, 1000>}, {pipeline_mode = #tpu.pipeline_mode<synchronous>, transform_indices = @transform_2, window_bounds = array<i64: 32, 121, 128>}, {pipeline_mode = #tpu.pipeline_mode<synchronous>, transform_indices = @transform_3, window_bounds = array<i64: 1, 128>}, {transform_indices = @transform_4, window_bounds = array<i64: 1, 1, 128>}]} {
    %c0 = arith.constant 0 : index
    %c0_0 = arith.constant 0 : index
    %c0_1 = arith.constant 0 : index
    %0 = vector.load %arg1[%c0, %c0_0, %c0_1] : memref<1x1000x128xbf16, #tpu.memory_space<vmem>>, vector<1x1000x128xbf16>
    %1 = vector.shape_cast %0 : vector<1x1000x128xbf16> to vector<1000x128xbf16>
    %cst = arith.constant 0.000000e+00 : f32
    %2 = vector.broadcast %cst : f32 to vector<32x121xf32>
    %c0_2 = arith.constant 0 : index
    %c0_3 = arith.constant 0 : index
    %c0_4 = arith.constant 0 : index
    %3 = vector.load %arg2[%c0_2, %c0_3, %c0_4] : memref<8x32x1000xbf16, #tpu.memory_space<vmem>>, vector<1x32x1000xbf16>
    %4 = vector.shape_cast %3 : vector<1x32x1000xbf16> to vector<32x1000xbf16>
    %cst_5 = arith.constant dense<0.000000e+00> : vector<32x128xf32>
    %5 = tpu.matmul %4, %1, %cst_5 {dimension_numbers = #tpu.dot_dimension_numbers<[1], [0], [0], [1], [0, 0, 1, 1], [], []>} : vector<32x1000xbf16>, vector<1000x128xbf16>, vector<32x128xf32> -> vector<32x128xf32>
    %6 = vector.extract_strided_slice %5 {offsets = [0, 0], sizes = [32, 121], strides = [1, 1]} : vector<32x128xf32> to vector<32x121xf32>
    %7 = arith.addf %2, %6 : vector<32x121xf32>
    %c1 = arith.constant 1 : index
    %c0_6 = arith.constant 0 : index
    %c0_7 = arith.constant 0 : index
    %8 = vector.load %arg2[%c1, %c0_6, %c0_7] : memref<8x32x1000xbf16, #tpu.memory_space<vmem>>, vector<1x32x1000xbf16>
    %9 = vector.shape_cast %8 : vector<1x32x1000xbf16> to vector<32x1000xbf16>
    %cst_8 = arith.constant dense<0.000000e+00> : vector<32x128xf32>
    %10 = tpu.matmul %9, %1, %cst_8 {dimension_numbers = #tpu.dot_dimension_numbers<[1], [0], [0], [1], [0, 0, 1, 1], [], []>} : vector<32x1000xbf16>, vector<1000x128xbf16>, vector<32x128xf32> -> vector<32x128xf32>
    %11 = vector.extract_strided_slice %10 {offsets = [0, 1], sizes = [32, 121], strides = [1, 1]} : vector<32x128xf32> to vector<32x121xf32>
    %12 = arith.addf %7, %11 : vector<32x121xf32>
    %c2 = arith.constant 2 : index
    %c0_9 = arith.constant 0 : index
    %c0_10 = arith.constant 0 : index
    %13 = vector.load %arg2[%c2, %c0_9, %c0_10] : memref<8x32x1000xbf16, #tpu.memory_space<vmem>>, vector<1x32x1000xbf16>
    %14 = vector.shape_cast %13 : vector<1x32x1000xbf16> to vector<32x1000xbf16>
    %cst_11 = arith.constant dense<0.000000e+00> : vector<32x128xf32>
    %15 = tpu.matmul %14, %1, %cst_11 {dimension_numbers = #tpu.dot_dimension_numbers<[1], [0], [0], [1], [0, 0, 1, 1], [], []>} : vector<32x1000xbf16>, vector<1000x128xbf16>, vector<32x128xf32> -> vector<32x128xf32>
    %16 = vector.extract_strided_slice %15 {offsets = [0, 2], sizes = [32, 121], strides = [1, 1]} : vector<32x128xf32> to vector<32x121xf32>
    %17 = arith.addf %12, %16 : vector<32x121xf32>
    %c3 = arith.constant 3 : index
    %c0_12 = arith.constant 0 : index
    %c0_13 = arith.constant 0 : index
    %18 = vector.load %arg2[%c3, %c0_12, %c0_13] : memref<8x32x1000xbf16, #tpu.memory_space<vmem>>, vector<1x32x1000xbf16>
    %19 = vector.shape_cast %18 : vector<1x32x1000xbf16> to vector<32x1000xbf16>
    %cst_14 = arith.constant dense<0.000000e+00> : vector<32x128xf32>
    %20 = tpu.matmul %19, %1, %cst_14 {dimension_numbers = #tpu.dot_dimension_numbers<[1], [0], [0], [1], [0, 0, 1, 1], [], []>} : vector<32x1000xbf16>, vector<1000x128xbf16>, vector<32x128xf32> -> vector<32x128xf32>
    %21 = vector.extract_strided_slice %20 {offsets = [0, 3], sizes = [32, 121], strides = [1, 1]} : vector<32x128xf32> to vector<32x121xf32>
    %22 = arith.addf %17, %21 : vector<32x121xf32>
    %c4 = arith.constant 4 : index
    %c0_15 = arith.constant 0 : index
    %c0_16 = arith.constant 0 : index
    %23 = vector.load %arg2[%c4, %c0_15, %c0_16] : memref<8x32x1000xbf16, #tpu.memory_space<vmem>>, vector<1x32x1000xbf16>
    %24 = vector.shape_cast %23 : vector<1x32x1000xbf16> to vector<32x1000xbf16>
    %cst_17 = arith.constant dense<0.000000e+00> : vector<32x128xf32>
    %25 = tpu.matmul %24, %1, %cst_17 {dimension_numbers = #tpu.dot_dimension_numbers<[1], [0], [0], [1], [0, 0, 1, 1], [], []>} : vector<32x1000xbf16>, vector<1000x128xbf16>, vector<32x128xf32> -> vector<32x128xf32>
    %26 = vector.extract_strided_slice %25 {offsets = [0, 4], sizes = [32, 121], strides = [1, 1]} : vector<32x128xf32> to vector<32x121xf32>
    %27 = arith.addf %22, %26 : vector<32x121xf32>
    %c5 = arith.constant 5 : index
    %c0_18 = arith.constant 0 : index
    %c0_19 = arith.constant 0 : index
    %28 = vector.load %arg2[%c5, %c0_18, %c0_19] : memref<8x32x1000xbf16, #tpu.memory_space<vmem>>, vector<1x32x1000xbf16>
    %29 = vector.shape_cast %28 : vector<1x32x1000xbf16> to vector<32x1000xbf16>
    %cst_20 = arith.constant dense<0.000000e+00> : vector<32x128xf32>
    %30 = tpu.matmul %29, %1, %cst_20 {dimension_numbers = #tpu.dot_dimension_numbers<[1], [0], [0], [1], [0, 0, 1, 1], [], []>} : vector<32x1000xbf16>, vector<1000x128xbf16>, vector<32x128xf32> -> vector<32x128xf32>
    %31 = vector.extract_strided_slice %30 {offsets = [0, 5], sizes = [32, 121], strides = [1, 1]} : vector<32x128xf32> to vector<32x121xf32>
    %32 = arith.addf %27, %31 : vector<32x121xf32>
    %c6 = arith.constant 6 : index
    %c0_21 = arith.constant 0 : index
    %c0_22 = arith.constant 0 : index
    %33 = vector.load %arg2[%c6, %c0_21, %c0_22] : memref<8x32x1000xbf16, #tpu.memory_space<vmem>>, vector<1x32x1000xbf16>
    %34 = vector.shape_cast %33 : vector<1x32x1000xbf16> to vector<32x1000xbf16>
    %cst_23 = arith.constant dense<0.000000e+00> : vector<32x128xf32>
    %35 = tpu.matmul %34, %1, %cst_23 {dimension_numbers = #tpu.dot_dimension_numbers<[1], [0], [0], [1], [0, 0, 1, 1], [], []>} : vector<32x1000xbf16>, vector<1000x128xbf16>, vector<32x128xf32> -> vector<32x128xf32>
    %36 = vector.extract_strided_slice %35 {offsets = [0, 6], sizes = [32, 121], strides = [1, 1]} : vector<32x128xf32> to vector<32x121xf32>
    %37 = arith.addf %32, %36 : vector<32x121xf32>
    %c7 = arith.constant 7 : index
    %c0_24 = arith.constant 0 : index
    %c0_25 = arith.constant 0 : index
    %38 = vector.load %arg2[%c7, %c0_24, %c0_25] : memref<8x32x1000xbf16, #tpu.memory_space<vmem>>, vector<1x32x1000xbf16>
    %39 = vector.shape_cast %38 : vector<1x32x1000xbf16> to vector<32x1000xbf16>
    %cst_26 = arith.constant dense<0.000000e+00> : vector<32x128xf32>
    %40 = tpu.matmul %39, %1, %cst_26 {dimension_numbers = #tpu.dot_dimension_numbers<[1], [0], [0], [1], [0, 0, 1, 1], [], []>} : vector<32x1000xbf16>, vector<1000x128xbf16>, vector<32x128xf32> -> vector<32x128xf32>
    %41 = vector.extract_strided_slice %40 {offsets = [0, 7], sizes = [32, 121], strides = [1, 1]} : vector<32x128xf32> to vector<32x121xf32>
    %42 = arith.addf %37, %41 : vector<32x121xf32>
    %c0_27 = arith.constant 0 : index
    %c0_28 = arith.constant 0 : index
    %43 = vector.load %arg4[%c0_27, %c0_28] : memref<1x128xf32, #tpu.memory_space<vmem>>, vector<1x128xf32>
    %44 = vector.extract_strided_slice %42 {offsets = [0, 0], sizes = [1, 121], strides = [1, 1]} : vector<32x121xf32> to vector<1x121xf32>
    %c0_29 = arith.constant 0 : index
    %c0_30 = arith.constant 0 : index
    %c0_31 = arith.constant 0 : index
    %45 = vector.load %arg3[%c0_29, %c0_30, %c0_31] : memref<32x121x128xf32, #tpu.memory_space<vmem>>, vector<1x121x128xf32>
    %46 = vector.shape_cast %45 : vector<1x121x128xf32> to vector<121x128xf32>
    %cst_32 = arith.constant dense<0.000000e+00> : vector<1x128xf32>
    %47 = tpu.matmul %44, %46, %cst_32 {dimension_numbers = #tpu.dot_dimension_numbers<[1], [0], [0], [1], [0, 0, 1, 1], [], []>} : vector<1x121xf32>, vector<121x128xf32>, vector<1x128xf32> -> vector<1x128xf32>
    %48 = arith.addf %43, %47 : vector<1x128xf32>
    %49 = vector.extract_strided_slice %42 {offsets = [1, 0], sizes = [1, 121], strides = [1, 1]} : vector<32x121xf32> to vector<1x121xf32>
    %c1_33 = arith.constant 1 : index
    %c0_34 = arith.constant 0 : index
    %c0_35 = arith.constant 0 : index
    %50 = vector.load %arg3[%c1_33, %c0_34, %c0_35] : memref<32x121x128xf32, #tpu.memory_space<vmem>>, vector<1x121x128xf32>
    %51 = vector.shape_cast %50 : vector<1x121x128xf32> to vector<121x128xf32>
    %cst_36 = arith.constant dense<0.000000e+00> : vector<1x128xf32>
    %52 = tpu.matmul %49, %51, %cst_36 {dimension_numbers = #tpu.dot_dimension_numbers<[1], [0], [0], [1], [0, 0, 1, 1], [], []>} : vector<1x121xf32>, vector<121x128xf32>, vector<1x128xf32> -> vector<1x128xf32>
    %53 = arith.addf %48, %52 : vector<1x128xf32>
    %54 = vector.extract_strided_slice %42 {offsets = [2, 0], sizes = [1, 121], strides = [1, 1]} : vector<32x121xf32> to vector<1x121xf32>
    %c2_37 = arith.constant 2 : index
    %c0_38 = arith.constant 0 : index
    %c0_39 = arith.constant 0 : index
    %55 = vector.load %arg3[%c2_37, %c0_38, %c0_39] : memref<32x121x128xf32, #tpu.memory_space<vmem>>, vector<1x121x128xf32>
    %56 = vector.shape_cast %55 : vector<1x121x128xf32> to vector<121x128xf32>
    %cst_40 = arith.constant dense<0.000000e+00> : vector<1x128xf32>
    %57 = tpu.matmul %54, %56, %cst_40 {dimension_numbers = #tpu.dot_dimension_numbers<[1], [0], [0], [1], [0, 0, 1, 1], [], []>} : vector<1x121xf32>, vector<121x128xf32>, vector<1x128xf32> -> vector<1x128xf32>
    %58 = arith.addf %53, %57 : vector<1x128xf32>
    %59 = vector.extract_strided_slice %42 {offsets = [3, 0], sizes = [1, 121], strides = [1, 1]} : vector<32x121xf32> to vector<1x121xf32>
    %c3_41 = arith.constant 3 : index
    %c0_42 = arith.constant 0 : index
    %c0_43 = arith.constant 0 : index
    %60 = vector.load %arg3[%c3_41, %c0_42, %c0_43] : memref<32x121x128xf32, #tpu.memory_space<vmem>>, vector<1x121x128xf32>
    %61 = vector.shape_cast %60 : vector<1x121x128xf32> to vector<121x128xf32>
    %cst_44 = arith.constant dense<0.000000e+00> : vector<1x128xf32>
    %62 = tpu.matmul %59, %61, %cst_44 {dimension_numbers = #tpu.dot_dimension_numbers<[1], [0], [0], [1], [0, 0, 1, 1], [], []>} : vector<1x121xf32>, vector<121x128xf32>, vector<1x128xf32> -> vector<1x128xf32>
    %63 = arith.addf %58, %62 : vector<1x128xf32>
    %64 = vector.extract_strided_slice %42 {offsets = [4, 0], sizes = [1, 121], strides = [1, 1]} : vector<32x121xf32> to vector<1x121xf32>
    %c4_45 = arith.constant 4 : index
    %c0_46 = arith.constant 0 : index
    %c0_47 = arith.constant 0 : index
    %65 = vector.load %arg3[%c4_45, %c0_46, %c0_47] : memref<32x121x128xf32, #tpu.memory_space<vmem>>, vector<1x121x128xf32>
    %66 = vector.shape_cast %65 : vector<1x121x128xf32> to vector<121x128xf32>
    %cst_48 = arith.constant dense<0.000000e+00> : vector<1x128xf32>
    %67 = tpu.matmul %64, %66, %cst_48 {dimension_numbers = #tpu.dot_dimension_numbers<[1], [0], [0], [1], [0, 0, 1, 1], [], []>} : vector<1x121xf32>, vector<121x128xf32>, vector<1x128xf32> -> vector<1x128xf32>
    %68 = arith.addf %63, %67 : vector<1x128xf32>
    %69 = vector.extract_strided_slice %42 {offsets = [5, 0], sizes = [1, 121], strides = [1, 1]} : vector<32x121xf32> to vector<1x121xf32>
    %c5_49 = arith.constant 5 : index
    %c0_50 = arith.constant 0 : index
    %c0_51 = arith.constant 0 : index
    %70 = vector.load %arg3[%c5_49, %c0_50, %c0_51] : memref<32x121x128xf32, #tpu.memory_space<vmem>>, vector<1x121x128xf32>
    %71 = vector.shape_cast %70 : vector<1x121x128xf32> to vector<121x128xf32>
    %cst_52 = arith.constant dense<0.000000e+00> : vector<1x128xf32>
    %72 = tpu.matmul %69, %71, %cst_52 {dimension_numbers = #tpu.dot_dimension_numbers<[1], [0], [0], [1], [0, 0, 1, 1], [], []>} : vector<1x121xf32>, vector<121x128xf32>, vector<1x128xf32> -> vector<1x128xf32>
    %73 = arith.addf %68, %72 : vector<1x128xf32>
    %74 = vector.extract_strided_slice %42 {offsets = [6, 0], sizes = [1, 121], strides = [1, 1]} : vector<32x121xf32> to vector<1x121xf32>
    %c6_53 = arith.constant 6 : index
    %c0_54 = arith.constant 0 : index
    %c0_55 = arith.constant 0 : index
    %75 = vector.load %arg3[%c6_53, %c0_54, %c0_55] : memref<32x121x128xf32, #tpu.memory_space<vmem>>, vector<1x121x128xf32>
    %76 = vector.shape_cast %75 : vector<1x121x128xf32> to vector<121x128xf32>
    %cst_56 = arith.constant dense<0.000000e+00> : vector<1x128xf32>
    %77 = tpu.matmul %74, %76, %cst_56 {dimension_numbers = #tpu.dot_dimension_numbers<[1], [0], [0], [1], [0, 0, 1, 1], [], []>} : vector<1x121xf32>, vector<121x128xf32>, vector<1x128xf32> -> vector<1x128xf32>
    %78 = arith.addf %73, %77 : vector<1x128xf32>
    %79 = vector.extract_strided_slice %42 {offsets = [7, 0], sizes = [1, 121], strides = [1, 1]} : vector<32x121xf32> to vector<1x121xf32>
    %c7_57 = arith.constant 7 : index
    %c0_58 = arith.constant 0 : index
    %c0_59 = arith.constant 0 : index
    %80 = vector.load %arg3[%c7_57, %c0_58, %c0_59] : memref<32x121x128xf32, #tpu.memory_space<vmem>>, vector<1x121x128xf32>
    %81 = vector.shape_cast %80 : vector<1x121x128xf32> to vector<121x128xf32>
    %cst_60 = arith.constant dense<0.000000e+00> : vector<1x128xf32>
    %82 = tpu.matmul %79, %81, %cst_60 {dimension_numbers = #tpu.dot_dimension_numbers<[1], [0], [0], [1], [0, 0, 1, 1], [], []>} : vector<1x121xf32>, vector<121x128xf32>, vector<1x128xf32> -> vector<1x128xf32>
    %83 = arith.addf %78, %82 : vector<1x128xf32>
    %84 = vector.extract_strided_slice %42 {offsets = [8, 0], sizes = [1, 121], strides = [1, 1]} : vector<32x121xf32> to vector<1x121xf32>
    %c8 = arith.constant 8 : index
    %c0_61 = arith.constant 0 : index
    %c0_62 = arith.constant 0 : index
    %85 = vector.load %arg3[%c8, %c0_61, %c0_62] : memref<32x121x128xf32, #tpu.memory_space<vmem>>, vector<1x121x128xf32>
    %86 = vector.shape_cast %85 : vector<1x121x128xf32> to vector<121x128xf32>
    %cst_63 = arith.constant dense<0.000000e+00> : vector<1x128xf32>
    %87 = tpu.matmul %84, %86, %cst_63 {dimension_numbers = #tpu.dot_dimension_numbers<[1], [0], [0], [1], [0, 0, 1, 1], [], []>} : vector<1x121xf32>, vector<121x128xf32>, vector<1x128xf32> -> vector<1x128xf32>
    %88 = arith.addf %83, %87 : vector<1x128xf32>
    %89 = vector.extract_strided_slice %42 {offsets = [9, 0], sizes = [1, 121], strides = [1, 1]} : vector<32x121xf32> to vector<1x121xf32>
    %c9 = arith.constant 9 : index
    %c0_64 = arith.constant 0 : index
    %c0_65 = arith.constant 0 : index
    %90 = vector.load %arg3[%c9, %c0_64, %c0_65] : memref<32x121x128xf32, #tpu.memory_space<vmem>>, vector<1x121x128xf32>
    %91 = vector.shape_cast %90 : vector<1x121x128xf32> to vector<121x128xf32>
    %cst_66 = arith.constant dense<0.000000e+00> : vector<1x128xf32>
    %92 = tpu.matmul %89, %91, %cst_66 {dimension_numbers = #tpu.dot_dimension_numbers<[1], [0], [0], [1], [0, 0, 1, 1], [], []>} : vector<1x121xf32>, vector<121x128xf32>, vector<1x128xf32> -> vector<1x128xf32>
    %93 = arith.addf %88, %92 : vector<1x128xf32>
    %94 = vector.extract_strided_slice %42 {offsets = [10, 0], sizes = [1, 121], strides = [1, 1]} : vector<32x121xf32> to vector<1x121xf32>
    %c10 = arith.constant 10 : index
    %c0_67 = arith.constant 0 : index
    %c0_68 = arith.constant 0 : index
    %95 = vector.load %arg3[%c10, %c0_67, %c0_68] : memref<32x121x128xf32, #tpu.memory_space<vmem>>, vector<1x121x128xf32>
    %96 = vector.shape_cast %95 : vector<1x121x128xf32> to vector<121x128xf32>
    %cst_69 = arith.constant dense<0.000000e+00> : vector<1x128xf32>
    %97 = tpu.matmul %94, %96, %cst_69 {dimension_numbers = #tpu.dot_dimension_numbers<[1], [0], [0], [1], [0, 0, 1, 1], [], []>} : vector<1x121xf32>, vector<121x128xf32>, vector<1x128xf32> -> vector<1x128xf32>
    %98 = arith.addf %93, %97 : vector<1x128xf32>
    %99 = vector.extract_strided_slice %42 {offsets = [11, 0], sizes = [1, 121], strides = [1, 1]} : vector<32x121xf32> to vector<1x121xf32>
    %c11 = arith.constant 11 : index
    %c0_70 = arith.constant 0 : index
    %c0_71 = arith.constant 0 : index
    %100 = vector.load %arg3[%c11, %c0_70, %c0_71] : memref<32x121x128xf32, #tpu.memory_space<vmem>>, vector<1x121x128xf32>
    %101 = vector.shape_cast %100 : vector<1x121x128xf32> to vector<121x128xf32>
    %cst_72 = arith.constant dense<0.000000e+00> : vector<1x128xf32>
    %102 = tpu.matmul %99, %101, %cst_72 {dimension_numbers = #tpu.dot_dimension_numbers<[1], [0], [0], [1], [0, 0, 1, 1], [], []>} : vector<1x121xf32>, vector<121x128xf32>, vector<1x128xf32> -> vector<1x128xf32>
    %103 = arith.addf %98, %102 : vector<1x128xf32>
    %104 = vector.extract_strided_slice %42 {offsets = [12, 0], sizes = [1, 121], strides = [1, 1]} : vector<32x121xf32> to vector<1x121xf32>
    %c12 = arith.constant 12 : index
    %c0_73 = arith.constant 0 : index
    %c0_74 = arith.constant 0 : index
    %105 = vector.load %arg3[%c12, %c0_73, %c0_74] : memref<32x121x128xf32, #tpu.memory_space<vmem>>, vector<1x121x128xf32>
    %106 = vector.shape_cast %105 : vector<1x121x128xf32> to vector<121x128xf32>
    %cst_75 = arith.constant dense<0.000000e+00> : vector<1x128xf32>
    %107 = tpu.matmul %104, %106, %cst_75 {dimension_numbers = #tpu.dot_dimension_numbers<[1], [0], [0], [1], [0, 0, 1, 1], [], []>} : vector<1x121xf32>, vector<121x128xf32>, vector<1x128xf32> -> vector<1x128xf32>
    %108 = arith.addf %103, %107 : vector<1x128xf32>
    %109 = vector.extract_strided_slice %42 {offsets = [13, 0], sizes = [1, 121], strides = [1, 1]} : vector<32x121xf32> to vector<1x121xf32>
    %c13 = arith.constant 13 : index
    %c0_76 = arith.constant 0 : index
    %c0_77 = arith.constant 0 : index
    %110 = vector.load %arg3[%c13, %c0_76, %c0_77] : memref<32x121x128xf32, #tpu.memory_space<vmem>>, vector<1x121x128xf32>
    %111 = vector.shape_cast %110 : vector<1x121x128xf32> to vector<121x128xf32>
    %cst_78 = arith.constant dense<0.000000e+00> : vector<1x128xf32>
    %112 = tpu.matmul %109, %111, %cst_78 {dimension_numbers = #tpu.dot_dimension_numbers<[1], [0], [0], [1], [0, 0, 1, 1], [], []>} : vector<1x121xf32>, vector<121x128xf32>, vector<1x128xf32> -> vector<1x128xf32>
    %113 = arith.addf %108, %112 : vector<1x128xf32>
    %114 = vector.extract_strided_slice %42 {offsets = [14, 0], sizes = [1, 121], strides = [1, 1]} : vector<32x121xf32> to vector<1x121xf32>
    %c14 = arith.constant 14 : index
    %c0_79 = arith.constant 0 : index
    %c0_80 = arith.constant 0 : index
    %115 = vector.load %arg3[%c14, %c0_79, %c0_80] : memref<32x121x128xf32, #tpu.memory_space<vmem>>, vector<1x121x128xf32>
    %116 = vector.shape_cast %115 : vector<1x121x128xf32> to vector<121x128xf32>
    %cst_81 = arith.constant dense<0.000000e+00> : vector<1x128xf32>
    %117 = tpu.matmul %114, %116, %cst_81 {dimension_numbers = #tpu.dot_dimension_numbers<[1], [0], [0], [1], [0, 0, 1, 1], [], []>} : vector<1x121xf32>, vector<121x128xf32>, vector<1x128xf32> -> vector<1x128xf32>
    %118 = arith.addf %113, %117 : vector<1x128xf32>
    %119 = vector.extract_strided_slice %42 {offsets = [15, 0], sizes = [1, 121], strides = [1, 1]} : vector<32x121xf32> to vector<1x121xf32>
    %c15 = arith.constant 15 : index
    %c0_82 = arith.constant 0 : index
    %c0_83 = arith.constant 0 : index
    %120 = vector.load %arg3[%c15, %c0_82, %c0_83] : memref<32x121x128xf32, #tpu.memory_space<vmem>>, vector<1x121x128xf32>
    %121 = vector.shape_cast %120 : vector<1x121x128xf32> to vector<121x128xf32>
    %cst_84 = arith.constant dense<0.000000e+00> : vector<1x128xf32>
    %122 = tpu.matmul %119, %121, %cst_84 {dimension_numbers = #tpu.dot_dimension_numbers<[1], [0], [0], [1], [0, 0, 1, 1], [], []>} : vector<1x121xf32>, vector<121x128xf32>, vector<1x128xf32> -> vector<1x128xf32>
    %123 = arith.addf %118, %122 : vector<1x128xf32>
    %124 = vector.extract_strided_slice %42 {offsets = [16, 0], sizes = [1, 121], strides = [1, 1]} : vector<32x121xf32> to vector<1x121xf32>
    %c16 = arith.constant 16 : index
    %c0_85 = arith.constant 0 : index
    %c0_86 = arith.constant 0 : index
    %125 = vector.load %arg3[%c16, %c0_85, %c0_86] : memref<32x121x128xf32, #tpu.memory_space<vmem>>, vector<1x121x128xf32>
    %126 = vector.shape_cast %125 : vector<1x121x128xf32> to vector<121x128xf32>
    %cst_87 = arith.constant dense<0.000000e+00> : vector<1x128xf32>
    %127 = tpu.matmul %124, %126, %cst_87 {dimension_numbers = #tpu.dot_dimension_numbers<[1], [0], [0], [1], [0, 0, 1, 1], [], []>} : vector<1x121xf32>, vector<121x128xf32>, vector<1x128xf32> -> vector<1x128xf32>
    %128 = arith.addf %123, %127 : vector<1x128xf32>
    %129 = vector.extract_strided_slice %42 {offsets = [17, 0], sizes = [1, 121], strides = [1, 1]} : vector<32x121xf32> to vector<1x121xf32>
    %c17 = arith.constant 17 : index
    %c0_88 = arith.constant 0 : index
    %c0_89 = arith.constant 0 : index
    %130 = vector.load %arg3[%c17, %c0_88, %c0_89] : memref<32x121x128xf32, #tpu.memory_space<vmem>>, vector<1x121x128xf32>
    %131 = vector.shape_cast %130 : vector<1x121x128xf32> to vector<121x128xf32>
    %cst_90 = arith.constant dense<0.000000e+00> : vector<1x128xf32>
    %132 = tpu.matmul %129, %131, %cst_90 {dimension_numbers = #tpu.dot_dimension_numbers<[1], [0], [0], [1], [0, 0, 1, 1], [], []>} : vector<1x121xf32>, vector<121x128xf32>, vector<1x128xf32> -> vector<1x128xf32>
    %133 = arith.addf %128, %132 : vector<1x128xf32>
    %134 = vector.extract_strided_slice %42 {offsets = [18, 0], sizes = [1, 121], strides = [1, 1]} : vector<32x121xf32> to vector<1x121xf32>
    %c18 = arith.constant 18 : index
    %c0_91 = arith.constant 0 : index
    %c0_92 = arith.constant 0 : index
    %135 = vector.load %arg3[%c18, %c0_91, %c0_92] : memref<32x121x128xf32, #tpu.memory_space<vmem>>, vector<1x121x128xf32>
    %136 = vector.shape_cast %135 : vector<1x121x128xf32> to vector<121x128xf32>
    %cst_93 = arith.constant dense<0.000000e+00> : vector<1x128xf32>
    %137 = tpu.matmul %134, %136, %cst_93 {dimension_numbers = #tpu.dot_dimension_numbers<[1], [0], [0], [1], [0, 0, 1, 1], [], []>} : vector<1x121xf32>, vector<121x128xf32>, vector<1x128xf32> -> vector<1x128xf32>
    %138 = arith.addf %133, %137 : vector<1x128xf32>
    %139 = vector.extract_strided_slice %42 {offsets = [19, 0], sizes = [1, 121], strides = [1, 1]} : vector<32x121xf32> to vector<1x121xf32>
    %c19 = arith.constant 19 : index
    %c0_94 = arith.constant 0 : index
    %c0_95 = arith.constant 0 : index
    %140 = vector.load %arg3[%c19, %c0_94, %c0_95] : memref<32x121x128xf32, #tpu.memory_space<vmem>>, vector<1x121x128xf32>
    %141 = vector.shape_cast %140 : vector<1x121x128xf32> to vector<121x128xf32>
    %cst_96 = arith.constant dense<0.000000e+00> : vector<1x128xf32>
    %142 = tpu.matmul %139, %141, %cst_96 {dimension_numbers = #tpu.dot_dimension_numbers<[1], [0], [0], [1], [0, 0, 1, 1], [], []>} : vector<1x121xf32>, vector<121x128xf32>, vector<1x128xf32> -> vector<1x128xf32>
    %143 = arith.addf %138, %142 : vector<1x128xf32>
    %144 = vector.extract_strided_slice %42 {offsets = [20, 0], sizes = [1, 121], strides = [1, 1]} : vector<32x121xf32> to vector<1x121xf32>
    %c20 = arith.constant 20 : index
    %c0_97 = arith.constant 0 : index
    %c0_98 = arith.constant 0 : index
    %145 = vector.load %arg3[%c20, %c0_97, %c0_98] : memref<32x121x128xf32, #tpu.memory_space<vmem>>, vector<1x121x128xf32>
    %146 = vector.shape_cast %145 : vector<1x121x128xf32> to vector<121x128xf32>
    %cst_99 = arith.constant dense<0.000000e+00> : vector<1x128xf32>
    %147 = tpu.matmul %144, %146, %cst_99 {dimension_numbers = #tpu.dot_dimension_numbers<[1], [0], [0], [1], [0, 0, 1, 1], [], []>} : vector<1x121xf32>, vector<121x128xf32>, vector<1x128xf32> -> vector<1x128xf32>
    %148 = arith.addf %143, %147 : vector<1x128xf32>
    %149 = vector.extract_strided_slice %42 {offsets = [21, 0], sizes = [1, 121], strides = [1, 1]} : vector<32x121xf32> to vector<1x121xf32>
    %c21 = arith.constant 21 : index
    %c0_100 = arith.constant 0 : index
    %c0_101 = arith.constant 0 : index
    %150 = vector.load %arg3[%c21, %c0_100, %c0_101] : memref<32x121x128xf32, #tpu.memory_space<vmem>>, vector<1x121x128xf32>
    %151 = vector.shape_cast %150 : vector<1x121x128xf32> to vector<121x128xf32>
    %cst_102 = arith.constant dense<0.000000e+00> : vector<1x128xf32>
    %152 = tpu.matmul %149, %151, %cst_102 {dimension_numbers = #tpu.dot_dimension_numbers<[1], [0], [0], [1], [0, 0, 1, 1], [], []>} : vector<1x121xf32>, vector<121x128xf32>, vector<1x128xf32> -> vector<1x128xf32>
    %153 = arith.addf %148, %152 : vector<1x128xf32>
    %154 = vector.extract_strided_slice %42 {offsets = [22, 0], sizes = [1, 121], strides = [1, 1]} : vector<32x121xf32> to vector<1x121xf32>
    %c22 = arith.constant 22 : index
    %c0_103 = arith.constant 0 : index
    %c0_104 = arith.constant 0 : index
    %155 = vector.load %arg3[%c22, %c0_103, %c0_104] : memref<32x121x128xf32, #tpu.memory_space<vmem>>, vector<1x121x128xf32>
    %156 = vector.shape_cast %155 : vector<1x121x128xf32> to vector<121x128xf32>
    %cst_105 = arith.constant dense<0.000000e+00> : vector<1x128xf32>
    %157 = tpu.matmul %154, %156, %cst_105 {dimension_numbers = #tpu.dot_dimension_numbers<[1], [0], [0], [1], [0, 0, 1, 1], [], []>} : vector<1x121xf32>, vector<121x128xf32>, vector<1x128xf32> -> vector<1x128xf32>
    %158 = arith.addf %153, %157 : vector<1x128xf32>
    %159 = vector.extract_strided_slice %42 {offsets = [23, 0], sizes = [1, 121], strides = [1, 1]} : vector<32x121xf32> to vector<1x121xf32>
    %c23 = arith.constant 23 : index
    %c0_106 = arith.constant 0 : index
    %c0_107 = arith.constant 0 : index
    %160 = vector.load %arg3[%c23, %c0_106, %c0_107] : memref<32x121x128xf32, #tpu.memory_space<vmem>>, vector<1x121x128xf32>
    %161 = vector.shape_cast %160 : vector<1x121x128xf32> to vector<121x128xf32>
    %cst_108 = arith.constant dense<0.000000e+00> : vector<1x128xf32>
    %162 = tpu.matmul %159, %161, %cst_108 {dimension_numbers = #tpu.dot_dimension_numbers<[1], [0], [0], [1], [0, 0, 1, 1], [], []>} : vector<1x121xf32>, vector<121x128xf32>, vector<1x128xf32> -> vector<1x128xf32>
    %163 = arith.addf %158, %162 : vector<1x128xf32>
    %164 = vector.extract_strided_slice %42 {offsets = [24, 0], sizes = [1, 121], strides = [1, 1]} : vector<32x121xf32> to vector<1x121xf32>
    %c24 = arith.constant 24 : index
    %c0_109 = arith.constant 0 : index
    %c0_110 = arith.constant 0 : index
    %165 = vector.load %arg3[%c24, %c0_109, %c0_110] : memref<32x121x128xf32, #tpu.memory_space<vmem>>, vector<1x121x128xf32>
    %166 = vector.shape_cast %165 : vector<1x121x128xf32> to vector<121x128xf32>
    %cst_111 = arith.constant dense<0.000000e+00> : vector<1x128xf32>
    %167 = tpu.matmul %164, %166, %cst_111 {dimension_numbers = #tpu.dot_dimension_numbers<[1], [0], [0], [1], [0, 0, 1, 1], [], []>} : vector<1x121xf32>, vector<121x128xf32>, vector<1x128xf32> -> vector<1x128xf32>
    %168 = arith.addf %163, %167 : vector<1x128xf32>
    %169 = vector.extract_strided_slice %42 {offsets = [25, 0], sizes = [1, 121], strides = [1, 1]} : vector<32x121xf32> to vector<1x121xf32>
    %c25 = arith.constant 25 : index
    %c0_112 = arith.constant 0 : index
    %c0_113 = arith.constant 0 : index
    %170 = vector.load %arg3[%c25, %c0_112, %c0_113] : memref<32x121x128xf32, #tpu.memory_space<vmem>>, vector<1x121x128xf32>
    %171 = vector.shape_cast %170 : vector<1x121x128xf32> to vector<121x128xf32>
    %cst_114 = arith.constant dense<0.000000e+00> : vector<1x128xf32>
    %172 = tpu.matmul %169, %171, %cst_114 {dimension_numbers = #tpu.dot_dimension_numbers<[1], [0], [0], [1], [0, 0, 1, 1], [], []>} : vector<1x121xf32>, vector<121x128xf32>, vector<1x128xf32> -> vector<1x128xf32>
    %173 = arith.addf %168, %172 : vector<1x128xf32>
    %174 = vector.extract_strided_slice %42 {offsets = [26, 0], sizes = [1, 121], strides = [1, 1]} : vector<32x121xf32> to vector<1x121xf32>
    %c26 = arith.constant 26 : index
    %c0_115 = arith.constant 0 : index
    %c0_116 = arith.constant 0 : index
    %175 = vector.load %arg3[%c26, %c0_115, %c0_116] : memref<32x121x128xf32, #tpu.memory_space<vmem>>, vector<1x121x128xf32>
    %176 = vector.shape_cast %175 : vector<1x121x128xf32> to vector<121x128xf32>
    %cst_117 = arith.constant dense<0.000000e+00> : vector<1x128xf32>
    %177 = tpu.matmul %174, %176, %cst_117 {dimension_numbers = #tpu.dot_dimension_numbers<[1], [0], [0], [1], [0, 0, 1, 1], [], []>} : vector<1x121xf32>, vector<121x128xf32>, vector<1x128xf32> -> vector<1x128xf32>
    %178 = arith.addf %173, %177 : vector<1x128xf32>
    %179 = vector.extract_strided_slice %42 {offsets = [27, 0], sizes = [1, 121], strides = [1, 1]} : vector<32x121xf32> to vector<1x121xf32>
    %c27 = arith.constant 27 : index
    %c0_118 = arith.constant 0 : index
    %c0_119 = arith.constant 0 : index
    %180 = vector.load %arg3[%c27, %c0_118, %c0_119] : memref<32x121x128xf32, #tpu.memory_space<vmem>>, vector<1x121x128xf32>
    %181 = vector.shape_cast %180 : vector<1x121x128xf32> to vector<121x128xf32>
    %cst_120 = arith.constant dense<0.000000e+00> : vector<1x128xf32>
    %182 = tpu.matmul %179, %181, %cst_120 {dimension_numbers = #tpu.dot_dimension_numbers<[1], [0], [0], [1], [0, 0, 1, 1], [], []>} : vector<1x121xf32>, vector<121x128xf32>, vector<1x128xf32> -> vector<1x128xf32>
    %183 = arith.addf %178, %182 : vector<1x128xf32>
    %184 = vector.extract_strided_slice %42 {offsets = [28, 0], sizes = [1, 121], strides = [1, 1]} : vector<32x121xf32> to vector<1x121xf32>
    %c28 = arith.constant 28 : index
    %c0_121 = arith.constant 0 : index
    %c0_122 = arith.constant 0 : index
    %185 = vector.load %arg3[%c28, %c0_121, %c0_122] : memref<32x121x128xf32, #tpu.memory_space<vmem>>, vector<1x121x128xf32>
    %186 = vector.shape_cast %185 : vector<1x121x128xf32> to vector<121x128xf32>
    %cst_123 = arith.constant dense<0.000000e+00> : vector<1x128xf32>
    %187 = tpu.matmul %184, %186, %cst_123 {dimension_numbers = #tpu.dot_dimension_numbers<[1], [0], [0], [1], [0, 0, 1, 1], [], []>} : vector<1x121xf32>, vector<121x128xf32>, vector<1x128xf32> -> vector<1x128xf32>
    %188 = arith.addf %183, %187 : vector<1x128xf32>
    %189 = vector.extract_strided_slice %42 {offsets = [29, 0], sizes = [1, 121], strides = [1, 1]} : vector<32x121xf32> to vector<1x121xf32>
    %c29 = arith.constant 29 : index
    %c0_124 = arith.constant 0 : index
    %c0_125 = arith.constant 0 : index
    %190 = vector.load %arg3[%c29, %c0_124, %c0_125] : memref<32x121x128xf32, #tpu.memory_space<vmem>>, vector<1x121x128xf32>
    %191 = vector.shape_cast %190 : vector<1x121x128xf32> to vector<121x128xf32>
    %cst_126 = arith.constant dense<0.000000e+00> : vector<1x128xf32>
    %192 = tpu.matmul %189, %191, %cst_126 {dimension_numbers = #tpu.dot_dimension_numbers<[1], [0], [0], [1], [0, 0, 1, 1], [], []>} : vector<1x121xf32>, vector<121x128xf32>, vector<1x128xf32> -> vector<1x128xf32>
    %193 = arith.addf %188, %192 : vector<1x128xf32>
    %194 = vector.extract_strided_slice %42 {offsets = [30, 0], sizes = [1, 121], strides = [1, 1]} : vector<32x121xf32> to vector<1x121xf32>
    %c30 = arith.constant 30 : index
    %c0_127 = arith.constant 0 : index
    %c0_128 = arith.constant 0 : index
    %195 = vector.load %arg3[%c30, %c0_127, %c0_128] : memref<32x121x128xf32, #tpu.memory_space<vmem>>, vector<1x121x128xf32>
    %196 = vector.shape_cast %195 : vector<1x121x128xf32> to vector<121x128xf32>
    %cst_129 = arith.constant dense<0.000000e+00> : vector<1x128xf32>
    %197 = tpu.matmul %194, %196, %cst_129 {dimension_numbers = #tpu.dot_dimension_numbers<[1], [0], [0], [1], [0, 0, 1, 1], [], []>} : vector<1x121xf32>, vector<121x128xf32>, vector<1x128xf32> -> vector<1x128xf32>
    %198 = arith.addf %193, %197 : vector<1x128xf32>
    %199 = vector.extract_strided_slice %42 {offsets = [31, 0], sizes = [1, 121], strides = [1, 1]} : vector<32x121xf32> to vector<1x121xf32>
    %c31 = arith.constant 31 : index
    %c0_130 = arith.constant 0 : index
    %c0_131 = arith.constant 0 : index
    %200 = vector.load %arg3[%c31, %c0_130, %c0_131] : memref<32x121x128xf32, #tpu.memory_space<vmem>>, vector<1x121x128xf32>
    %201 = vector.shape_cast %200 : vector<1x121x128xf32> to vector<121x128xf32>
    %cst_132 = arith.constant dense<0.000000e+00> : vector<1x128xf32>
    %202 = tpu.matmul %199, %201, %cst_132 {dimension_numbers = #tpu.dot_dimension_numbers<[1], [0], [0], [1], [0, 0, 1, 1], [], []>} : vector<1x121xf32>, vector<121x128xf32>, vector<1x128xf32> -> vector<1x128xf32>
    %203 = arith.addf %198, %202 : vector<1x128xf32>
    %c0_133 = arith.constant 0 : index
    %c0_134 = arith.constant 0 : index
    %c0_135 = arith.constant 0 : index
    %204 = vector.load %arg5[%c0_133, %c0_134, %c0_135] : memref<1x1x128xf32, #tpu.memory_space<vmem>>, vector<1x1x128xf32>
    %205 = vector.shape_cast %204 : vector<1x1x128xf32> to vector<1x128xf32>
    %206 = vector.shape_cast %203 : vector<1x128xf32> to vector<1x1x128xf32>
    tpu.vector_store %arg5[%c0_133, %c0_134, %c0_135], %206 {strides = array<i32>} : memref<1x1x128xf32, #tpu.memory_space<vmem>>, vector<1x1x128xf32>,
    return
  }
  func.func @transform_0(%arg0: i32) -> (i32, i32, i32) {
    %c0_i32 = arith.constant 0 : i32
    %c0_i32_0 = arith.constant 0 : i32
    %c0_i32_1 = arith.constant 0 : i32
    return %arg0, %c0_i32, %c0_i32_0 : i32, i32, i32
  }
  func.func @transform_1(%arg0: i32) -> (i32, i32, i32) {
    %c0_i32 = arith.constant 0 : i32
    %c0_i32_0 = arith.constant 0 : i32
    %c0_i32_1 = arith.constant 0 : i32
    %c0_i32_2 = arith.constant 0 : i32
    return %c0_i32, %c0_i32_0, %c0_i32_1 : i32, i32, i32
  }
  func.func @transform_2(%arg0: i32) -> (i32, i32, i32) {
    %c0_i32 = arith.constant 0 : i32
    %c0_i32_0 = arith.constant 0 : i32
    %c0_i32_1 = arith.constant 0 : i32
    %c0_i32_2 = arith.constant 0 : i32
    return %c0_i32, %c0_i32_0, %c0_i32_1 : i32, i32, i32
  }
  func.func @transform_3(%arg0: i32) -> (i32, i32) {
    %c0_i32 = arith.constant 0 : i32
    %c0_i32_0 = arith.constant 0 : i32
    %c0_i32_1 = arith.constant 0 : i32
    return %c0_i32, %c0_i32_0 : i32, i32
  }
  func.func @transform_4(%arg0: i32) -> (i32, i32, i32) {
    %c0_i32 = arith.constant 0 : i32
    %c0_i32_0 = arith.constant 0 : i32
    %c0_i32_1 = arith.constant 0 : i32
    return %arg0, %c0_i32, %c0_i32_0 : i32, i32, i32
  }
}

module attributes {stable_mosaic.version = 11 : i64} {
  func.func @_head_kernel(%arg0: memref<2x128xf32, #tpu.memory_space<vmem>>, %arg1: memref<2x128xf32, #tpu.memory_space<vmem>>, %arg2: memref<256x1024xf32, #tpu.memory_space<vmem>>, %arg3: memref<1x1024xf32, #tpu.memory_space<vmem>>, %arg4: memref<1024x256xf32, #tpu.memory_space<vmem>>, %arg5: memref<1x256xf32, #tpu.memory_space<vmem>>, %arg6: memref<256x1xf32, #tpu.memory_space<vmem>>, %arg7: memref<1x1xf32, #tpu.memory_space<vmem>>, %arg8: memref<2x1xf32, #tpu.memory_space<vmem>>) attributes {dimension_semantics = [], scalar_prefetch = 0 : i64, scratch_operands = 0 : i64, tpu.core_type = #tpu.core_type<tc>} {
    %c0 = arith.constant 0 : index
    %c0_0 = arith.constant 0 : index
    %0 = vector.load %arg2[%c0, %c0_0] : memref<256x1024xf32, #tpu.memory_space<vmem>>, vector<256x1024xf32>
    %c0_1 = arith.constant 0 : index
    %c0_2 = arith.constant 0 : index
    %1 = vector.load %arg0[%c0_1, %c0_2] : memref<2x128xf32, #tpu.memory_space<vmem>>, vector<2x128xf32>
    %2 = vector.extract_strided_slice %0 {offsets = [0, 0], sizes = [128, 1024], strides = [1, 1]} : vector<256x1024xf32> to vector<128x1024xf32>
    %cst = arith.constant dense<0.000000e+00> : vector<2x1024xf32>
    %3 = tpu.matmul %1, %2, %cst {dimension_numbers = #tpu.dot_dimension_numbers<[1], [0], [0], [1], [0, 0, 1, 1], [], []>} : vector<2x128xf32>, vector<128x1024xf32>, vector<2x1024xf32> -> vector<2x1024xf32>
    %c0_3 = arith.constant 0 : index
    %c0_4 = arith.constant 0 : index
    %4 = vector.load %arg1[%c0_3, %c0_4] : memref<2x128xf32, #tpu.memory_space<vmem>>, vector<2x128xf32>
    %5 = vector.extract_strided_slice %0 {offsets = [128, 0], sizes = [128, 1024], strides = [1, 1]} : vector<256x1024xf32> to vector<128x1024xf32>
    %cst_5 = arith.constant dense<0.000000e+00> : vector<2x1024xf32>
    %6 = tpu.matmul %4, %5, %cst_5 {dimension_numbers = #tpu.dot_dimension_numbers<[1], [0], [0], [1], [0, 0, 1, 1], [], []>} : vector<2x128xf32>, vector<128x1024xf32>, vector<2x1024xf32> -> vector<2x1024xf32>
    %7 = arith.addf %3, %6 : vector<2x1024xf32>
    %c0_6 = arith.constant 0 : index
    %c0_7 = arith.constant 0 : index
    %8 = vector.load %arg3[%c0_6, %c0_7] : memref<1x1024xf32, #tpu.memory_space<vmem>>, vector<1x1024xf32>
    %9 = vector.broadcast %8 : vector<1x1024xf32> to vector<2x1024xf32>
    %10 = arith.addf %7, %9 : vector<2x1024xf32>
    %cst_8 = arith.constant 0.000000e+00 : f32
    %11 = vector.broadcast %cst_8 : f32 to vector<2x1024xf32>
    %12 = arith.maximumf %10, %11 : vector<2x1024xf32>
    %c0_9 = arith.constant 0 : index
    %c0_10 = arith.constant 0 : index
    %13 = vector.load %arg4[%c0_9, %c0_10] : memref<1024x256xf32, #tpu.memory_space<vmem>>, vector<1024x256xf32>
    %cst_11 = arith.constant dense<0.000000e+00> : vector<2x256xf32>
    %14 = tpu.matmul %12, %13, %cst_11 {dimension_numbers = #tpu.dot_dimension_numbers<[1], [0], [0], [1], [0, 0, 1, 1], [], []>} : vector<2x1024xf32>, vector<1024x256xf32>, vector<2x256xf32> -> vector<2x256xf32>
    %c0_12 = arith.constant 0 : index
    %c0_13 = arith.constant 0 : index
    %15 = vector.load %arg5[%c0_12, %c0_13] : memref<1x256xf32, #tpu.memory_space<vmem>>, vector<1x256xf32>
    %16 = vector.broadcast %15 : vector<1x256xf32> to vector<2x256xf32>
    %17 = arith.addf %14, %16 : vector<2x256xf32>
    %cst_14 = arith.constant 0.000000e+00 : f32
    %18 = vector.broadcast %cst_14 : f32 to vector<2x256xf32>
    %19 = arith.maximumf %17, %18 : vector<2x256xf32>
    %c0_15 = arith.constant 0 : index
    %c0_16 = arith.constant 0 : index
    %20 = vector.load %arg6[%c0_15, %c0_16] : memref<256x1xf32, #tpu.memory_space<vmem>>, vector<256x1xf32>
    %cst_17 = arith.constant dense<0.000000e+00> : vector<2x1xf32>
    %21 = tpu.matmul %19, %20, %cst_17 {dimension_numbers = #tpu.dot_dimension_numbers<[1], [0], [0], [1], [0, 0, 1, 1], [], []>} : vector<2x256xf32>, vector<256x1xf32>, vector<2x1xf32> -> vector<2x1xf32>
    %c0_18 = arith.constant 0 : index
    %c0_19 = arith.constant 0 : index
    %22 = vector.load %arg7[%c0_18, %c0_19] : memref<1x1xf32, #tpu.memory_space<vmem>>, vector<1x1xf32>
    %23 = vector.broadcast %22 : vector<1x1xf32> to vector<2x1xf32>
    %24 = arith.addf %21, %23 : vector<2x1xf32>
    %c0_20 = arith.constant 0 : index
    %c0_21 = arith.constant 0 : index
    %25 = vector.load %arg8[%c0_20, %c0_21] : memref<2x1xf32, #tpu.memory_space<vmem>>, vector<2x1xf32>
    tpu.vector_store %arg8[%c0_20, %c0_21], %24 {strides = array<i32>} : memref<2x1xf32, #tpu.memory_space<vmem>>, vector<2x1xf32>,
    return
  }
}

</mosaic_0001>

<bundles_post_ra>
// kernel: gin_forward.3
= control target key start
LH: loop header
LB: loop body
LE: loop exit
PB: predicated region body
PF: predicated region fallthrough
CT: control target
= control target key end

     0   :  { %vm108_vm0 = vcmask 1045504   ;;  %vm61_vm1 = vcmask 195584   ;;  %vm98_vm2 = vcmask 637952   ;;  %vm146_vm3 = vcmask 261120   ;;  %s1165_s1 = inlined_call_operand.vmem [shape: f32[24,78], index: 1, kind: input, shape index: {}]   ;;  %s1166_s2 = inlined_call_operand.vmem [shape: f32[78,32], index: 2, kind: input, shape index: {}]   ;;  %s1167_s0 = inlined_call_operand.vmem [shape: f32[24,24], index: 0, kind: input, shape index: {}]   ;;  %s1168_s4 = inlined_call_operand.vmem [shape: f32[5,32,32], index: 4, kind: input, shape index: {}]   ;;  %s1169_s5 = inlined_call_operand.vmem [shape: f32[5,32], index: 5, kind: input, shape index: {}]   ;;  %s1170_s6 = inlined_call_operand.vmem [shape: f32[5,32], index: 6, kind: input, shape index: {}]   ;;  %s1171_s3 = inlined_call_operand.vmem [shape: f32[4,32,32], index: 3, kind: input, shape index: {}]   ;;  %s1172_s7 = inlined_call_operand.vmem [shape: f32[5,32], index: 7, kind: input, shape index: {}]   ;;  %s1173_s8 = inlined_call_operand.vmem [shape: f32[5,32], index: 8, kind: input, shape index: {}]   ;;  %s1174_s9 = inlined_call_operand.vmem [shape: f32[2,24], index: 9, kind: input, shape index: {}]   ;;  %s1175_s10 = inlined_call_operand.vmem [shape: f32[32,128], index: 10, kind: input, shape index: {}]   ;;  %s1176_s11 = inlined_call_operand.vmem [shape: f32[1,128], index: 11, kind: input, shape index: {}]   ;;  %s1177_s12 = inlined_call_operand.vmem [shape: f32[2,128], index: 12, kind: output, shape index: {}]  }
   0x1   :  { %v46_v0 = vld [vmem:[%s1165_s1 + $0x10] sm:$0xff]  ;;  %v45_v1 = vld [vmem:[%s1165_s1 + $0x8] sm:$0xff]  ;;  %v44_v2 = vld [vmem:[%s1165_s1] sm:$0xff] }
   0x2   :  { %84 = vmatpush.msra.mxu0 %v46_v0  ;;  %v60_v3 = vld [vmem:[%s1166_s2 + $0x48] sm:$0x3f]  ;;  %v59_v4 = vld [vmem:[%s1166_s2 + $0x40] sm:$0xff]  ;;  %v58_v6 = vld [vmem:[%s1166_s2 + $0x38] sm:$0xff] }
   0x3   :  { %v901_v5 = vld [vmem:[%s1167_s0] sm:$0xff]  ;;  %744 = vmatpush.msk.msra.mxu1 %vm108_vm0, %v60_v3  ;;  %v57_v7 = vld [vmem:[%s1166_s2 + $0x30] sm:$0xff]  ;;  %v56_v8 = vld [vmem:[%s1166_s2 + $0x28] sm:$0xff] }
   0x4   :  { %85 = vmatpush.msra.mxu0 %v45_v1  ;;  %v55_v9 = vld [vmem:[%s1166_s2 + $0x20] sm:$0xff]  ;;  %v920_v10 = vld [vmem:[%s1167_s0 + $0x8] sm:$0xff]  ;;  %v54_v11 = vld [vmem:[%s1166_s2 + $0x18] sm:$0xff] }
   0x5   :  { %119 = vmatpush.msra.mxu1 %v59_v4  ;;  %v53_v12 = vld [vmem:[%s1166_s2 + $0x10] sm:$0xff]  ;;  %v52_v14 = vld [vmem:[%s1166_s2 + $0x8] sm:$0xff]  ;;  %v51_v15 = vld [vmem:[%s1166_s2] sm:$0xff] }
   0x6   :  { %86 = vmatpush.msra.mxu0 %v44_v2  ;;  %v933_v13 = vld [vmem:[%s1167_s0 + $0x10] sm:$0xff]  ;;  %v144_v16 = vld [vmem:[%s1168_s4 + $0x18] sm:$0xff]  ;;  %v142_v24 = vld [vmem:[%s1168_s4 + $0x8] sm:$0xff] }
   0x7   :  { %741 = vmatmul.msk.f32.vlgmr.msra.gmra.mxu0 %vm61_vm1, %v901_v5  ;;  %120 = vmatpush.msra.mxu1 %v58_v6  ;;  %v143_v23 = vld [vmem:[%s1168_s4 + $0x10] sm:$0xff]  ;;  %v141_v25 = vld [vmem:[%s1168_s4] sm:$0xff]  ;;  %v196_v42 = vld [vmem:[%s1171_s3 + $0x18] sm:$0xff] }
   0x8   :  { %168 = vmatpush.msra.mxu2 %v144_v16  ;;  %v958_v26 = vld [vmem:[%s1169_s5] sm:$0x1f]  ;;  %v195_v43 = vld [vmem:[%s1171_s3 + $0x10] sm:$0xff]  ;;  %245 = vmatpush.msrb.mxu0 %v196_v42  ;;  %v194_v60 = vld [vmem:[%s1171_s3 + $0x8] sm:$0xff] }
   0x9   :  { %121 = vmatpush.msra.mxu1 %v57_v7  ;;  %v97_v27 = vperm.slane %v958_v26, 0  ;;  %v967_v38 = vld [vmem:[%s1170_s6] sm:$0x1f]  ;;  %v760_v62 = vld [vmem:[%s1168_s4 + $0x38] sm:$0xff]  ;;  %v759_v6 = vld [vmem:[%s1168_s4 + $0x30] sm:$0xff] }
   0xa   :  { %169 = vmatpush.msra.mxu2 %v143_v23  ;;  %v145_v40 = vperm.slane %v967_v38, 0  ;;  %v979_v45 = vld [vmem:[%s1172_s7] sm:$0x1f]  ;;  %246 = vmatpush.msrb.mxu0 %v195_v43  ;;  %v758_v7 = vld [vmem:[%s1168_s4 + $0x28] sm:$0xff]  ;;  %v267_v23 = vperm.slane %v967_v38, 1 }
   0xb   :  { %122 = vmatpush.msra.mxu1 %v56_v8  ;;  %v984_v49 = vld [vmem:[%s1173_s8] sm:$0x1f]  ;;  %v185_v51 = vperm.slane %v979_v45, 0  ;;  %v765_v43 = vld [vmem:[%s1171_s3 + $0x28] sm:$0xff] }
   0xc   :  { %170 = vmatpush.msra.mxu2 %v142_v24  ;;  %v189_v55 = vperm.slane %v984_v49, 0  ;;  %247 = vmatpush.msrb.mxu0 %v194_v60  ;;  %v193_v61 = vld [vmem:[%s1171_s3] sm:$0xff] }
   0xd   :  { %123 = vmatpush.msra.mxu1 %v55_v9  ;;  %v757_v8 = vld [vmem:[%s1168_s4 + $0x20] sm:$0xff]  ;;  %v223_v9 = vperm.slane %v958_v26, 1 }
   0xe   :  { %171 = vmatpush.msra.mxu2 %v141_v25  ;;  %248 = vmatpush.msrb.mxu0 %v193_v61  ;;  %v767_v25 = vld [vmem:[%s1171_s3 + $0x38] sm:$0xff] }
   0xf   :  { %742 = vmatmul.msk.f32.gmra.mxu0 %vm61_vm1, %v920_v10  ;;  %124 = vmatpush.msra.mxu1 %v54_v11 }
  0x11   :  { %125 = vmatpush.msra.mxu1 %v53_v12 }
  0x13   :  { %126 = vmatpush.msra.mxu1 %v52_v14 }
  0x15   :  { %127 = vmatpush.msra.mxu1 %v51_v15 }
  0x17   :  { %743 = vmatmul.msk.f32.gmra.mxu0 %vm61_vm1, %v933_v13  ;;  %367 = vmatpush.msrb.mxu1 %v767_v25 }
  0x84   :  { %v88_v17 = vpop.f32.mrf.mxu0 }
  0x85   :  { %v89_v18 = vadd.f32 %v88_v17, %v44_v2 }
  0x87   :  { %745 = vmatmul.msk.f32.vlgmr.msra.gmra.mxu1 %vm98_vm2, %v89_v18 }
  0x8c   :  { %v91_v19 = vpop.f32.mrf.mxu0 }
  0x8d   :  { %v92_v20 = vadd.f32 %v91_v19, %v45_v1 }
  0x8f   :  { %746 = vmatmul.msk.f32.gmra.mxu1 %vm98_vm2, %v92_v20 }
  0x94   :  { %v94_v21 = vpop.f32.mrf.mxu0 }
  0x95   :  { %v95_v22 = vadd.f32 %v94_v21, %v46_v0 }
  0x97   :  { %747 = vmatmul.msk.f32.gmra.mxu1 %vm98_vm2, %v95_v22 }
 0x104   :  { %v129_v28 = vpop.f32.mrf.mxu1 }
 0x105   :  { %v130_v29 = vadd.f32 %v129_v28, %v97_v27 }
 0x107   :  { %v138_v30 = vmax.f32 %v130_v29, 0.0 }
 0x109   :  { %748 = vmatmul.msk.f32.vlgmr.msra.gmra.mxu2 %vm146_vm3, %v138_v30 }
 0x10c   :  { %v132_v31 = vpop.f32.mrf.mxu1 }
 0x10d   :  { %v133_v32 = vadd.f32 %v132_v31, %v97_v27 }
 0x10f   :  { %v139_v33 = vmax.f32 %v133_v32, 0.0 }
 0x111   :  { %749 = vmatmul.msk.f32.gmra.mxu2 %vm146_vm3, %v139_v33  ;;  %v306_v33 = vperm.slane %v979_v45, 1 }
 0x114   :  { %v135_v34 = vpop.f32.mrf.mxu1 }
 0x115   :  { %v136_v35 = vadd.f32 %v135_v34, %v97_v27  ;;  %v766_v27 = vld [vmem:[%s1171_s3 + $0x30] sm:$0xff] }
 0x116   :  { %368 = vmatpush.msrb.mxu1 %v766_v27  ;;  %v782_v27 = vld [vmem:[%s1171_s3 + $0x48] sm:$0xff] }
 0x117   :  { %v140_v36 = vmax.f32 %v136_v35, 0.0 }
 0x118   :  { %369 = vmatpush.msrb.mxu1 %v765_v43 }
 0x119   :  { %750 = vmatmul.msk.f32.gmra.mxu2 %vm146_vm3, %v140_v36 }
 0x18c   :  { %v173_v37 = vpop.f32.mrf.mxu2 }
 0x18d   :  { %v174_v44 = vadd.f32 %v173_v37, %v145_v40  ;;  %v310_v37 = vperm.slane %v984_v49, 1 }
 0x18f   :  { %v182_v50 = vmax.f32 %v174_v44, 0.0  ;;  %v764_v44 = vld [vmem:[%s1171_s3 + $0x20] sm:$0xff] }
 0x190   :  { %370 = vmatpush.msrb.mxu1 %v764_v44 }
 0x191   :  { %v186_v56 = vmul.f32 %v185_v51, %v182_v50 }
 0x193   :  { %v190_v59 = vadd.f32 %v189_v55, %v186_v56  ;;  %v774_v56 = vld [vmem:[%s1168_s4 + $0x40] sm:$0xff] }
 0x194   :  { %v176_v39 = vpop.f32.mrf.mxu2 }
 0x195   :  { %v177_v41 = vadd.f32 %v176_v39, %v145_v40 }
 0x197   :  { %v183_v47 = vmax.f32 %v177_v41, 0.0 }
 0x199   :  { %v187_v53 = vmul.f32 %v185_v51, %v183_v47 }
 0x19b   :  { %v191_v58 = vadd.f32 %v189_v55, %v187_v53 }
 0x19c   :  { %v179_v46 = vpop.f32.mrf.mxu2 }
 0x19d   :  { %v180_v48 = vadd.f32 %v179_v46, %v145_v40  ;;  %v777_v46 = vld [vmem:[%s1168_s4 + $0x58] sm:$0xff] }
 0x19e   :  { %411 = vmatpush.msra.mxu0 %v777_v46 }
 0x19f   :  { %v184_v52 = vmax.f32 %v180_v48, 0.0 }
 0x1a1   :  { %v188_v54 = vmul.f32 %v185_v51, %v184_v52 }
 0x1a3   :  { %v192_v57 = vadd.f32 %v189_v55, %v188_v54  ;;  %v776_v54 = vld [vmem:[%s1168_s4 + $0x50] sm:$0xff]  ;;  %v775_v55 = vld [vmem:[%s1168_s4 + $0x48] sm:$0xff] }
 0x1a4   :  { %412 = vmatpush.msra.mxu0 %v776_v54  ;;  %v511_v54 = vperm.slane %v967_v38, 3 }
 0x1a5   :  { %210 = vmatpush.msra.mxu3 %v192_v57 }
 0x1a6   :  { %413 = vmatpush.msra.mxu0 %v775_v55 }
 0x1a7   :  { %211 = vmatpush.msra.mxu3 %v191_v58 }
 0x1a8   :  { %414 = vmatpush.msra.mxu0 %v774_v56  ;;  %v801_v56 = vld [vmem:[%s1171_s3 + $0x78] sm:$0xff] }
 0x1a9   :  { %212 = vmatpush.msra.mxu3 %v190_v59 }
 0x1aa   :  { %751 = vmatmul.msk.f32.vlgmr.msra.gmra.mxu3 %vm61_vm1, %v901_v5 }
 0x1ab   :  { %289 = vmatpush.msrb.mxu3 %v760_v62 }
 0x1ad   :  { %290 = vmatpush.msrb.mxu3 %v759_v6  ;;  %v389_v6 = vperm.slane %v967_v38, 2 }
 0x1af   :  { %291 = vmatpush.msrb.mxu3 %v758_v7 }
 0x1b1   :  { %292 = vmatpush.msrb.mxu3 %v757_v8  ;;  %v784_v8 = vld [vmem:[%s1171_s3 + $0x58] sm:$0xff] }
 0x1b2   :  { %752 = vmatmul.msk.f32.gmra.mxu3 %vm61_vm1, %v920_v10 }
 0x1ba   :  { %753 = vmatmul.msk.f32.gmra.mxu3 %vm61_vm1, %v933_v13 }
 0x22d   :  { %v214_v63 = vpop.f32.mrf.mxu3 }
 0x22e   :  { %v215_v0 = vadd.f32 %v214_v63, %v190_v59 }
 0x230   :  { %754 = vmatmul.msk.f32.vlgmr.msrb.gmra.mxu0 %vm146_vm3, %v215_v0 }
 0x235   :  { %v217_v1 = vpop.f32.mrf.mxu3 }
 0x236   :  { %v218_v2 = vadd.f32 %v217_v1, %v191_v58 }
 0x238   :  { %755 = vmatmul.msk.f32.gmra.mxu0 %vm146_vm3, %v218_v2 }
 0x23d   :  { %v220_v3 = vpop.f32.mrf.mxu3 }
 0x23e   :  { %v221_v4 = vadd.f32 %v220_v3, %v192_v57  ;;  %v345_v57 = vperm.slane %v958_v26, 2 }
 0x240   :  { %756 = vmatmul.msk.f32.gmra.mxu0 %vm146_vm3, %v221_v4 }
 0x2ad   :  { %v250_v11 = vpop.f32.mrf.mxu0 }
 0x2ae   :  { %v251_v12 = vadd.f32 %v250_v11, %v223_v9 }
 0x2b0   :  { %v259_v14 = vmax.f32 %v251_v12, 0.0 }
 0x2b2   :  { %761 = vmatmul.msk.f32.vlgmr.msrb.gmra.mxu3 %vm146_vm3, %v259_v14 }
 0x2b5   :  { %v253_v15 = vpop.f32.mrf.mxu0 }
 0x2b6   :  { %v254_v16 = vadd.f32 %v253_v15, %v223_v9 }
 0x2b8   :  { %v260_v17 = vmax.f32 %v254_v16, 0.0 }
 0x2ba   :  { %762 = vmatmul.msk.f32.gmra.mxu3 %vm146_vm3, %v260_v17  ;;  %v428_v17 = vperm.slane %v979_v45, 2 }
 0x2bd   :  { %v256_v18 = vpop.f32.mrf.mxu0 }
 0x2be   :  { %v257_v19 = vadd.f32 %v256_v18, %v223_v9  ;;  %v783_v9 = vld [vmem:[%s1171_s3 + $0x50] sm:$0xff] }
 0x2c0   :  { %v261_v20 = vmax.f32 %v257_v19, 0.0 }
 0x2c2   :  { %763 = vmatmul.msk.f32.gmra.mxu3 %vm146_vm3, %v261_v20 }
 0x335   :  { %v294_v21 = vpop.f32.mrf.mxu3 }
 0x336   :  { %v295_v28 = vadd.f32 %v294_v21, %v267_v23  ;;  %v432_v21 = vperm.slane %v984_v49, 2 }
 0x338   :  { %v303_v32 = vmax.f32 %v295_v28, 0.0  ;;  %v781_v28 = vld [vmem:[%s1171_s3 + $0x40] sm:$0xff] }
 0x33a   :  { %v307_v39 = vmul.f32 %v306_v33, %v303_v32 }
 0x33c   :  { %v311_v42 = vadd.f32 %v310_v37, %v307_v39  ;;  %v791_v39 = vld [vmem:[%s1168_s4 + $0x60] sm:$0xff] }
 0x33d   :  { %v297_v22 = vpop.f32.mrf.mxu3 }
 0x33e   :  { %v298_v24 = vadd.f32 %v297_v22, %v267_v23 }
 0x340   :  { %v304_v30 = vmax.f32 %v298_v24, 0.0 }
 0x342   :  { %v308_v35 = vmul.f32 %v306_v33, %v304_v30 }
 0x344   :  { %v312_v41 = vadd.f32 %v310_v37, %v308_v35 }
 0x345   :  { %v300_v29 = vpop.f32.mrf.mxu3 }
 0x346   :  { %v301_v31 = vadd.f32 %v300_v29, %v267_v23  ;;  %v794_v29 = vld [vmem:[%s1168_s4 + $0x78] sm:$0xff] }
 0x347   :  { %533 = vmatpush.msra.mxu1 %v794_v29 }
 0x348   :  { %v305_v34 = vmax.f32 %v301_v31, 0.0 }
 0x34a   :  { %v309_v36 = vmul.f32 %v306_v33, %v305_v34 }
 0x34c   :  { %v313_v40 = vadd.f32 %v310_v37, %v309_v36  ;;  %v793_v36 = vld [vmem:[%s1168_s4 + $0x70] sm:$0xff]  ;;  %v792_v37 = vld [vmem:[%s1168_s4 + $0x68] sm:$0xff] }
 0x34d   :  { %534 = vmatpush.msra.mxu1 %v793_v36 }
 0x34e   :  { %332 = vmatpush.msrb.mxu2 %v313_v40 }
 0x34f   :  { %535 = vmatpush.msra.mxu1 %v792_v37 }
 0x350   :  { %333 = vmatpush.msrb.mxu2 %v312_v41 }
 0x351   :  { %536 = vmatpush.msra.mxu1 %v791_v39 }
 0x352   :  { %334 = vmatpush.msrb.mxu2 %v311_v42 }
 0x353   :  { %768 = vmatmul.msk.f32.vlgmr.msrb.gmra.mxu2 %vm61_vm1, %v901_v5 }
 0x354   :  { %489 = vmatpush.msra.mxu2 %v784_v8 }
 0x356   :  { %490 = vmatpush.msra.mxu2 %v783_v9  ;;  %v799_v9 = vld [vmem:[%s1171_s3 + $0x68] sm:$0xff] }
 0x358   :  { %491 = vmatpush.msra.mxu2 %v782_v27 }
 0x35a   :  { %492 = vmatpush.msra.mxu2 %v781_v28 }
 0x35b   :  { %769 = vmatmul.msk.f32.gmra.mxu2 %vm61_vm1, %v920_v10 }
 0x363   :  { %770 = vmatmul.msk.f32.gmra.mxu2 %vm61_vm1, %v933_v13 }
 0x3d6   :  { %v336_v47 = vpop.f32.mrf.mxu2 }
 0x3d7   :  { %v337_v48 = vadd.f32 %v336_v47, %v311_v42 }
 0x3d9   :  { %771 = vmatmul.msk.f32.vlgmr.msrb.gmra.mxu1 %vm146_vm3, %v337_v48 }
 0x3de   :  { %v339_v50 = vpop.f32.mrf.mxu2 }
 0x3df   :  { %v340_v51 = vadd.f32 %v339_v50, %v312_v41 }
 0x3e1   :  { %772 = vmatmul.msk.f32.gmra.mxu1 %vm146_vm3, %v340_v51 }
 0x3e6   :  { %v342_v52 = vpop.f32.mrf.mxu2 }
 0x3e7   :  { %v343_v53 = vadd.f32 %v342_v52, %v313_v40  ;;  %v467_v40 = vperm.slane %v958_v26, 3 }
 0x3e9   :  { %773 = vmatmul.msk.f32.gmra.mxu1 %vm146_vm3, %v343_v53 }
 0x456   :  { %v372_v58 = vpop.f32.mrf.mxu1 }
 0x457   :  { %v373_v59 = vadd.f32 %v372_v58, %v345_v57 }
 0x459   :  { %v381_v60 = vmax.f32 %v373_v59, 0.0 }
 0x45b   :  { %778 = vmatmul.msk.f32.vlgmr.msra.gmra.mxu0 %vm146_vm3, %v381_v60 }
 0x45e   :  { %v375_v61 = vpop.f32.mrf.mxu1 }
 0x45f   :  { %v376_v62 = vadd.f32 %v375_v61, %v345_v57 }
 0x461   :  { %v382_v63 = vmax.f32 %v376_v62, 0.0 }
 0x463   :  { %779 = vmatmul.msk.f32.gmra.mxu0 %vm146_vm3, %v382_v63  ;;  %v550_v63 = vperm.slane %v979_v45, 3 }
 0x466   :  { %v378_v0 = vpop.f32.mrf.mxu1 }
 0x467   :  { %v379_v1 = vadd.f32 %v378_v0, %v345_v57  ;;  %v800_v57 = vld [vmem:[%s1171_s3 + $0x70] sm:$0xff] }
 0x469   :  { %v383_v2 = vmax.f32 %v379_v1, 0.0 }
 0x46b   :  { %780 = vmatmul.msk.f32.gmra.mxu0 %vm146_vm3, %v383_v2 }
 0x4d8   :  { %v416_v3 = vpop.f32.mrf.mxu0 }
 0x4d9   :  { %v417_v11 = vadd.f32 %v416_v3, %v389_v6  ;;  %v554_v3 = vperm.slane %v984_v49, 3 }
 0x4db   :  { %v425_v16 = vmax.f32 %v417_v11, 0.0  ;;  %v798_v11 = vld [vmem:[%s1171_s3 + $0x60] sm:$0xff] }
 0x4dd   :  { %v429_v22 = vmul.f32 %v428_v17, %v425_v16 }
 0x4df   :  { %v433_v25 = vadd.f32 %v432_v21, %v429_v22 }
 0x4e0   :  { %v419_v4 = vpop.f32.mrf.mxu0 }
 0x4e1   :  { %v420_v7 = vadd.f32 %v419_v4, %v389_v6 }
 0x4e3   :  { %v426_v14 = vmax.f32 %v420_v7, 0.0 }
 0x4e5   :  { %v430_v19 = vmul.f32 %v428_v17, %v426_v14 }
 0x4e7   :  { %v434_v24 = vadd.f32 %v432_v21, %v430_v19  ;;  %v808_v19 = vld [vmem:[%s1168_s4 + $0x80] sm:$0xff] }
 0x4e8   :  { %v422_v12 = vpop.f32.mrf.mxu0 }
 0x4e9   :  { %v423_v15 = vadd.f32 %v422_v12, %v389_v6 }
 0x4eb   :  { %v427_v18 = vmax.f32 %v423_v15, 0.0 }
 0x4ed   :  { %v431_v20 = vmul.f32 %v428_v17, %v427_v18  ;;  %v810_v17 = vld [vmem:[%s1168_s4 + $0x90] sm:$0xff]  ;;  %v809_v18 = vld [vmem:[%s1168_s4 + $0x88] sm:$0xff] }
 0x4ef   :  { %v435_v23 = vadd.f32 %v432_v21, %v431_v20  ;;  %v589_v20 = vperm.slane %v958_v26, 4 }
 0x4f1   :  { %454 = vmatpush.msra.mxu3 %v435_v23 }
 0x4f3   :  { %455 = vmatpush.msra.mxu3 %v434_v24 }
 0x4f5   :  { %456 = vmatpush.msra.mxu3 %v433_v25 }
 0x4f6   :  { %785 = vmatmul.msk.f32.vlgmr.msra.gmra.mxu3 %vm61_vm1, %v901_v5 }
 0x4f7   :  { %611 = vmatpush.msrb.mxu3 %v801_v56 }
 0x4f9   :  { %612 = vmatpush.msrb.mxu3 %v800_v57 }
 0x4fb   :  { %613 = vmatpush.msrb.mxu3 %v799_v9 }
 0x4fd   :  { %614 = vmatpush.msrb.mxu3 %v798_v11 }
 0x4fe   :  { %786 = vmatmul.msk.f32.gmra.mxu3 %vm61_vm1, %v920_v10 }
 0x506   :  { %787 = vmatmul.msk.f32.gmra.mxu3 %vm61_vm1, %v933_v13 }
 0x579   :  { %v458_v30 = vpop.f32.mrf.mxu3 }
 0x57a   :  { %v459_v31 = vadd.f32 %v458_v30, %v433_v25 }
 0x57c   :  { %788 = vmatmul.msk.f32.vlgmr.msra.gmra.mxu2 %vm146_vm3, %v459_v31 }
 0x581   :  { %v461_v32 = vpop.f32.mrf.mxu3 }
 0x582   :  { %v462_v33 = vadd.f32 %v461_v32, %v434_v24 }
 0x584   :  { %789 = vmatmul.msk.f32.gmra.mxu2 %vm146_vm3, %v462_v33  ;;  %v633_v33 = vperm.slane %v967_v38, 4  ;;  %v680_v38 = vld [vmem:[%s1174_s9] sm:$0x3] }
 0x589   :  { %v464_v34 = vpop.f32.mrf.mxu3 }
 0x58a   :  { %v465_v35 = vadd.f32 %v464_v34, %v435_v23 }
 0x58c   :  { %790 = vmatmul.msk.f32.gmra.mxu2 %vm146_vm3, %v465_v35 }
 0x5ff   :  { %v494_v41 = vpop.f32.mrf.mxu2 }
 0x600   :  { %v495_v42 = vadd.f32 %v494_v41, %v467_v40 }
 0x602   :  { %v503_v43 = vmax.f32 %v495_v42, 0.0 }
 0x604   :  { %795 = vmatmul.msk.f32.vlgmr.msra.gmra.mxu1 %vm146_vm3, %v503_v43 }
 0x607   :  { %v497_v44 = vpop.f32.mrf.mxu2 }
 0x608   :  { %v498_v46 = vadd.f32 %v497_v44, %v467_v40  ;;  %v676_v44 = vperm.slane %v984_v49, 4  ;;  %v705_v49 = vld [vmem:[%s1175_s10 + $0x8] sm:$0xff] }
 0x60a   :  { %v504_v47 = vmax.f32 %v498_v46, 0.0 }
 0x60c   :  { %796 = vmatmul.msk.f32.gmra.mxu1 %vm146_vm3, %v504_v47 }
 0x60f   :  { %v500_v48 = vpop.f32.mrf.mxu2 }
 0x610   :  { %v501_v50 = vadd.f32 %v500_v48, %v467_v40  ;;  %v672_v40 = vperm.slane %v979_v45, 4  ;;  %v706_v45 = vld [vmem:[%s1175_s10 + $0x10] sm:$0xff] }
 0x612   :  { %v505_v51 = vmax.f32 %v501_v50, 0.0 }
 0x614   :  { %797 = vmatmul.msk.f32.gmra.mxu1 %vm146_vm3, %v505_v51  ;;  %v707_v51 = vld [vmem:[%s1175_s10 + $0x18] sm:$0xff] }
 0x681   :  { %v538_v52 = vpop.f32.mrf.mxu1 }
 0x682   :  { %v539_v58 = vadd.f32 %v538_v52, %v511_v54  ;;  %v704_v52 = vld [vmem:[%s1175_s10] sm:$0xff] }
 0x684   :  { %v547_v62 = vmax.f32 %v539_v58, 0.0 }
 0x686   :  { %v551_v4 = vmul.f32 %v550_v63, %v547_v62 }
 0x688   :  { %v555_v8 = vadd.f32 %v554_v3, %v551_v4 }
 0x689   :  { %v541_v53 = vpop.f32.mrf.mxu1 }
 0x68a   :  { %v542_v55 = vadd.f32 %v541_v53, %v511_v54 }
 0x68c   :  { %v548_v60 = vmax.f32 %v542_v55, 0.0 }
 0x68e   :  { %v552_v1 = vmul.f32 %v550_v63, %v548_v60 }
 0x690   :  { %v556_v7 = vadd.f32 %v554_v3, %v552_v1 }
 0x691   :  { %v544_v59 = vpop.f32.mrf.mxu1 }
 0x692   :  { %v545_v61 = vadd.f32 %v544_v59, %v511_v54  ;;  %v817_v54 = vld [vmem:[%s1176_s11] ss:$0 sm:$0xff] }
 0x694   :  { %v549_v0 = vmax.f32 %v545_v61, 0.0 }
 0x696   :  { %v553_v2 = vmul.f32 %v550_v63, %v549_v0 }
 0x698   :  { %v557_v6 = vadd.f32 %v554_v3, %v553_v2 }
 0x69a   :  { %576 = vmatpush.msrb.mxu0 %v557_v6 }
 0x69c   :  { %577 = vmatpush.msrb.mxu0 %v556_v7 }
 0x69e   :  { %578 = vmatpush.msrb.mxu0 %v555_v8 }
 0x69f   :  { %802 = vmatmul.msk.f32.vlgmr.msrb.gmra.mxu0 %vm61_vm1, %v901_v5  ;;  %v811_v5 = vld [vmem:[%s1168_s4 + $0x98] sm:$0xff] }
 0x6a0   :  { %655 = vmatpush.msrb.mxu2 %v811_v5 }
 0x6a2   :  { %656 = vmatpush.msrb.mxu2 %v810_v17 }
 0x6a4   :  { %657 = vmatpush.msrb.mxu2 %v809_v18 }
 0x6a6   :  { %658 = vmatpush.msrb.mxu2 %v808_v19 }
 0x6a7   :  { %803 = vmatmul.msk.f32.gmra.mxu0 %vm61_vm1, %v920_v10 }
 0x6af   :  { %804 = vmatmul.msk.f32.gmra.mxu0 %vm61_vm1, %v933_v13 }
 0x71c   :  { %v580_v12 = vpop.f32.mrf.mxu0 }
 0x71d   :  { %v581_v10 = vadd.f32 %v580_v12, %v555_v8 }
 0x71f   :  { %805 = vmatmul.msk.f32.vlgmr.msrb.gmra.mxu3 %vm146_vm3, %v581_v10 }
 0x724   :  { %v583_v13 = vpop.f32.mrf.mxu0 }
 0x725   :  { %v584_v14 = vadd.f32 %v583_v13, %v556_v7 }
 0x727   :  { %806 = vmatmul.msk.f32.gmra.mxu3 %vm146_vm3, %v584_v14 }
 0x72c   :  { %v586_v15 = vpop.f32.mrf.mxu0 }
 0x72d   :  { %v587_v16 = vadd.f32 %v586_v15, %v557_v6 }
 0x72f   :  { %807 = vmatmul.msk.f32.gmra.mxu3 %vm146_vm3, %v587_v16 }
 0x7a2   :  { %v616_v21 = vpop.f32.mrf.mxu3 }
 0x7a3   :  { %v617_v22 = vadd.f32 %v616_v21, %v589_v20 }
 0x7a5   :  { %v625_v23 = vmax.f32 %v617_v22, 0.0 }
 0x7a7   :  { %812 = vmatmul.msk.f32.vlgmr.msrb.gmra.mxu2 %vm146_vm3, %v625_v23 }
 0x7aa   :  { %v619_v24 = vpop.f32.mrf.mxu3 }
 0x7ab   :  { %v620_v25 = vadd.f32 %v619_v24, %v589_v20 }
 0x7ad   :  { %v626_v27 = vmax.f32 %v620_v25, 0.0 }
 0x7af   :  { %813 = vmatmul.msk.f32.gmra.mxu2 %vm146_vm3, %v626_v27 }
 0x7b2   :  { %v622_v28 = vpop.f32.mrf.mxu3 }
 0x7b3   :  { %v623_v29 = vadd.f32 %v622_v28, %v589_v20 }
 0x7b5   :  { %v627_v30 = vmax.f32 %v623_v29, 0.0 }
 0x7b7   :  { %814 = vmatmul.msk.f32.gmra.mxu2 %vm146_vm3, %v627_v30 }
 0x82a   :  { %v660_v31 = vpop.f32.mrf.mxu2 }
 0x82b   :  { %v661_v34 = vadd.f32 %v660_v31, %v633_v33 }
 0x82d   :  { %v669_v39 = vmax.f32 %v661_v34, 0.0 }
 0x82f   :  { %v673_v46 = vmul.f32 %v672_v40, %v669_v39 }
 0x831   :  { %v677_v50 = vadd.f32 %v676_v44, %v673_v46 }
 0x832   :  { %v663_v32 = vpop.f32.mrf.mxu2 }
 0x833   :  { %v664_v26 = vadd.f32 %v663_v32, %v633_v33 }
 0x835   :  { %v670_v36 = vmax.f32 %v664_v26, 0.0 }
 0x837   :  { %v674_v42 = vmul.f32 %v672_v40, %v670_v36 }
 0x839   :  { %v678_v48 = vadd.f32 %v676_v44, %v674_v42 }
 0x83a   :  { %v666_v35 = vpop.f32.mrf.mxu2 }
 0x83b   :  { %v667_v37 = vadd.f32 %v666_v35, %v633_v33 }
 0x83d   :  { %v671_v41 = vmax.f32 %v667_v37, 0.0 }
 0x83f   :  { %v675_v43 = vmul.f32 %v672_v40, %v671_v41 }
 0x841   :  { %v679_v47 = vadd.f32 %v676_v44, %v675_v43 }
 0x843   :  { %697 = vmatpush.msrb.mxu1 %v679_v47 }
 0x845   :  { %698 = vmatpush.msrb.mxu1 %v678_v48 }
 0x847   :  { %699 = vmatpush.msrb.mxu1 %v677_v50 }
 0x848   :  { %815 = vmatmul.msk.f32.vlgmr.msrb.gmra.mxu1 %vm61_vm1, %v680_v38 }
 0x849   :  { %727 = vmatpush.msra.mxu1 %v707_v51 }
 0x84b   :  { %728 = vmatpush.msra.mxu1 %v706_v45 }
 0x84d   :  { %729 = vmatpush.msra.mxu1 %v705_v49 }
 0x84f   :  { %730 = vmatpush.msra.mxu1 %v704_v52 }
 0x8c5   :  { %v701_v53 = vpop.f32.mrf.mxu1 }
 0x8c6   :  { %816 = vmatmul.msk.f32.vlgmr.msra.gmra.mxu1 %vm146_vm3, %v701_v53 }
 0x943   :  { %v732_v55 = vpop.f32.mrf.mxu1 }
 0x944   :  { %v733_v56 = vadd.f32 %v817_v54, %v732_v55 }
 0x946   :  { %v735_v57 = vmax.f32 %v733_v56, 0.0 }
 0x948   :  { %736 = vst [vmem:[%s1177_s12] sm:$0x3] %v735_v57 }

// kernel: gin_forward.5
= control target key start
LH: loop header
LB: loop body
LE: loop exit
PB: predicated region body
PF: predicated region fallthrough
CT: control target
= control target key end

     0   :  { %vm1303_vm0 = vcmask 1024   ;;  %s3103_s2 = inlined_call_operand.vmem [shape: f32[256,1024], index: 2, kind: input, shape index: {}]   ;;  %s3104_s1 = inlined_call_operand.vmem [shape: f32[2,128], index: 1, kind: input, shape index: {}]   ;;  %s3105_s0 = inlined_call_operand.vmem [shape: f32[2,128], index: 0, kind: input, shape index: {}]   ;;  %s3106_s4 = inlined_call_operand.vmem [shape: f32[1024,256], index: 4, kind: input, shape index: {}]   ;;  %s3107_s3 = inlined_call_operand.vmem [shape: f32[1,1024], index: 3, kind: input, shape index: {}]   ;;  %s3108_s6 = inlined_call_operand.vmem [shape: f32[256,1], index: 6, kind: input, shape index: {}]   ;;  %s3109_s5 = inlined_call_operand.vmem [shape: f32[1,256], index: 5, kind: input, shape index: {}]   ;;  %s3110_s7 = inlined_call_operand.<no memory space> [shape: f32[1,1], index: 7, kind: input, shape index: {}]   ;;  %s3111_s8 = inlined_call_operand.vmem [shape: f32[2,1], index: 8, kind: output, shape index: {}]  }
   0x1   :  { %v279_v0 = vld [vmem:[%s3103_s2 + $0x7c0] sm:$0xff]  ;;  %v280_v1 = vld [vmem:[%s3103_s2 + $0x7c8] sm:$0xff]  ;;  %v281_v2 = vld [vmem:[%s3103_s2 + $0x7d0] sm:$0xff] }
   0x2   :  { %289 = vmatpush.msra.mxu0 %v279_v0  ;;  %309 = vmatpush.msra.mxu1 %v280_v1  ;;  %v282_v3 = vld [vmem:[%s3103_s2 + $0x7d8] sm:$0xff]  ;;  %v271_v4 = vld [vmem:[%s3103_s2 + $0x780] sm:$0xff]  ;;  %v272_v5 = vld [vmem:[%s3103_s2 + $0x788] sm:$0xff] }
   0x3   :  { %329 = vmatpush.msra.mxu2 %v281_v2  ;;  %349 = vmatpush.msra.mxu3 %v282_v3  ;;  %v273_v6 = vld [vmem:[%s3103_s2 + $0x790] sm:$0xff]  ;;  %v274_v7 = vld [vmem:[%s3103_s2 + $0x798] sm:$0xff]  ;;  %v263_v8 = vld [vmem:[%s3103_s2 + $0x740] sm:$0xff] }
   0x4   :  { %290 = vmatpush.msra.mxu0 %v271_v4  ;;  %310 = vmatpush.msra.mxu1 %v272_v5  ;;  %v264_v9 = vld [vmem:[%s3103_s2 + $0x748] sm:$0xff]  ;;  %v265_v10 = vld [vmem:[%s3103_s2 + $0x750] sm:$0xff]  ;;  %v266_v11 = vld [vmem:[%s3103_s2 + $0x758] sm:$0xff] }
   0x5   :  { %330 = vmatpush.msra.mxu2 %v273_v6  ;;  %350 = vmatpush.msra.mxu3 %v274_v7  ;;  %v255_v12 = vld [vmem:[%s3103_s2 + $0x700] sm:$0xff]  ;;  %v256_v13 = vld [vmem:[%s3103_s2 + $0x708] sm:$0xff]  ;;  %v257_v14 = vld [vmem:[%s3103_s2 + $0x710] sm:$0xff] }
   0x6   :  { %291 = vmatpush.msra.mxu0 %v263_v8  ;;  %311 = vmatpush.msra.mxu1 %v264_v9  ;;  %v258_v15 = vld [vmem:[%s3103_s2 + $0x718] sm:$0xff]  ;;  %v247_v16 = vld [vmem:[%s3103_s2 + $0x6c0] sm:$0xff]  ;;  %v248_v17 = vld [vmem:[%s3103_s2 + $0x6c8] sm:$0xff] }
   0x7   :  { %331 = vmatpush.msra.mxu2 %v265_v10  ;;  %351 = vmatpush.msra.mxu3 %v266_v11  ;;  %v249_v18 = vld [vmem:[%s3103_s2 + $0x6d0] sm:$0xff]  ;;  %v250_v19 = vld [vmem:[%s3103_s2 + $0x6d8] sm:$0xff]  ;;  %v239_v20 = vld [vmem:[%s3103_s2 + $0x680] sm:$0xff] }
   0x8   :  { %292 = vmatpush.msra.mxu0 %v255_v12  ;;  %312 = vmatpush.msra.mxu1 %v256_v13  ;;  %v240_v21 = vld [vmem:[%s3103_s2 + $0x688] sm:$0xff]  ;;  %v241_v22 = vld [vmem:[%s3103_s2 + $0x690] sm:$0xff]  ;;  %v242_v23 = vld [vmem:[%s3103_s2 + $0x698] sm:$0xff] }
   0x9   :  { %332 = vmatpush.msra.mxu2 %v257_v14  ;;  %352 = vmatpush.msra.mxu3 %v258_v15  ;;  %v231_v24 = vld [vmem:[%s3103_s2 + $0x640] sm:$0xff]  ;;  %v232_v25 = vld [vmem:[%s3103_s2 + $0x648] sm:$0xff]  ;;  %v233_v26 = vld [vmem:[%s3103_s2 + $0x650] sm:$0xff] }
   0xa   :  { %293 = vmatpush.msra.mxu0 %v247_v16  ;;  %313 = vmatpush.msra.mxu1 %v248_v17  ;;  %v234_v27 = vld [vmem:[%s3103_s2 + $0x658] sm:$0xff]  ;;  %v223_v28 = vld [vmem:[%s3103_s2 + $0x600] sm:$0xff]  ;;  %v224_v29 = vld [vmem:[%s3103_s2 + $0x608] sm:$0xff] }
   0xb   :  { %333 = vmatpush.msra.mxu2 %v249_v18  ;;  %353 = vmatpush.msra.mxu3 %v250_v19  ;;  %v225_v30 = vld [vmem:[%s3103_s2 + $0x610] sm:$0xff]  ;;  %v226_v31 = vld [vmem:[%s3103_s2 + $0x618] sm:$0xff]  ;;  %v215_v32 = vld [vmem:[%s3103_s2 + $0x5c0] sm:$0xff] }
   0xc   :  { %294 = vmatpush.msra.mxu0 %v239_v20  ;;  %314 = vmatpush.msra.mxu1 %v240_v21  ;;  %v216_v33 = vld [vmem:[%s3103_s2 + $0x5c8] sm:$0xff]  ;;  %v217_v34 = vld [vmem:[%s3103_s2 + $0x5d0] sm:$0xff]  ;;  %v218_v35 = vld [vmem:[%s3103_s2 + $0x5d8] sm:$0xff] }
   0xd   :  { %334 = vmatpush.msra.mxu2 %v241_v22  ;;  %354 = vmatpush.msra.mxu3 %v242_v23  ;;  %v207_v36 = vld [vmem:[%s3103_s2 + $0x580] sm:$0xff]  ;;  %v208_v37 = vld [vmem:[%s3103_s2 + $0x588] sm:$0xff]  ;;  %v209_v38 = vld [vmem:[%s3103_s2 + $0x590] sm:$0xff] }
   0xe   :  { %295 = vmatpush.msra.mxu0 %v231_v24  ;;  %315 = vmatpush.msra.mxu1 %v232_v25  ;;  %v210_v39 = vld [vmem:[%s3103_s2 + $0x598] sm:$0xff]  ;;  %v199_v40 = vld [vmem:[%s3103_s2 + $0x540] sm:$0xff]  ;;  %v200_v41 = vld [vmem:[%s3103_s2 + $0x548] sm:$0xff] }
   0xf   :  { %335 = vmatpush.msra.mxu2 %v233_v26  ;;  %355 = vmatpush.msra.mxu3 %v234_v27  ;;  %v201_v42 = vld [vmem:[%s3103_s2 + $0x550] sm:$0xff]  ;;  %v202_v43 = vld [vmem:[%s3103_s2 + $0x558] sm:$0xff]  ;;  %v191_v44 = vld [vmem:[%s3103_s2 + $0x500] sm:$0xff] }
  0x10   :  { %296 = vmatpush.msra.mxu0 %v223_v28  ;;  %316 = vmatpush.msra.mxu1 %v224_v29  ;;  %v192_v45 = vld [vmem:[%s3103_s2 + $0x508] sm:$0xff]  ;;  %v193_v46 = vld [vmem:[%s3103_s2 + $0x510] sm:$0xff]  ;;  %v194_v47 = vld [vmem:[%s3103_s2 + $0x518] sm:$0xff] }
  0x11   :  { %336 = vmatpush.msra.mxu2 %v225_v30  ;;  %356 = vmatpush.msra.mxu3 %v226_v31  ;;  %v183_v48 = vld [vmem:[%s3103_s2 + $0x4c0] sm:$0xff]  ;;  %v184_v49 = vld [vmem:[%s3103_s2 + $0x4c8] sm:$0xff]  ;;  %v185_v50 = vld [vmem:[%s3103_s2 + $0x4d0] sm:$0xff] }
  0x12   :  { %297 = vmatpush.msra.mxu0 %v215_v32  ;;  %317 = vmatpush.msra.mxu1 %v216_v33  ;;  %v186_v51 = vld [vmem:[%s3103_s2 + $0x4d8] sm:$0xff]  ;;  %v175_v52 = vld [vmem:[%s3103_s2 + $0x480] sm:$0xff]  ;;  %v176_v53 = vld [vmem:[%s3103_s2 + $0x488] sm:$0xff] }
  0x13   :  { %337 = vmatpush.msra.mxu2 %v217_v34  ;;  %357 = vmatpush.msra.mxu3 %v218_v35  ;;  %v177_v54 = vld [vmem:[%s3103_s2 + $0x490] sm:$0xff]  ;;  %v178_v55 = vld [vmem:[%s3103_s2 + $0x498] sm:$0xff]  ;;  %v167_v56 = vld [vmem:[%s3103_s2 + $0x440] sm:$0xff] }
  0x14   :  { %298 = vmatpush.msra.mxu0 %v207_v36  ;;  %318 = vmatpush.msra.mxu1 %v208_v37  ;;  %v168_v57 = vld [vmem:[%s3103_s2 + $0x448] sm:$0xff]  ;;  %v169_v58 = vld [vmem:[%s3103_s2 + $0x450] sm:$0xff]  ;;  %v170_v59 = vld [vmem:[%s3103_s2 + $0x458] sm:$0xff] }
  0x15   :  { %338 = vmatpush.msra.mxu2 %v209_v38  ;;  %358 = vmatpush.msra.mxu3 %v210_v39  ;;  %v159_v60 = vld [vmem:[%s3103_s2 + $0x400] sm:$0xff]  ;;  %v160_v61 = vld [vmem:[%s3103_s2 + $0x408] sm:$0xff]  ;;  %v161_v62 = vld [vmem:[%s3103_s2 + $0x410] sm:$0xff] }
  0x16   :  { %299 = vmatpush.msra.mxu0 %v199_v40  ;;  %319 = vmatpush.msra.mxu1 %v200_v41  ;;  %v162_v63 = vld [vmem:[%s3103_s2 + $0x418] sm:$0xff]  ;;  %v283_v0 = vld [vmem:[%s3103_s2 + $0x7e0] sm:$0xff]  ;;  %v284_v1 = vld [vmem:[%s3103_s2 + $0x7e8] sm:$0xff] }
  0x17   :  { %339 = vmatpush.msra.mxu2 %v201_v42  ;;  %359 = vmatpush.msra.mxu3 %v202_v43  ;;  %v285_v2 = vld [vmem:[%s3103_s2 + $0x7f0] sm:$0xff]  ;;  %v286_v3 = vld [vmem:[%s3103_s2 + $0x7f8] sm:$0xff]  ;;  %v275_v4 = vld [vmem:[%s3103_s2 + $0x7a0] sm:$0xff] }
  0x18   :  { %300 = vmatpush.msra.mxu0 %v191_v44  ;;  %320 = vmatpush.msra.mxu1 %v192_v45  ;;  %v276_v5 = vld [vmem:[%s3103_s2 + $0x7a8] sm:$0xff]  ;;  %v277_v6 = vld [vmem:[%s3103_s2 + $0x7b0] sm:$0xff]  ;;  %v278_v7 = vld [vmem:[%s3103_s2 + $0x7b8] sm:$0xff] }
  0x19   :  { %340 = vmatpush.msra.mxu2 %v193_v46  ;;  %360 = vmatpush.msra.mxu3 %v194_v47  ;;  %v267_v8 = vld [vmem:[%s3103_s2 + $0x760] sm:$0xff]  ;;  %v268_v9 = vld [vmem:[%s3103_s2 + $0x768] sm:$0xff]  ;;  %v269_v10 = vld [vmem:[%s3103_s2 + $0x770] sm:$0xff] }
  0x1a   :  { %301 = vmatpush.msra.mxu0 %v183_v48  ;;  %321 = vmatpush.msra.mxu1 %v184_v49  ;;  %v270_v11 = vld [vmem:[%s3103_s2 + $0x778] sm:$0xff]  ;;  %v259_v12 = vld [vmem:[%s3103_s2 + $0x720] sm:$0xff]  ;;  %v260_v13 = vld [vmem:[%s3103_s2 + $0x728] sm:$0xff] }
  0x1b   :  { %341 = vmatpush.msra.mxu2 %v185_v50  ;;  %361 = vmatpush.msra.mxu3 %v186_v51  ;;  %v261_v14 = vld [vmem:[%s3103_s2 + $0x730] sm:$0xff]  ;;  %v262_v15 = vld [vmem:[%s3103_s2 + $0x738] sm:$0xff]  ;;  %v251_v16 = vld [vmem:[%s3103_s2 + $0x6e0] sm:$0xff] }
  0x1c   :  { %302 = vmatpush.msra.mxu0 %v175_v52  ;;  %322 = vmatpush.msra.mxu1 %v176_v53  ;;  %v252_v17 = vld [vmem:[%s3103_s2 + $0x6e8] sm:$0xff]  ;;  %v253_v18 = vld [vmem:[%s3103_s2 + $0x6f0] sm:$0xff]  ;;  %v254_v19 = vld [vmem:[%s3103_s2 + $0x6f8] sm:$0xff] }
  0x1d   :  { %342 = vmatpush.msra.mxu2 %v177_v54  ;;  %362 = vmatpush.msra.mxu3 %v178_v55  ;;  %v243_v20 = vld [vmem:[%s3103_s2 + $0x6a0] sm:$0xff]  ;;  %v244_v21 = vld [vmem:[%s3103_s2 + $0x6a8] sm:$0xff]  ;;  %v245_v22 = vld [vmem:[%s3103_s2 + $0x6b0] sm:$0xff] }
  0x1e   :  { %303 = vmatpush.msra.mxu0 %v167_v56  ;;  %323 = vmatpush.msra.mxu1 %v168_v57  ;;  %v246_v23 = vld [vmem:[%s3103_s2 + $0x6b8] sm:$0xff]  ;;  %v235_v24 = vld [vmem:[%s3103_s2 + $0x660] sm:$0xff]  ;;  %v236_v25 = vld [vmem:[%s3103_s2 + $0x668] sm:$0xff] }
  0x1f   :  { %343 = vmatpush.msra.mxu2 %v169_v58  ;;  %363 = vmatpush.msra.mxu3 %v170_v59  ;;  %v237_v26 = vld [vmem:[%s3103_s2 + $0x670] sm:$0xff]  ;;  %v238_v27 = vld [vmem:[%s3103_s2 + $0x678] sm:$0xff]  ;;  %v227_v28 = vld [vmem:[%s3103_s2 + $0x620] sm:$0xff] }
  0x20   :  { %304 = vmatpush.msra.mxu0 %v159_v60  ;;  %324 = vmatpush.msra.mxu1 %v160_v61  ;;  %v228_v29 = vld [vmem:[%s3103_s2 + $0x628] sm:$0xff]  ;;  %v229_v30 = vld [vmem:[%s3103_s2 + $0x630] sm:$0xff]  ;;  %v230_v31 = vld [vmem:[%s3103_s2 + $0x638] sm:$0xff] }
  0x21   :  { %344 = vmatpush.msra.mxu2 %v161_v62  ;;  %364 = vmatpush.msra.mxu3 %v162_v63  ;;  %v219_v32 = vld [vmem:[%s3103_s2 + $0x5e0] sm:$0xff]  ;;  %v220_v33 = vld [vmem:[%s3103_s2 + $0x5e8] sm:$0xff]  ;;  %v221_v34 = vld [vmem:[%s3103_s2 + $0x5f0] sm:$0xff] }
  0x22   :  { %369 = vmatpush.msrb.mxu0 %v283_v0  ;;  %389 = vmatpush.msrb.mxu1 %v284_v1  ;;  %v222_v35 = vld [vmem:[%s3103_s2 + $0x5f8] sm:$0xff]  ;;  %v211_v36 = vld [vmem:[%s3103_s2 + $0x5a0] sm:$0xff]  ;;  %v212_v37 = vld [vmem:[%s3103_s2 + $0x5a8] sm:$0xff] }
  0x23   :  { %409 = vmatpush.msrb.mxu2 %v285_v2  ;;  %429 = vmatpush.msrb.mxu3 %v286_v3  ;;  %v213_v38 = vld [vmem:[%s3103_s2 + $0x5b0] sm:$0xff]  ;;  %v214_v39 = vld [vmem:[%s3103_s2 + $0x5b8] sm:$0xff]  ;;  %v203_v40 = vld [vmem:[%s3103_s2 + $0x560] sm:$0xff] }
  0x24   :  { %370 = vmatpush.msrb.mxu0 %v275_v4  ;;  %390 = vmatpush.msrb.mxu1 %v276_v5  ;;  %v204_v41 = vld [vmem:[%s3103_s2 + $0x568] sm:$0xff]  ;;  %v205_v42 = vld [vmem:[%s3103_s2 + $0x570] sm:$0xff]  ;;  %v206_v43 = vld [vmem:[%s3103_s2 + $0x578] sm:$0xff] }
  0x25   :  { %410 = vmatpush.msrb.mxu2 %v277_v6  ;;  %430 = vmatpush.msrb.mxu3 %v278_v7  ;;  %v195_v44 = vld [vmem:[%s3103_s2 + $0x520] sm:$0xff]  ;;  %v196_v45 = vld [vmem:[%s3103_s2 + $0x528] sm:$0xff]  ;;  %v197_v46 = vld [vmem:[%s3103_s2 + $0x530] sm:$0xff] }
  0x26   :  { %371 = vmatpush.msrb.mxu0 %v267_v8  ;;  %391 = vmatpush.msrb.mxu1 %v268_v9  ;;  %v198_v47 = vld [vmem:[%s3103_s2 + $0x538] sm:$0xff]  ;;  %v187_v48 = vld [vmem:[%s3103_s2 + $0x4e0] sm:$0xff]  ;;  %v188_v49 = vld [vmem:[%s3103_s2 + $0x4e8] sm:$0xff] }
  0x27   :  { %411 = vmatpush.msrb.mxu2 %v269_v10  ;;  %431 = vmatpush.msrb.mxu3 %v270_v11  ;;  %v189_v50 = vld [vmem:[%s3103_s2 + $0x4f0] sm:$0xff]  ;;  %v190_v51 = vld [vmem:[%s3103_s2 + $0x4f8] sm:$0xff]  ;;  %v179_v52 = vld [vmem:[%s3103_s2 + $0x4a0] sm:$0xff] }
  0x28   :  { %372 = vmatpush.msrb.mxu0 %v259_v12  ;;  %392 = vmatpush.msrb.mxu1 %v260_v13  ;;  %v180_v53 = vld [vmem:[%s3103_s2 + $0x4a8] sm:$0xff]  ;;  %v181_v54 = vld [vmem:[%s3103_s2 + $0x4b0] sm:$0xff]  ;;  %v182_v55 = vld [vmem:[%s3103_s2 + $0x4b8] sm:$0xff] }
  0x29   :  { %412 = vmatpush.msrb.mxu2 %v261_v14  ;;  %432 = vmatpush.msrb.mxu3 %v262_v15  ;;  %v171_v56 = vld [vmem:[%s3103_s2 + $0x460] sm:$0xff]  ;;  %v172_v57 = vld [vmem:[%s3103_s2 + $0x468] sm:$0xff]  ;;  %v173_v58 = vld [vmem:[%s3103_s2 + $0x470] sm:$0xff] }
  0x2a   :  { %373 = vmatpush.msrb.mxu0 %v251_v16  ;;  %393 = vmatpush.msrb.mxu1 %v252_v17  ;;  %v174_v59 = vld [vmem:[%s3103_s2 + $0x478] sm:$0xff]  ;;  %v163_v60 = vld [vmem:[%s3103_s2 + $0x420] sm:$0xff]  ;;  %v164_v61 = vld [vmem:[%s3103_s2 + $0x428] sm:$0xff] }
  0x2b   :  { %413 = vmatpush.msrb.mxu2 %v253_v18  ;;  %433 = vmatpush.msrb.mxu3 %v254_v19  ;;  %v165_v62 = vld [vmem:[%s3103_s2 + $0x430] sm:$0xff]  ;;  %v166_v63 = vld [vmem:[%s3103_s2 + $0x438] sm:$0xff]  ;;  %v1742_v0 = vld [vmem:[%s3104_s1] sm:$0x3] }
  0x2c   :  { %374 = vmatpush.msrb.mxu0 %v243_v20  ;;  %394 = vmatpush.msrb.mxu1 %v244_v21  ;;  %v151_v1 = vld [vmem:[%s3103_s2 + $0x3c0] sm:$0xff]  ;;  %v152_v2 = vld [vmem:[%s3103_s2 + $0x3c8] sm:$0xff]  ;;  %v153_v3 = vld [vmem:[%s3103_s2 + $0x3d0] sm:$0xff] }
  0x2d   :  { %414 = vmatpush.msrb.mxu2 %v245_v22  ;;  %434 = vmatpush.msrb.mxu3 %v246_v23  ;;  %v154_v4 = vld [vmem:[%s3103_s2 + $0x3d8] sm:$0xff]  ;;  %v143_v5 = vld [vmem:[%s3103_s2 + $0x380] sm:$0xff]  ;;  %v144_v6 = vld [vmem:[%s3103_s2 + $0x388] sm:$0xff] }
  0x2e   :  { %375 = vmatpush.msrb.mxu0 %v235_v24  ;;  %395 = vmatpush.msrb.mxu1 %v236_v25  ;;  %v145_v7 = vld [vmem:[%s3103_s2 + $0x390] sm:$0xff]  ;;  %v146_v8 = vld [vmem:[%s3103_s2 + $0x398] sm:$0xff]  ;;  %v135_v9 = vld [vmem:[%s3103_s2 + $0x340] sm:$0xff] }
  0x2f   :  { %415 = vmatpush.msrb.mxu2 %v237_v26  ;;  %435 = vmatpush.msrb.mxu3 %v238_v27  ;;  %v136_v10 = vld [vmem:[%s3103_s2 + $0x348] sm:$0xff]  ;;  %v137_v11 = vld [vmem:[%s3103_s2 + $0x350] sm:$0xff]  ;;  %v138_v12 = vld [vmem:[%s3103_s2 + $0x358] sm:$0xff] }
  0x30   :  { %376 = vmatpush.msrb.mxu0 %v227_v28  ;;  %396 = vmatpush.msrb.mxu1 %v228_v29  ;;  %v127_v13 = vld [vmem:[%s3103_s2 + $0x300] sm:$0xff]  ;;  %v128_v14 = vld [vmem:[%s3103_s2 + $0x308] sm:$0xff]  ;;  %v129_v15 = vld [vmem:[%s3103_s2 + $0x310] sm:$0xff] }
  0x31   :  { %416 = vmatpush.msrb.mxu2 %v229_v30  ;;  %436 = vmatpush.msrb.mxu3 %v230_v31  ;;  %v130_v16 = vld [vmem:[%s3103_s2 + $0x318] sm:$0xff]  ;;  %v119_v17 = vld [vmem:[%s3103_s2 + $0x2c0] sm:$0xff]  ;;  %v120_v18 = vld [vmem:[%s3103_s2 + $0x2c8] sm:$0xff] }
  0x32   :  { %377 = vmatpush.msrb.mxu0 %v219_v32  ;;  %397 = vmatpush.msrb.mxu1 %v220_v33  ;;  %v121_v19 = vld [vmem:[%s3103_s2 + $0x2d0] sm:$0xff]  ;;  %v122_v20 = vld [vmem:[%s3103_s2 + $0x2d8] sm:$0xff]  ;;  %v111_v21 = vld [vmem:[%s3103_s2 + $0x280] sm:$0xff] }
  0x33   :  { %417 = vmatpush.msrb.mxu2 %v221_v34  ;;  %437 = vmatpush.msrb.mxu3 %v222_v35  ;;  %v112_v22 = vld [vmem:[%s3103_s2 + $0x288] sm:$0xff]  ;;  %v113_v23 = vld [vmem:[%s3103_s2 + $0x290] sm:$0xff]  ;;  %v114_v24 = vld [vmem:[%s3103_s2 + $0x298] sm:$0xff] }
  0x34   :  { %378 = vmatpush.msrb.mxu0 %v211_v36  ;;  %398 = vmatpush.msrb.mxu1 %v212_v37  ;;  %v103_v25 = vld [vmem:[%s3103_s2 + $0x240] sm:$0xff]  ;;  %v104_v26 = vld [vmem:[%s3103_s2 + $0x248] sm:$0xff]  ;;  %v105_v27 = vld [vmem:[%s3103_s2 + $0x250] sm:$0xff] }
  0x35   :  { %418 = vmatpush.msrb.mxu2 %v213_v38  ;;  %438 = vmatpush.msrb.mxu3 %v214_v39  ;;  %v106_v28 = vld [vmem:[%s3103_s2 + $0x258] sm:$0xff]  ;;  %v95_v29 = vld [vmem:[%s3103_s2 + $0x200] sm:$0xff]  ;;  %v96_v30 = vld [vmem:[%s3103_s2 + $0x208] sm:$0xff] }
  0x36   :  { %379 = vmatpush.msrb.mxu0 %v203_v40  ;;  %399 = vmatpush.msrb.mxu1 %v204_v41  ;;  %v97_v31 = vld [vmem:[%s3103_s2 + $0x210] sm:$0xff]  ;;  %v98_v32 = vld [vmem:[%s3103_s2 + $0x218] sm:$0xff]  ;;  %v87_v33 = vld [vmem:[%s3103_s2 + $0x1c0] sm:$0xff] }
  0x37   :  { %419 = vmatpush.msrb.mxu2 %v205_v42  ;;  %439 = vmatpush.msrb.mxu3 %v206_v43  ;;  %v88_v34 = vld [vmem:[%s3103_s2 + $0x1c8] sm:$0xff]  ;;  %v89_v35 = vld [vmem:[%s3103_s2 + $0x1d0] sm:$0xff]  ;;  %v90_v36 = vld [vmem:[%s3103_s2 + $0x1d8] sm:$0xff] }
  0x38   :  { %380 = vmatpush.msrb.mxu0 %v195_v44  ;;  %400 = vmatpush.msrb.mxu1 %v196_v45  ;;  %v79_v37 = vld [vmem:[%s3103_s2 + $0x180] sm:$0xff]  ;;  %v80_v38 = vld [vmem:[%s3103_s2 + $0x188] sm:$0xff]  ;;  %v81_v39 = vld [vmem:[%s3103_s2 + $0x190] sm:$0xff] }
  0x39   :  { %420 = vmatpush.msrb.mxu2 %v197_v46  ;;  %440 = vmatpush.msrb.mxu3 %v198_v47  ;;  %v82_v40 = vld [vmem:[%s3103_s2 + $0x198] sm:$0xff]  ;;  %v71_v41 = vld [vmem:[%s3103_s2 + $0x140] sm:$0xff]  ;;  %v72_v42 = vld [vmem:[%s3103_s2 + $0x148] sm:$0xff] }
  0x3a   :  { %381 = vmatpush.msrb.mxu0 %v187_v48  ;;  %401 = vmatpush.msrb.mxu1 %v188_v49  ;;  %v73_v43 = vld [vmem:[%s3103_s2 + $0x150] sm:$0xff]  ;;  %v74_v44 = vld [vmem:[%s3103_s2 + $0x158] sm:$0xff]  ;;  %v63_v45 = vld [vmem:[%s3103_s2 + $0x100] sm:$0xff] }
  0x3b   :  { %421 = vmatpush.msrb.mxu2 %v189_v50  ;;  %441 = vmatpush.msrb.mxu3 %v190_v51  ;;  %v64_v46 = vld [vmem:[%s3103_s2 + $0x108] sm:$0xff]  ;;  %v65_v47 = vld [vmem:[%s3103_s2 + $0x110] sm:$0xff]  ;;  %v66_v48 = vld [vmem:[%s3103_s2 + $0x118] sm:$0xff] }
  0x3c   :  { %382 = vmatpush.msrb.mxu0 %v179_v52  ;;  %402 = vmatpush.msrb.mxu1 %v180_v53  ;;  %v55_v49 = vld [vmem:[%s3103_s2 + $0xc0] sm:$0xff]  ;;  %v56_v50 = vld [vmem:[%s3103_s2 + $0xc8] sm:$0xff]  ;;  %v57_v51 = vld [vmem:[%s3103_s2 + $0xd0] sm:$0xff] }
  0x3d   :  { %422 = vmatpush.msrb.mxu2 %v181_v54  ;;  %442 = vmatpush.msrb.mxu3 %v182_v55  ;;  %v58_v52 = vld [vmem:[%s3103_s2 + $0xd8] sm:$0xff]  ;;  %v47_v53 = vld [vmem:[%s3103_s2 + $0x80] sm:$0xff]  ;;  %v48_v54 = vld [vmem:[%s3103_s2 + $0x88] sm:$0xff] }
  0x3e   :  { %383 = vmatpush.msrb.mxu0 %v171_v56  ;;  %403 = vmatpush.msrb.mxu1 %v172_v57  ;;  %v49_v55 = vld [vmem:[%s3103_s2 + $0x90] sm:$0xff]  ;;  %v50_v56 = vld [vmem:[%s3103_s2 + $0x98] sm:$0xff]  ;;  %v39_v57 = vld [vmem:[%s3103_s2 + $0x40] sm:$0xff] }
  0x3f   :  { %423 = vmatpush.msrb.mxu2 %v173_v58  ;;  %443 = vmatpush.msrb.mxu3 %v174_v59  ;;  %v40_v58 = vld [vmem:[%s3103_s2 + $0x48] sm:$0xff]  ;;  %v41_v59 = vld [vmem:[%s3103_s2 + $0x50] sm:$0xff] }
  0x40   :  { %384 = vmatpush.msrb.mxu0 %v163_v60  ;;  %404 = vmatpush.msrb.mxu1 %v164_v61  ;;  %v42_v60 = vld [vmem:[%s3103_s2 + $0x58] sm:$0xff]  ;;  %v31_v61 = vld [vmem:[%s3103_s2] sm:$0xff] }
  0x41   :  { %424 = vmatpush.msrb.mxu2 %v165_v62  ;;  %444 = vmatpush.msrb.mxu3 %v166_v63  ;;  %v32_v62 = vld [vmem:[%s3103_s2 + $0x8] sm:$0xff]  ;;  %v33_v63 = vld [vmem:[%s3103_s2 + $0x10] sm:$0xff] }
  0x42   :  { %305 = vmatmul.f32.vlgmr.msra.gmra.mxu0 %v1742_v0  ;;  %325 = vmatmul.f32.vlgmr.msra.gmra.mxu1 %v1742_v0 }
  0x43   :  { %345 = vmatmul.f32.vlgmr.msra.gmra.mxu2 %v1742_v0  ;;  %365 = vmatmul.f32.vlgmr.msra.gmra.mxu3 %v1742_v0 }
  0x44   :  { %449 = vmatpush.msra.mxu0 %v151_v1  ;;  %469 = vmatpush.msra.mxu1 %v152_v2  ;;  %v1947_v1 = vld [vmem:[%s3105_s0] sm:$0x3] }
  0x45   :  { %489 = vmatpush.msra.mxu2 %v153_v3  ;;  %509 = vmatpush.msra.mxu3 %v154_v4  ;;  %v155_v2 = vld [vmem:[%s3103_s2 + $0x3e0] sm:$0xff]  ;;  %v156_v3 = vld [vmem:[%s3103_s2 + $0x3e8] sm:$0xff]  ;;  %v157_v4 = vld [vmem:[%s3103_s2 + $0x3f0] sm:$0xff] }
  0x46   :  { %450 = vmatpush.msra.mxu0 %v143_v5  ;;  %470 = vmatpush.msra.mxu1 %v144_v6  ;;  %v158_v5 = vld [vmem:[%s3103_s2 + $0x3f8] sm:$0xff]  ;;  %v147_v6 = vld [vmem:[%s3103_s2 + $0x3a0] sm:$0xff] }
  0x47   :  { %490 = vmatpush.msra.mxu2 %v145_v7  ;;  %510 = vmatpush.msra.mxu3 %v146_v8  ;;  %v148_v7 = vld [vmem:[%s3103_s2 + $0x3a8] sm:$0xff]  ;;  %v149_v8 = vld [vmem:[%s3103_s2 + $0x3b0] sm:$0xff] }
  0x48   :  { %451 = vmatpush.msra.mxu0 %v135_v9  ;;  %471 = vmatpush.msra.mxu1 %v136_v10  ;;  %v150_v9 = vld [vmem:[%s3103_s2 + $0x3b8] sm:$0xff]  ;;  %v139_v10 = vld [vmem:[%s3103_s2 + $0x360] sm:$0xff] }
  0x49   :  { %491 = vmatpush.msra.mxu2 %v137_v11  ;;  %511 = vmatpush.msra.mxu3 %v138_v12  ;;  %v140_v11 = vld [vmem:[%s3103_s2 + $0x368] sm:$0xff]  ;;  %v141_v12 = vld [vmem:[%s3103_s2 + $0x370] sm:$0xff] }
  0x4a   :  { %452 = vmatpush.msra.mxu0 %v127_v13  ;;  %472 = vmatpush.msra.mxu1 %v128_v14  ;;  %v142_v13 = vld [vmem:[%s3103_s2 + $0x378] sm:$0xff]  ;;  %v131_v14 = vld [vmem:[%s3103_s2 + $0x320] sm:$0xff] }
  0x4b   :  { %492 = vmatpush.msra.mxu2 %v129_v15  ;;  %512 = vmatpush.msra.mxu3 %v130_v16  ;;  %v132_v15 = vld [vmem:[%s3103_s2 + $0x328] sm:$0xff]  ;;  %v133_v16 = vld [vmem:[%s3103_s2 + $0x330] sm:$0xff] }
  0x4c   :  { %453 = vmatpush.msra.mxu0 %v119_v17  ;;  %473 = vmatpush.msra.mxu1 %v120_v18  ;;  %v134_v17 = vld [vmem:[%s3103_s2 + $0x338] sm:$0xff]  ;;  %v123_v18 = vld [vmem:[%s3103_s2 + $0x2e0] sm:$0xff] }
  0x4d   :  { %493 = vmatpush.msra.mxu2 %v121_v19  ;;  %513 = vmatpush.msra.mxu3 %v122_v20  ;;  %v124_v19 = vld [vmem:[%s3103_s2 + $0x2e8] sm:$0xff]  ;;  %v125_v20 = vld [vmem:[%s3103_s2 + $0x2f0] sm:$0xff] }
  0x4e   :  { %454 = vmatpush.msra.mxu0 %v111_v21  ;;  %474 = vmatpush.msra.mxu1 %v112_v22  ;;  %v126_v21 = vld [vmem:[%s3103_s2 + $0x2f8] sm:$0xff]  ;;  %v115_v22 = vld [vmem:[%s3103_s2 + $0x2a0] sm:$0xff] }
  0x4f   :  { %494 = vmatpush.msra.mxu2 %v113_v23  ;;  %514 = vmatpush.msra.mxu3 %v114_v24  ;;  %v116_v23 = vld [vmem:[%s3103_s2 + $0x2a8] sm:$0xff]  ;;  %v117_v24 = vld [vmem:[%s3103_s2 + $0x2b0] sm:$0xff] }
  0x50   :  { %455 = vmatpush.msra.mxu0 %v103_v25  ;;  %475 = vmatpush.msra.mxu1 %v104_v26  ;;  %v118_v25 = vld [vmem:[%s3103_s2 + $0x2b8] sm:$0xff]  ;;  %v107_v26 = vld [vmem:[%s3103_s2 + $0x260] sm:$0xff] }
  0x51   :  { %495 = vmatpush.msra.mxu2 %v105_v27  ;;  %515 = vmatpush.msra.mxu3 %v106_v28  ;;  %v108_v27 = vld [vmem:[%s3103_s2 + $0x268] sm:$0xff]  ;;  %v109_v28 = vld [vmem:[%s3103_s2 + $0x270] sm:$0xff] }
  0x52   :  { %456 = vmatpush.msra.mxu0 %v95_v29  ;;  %476 = vmatpush.msra.mxu1 %v96_v30  ;;  %v110_v29 = vld [vmem:[%s3103_s2 + $0x278] sm:$0xff]  ;;  %v99_v30 = vld [vmem:[%s3103_s2 + $0x220] sm:$0xff] }
  0x53   :  { %496 = vmatpush.msra.mxu2 %v97_v31  ;;  %516 = vmatpush.msra.mxu3 %v98_v32  ;;  %v100_v31 = vld [vmem:[%s3103_s2 + $0x228] sm:$0xff]  ;;  %v101_v32 = vld [vmem:[%s3103_s2 + $0x230] sm:$0xff] }
  0x54   :  { %457 = vmatpush.msra.mxu0 %v87_v33  ;;  %477 = vmatpush.msra.mxu1 %v88_v34  ;;  %v102_v33 = vld [vmem:[%s3103_s2 + $0x238] sm:$0xff]  ;;  %v91_v34 = vld [vmem:[%s3103_s2 + $0x1e0] sm:$0xff] }
  0x55   :  { %497 = vmatpush.msra.mxu2 %v89_v35  ;;  %517 = vmatpush.msra.mxu3 %v90_v36  ;;  %v92_v35 = vld [vmem:[%s3103_s2 + $0x1e8] sm:$0xff]  ;;  %v93_v36 = vld [vmem:[%s3103_s2 + $0x1f0] sm:$0xff] }
  0x56   :  { %458 = vmatpush.msra.mxu0 %v79_v37  ;;  %478 = vmatpush.msra.mxu1 %v80_v38  ;;  %v94_v37 = vld [vmem:[%s3103_s2 + $0x1f8] sm:$0xff]  ;;  %v83_v38 = vld [vmem:[%s3103_s2 + $0x1a0] sm:$0xff] }
  0x57   :  { %498 = vmatpush.msra.mxu2 %v81_v39  ;;  %518 = vmatpush.msra.mxu3 %v82_v40  ;;  %v84_v39 = vld [vmem:[%s3103_s2 + $0x1a8] sm:$0xff]  ;;  %v85_v40 = vld [vmem:[%s3103_s2 + $0x1b0] sm:$0xff] }
  0x58   :  { %459 = vmatpush.msra.mxu0 %v71_v41  ;;  %479 = vmatpush.msra.mxu1 %v72_v42  ;;  %v86_v41 = vld [vmem:[%s3103_s2 + $0x1b8] sm:$0xff]  ;;  %v75_v42 = vld [vmem:[%s3103_s2 + $0x160] sm:$0xff] }
  0x59   :  { %499 = vmatpush.msra.mxu2 %v73_v43  ;;  %519 = vmatpush.msra.mxu3 %v74_v44  ;;  %v76_v43 = vld [vmem:[%s3103_s2 + $0x168] sm:$0xff]  ;;  %v77_v44 = vld [vmem:[%s3103_s2 + $0x170] sm:$0xff] }
  0x5a   :  { %460 = vmatpush.msra.mxu0 %v63_v45  ;;  %480 = vmatpush.msra.mxu1 %v64_v46  ;;  %v78_v45 = vld [vmem:[%s3103_s2 + $0x178] sm:$0xff]  ;;  %v67_v46 = vld [vmem:[%s3103_s2 + $0x120] sm:$0xff] }
  0x5b   :  { %500 = vmatpush.msra.mxu2 %v65_v47  ;;  %520 = vmatpush.msra.mxu3 %v66_v48  ;;  %v68_v47 = vld [vmem:[%s3103_s2 + $0x128] sm:$0xff]  ;;  %v69_v48 = vld [vmem:[%s3103_s2 + $0x130] sm:$0xff] }
  0x5c   :  { %385 = vmatmul.f32.vlgmr.msrb.gmra.mxu0 %v1742_v0  ;;  %405 = vmatmul.f32.vlgmr.msrb.gmra.mxu1 %v1742_v0 }
  0x5d   :  { %425 = vmatmul.f32.vlgmr.msrb.gmra.mxu2 %v1742_v0  ;;  %445 = vmatmul.f32.vlgmr.msrb.gmra.mxu3 %v1742_v0  ;;  %v34_v0 = vld [vmem:[%s3103_s2 + $0x18] sm:$0xff] }
  0x5e   :  { %461 = vmatpush.msra.mxu0 %v55_v49  ;;  %481 = vmatpush.msra.mxu1 %v56_v50  ;;  %v70_v49 = vld [vmem:[%s3103_s2 + $0x138] sm:$0xff]  ;;  %v59_v50 = vld [vmem:[%s3103_s2 + $0xe0] sm:$0xff] }
  0x5f   :  { %501 = vmatpush.msra.mxu2 %v57_v51  ;;  %521 = vmatpush.msra.mxu3 %v58_v52  ;;  %v60_v51 = vld [vmem:[%s3103_s2 + $0xe8] sm:$0xff]  ;;  %v61_v52 = vld [vmem:[%s3103_s2 + $0xf0] sm:$0xff] }
  0x60   :  { %462 = vmatpush.msra.mxu0 %v47_v53  ;;  %482 = vmatpush.msra.mxu1 %v48_v54  ;;  %v62_v53 = vld [vmem:[%s3103_s2 + $0xf8] sm:$0xff]  ;;  %v51_v54 = vld [vmem:[%s3103_s2 + $0xa0] sm:$0xff] }
  0x61   :  { %502 = vmatpush.msra.mxu2 %v49_v55  ;;  %522 = vmatpush.msra.mxu3 %v50_v56  ;;  %v52_v55 = vld [vmem:[%s3103_s2 + $0xa8] sm:$0xff]  ;;  %v53_v56 = vld [vmem:[%s3103_s2 + $0xb0] sm:$0xff] }
  0x62   :  { %463 = vmatpush.msra.mxu0 %v39_v57  ;;  %483 = vmatpush.msra.mxu1 %v40_v58  ;;  %v54_v57 = vld [vmem:[%s3103_s2 + $0xb8] sm:$0xff]  ;;  %v43_v58 = vld [vmem:[%s3103_s2 + $0x60] sm:$0xff] }
  0x63   :  { %503 = vmatpush.msra.mxu2 %v41_v59  ;;  %523 = vmatpush.msra.mxu3 %v42_v60  ;;  %v44_v59 = vld [vmem:[%s3103_s2 + $0x68] sm:$0xff]  ;;  %v45_v60 = vld [vmem:[%s3103_s2 + $0x70] sm:$0xff] }
  0x64   :  { %464 = vmatpush.msra.mxu0 %v31_v61  ;;  %484 = vmatpush.msra.mxu1 %v32_v62  ;;  %v46_v61 = vld [vmem:[%s3103_s2 + $0x78] sm:$0xff]  ;;  %v35_v62 = vld [vmem:[%s3103_s2 + $0x20] sm:$0xff] }
  0x65   :  { %504 = vmatpush.msra.mxu2 %v33_v63  ;;  %524 = vmatpush.msra.mxu3 %v34_v0  ;;  %v36_v63 = vld [vmem:[%s3103_s2 + $0x28] sm:$0xff]  ;;  %v37_v0 = vld [vmem:[%s3103_s2 + $0x30] sm:$0xff] }
  0x66   :  { %465 = vmatmul.f32.vlgmr.msra.gmra.mxu0 %v1947_v1  ;;  %485 = vmatmul.f32.vlgmr.msra.gmra.mxu1 %v1947_v1 }
  0x67   :  { %505 = vmatmul.f32.vlgmr.msra.gmra.mxu2 %v1947_v1  ;;  %525 = vmatmul.f32.vlgmr.msra.gmra.mxu3 %v1947_v1 }
  0x68   :  { %529 = vmatpush.msrb.mxu0 %v155_v2  ;;  %549 = vmatpush.msrb.mxu1 %v156_v3  ;;  %v38_v2 = vld [vmem:[%s3103_s2 + $0x38] sm:$0xff]  ;;  %v673_v3 = vld [vmem:[%s3106_s4 + $0xf0] sm:$0xff] }
  0x69   :  { %569 = vmatpush.msrb.mxu2 %v157_v4  ;;  %589 = vmatpush.msrb.mxu3 %v158_v5  ;;  %v705_v4 = vld [vmem:[%s3106_s4 + $0x1f0] sm:$0xff] }
  0x6a   :  { %530 = vmatpush.msrb.mxu0 %v147_v6  ;;  %550 = vmatpush.msrb.mxu1 %v148_v7  ;;  %v737_v5 = vld [vmem:[%s3106_s4 + $0x2f0] sm:$0xff]  ;;  %v671_v7 = vld [vmem:[%s3106_s4 + $0xe0] sm:$0xff] }
  0x6b   :  { %570 = vmatpush.msrb.mxu2 %v149_v8  ;;  %590 = vmatpush.msrb.mxu3 %v150_v9  ;;  %v769_v6 = vld [vmem:[%s3106_s4 + $0x3f0] sm:$0xff]  ;;  %v703_v8 = vld [vmem:[%s3106_s4 + $0x1e0] sm:$0xff] }
  0x6c   :  { %531 = vmatpush.msrb.mxu0 %v139_v10  ;;  %551 = vmatpush.msrb.mxu1 %v140_v11  ;;  %v735_v9 = vld [vmem:[%s3106_s4 + $0x2e0] sm:$0xff]  ;;  %v701_v11 = vld [vmem:[%s3106_s4 + $0x1d0] sm:$0xff] }
  0x6d   :  { %571 = vmatpush.msrb.mxu2 %v141_v12  ;;  %591 = vmatpush.msrb.mxu3 %v142_v13  ;;  %v767_v10 = vld [vmem:[%s3106_s4 + $0x3e0] sm:$0xff]  ;;  %v733_v12 = vld [vmem:[%s3106_s4 + $0x2d0] sm:$0xff] }
  0x6e   :  { %532 = vmatpush.msrb.mxu0 %v131_v14  ;;  %552 = vmatpush.msrb.mxu1 %v132_v15  ;;  %v765_v13 = vld [vmem:[%s3106_s4 + $0x3d0] sm:$0xff]  ;;  %v667_v14 = vld [vmem:[%s3106_s4 + $0xc0] sm:$0xff] }
  0x6f   :  { %572 = vmatpush.msrb.mxu2 %v133_v16  ;;  %592 = vmatpush.msrb.mxu3 %v134_v17  ;;  %v699_v15 = vld [vmem:[%s3106_s4 + $0x1c0] sm:$0xff] }
  0x70   :  { %533 = vmatpush.msrb.mxu0 %v123_v18  ;;  %553 = vmatpush.msrb.mxu1 %v124_v19  ;;  %v731_v16 = vld [vmem:[%s3106_s4 + $0x2c0] sm:$0xff]  ;;  %v665_v18 = vld [vmem:[%s3106_s4 + $0xb0] sm:$0xff] }
  0x71   :  { %573 = vmatpush.msrb.mxu2 %v125_v20  ;;  %593 = vmatpush.msrb.mxu3 %v126_v21  ;;  %v763_v17 = vld [vmem:[%s3106_s4 + $0x3c0] sm:$0xff]  ;;  %v697_v19 = vld [vmem:[%s3106_s4 + $0x1b0] sm:$0xff] }
  0x72   :  { %534 = vmatpush.msrb.mxu0 %v115_v22  ;;  %554 = vmatpush.msrb.mxu1 %v116_v23  ;;  %v729_v20 = vld [vmem:[%s3106_s4 + $0x2b0] sm:$0xff]  ;;  %v663_v22 = vld [vmem:[%s3106_s4 + $0xa0] sm:$0xff] }
  0x73   :  { %574 = vmatpush.msrb.mxu2 %v117_v24  ;;  %594 = vmatpush.msrb.mxu3 %v118_v25  ;;  %v761_v21 = vld [vmem:[%s3106_s4 + $0x3b0] sm:$0xff]  ;;  %v695_v23 = vld [vmem:[%s3106_s4 + $0x1a0] sm:$0xff] }
  0x74   :  { %535 = vmatpush.msrb.mxu0 %v107_v26  ;;  %555 = vmatpush.msrb.mxu1 %v108_v27  ;;  %v727_v24 = vld [vmem:[%s3106_s4 + $0x2a0] sm:$0xff]  ;;  %v661_v26 = vld [vmem:[%s3106_s4 + $0x90] sm:$0xff] }
  0x75   :  { %575 = vmatpush.msrb.mxu2 %v109_v28  ;;  %595 = vmatpush.msrb.mxu3 %v110_v29  ;;  %v759_v25 = vld [vmem:[%s3106_s4 + $0x3a0] sm:$0xff]  ;;  %v693_v27 = vld [vmem:[%s3106_s4 + $0x190] sm:$0xff] }
  0x76   :  { %536 = vmatpush.msrb.mxu0 %v99_v30  ;;  %556 = vmatpush.msrb.mxu1 %v100_v31  ;;  %v725_v28 = vld [vmem:[%s3106_s4 + $0x290] sm:$0xff]  ;;  %v659_v30 = vld [vmem:[%s3106_s4 + $0x80] sm:$0xff] }
  0x77   :  { %576 = vmatpush.msrb.mxu2 %v101_v32  ;;  %596 = vmatpush.msrb.mxu3 %v102_v33  ;;  %v757_v29 = vld [vmem:[%s3106_s4 + $0x390] sm:$0xff]  ;;  %v691_v31 = vld [vmem:[%s3106_s4 + $0x180] sm:$0xff] }
  0x78   :  { %537 = vmatpush.msrb.mxu0 %v91_v34  ;;  %557 = vmatpush.msrb.mxu1 %v92_v35  ;;  %v723_v32 = vld [vmem:[%s3106_s4 + $0x280] sm:$0xff]  ;;  %v657_v34 = vld [vmem:[%s3106_s4 + $0x70] sm:$0xff] }
  0x79   :  { %577 = vmatpush.msrb.mxu2 %v93_v36  ;;  %597 = vmatpush.msrb.mxu3 %v94_v37  ;;  %v755_v33 = vld [vmem:[%s3106_s4 + $0x380] sm:$0xff]  ;;  %v689_v35 = vld [vmem:[%s3106_s4 + $0x170] sm:$0xff] }
  0x7a   :  { %538 = vmatpush.msrb.mxu0 %v83_v38  ;;  %558 = vmatpush.msrb.mxu1 %v84_v39  ;;  %v721_v36 = vld [vmem:[%s3106_s4 + $0x270] sm:$0xff]  ;;  %v655_v38 = vld [vmem:[%s3106_s4 + $0x60] sm:$0xff] }
  0x7b   :  { %578 = vmatpush.msrb.mxu2 %v85_v40  ;;  %598 = vmatpush.msrb.mxu3 %v86_v41  ;;  %v753_v37 = vld [vmem:[%s3106_s4 + $0x370] sm:$0xff]  ;;  %v687_v39 = vld [vmem:[%s3106_s4 + $0x160] sm:$0xff] }
  0x7c   :  { %539 = vmatpush.msrb.mxu0 %v75_v42  ;;  %559 = vmatpush.msrb.mxu1 %v76_v43  ;;  %v719_v40 = vld [vmem:[%s3106_s4 + $0x260] sm:$0xff]  ;;  %v653_v42 = vld [vmem:[%s3106_s4 + $0x50] sm:$0xff] }
  0x7d   :  { %579 = vmatpush.msrb.mxu2 %v77_v44  ;;  %599 = vmatpush.msrb.mxu3 %v78_v45  ;;  %v751_v41 = vld [vmem:[%s3106_s4 + $0x360] sm:$0xff]  ;;  %v685_v43 = vld [vmem:[%s3106_s4 + $0x150] sm:$0xff] }
  0x7e   :  { %540 = vmatpush.msrb.mxu0 %v67_v46  ;;  %560 = vmatpush.msrb.mxu1 %v68_v47  ;;  %v717_v44 = vld [vmem:[%s3106_s4 + $0x250] sm:$0xff]  ;;  %v651_v46 = vld [vmem:[%s3106_s4 + $0x40] sm:$0xff] }
  0x7f   :  { %580 = vmatpush.msrb.mxu2 %v69_v48  ;;  %600 = vmatpush.msrb.mxu3 %v70_v49  ;;  %v749_v45 = vld [vmem:[%s3106_s4 + $0x350] sm:$0xff]  ;;  %v683_v47 = vld [vmem:[%s3106_s4 + $0x140] sm:$0xff] }
  0x80   :  { %541 = vmatpush.msrb.mxu0 %v59_v50  ;;  %561 = vmatpush.msrb.mxu1 %v60_v51  ;;  %v715_v48 = vld [vmem:[%s3106_s4 + $0x240] sm:$0xff]  ;;  %v649_v50 = vld [vmem:[%s3106_s4 + $0x30] sm:$0xff] }
  0x81   :  { %581 = vmatpush.msrb.mxu2 %v61_v52  ;;  %601 = vmatpush.msrb.mxu3 %v62_v53  ;;  %v747_v49 = vld [vmem:[%s3106_s4 + $0x340] sm:$0xff]  ;;  %v681_v51 = vld [vmem:[%s3106_s4 + $0x130] sm:$0xff] }
  0x82   :  { %542 = vmatpush.msrb.mxu0 %v51_v54  ;;  %562 = vmatpush.msrb.mxu1 %v52_v55  ;;  %v647_v52 = vld [vmem:[%s3106_s4 + $0x20] sm:$0xff]  ;;  %v645_v54 = vld [vmem:[%s3106_s4 + $0x10] sm:$0xff] }
  0x83   :  { %582 = vmatpush.msrb.mxu2 %v53_v56  ;;  %602 = vmatpush.msrb.mxu3 %v54_v57  ;;  %v679_v53 = vld [vmem:[%s3106_s4 + $0x120] sm:$0xff]  ;;  %v677_v55 = vld [vmem:[%s3106_s4 + $0x110] sm:$0xff] }
  0x84   :  { %543 = vmatpush.msrb.mxu0 %v43_v58  ;;  %563 = vmatpush.msrb.mxu1 %v44_v59  ;;  %v643_v56 = vld [vmem:[%s3106_s4] sm:$0xff]  ;;  %v713_v58 = vld [vmem:[%s3106_s4 + $0x230] sm:$0xff] }
  0x85   :  { %583 = vmatpush.msrb.mxu2 %v45_v60  ;;  %603 = vmatpush.msrb.mxu3 %v46_v61  ;;  %v675_v57 = vld [vmem:[%s3106_s4 + $0x100] sm:$0xff]  ;;  %v745_v59 = vld [vmem:[%s3106_s4 + $0x330] sm:$0xff] }
  0x86   :  { %544 = vmatpush.msrb.mxu0 %v35_v62  ;;  %564 = vmatpush.msrb.mxu1 %v36_v63  ;;  %v801_v60 = vld [vmem:[%s3106_s4 + $0x4f0] sm:$0xff]  ;;  %v711_v62 = vld [vmem:[%s3106_s4 + $0x220] sm:$0xff] }
  0x87   :  { %584 = vmatpush.msrb.mxu2 %v37_v0  ;;  %604 = vmatpush.msrb.mxu3 %v38_v2  ;;  %v833_v61 = vld [vmem:[%s3106_s4 + $0x5f0] sm:$0xff]  ;;  %v743_v63 = vld [vmem:[%s3106_s4 + $0x320] sm:$0xff] }
  0x88   :  { %545 = vmatmul.f32.vlgmr.msrb.gmra.mxu0 %v1947_v1  ;;  %565 = vmatmul.f32.vlgmr.msrb.gmra.mxu1 %v1947_v1  ;;  %v799_v0 = vld [vmem:[%s3106_s4 + $0x4e0] sm:$0xff] }
  0x89   :  { %585 = vmatmul.f32.vlgmr.msrb.gmra.mxu2 %v1947_v1  ;;  %605 = vmatmul.f32.vlgmr.msrb.gmra.mxu3 %v1947_v1  ;;  %v669_v1 = vld [vmem:[%s3106_s4 + $0xd0] sm:$0xff]  ;;  %v831_v2 = vld [vmem:[%s3106_s4 + $0x5e0] sm:$0xff] }
  0x8a   :  { %905 = vmatpush.msra.mxu0 %v673_v3  ;;  %925 = vmatpush.msra.mxu1 %v705_v4  ;;  %v709_v3 = vld [vmem:[%s3106_s4 + $0x210] sm:$0xff] }
  0x8b   :  { %945 = vmatpush.msra.mxu2 %v737_v5  ;;  %965 = vmatpush.msra.mxu3 %v769_v6  ;;  %v741_v4 = vld [vmem:[%s3106_s4 + $0x310] sm:$0xff] }
  0x8c   :  { %906 = vmatpush.msra.mxu0 %v671_v7  ;;  %926 = vmatpush.msra.mxu1 %v703_v8  ;;  %v797_v5 = vld [vmem:[%s3106_s4 + $0x4d0] sm:$0xff]  ;;  %v707_v7 = vld [vmem:[%s3106_s4 + $0x200] sm:$0xff] }
  0x8d   :  { %946 = vmatpush.msra.mxu2 %v735_v9  ;;  %966 = vmatpush.msra.mxu3 %v767_v10  ;;  %v829_v6 = vld [vmem:[%s3106_s4 + $0x5d0] sm:$0xff]  ;;  %v739_v8 = vld [vmem:[%s3106_s4 + $0x300] sm:$0xff] }
  0x8e   :  { %907 = vmatpush.msra.mxu0 %v669_v1  ;;  %927 = vmatpush.msra.mxu1 %v701_v11  ;;  %v795_v9 = vld [vmem:[%s3106_s4 + $0x4c0] sm:$0xff]  ;;  %v865_v1 = vld [vmem:[%s3106_s4 + $0x6f0] sm:$0xff] }
  0x8f   :  { %947 = vmatpush.msra.mxu2 %v733_v12  ;;  %967 = vmatpush.msra.mxu3 %v765_v13  ;;  %v827_v10 = vld [vmem:[%s3106_s4 + $0x5c0] sm:$0xff]  ;;  %v897_v11 = vld [vmem:[%s3106_s4 + $0x7f0] sm:$0xff] }
  0x90   :  { %908 = vmatpush.msra.mxu0 %v667_v14  ;;  %928 = vmatpush.msra.mxu1 %v699_v15  ;;  %v793_v12 = vld [vmem:[%s3106_s4 + $0x4b0] sm:$0xff]  ;;  %v863_v14 = vld [vmem:[%s3106_s4 + $0x6e0] sm:$0xff] }
  0x91   :  { %948 = vmatpush.msra.mxu2 %v731_v16  ;;  %968 = vmatpush.msra.mxu3 %v763_v17  ;;  %v825_v13 = vld [vmem:[%s3106_s4 + $0x5b0] sm:$0xff]  ;;  %v895_v15 = vld [vmem:[%s3106_s4 + $0x7e0] sm:$0xff] }
  0x92   :  { %909 = vmatpush.msra.mxu0 %v665_v18  ;;  %929 = vmatpush.msra.mxu1 %v697_v19  ;;  %v791_v16 = vld [vmem:[%s3106_s4 + $0x4a0] sm:$0xff]  ;;  %v861_v18 = vld [vmem:[%s3106_s4 + $0x6d0] sm:$0xff] }
  0x93   :  { %949 = vmatpush.msra.mxu2 %v729_v20  ;;  %969 = vmatpush.msra.mxu3 %v761_v21  ;;  %v823_v17 = vld [vmem:[%s3106_s4 + $0x5a0] sm:$0xff]  ;;  %v893_v19 = vld [vmem:[%s3106_s4 + $0x7d0] sm:$0xff] }
  0x94   :  { %910 = vmatpush.msra.mxu0 %v663_v22  ;;  %930 = vmatpush.msra.mxu1 %v695_v23  ;;  %v789_v20 = vld [vmem:[%s3106_s4 + $0x490] sm:$0xff]  ;;  %v859_v22 = vld [vmem:[%s3106_s4 + $0x6c0] sm:$0xff] }
  0x95   :  { %950 = vmatpush.msra.mxu2 %v727_v24  ;;  %970 = vmatpush.msra.mxu3 %v759_v25  ;;  %v821_v21 = vld [vmem:[%s3106_s4 + $0x590] sm:$0xff]  ;;  %v891_v23 = vld [vmem:[%s3106_s4 + $0x7c0] sm:$0xff] }
  0x96   :  { %911 = vmatpush.msra.mxu0 %v661_v26  ;;  %931 = vmatpush.msra.mxu1 %v693_v27  ;;  %v787_v24 = vld [vmem:[%s3106_s4 + $0x480] sm:$0xff]  ;;  %v857_v26 = vld [vmem:[%s3106_s4 + $0x6b0] sm:$0xff] }
  0x97   :  { %951 = vmatpush.msra.mxu2 %v725_v28  ;;  %971 = vmatpush.msra.mxu3 %v757_v29  ;;  %v819_v25 = vld [vmem:[%s3106_s4 + $0x580] sm:$0xff]  ;;  %v889_v27 = vld [vmem:[%s3106_s4 + $0x7b0] sm:$0xff] }
  0x98   :  { %912 = vmatpush.msra.mxu0 %v659_v30  ;;  %932 = vmatpush.msra.mxu1 %v691_v31  ;;  %v785_v28 = vld [vmem:[%s3106_s4 + $0x470] sm:$0xff]  ;;  %v855_v30 = vld [vmem:[%s3106_s4 + $0x6a0] sm:$0xff] }
  0x99   :  { %952 = vmatpush.msra.mxu2 %v723_v32  ;;  %972 = vmatpush.msra.mxu3 %v755_v33  ;;  %v817_v29 = vld [vmem:[%s3106_s4 + $0x570] sm:$0xff]  ;;  %v887_v31 = vld [vmem:[%s3106_s4 + $0x7a0] sm:$0xff] }
  0x9a   :  { %913 = vmatpush.msra.mxu0 %v657_v34  ;;  %933 = vmatpush.msra.mxu1 %v689_v35  ;;  %v783_v32 = vld [vmem:[%s3106_s4 + $0x460] sm:$0xff]  ;;  %v853_v34 = vld [vmem:[%s3106_s4 + $0x690] sm:$0xff] }
  0x9b   :  { %953 = vmatpush.msra.mxu2 %v721_v36  ;;  %973 = vmatpush.msra.mxu3 %v753_v37  ;;  %v815_v33 = vld [vmem:[%s3106_s4 + $0x560] sm:$0xff]  ;;  %v885_v35 = vld [vmem:[%s3106_s4 + $0x790] sm:$0xff] }
  0x9c   :  { %914 = vmatpush.msra.mxu0 %v655_v38  ;;  %934 = vmatpush.msra.mxu1 %v687_v39  ;;  %v781_v36 = vld [vmem:[%s3106_s4 + $0x450] sm:$0xff]  ;;  %v851_v38 = vld [vmem:[%s3106_s4 + $0x680] sm:$0xff] }
  0x9d   :  { %954 = vmatpush.msra.mxu2 %v719_v40  ;;  %974 = vmatpush.msra.mxu3 %v751_v41  ;;  %v813_v37 = vld [vmem:[%s3106_s4 + $0x550] sm:$0xff]  ;;  %v883_v39 = vld [vmem:[%s3106_s4 + $0x780] sm:$0xff] }
  0x9e   :  { %915 = vmatpush.msra.mxu0 %v653_v42  ;;  %935 = vmatpush.msra.mxu1 %v685_v43  ;;  %v779_v40 = vld [vmem:[%s3106_s4 + $0x440] sm:$0xff]  ;;  %v849_v42 = vld [vmem:[%s3106_s4 + $0x670] sm:$0xff] }
  0x9f   :  { %955 = vmatpush.msra.mxu2 %v717_v44  ;;  %975 = vmatpush.msra.mxu3 %v749_v45  ;;  %v811_v41 = vld [vmem:[%s3106_s4 + $0x540] sm:$0xff]  ;;  %v881_v43 = vld [vmem:[%s3106_s4 + $0x770] sm:$0xff] }
  0xa0   :  { %916 = vmatpush.msra.mxu0 %v651_v46  ;;  %936 = vmatpush.msra.mxu1 %v683_v47  ;;  %v777_v44 = vld [vmem:[%s3106_s4 + $0x430] sm:$0xff]  ;;  %v847_v46 = vld [vmem:[%s3106_s4 + $0x660] sm:$0xff] }
  0xa1   :  { %956 = vmatpush.msra.mxu2 %v715_v48  ;;  %976 = vmatpush.msra.mxu3 %v747_v49  ;;  %v809_v45 = vld [vmem:[%s3106_s4 + $0x530] sm:$0xff]  ;;  %v879_v47 = vld [vmem:[%s3106_s4 + $0x760] sm:$0xff] }
  0xa2   :  { %917 = vmatpush.msra.mxu0 %v649_v50  ;;  %937 = vmatpush.msra.mxu1 %v681_v51  ;;  %v775_v48 = vld [vmem:[%s3106_s4 + $0x420] sm:$0xff]  ;;  %v845_v50 = vld [vmem:[%s3106_s4 + $0x650] sm:$0xff] }
  0xa3   :  { %957 = vmatpush.msra.mxu2 %v713_v58  ;;  %977 = vmatpush.msra.mxu3 %v745_v59  ;;  %v807_v49 = vld [vmem:[%s3106_s4 + $0x520] sm:$0xff]  ;;  %v877_v51 = vld [vmem:[%s3106_s4 + $0x750] sm:$0xff] }
  0xa4   :  { %918 = vmatpush.msra.mxu0 %v647_v52  ;;  %938 = vmatpush.msra.mxu1 %v679_v53  ;;  %v773_v52 = vld [vmem:[%s3106_s4 + $0x410] sm:$0xff] }
  0xa5   :  { %958 = vmatpush.msra.mxu2 %v711_v62  ;;  %978 = vmatpush.msra.mxu3 %v743_v63  ;;  %v805_v53 = vld [vmem:[%s3106_s4 + $0x510] sm:$0xff] }
  0xa6   :  { %919 = vmatpush.msra.mxu0 %v645_v54  ;;  %939 = vmatpush.msra.mxu1 %v677_v55  ;;  %v843_v54 = vld [vmem:[%s3106_s4 + $0x640] sm:$0xff]  ;;  %v841_v58 = vld [vmem:[%s3106_s4 + $0x630] sm:$0xff] }
  0xa7   :  { %959 = vmatpush.msra.mxu2 %v709_v3  ;;  %979 = vmatpush.msra.mxu3 %v741_v4  ;;  %v875_v55 = vld [vmem:[%s3106_s4 + $0x740] sm:$0xff]  ;;  %v873_v59 = vld [vmem:[%s3106_s4 + $0x730] sm:$0xff] }
  0xa8   :  { %920 = vmatpush.msra.mxu0 %v643_v56  ;;  %940 = vmatpush.msra.mxu1 %v675_v57  ;;  %v771_v56 = vld [vmem:[%s3106_s4 + $0x400] sm:$0xff]  ;;  %v837_v62 = vld [vmem:[%s3106_s4 + $0x610] sm:$0xff] }
  0xa9   :  { %960 = vmatpush.msra.mxu2 %v707_v7  ;;  %980 = vmatpush.msra.mxu3 %v739_v8  ;;  %v803_v57 = vld [vmem:[%s3106_s4 + $0x500] sm:$0xff]  ;;  %v869_v63 = vld [vmem:[%s3106_s4 + $0x710] sm:$0xff] }
  0xaa   :  { %985 = vmatpush.msrb.mxu0 %v801_v60  ;;  %1005 = vmatpush.msrb.mxu1 %v833_v61  ;;  %v839_v60 = vld [vmem:[%s3106_s4 + $0x620] sm:$0xff] }
  0xab   :  { %1025 = vmatpush.msrb.mxu2 %v865_v1  ;;  %1045 = vmatpush.msrb.mxu3 %v897_v11  ;;  %v871_v61 = vld [vmem:[%s3106_s4 + $0x720] sm:$0xff] }
  0xac   :  { %986 = vmatpush.msrb.mxu0 %v799_v0  ;;  %1006 = vmatpush.msrb.mxu1 %v831_v2  ;;  %v835_v3 = vld [vmem:[%s3106_s4 + $0x600] sm:$0xff] }
  0xad   :  { %1026 = vmatpush.msrb.mxu2 %v863_v14  ;;  %1046 = vmatpush.msrb.mxu3 %v895_v15  ;;  %v867_v4 = vld [vmem:[%s3106_s4 + $0x700] sm:$0xff] }
  0xae   :  { %987 = vmatpush.msrb.mxu0 %v797_v5  ;;  %1007 = vmatpush.msrb.mxu1 %v829_v6 }
  0xaf   :  { %1027 = vmatpush.msrb.mxu2 %v861_v18  ;;  %1047 = vmatpush.msrb.mxu3 %v893_v19 }
  0xb0   :  { %988 = vmatpush.msrb.mxu0 %v795_v9  ;;  %1008 = vmatpush.msrb.mxu1 %v827_v10  ;;  %v2540_v9 = vld [vmem:[%s3107_s3] sm:$0xff] }
  0xb1   :  { %1028 = vmatpush.msrb.mxu2 %v859_v22  ;;  %1048 = vmatpush.msrb.mxu3 %v891_v23  ;;  %v611_v11 = vperm.slane %v2540_v9, 0  ;;  %v706_v22 = vld [vmem:[%s3106_s4 + $0x1f8] sm:$0xff]  ;;  %v613_v23 = vperm.slane %v2540_v9, 2 }
  0xb2   :  { %989 = vmatpush.msrb.mxu0 %v793_v12  ;;  %1009 = vmatpush.msrb.mxu1 %v825_v13  ;;  %v612_v12 = vperm.slane %v2540_v9, 1 }
  0xb3   :  { %1029 = vmatpush.msrb.mxu2 %v857_v26  ;;  %1049 = vmatpush.msrb.mxu3 %v889_v27  ;;  %v672_v27 = vld [vmem:[%s3106_s4 + $0xe8] sm:$0xff] }
  0xb4   :  { %990 = vmatpush.msrb.mxu0 %v791_v16  ;;  %1010 = vmatpush.msrb.mxu1 %v823_v17 }
  0xb5   :  { %1030 = vmatpush.msrb.mxu2 %v855_v30  ;;  %1050 = vmatpush.msrb.mxu3 %v887_v31  ;;  %v670_v31 = vld [vmem:[%s3106_s4 + $0xd8] sm:$0xff] }
  0xb6   :  { %991 = vmatpush.msrb.mxu0 %v789_v20  ;;  %1011 = vmatpush.msrb.mxu1 %v821_v21  ;;  %v674_v21 = vld [vmem:[%s3106_s4 + $0xf8] sm:$0xff] }
  0xb7   :  { %1031 = vmatpush.msrb.mxu2 %v853_v34  ;;  %1051 = vmatpush.msrb.mxu3 %v885_v35 }
  0xb8   :  { %992 = vmatpush.msrb.mxu0 %v787_v24  ;;  %1012 = vmatpush.msrb.mxu1 %v819_v25  ;;  %v614_v24 = vperm.slane %v2540_v9, 3 }
  0xb9   :  { %1032 = vmatpush.msrb.mxu2 %v851_v38  ;;  %1052 = vmatpush.msrb.mxu3 %v883_v39  ;;  %v700_v38 = vld [vmem:[%s3106_s4 + $0x1c8] sm:$0xff]  ;;  %v738_v39 = vld [vmem:[%s3106_s4 + $0x2f8] sm:$0xff] }
  0xba   :  { %993 = vmatpush.msrb.mxu0 %v785_v28  ;;  %1013 = vmatpush.msrb.mxu1 %v817_v29  ;;  %v704_v28 = vld [vmem:[%s3106_s4 + $0x1e8] sm:$0xff] }
  0xbb   :  { %1033 = vmatpush.msrb.mxu2 %v849_v42  ;;  %1053 = vmatpush.msrb.mxu3 %v881_v43  ;;  %v698_v42 = vld [vmem:[%s3106_s4 + $0x1b8] sm:$0xff]  ;;  %v736_v43 = vld [vmem:[%s3106_s4 + $0x2e8] sm:$0xff] }
  0xbc   :  { %994 = vmatpush.msrb.mxu0 %v783_v32  ;;  %1014 = vmatpush.msrb.mxu1 %v815_v33  ;;  %v702_v32 = vld [vmem:[%s3106_s4 + $0x1d8] sm:$0xff] }
  0xbd   :  { %1034 = vmatpush.msrb.mxu2 %v847_v46  ;;  %1054 = vmatpush.msrb.mxu3 %v879_v47  ;;  %v696_v46 = vld [vmem:[%s3106_s4 + $0x1a8] sm:$0xff]  ;;  %v734_v47 = vld [vmem:[%s3106_s4 + $0x2d8] sm:$0xff] }
  0xbe   :  { %995 = vmatpush.msrb.mxu0 %v781_v36  ;;  %1015 = vmatpush.msrb.mxu1 %v813_v37  ;;  %v668_v37 = vld [vmem:[%s3106_s4 + $0xc8] sm:$0xff] }
  0xbf   :  { %1035 = vmatpush.msrb.mxu2 %v845_v50  ;;  %1055 = vmatpush.msrb.mxu3 %v877_v51  ;;  %v306_v0 = vpop.f32.mrf.mxu0  ;;  %v326_v2 = vpop.f32.mrf.mxu1  ;;  %v694_v50 = vld [vmem:[%s3106_s4 + $0x198] sm:$0xff]  ;;  %v732_v51 = vld [vmem:[%s3106_s4 + $0x2c8] sm:$0xff] }
  0xc0   :  { %996 = vmatpush.msrb.mxu0 %v779_v40  ;;  %1016 = vmatpush.msrb.mxu1 %v811_v41  ;;  %v770_v40 = vld [vmem:[%s3106_s4 + $0x3f8] sm:$0xff] }
  0xc1   :  { %1036 = vmatpush.msrb.mxu2 %v843_v54  ;;  %1056 = vmatpush.msrb.mxu3 %v875_v55  ;;  %v666_v41 = vld [vmem:[%s3106_s4 + $0xb8] sm:$0xff]  ;;  %v692_v54 = vld [vmem:[%s3106_s4 + $0x188] sm:$0xff] }
  0xc2   :  { %997 = vmatpush.msrb.mxu0 %v777_v44  ;;  %1017 = vmatpush.msrb.mxu1 %v809_v45  ;;  %v768_v44 = vld [vmem:[%s3106_s4 + $0x3e8] sm:$0xff]  ;;  %v730_v55 = vld [vmem:[%s3106_s4 + $0x2b8] sm:$0xff] }
  0xc3   :  { %1037 = vmatpush.msrb.mxu2 %v841_v58  ;;  %1057 = vmatpush.msrb.mxu3 %v873_v59  ;;  %v664_v45 = vld [vmem:[%s3106_s4 + $0xa8] sm:$0xff]  ;;  %v690_v58 = vld [vmem:[%s3106_s4 + $0x178] sm:$0xff] }
  0xc4   :  { %998 = vmatpush.msrb.mxu0 %v775_v48  ;;  %1018 = vmatpush.msrb.mxu1 %v807_v49  ;;  %v766_v48 = vld [vmem:[%s3106_s4 + $0x3d8] sm:$0xff]  ;;  %v728_v59 = vld [vmem:[%s3106_s4 + $0x2a8] sm:$0xff] }
  0xc5   :  { %1038 = vmatpush.msrb.mxu2 %v839_v60  ;;  %1058 = vmatpush.msrb.mxu3 %v871_v61  ;;  %v662_v49 = vld [vmem:[%s3106_s4 + $0x98] sm:$0xff]  ;;  %v760_v60 = vld [vmem:[%s3106_s4 + $0x3a8] sm:$0xff] }
  0xc6   :  { %999 = vmatpush.msrb.mxu0 %v773_v52  ;;  %1019 = vmatpush.msrb.mxu1 %v805_v53  ;;  %v346_v5 = vpop.f32.mrf.mxu2  ;;  %v366_v6 = vpop.f32.mrf.mxu3  ;;  %v764_v52 = vld [vmem:[%s3106_s4 + $0x3c8] sm:$0xff] }
  0xc7   :  { %1039 = vmatpush.msrb.mxu2 %v837_v62  ;;  %1059 = vmatpush.msrb.mxu3 %v869_v63  ;;  %v660_v53 = vld [vmem:[%s3106_s4 + $0x88] sm:$0xff]  ;;  %v726_v63 = vld [vmem:[%s3106_s4 + $0x298] sm:$0xff] }
  0xc8   :  { %1000 = vmatpush.msrb.mxu0 %v771_v56  ;;  %1020 = vmatpush.msrb.mxu1 %v803_v57  ;;  %v762_v56 = vld [vmem:[%s3106_s4 + $0x3b8] sm:$0xff]  ;;  %v656_v61 = vld [vmem:[%s3106_s4 + $0x68] sm:$0xff] }
  0xc9   :  { %1040 = vmatpush.msrb.mxu2 %v835_v3  ;;  %1060 = vmatpush.msrb.mxu3 %v867_v4  ;;  %v658_v57 = vld [vmem:[%s3106_s4 + $0x78] sm:$0xff]  ;;  %v688_v62 = vld [vmem:[%s3106_s4 + $0x168] sm:$0xff] }
  0xca   :  { %v686_v3 = vld [vmem:[%s3106_s4 + $0x158] sm:$0xff]  ;;  %v724_v4 = vld [vmem:[%s3106_s4 + $0x288] sm:$0xff] }
  0xd9   :  { %v2533_v7 = vpop.f32.mrf.mxu0  ;;  %v2535_v8 = vpop.f32.mrf.mxu1 }
  0xe0   :  { %v2542_v10 = vpop.f32.mrf.mxu2  ;;  %v2544_v1 = vpop.f32.mrf.mxu3 }
  0xe3   :  { %v466_v13 = vpop.f32.mrf.mxu0  ;;  %v486_v14 = vpop.f32.mrf.mxu1 }
  0xe4   :  { %v467_v15 = vadd.f32 %v466_v13, %v306_v0  ;;  %v487_v16 = vadd.f32 %v486_v14, %v326_v2  ;;  %v758_v0 = vld [vmem:[%s3106_s4 + $0x398] sm:$0xff] }
  0xe5   :  { %v654_v2 = vld [vmem:[%s3106_s4 + $0x58] sm:$0xff] }
  0xe6   :  { %v2548_v17 = vadd.f32 %v611_v11, %v467_v15  ;;  %v2550_v18 = vadd.f32 %v612_v12, %v487_v16  ;;  %v684_v11 = vld [vmem:[%s3106_s4 + $0x148] sm:$0xff]  ;;  %v722_v12 = vld [vmem:[%s3106_s4 + $0x278] sm:$0xff] }
  0xe7   :  { %v754_v13 = vld [vmem:[%s3106_s4 + $0x378] sm:$0xff]  ;;  %v720_v16 = vld [vmem:[%s3106_s4 + $0x268] sm:$0xff] }
  0xe8   :  { %v635_v19 = vmax.f32 %v2548_v17, 0.0  ;;  %v636_v20 = vmax.f32 %v2550_v18, 0.0  ;;  %v650_v14 = vld [vmem:[%s3106_s4 + $0x38] sm:$0xff] }
  0xe9   :  { %v682_v15 = vld [vmem:[%s3106_s4 + $0x138] sm:$0xff] }
  0xea   :  { %v506_v25 = vpop.f32.mrf.mxu2  ;;  %v526_v26 = vpop.f32.mrf.mxu3  ;;  %921 = vmatmul.f32.vlgmr.msra.gmra.mxu0 %v635_v19  ;;  %941 = vmatmul.f32.vlgmr.msra.gmra.mxu1 %v636_v20  ;;  %v894_v17 = vld [vmem:[%s3106_s4 + $0x7d8] sm:$0xff] }
  0xeb   :  { %v507_v29 = vadd.f32 %v506_v25, %v346_v5  ;;  %v527_v30 = vadd.f32 %v526_v26, %v366_v6  ;;  %1065 = vmatpush.msra.mxu0 %v674_v21  ;;  %1085 = vmatpush.msra.mxu1 %v706_v22  ;;  %v756_v5 = vld [vmem:[%s3106_s4 + $0x388] sm:$0xff]  ;;  %v616_v25 = vperm.slane %v2540_v9, 5  ;;  %v718_v26 = vld [vmem:[%s3106_s4 + $0x258] sm:$0xff] }
  0xec   :  { %v652_v6 = vld [vmem:[%s3106_s4 + $0x48] sm:$0xff]  ;;  %v790_v18 = vld [vmem:[%s3106_s4 + $0x498] sm:$0xff] }
  0xed   :  { %v2578_v33 = vadd.f32 %v613_v23, %v507_v29  ;;  %v2580_v34 = vadd.f32 %v614_v24, %v527_v30  ;;  %1066 = vmatpush.msra.mxu0 %v672_v27  ;;  %1086 = vmatpush.msra.mxu1 %v704_v28  ;;  %v752_v21 = vld [vmem:[%s3106_s4 + $0x368] sm:$0xff]  ;;  %v615_v24 = vperm.slane %v2540_v9, 4  ;;  %v750_v27 = vld [vmem:[%s3106_s4 + $0x358] sm:$0xff] }
  0xee   :  { %v648_v22 = vld [vmem:[%s3106_s4 + $0x28] sm:$0xff]  ;;  %v646_v30 = vld [vmem:[%s3106_s4 + $0x18] sm:$0xff] }
  0xef   :  { %v637_v35 = vmax.f32 %v2578_v33, 0.0  ;;  %v638_v36 = vmax.f32 %v2580_v34, 0.0  ;;  %1067 = vmatpush.msra.mxu0 %v670_v31  ;;  %1087 = vmatpush.msra.mxu1 %v702_v32  ;;  %v680_v23 = vld [vmem:[%s3106_s4 + $0x128] sm:$0xff]  ;;  %v678_v31 = vld [vmem:[%s3106_s4 + $0x118] sm:$0xff] }
  0xf0   :  { %v888_v33 = vld [vmem:[%s3106_s4 + $0x7a8] sm:$0xff] }
  0xf1   :  { %961 = vmatmul.f32.vlgmr.msra.gmra.mxu2 %v637_v35  ;;  %981 = vmatmul.f32.vlgmr.msra.gmra.mxu3 %v638_v36  ;;  %v784_v34 = vld [vmem:[%s3106_s4 + $0x468] sm:$0xff] }
  0xf2   :  { %1068 = vmatpush.msra.mxu0 %v668_v37  ;;  %1088 = vmatpush.msra.mxu1 %v700_v38  ;;  %v716_v38 = vld [vmem:[%s3106_s4 + $0x248] sm:$0xff] }
  0xf3   :  { %1105 = vmatpush.msra.mxu2 %v738_v39  ;;  %1125 = vmatpush.msra.mxu3 %v770_v40  ;;  %v748_v39 = vld [vmem:[%s3106_s4 + $0x348] sm:$0xff] }
  0xf4   :  { %1069 = vmatpush.msra.mxu0 %v666_v41  ;;  %1089 = vmatpush.msra.mxu1 %v698_v42  ;;  %v644_v40 = vld [vmem:[%s3106_s4 + $0x8] sm:$0xff]  ;;  %v714_v42 = vld [vmem:[%s3106_s4 + $0x238] sm:$0xff] }
  0xf5   :  { %1106 = vmatpush.msra.mxu2 %v736_v43  ;;  %1126 = vmatpush.msra.mxu3 %v768_v44  ;;  %v746_v43 = vld [vmem:[%s3106_s4 + $0x338] sm:$0xff] }
  0xf6   :  { %1070 = vmatpush.msra.mxu0 %v664_v45  ;;  %1090 = vmatpush.msra.mxu1 %v696_v46  ;;  %v802_v46 = vld [vmem:[%s3106_s4 + $0x4f8] sm:$0xff] }
  0xf7   :  { %1107 = vmatpush.msra.mxu2 %v734_v47  ;;  %1127 = vmatpush.msra.mxu3 %v766_v48  ;;  %v834_v47 = vld [vmem:[%s3106_s4 + $0x5f8] sm:$0xff]  ;;  %v617_v48 = vperm.slane %v2540_v9, 6 }
  0xf8   :  { %1071 = vmatpush.msra.mxu0 %v662_v49  ;;  %1091 = vmatpush.msra.mxu1 %v694_v50  ;;  %v618_v49 = vperm.slane %v2540_v9, 7  ;;  %v712_v50 = vld [vmem:[%s3106_s4 + $0x228] sm:$0xff] }
  0xf9   :  { %1108 = vmatpush.msra.mxu2 %v732_v51  ;;  %1128 = vmatpush.msra.mxu3 %v764_v52  ;;  %v744_v51 = vld [vmem:[%s3106_s4 + $0x328] sm:$0xff] }
  0xfa   :  { %1072 = vmatpush.msra.mxu0 %v660_v53  ;;  %1092 = vmatpush.msra.mxu1 %v692_v54  ;;  %v800_v9 = vld [vmem:[%s3106_s4 + $0x4e8] sm:$0xff] }
  0xfb   :  { %1109 = vmatpush.msra.mxu2 %v730_v55  ;;  %1129 = vmatpush.msra.mxu3 %v762_v56  ;;  %v832_v54 = vld [vmem:[%s3106_s4 + $0x5e8] sm:$0xff] }
  0xfc   :  { %1073 = vmatpush.msra.mxu0 %v658_v57  ;;  %1093 = vmatpush.msra.mxu1 %v690_v58  ;;  %v710_v57 = vld [vmem:[%s3106_s4 + $0x218] sm:$0xff] }
  0xfd   :  { %1110 = vmatpush.msra.mxu2 %v728_v59  ;;  %1130 = vmatpush.msra.mxu3 %v760_v60  ;;  %v742_v58 = vld [vmem:[%s3106_s4 + $0x318] sm:$0xff] }
  0xfe   :  { %1074 = vmatpush.msra.mxu0 %v656_v61  ;;  %1094 = vmatpush.msra.mxu1 %v688_v62  ;;  %v798_v59 = vld [vmem:[%s3106_s4 + $0x4d8] sm:$0xff]  ;;  %v708_v61 = vld [vmem:[%s3106_s4 + $0x208] sm:$0xff] }
  0xff   :  { %1111 = vmatpush.msra.mxu2 %v726_v63  ;;  %1131 = vmatpush.msra.mxu3 %v758_v0  ;;  %v740_v62 = vld [vmem:[%s3106_s4 + $0x308] sm:$0xff] }
 0x100   :  { %1075 = vmatpush.msra.mxu0 %v654_v2  ;;  %1095 = vmatpush.msra.mxu1 %v686_v3  ;;  %v796_v2 = vld [vmem:[%s3106_s4 + $0x4c8] sm:$0xff] }
 0x101   :  { %1112 = vmatpush.msra.mxu2 %v724_v4  ;;  %1132 = vmatpush.msra.mxu3 %v756_v5  ;;  %v828_v3 = vld [vmem:[%s3106_s4 + $0x5c8] sm:$0xff]  ;;  %v866_v4 = vld [vmem:[%s3106_s4 + $0x6f8] sm:$0xff] }
 0x102   :  { %1076 = vmatpush.msra.mxu0 %v652_v6  ;;  %1096 = vmatpush.msra.mxu1 %v684_v11  ;;  %v898_v5 = vld [vmem:[%s3106_s4 + $0x7f8] sm:$0xff] }
 0x103   :  { %1113 = vmatpush.msra.mxu2 %v722_v12  ;;  %1133 = vmatpush.msra.mxu3 %v754_v13  ;;  %v794_v6 = vld [vmem:[%s3106_s4 + $0x4b8] sm:$0xff]  ;;  %v864_v12 = vld [vmem:[%s3106_s4 + $0x6e8] sm:$0xff] }
 0x104   :  { %1077 = vmatpush.msra.mxu0 %v650_v14  ;;  %1097 = vmatpush.msra.mxu1 %v682_v15  ;;  %v826_v11 = vld [vmem:[%s3106_s4 + $0x5b8] sm:$0xff]  ;;  %v896_v13 = vld [vmem:[%s3106_s4 + $0x7e8] sm:$0xff] }
 0x105   :  { %v546_v28 = vpop.f32.mrf.mxu0  ;;  %v566_v29 = vpop.f32.mrf.mxu1  ;;  %1114 = vmatpush.msra.mxu2 %v720_v16  ;;  %1134 = vmatpush.msra.mxu3 %v752_v21  ;;  %v792_v14 = vld [vmem:[%s3106_s4 + $0x4a8] sm:$0xff]  ;;  %v862_v16 = vld [vmem:[%s3106_s4 + $0x6d8] sm:$0xff] }
 0x106   :  { %v547_v32 = vadd.f32 %v546_v28, %v2533_v7  ;;  %v567_v37 = vadd.f32 %v566_v29, %v2535_v8  ;;  %1078 = vmatpush.msra.mxu0 %v648_v22  ;;  %1098 = vmatpush.msra.mxu1 %v680_v23  ;;  %v676_v7 = vld [vmem:[%s3106_s4 + $0x108] sm:$0xff]  ;;  %v886_v29 = vld [vmem:[%s3106_s4 + $0x798] sm:$0xff] }
 0x107   :  { %1115 = vmatpush.msra.mxu2 %v718_v26  ;;  %1135 = vmatpush.msra.mxu3 %v750_v27  ;;  %v824_v15 = vld [vmem:[%s3106_s4 + $0x5a8] sm:$0xff]  ;;  %v786_v26 = vld [vmem:[%s3106_s4 + $0x478] sm:$0xff] }
 0x108   :  { %v2742_v8 = vadd.f32 %v615_v24, %v547_v32  ;;  %v2744_v41 = vadd.f32 %v616_v25, %v567_v37  ;;  %1079 = vmatpush.msra.mxu0 %v646_v30  ;;  %1099 = vmatpush.msra.mxu1 %v678_v31  ;;  %v892_v21 = vld [vmem:[%s3106_s4 + $0x7c8] sm:$0xff]  ;;  %v858_v24 = vld [vmem:[%s3106_s4 + $0x6b8] sm:$0xff] }
 0x109   :  { %1116 = vmatpush.msra.mxu2 %v716_v38  ;;  %1136 = vmatpush.msra.mxu3 %v748_v39  ;;  %v788_v22 = vld [vmem:[%s3106_s4 + $0x488] sm:$0xff]  ;;  %v890_v25 = vld [vmem:[%s3106_s4 + $0x7b8] sm:$0xff] }
 0x10a   :  { %v639_v44 = vmax.f32 %v2742_v8, 0.0  ;;  %v640_v45 = vmax.f32 %v2744_v41, 0.0  ;;  %1080 = vmatpush.msra.mxu0 %v644_v40  ;;  %1100 = vmatpush.msra.mxu1 %v676_v7  ;;  %v820_v23 = vld [vmem:[%s3106_s4 + $0x588] sm:$0xff]  ;;  %v818_v27 = vld [vmem:[%s3106_s4 + $0x578] sm:$0xff] }
 0x10b   :  { %1117 = vmatpush.msra.mxu2 %v714_v42  ;;  %1137 = vmatpush.msra.mxu3 %v746_v43  ;;  %v856_v28 = vld [vmem:[%s3106_s4 + $0x6a8] sm:$0xff]  ;;  %v782_v30 = vld [vmem:[%s3106_s4 + $0x458] sm:$0xff] }
 0x10c   :  { %v586_v52 = vpop.f32.mrf.mxu2  ;;  %v606_v53 = vpop.f32.mrf.mxu3  ;;  %1001 = vmatmul.f32.vlgmr.msrb.gmra.mxu0 %v639_v44  ;;  %1021 = vmatmul.f32.vlgmr.msrb.gmra.mxu1 %v640_v45  ;;  %v814_v31 = vld [vmem:[%s3106_s4 + $0x558] sm:$0xff]  ;;  %v852_v32 = vld [vmem:[%s3106_s4 + $0x688] sm:$0xff] }
 0x10d   :  { %v587_v55 = vadd.f32 %v586_v52, %v2542_v10  ;;  %v607_v56 = vadd.f32 %v606_v53, %v2544_v1  ;;  %1145 = vmatpush.msrb.mxu0 %v802_v46  ;;  %1165 = vmatpush.msrb.mxu1 %v834_v47  ;;  %v830_v10 = vld [vmem:[%s3106_s4 + $0x5d8] sm:$0xff]  ;;  %v884_v37 = vld [vmem:[%s3106_s4 + $0x788] sm:$0xff] }
 0x10e   :  { %1118 = vmatpush.msra.mxu2 %v712_v50  ;;  %1138 = vmatpush.msra.mxu3 %v744_v51  ;;  %v780_v38 = vld [vmem:[%s3106_s4 + $0x448] sm:$0xff]  ;;  %v850_v40 = vld [vmem:[%s3106_s4 + $0x678] sm:$0xff] }
 0x10f   :  { %v2792_v1 = vadd.f32 %v617_v48, %v587_v55  ;;  %v2794_v60 = vadd.f32 %v618_v49, %v607_v56  ;;  %1146 = vmatpush.msrb.mxu0 %v800_v9  ;;  %1166 = vmatpush.msrb.mxu1 %v832_v54  ;;  %v812_v39 = vld [vmem:[%s3106_s4 + $0x548] sm:$0xff]  ;;  %v882_v7 = vld [vmem:[%s3106_s4 + $0x778] sm:$0xff] }
 0x110   :  { %1119 = vmatpush.msra.mxu2 %v710_v57  ;;  %1139 = vmatpush.msra.mxu3 %v742_v58  ;;  %v778_v42 = vld [vmem:[%s3106_s4 + $0x438] sm:$0xff]  ;;  %v848_v46 = vld [vmem:[%s3106_s4 + $0x668] sm:$0xff] }
 0x111   :  { %v641_v63 = vmax.f32 %v2792_v1, 0.0  ;;  %v642_v0 = vmax.f32 %v2794_v60, 0.0  ;;  %1147 = vmatpush.msrb.mxu0 %v798_v59  ;;  %1167 = vmatpush.msrb.mxu1 %v830_v10  ;;  %v810_v43 = vld [vmem:[%s3106_s4 + $0x538] sm:$0xff]  ;;  %v880_v47 = vld [vmem:[%s3106_s4 + $0x768] sm:$0xff]  ;;  %v1239_v1 = vld [vmem:[%s3108_s6 + $0x60] sm:$0xff] }
 0x112   :  { %1120 = vmatpush.msra.mxu2 %v708_v61  ;;  %1140 = vmatpush.msra.mxu3 %v740_v62  ;;  %v776_v48 = vld [vmem:[%s3106_s4 + $0x428] sm:$0xff]  ;;  %v846_v50 = vld [vmem:[%s3106_s4 + $0x658] sm:$0xff] }
 0x113   :  { %1041 = vmatmul.f32.vlgmr.msrb.gmra.mxu2 %v641_v63  ;;  %1061 = vmatmul.f32.vlgmr.msrb.gmra.mxu3 %v642_v0  ;;  %v808_v49 = vld [vmem:[%s3106_s4 + $0x528] sm:$0xff]  ;;  %v878_v51 = vld [vmem:[%s3106_s4 + $0x758] sm:$0xff] }
 0x114   :  { %1148 = vmatpush.msrb.mxu0 %v796_v2  ;;  %1168 = vmatpush.msrb.mxu1 %v828_v3  ;;  %v774_v52 = vld [vmem:[%s3106_s4 + $0x418] sm:$0xff]  ;;  %v844_v9 = vld [vmem:[%s3106_s4 + $0x648] sm:$0xff]  ;;  %v1235_v3 = vld [vmem:[%s3108_s6 + $0x40] sm:$0xff] }
 0x115   :  { %1185 = vmatpush.msrb.mxu2 %v866_v4  ;;  %1205 = vmatpush.msrb.mxu3 %v898_v5  ;;  %v806_v53 = vld [vmem:[%s3106_s4 + $0x518] sm:$0xff]  ;;  %v876_v54 = vld [vmem:[%s3106_s4 + $0x748] sm:$0xff]  ;;  %v1233_v5 = vld [vmem:[%s3108_s6 + $0x30] sm:$0xff] }
 0x116   :  { %1081 = vmatmul.f32.vlgmr.msra.gmra.mxu0 %v635_v19  ;;  %1101 = vmatmul.f32.vlgmr.msra.gmra.mxu1 %v636_v20  ;;  %v822_v19 = vld [vmem:[%s3106_s4 + $0x598] sm:$0xff]  ;;  %v860_v20 = vld [vmem:[%s3106_s4 + $0x6c8] sm:$0xff] }
 0x117   :  { %1149 = vmatpush.msrb.mxu0 %v794_v6  ;;  %1169 = vmatpush.msrb.mxu1 %v826_v11  ;;  %v772_v55 = vld [vmem:[%s3106_s4 + $0x408] sm:$0xff]  ;;  %v842_v57 = vld [vmem:[%s3106_s4 + $0x638] sm:$0xff]  ;;  %v1231_v11 = vld [vmem:[%s3108_s6 + $0x20] sm:$0xff] }
 0x118   :  { %1186 = vmatpush.msrb.mxu2 %v864_v12  ;;  %1206 = vmatpush.msrb.mxu3 %v896_v13  ;;  %v804_v56 = vld [vmem:[%s3106_s4 + $0x508] sm:$0xff]  ;;  %v874_v58 = vld [vmem:[%s3106_s4 + $0x738] sm:$0xff]  ;;  %v1229_v13 = vld [vmem:[%s3108_s6 + $0x10] sm:$0xff] }
 0x119   :  { %1150 = vmatpush.msrb.mxu0 %v792_v14  ;;  %1170 = vmatpush.msrb.mxu1 %v824_v15  ;;  %v840_v59 = vld [vmem:[%s3106_s4 + $0x628] sm:$0xff]  ;;  %v838_v61 = vld [vmem:[%s3106_s4 + $0x618] sm:$0xff]  ;;  %v1227_v15 = vld [vmem:[%s3108_s6] sm:$0xff] }
 0x11a   :  { %1187 = vmatpush.msrb.mxu2 %v862_v16  ;;  %1207 = vmatpush.msrb.mxu3 %v894_v17  ;;  %v872_v10 = vld [vmem:[%s3106_s4 + $0x728] sm:$0xff]  ;;  %v870_v62 = vld [vmem:[%s3106_s4 + $0x718] sm:$0xff]  ;;  %v899_v17 = vld [vmem:[%s3109_s5] sm:$0x3] }
 0x11b   :  { %1151 = vmatpush.msrb.mxu0 %v790_v18  ;;  %1171 = vmatpush.msrb.mxu1 %v822_v19  ;;  %v836_v2 = vld [vmem:[%s3106_s4 + $0x608] sm:$0xff]  ;;  %v1242_v41 = vld [vmem:[%s3108_s6 + $0x78] sm:$0xff]  ;;  %v901_v18 = vperm.slane %v899_v17, 0 }
 0x11c   :  { %1188 = vmatpush.msrb.mxu2 %v860_v20  ;;  %1208 = vmatpush.msrb.mxu3 %v892_v21  ;;  %v868_v8 = vld [vmem:[%s3106_s4 + $0x708] sm:$0xff]  ;;  %v1238_v60 = vld [vmem:[%s3108_s6 + $0x58] sm:$0xff]  ;;  %v1257_v20 = vld [vmem:[%s3108_s6 + $0xf0] sm:$0xff] }
 0x11d   :  { %1121 = vmatmul.f32.vlgmr.msra.gmra.mxu2 %v637_v35  ;;  %1141 = vmatmul.f32.vlgmr.msra.gmra.mxu3 %v638_v36  ;;  %v816_v35 = vld [vmem:[%s3106_s4 + $0x568] sm:$0xff]  ;;  %v854_v36 = vld [vmem:[%s3106_s4 + $0x698] sm:$0xff] }
 0x11e   :  { %1152 = vmatpush.msrb.mxu0 %v788_v22  ;;  %1172 = vmatpush.msrb.mxu1 %v820_v23  ;;  %v1234_v4 = vld [vmem:[%s3108_s6 + $0x38] sm:$0xff]  ;;  %v1232_v6 = vld [vmem:[%s3108_s6 + $0x28] sm:$0xff]  ;;  %v1255_v22 = vld [vmem:[%s3108_s6 + $0xe0] sm:$0xff] }
 0x11f   :  { %1189 = vmatpush.msrb.mxu2 %v858_v24  ;;  %1209 = vmatpush.msrb.mxu3 %v890_v25  ;;  %v1230_v12 = vld [vmem:[%s3108_s6 + $0x18] sm:$0xff]  ;;  %v1228_v14 = vld [vmem:[%s3108_s6 + $0x8] sm:$0xff] }
 0x120   :  { %1153 = vmatpush.msrb.mxu0 %v786_v26  ;;  %1173 = vmatpush.msrb.mxu1 %v818_v27  ;;  %v1258_v16 = vld [vmem:[%s3108_s6 + $0xf8] sm:$0xff]  ;;  %v1256_v21 = vld [vmem:[%s3108_s6 + $0xe8] sm:$0xff]  ;;  %v1253_v27 = vld [vmem:[%s3108_s6 + $0xd0] sm:$0xff] }
 0x121   :  { %1190 = vmatpush.msrb.mxu2 %v856_v28  ;;  %1210 = vmatpush.msrb.mxu3 %v888_v33  ;;  %v1254_v24 = vld [vmem:[%s3108_s6 + $0xd8] sm:$0xff] }
 0x122   :  { %1154 = vmatpush.msrb.mxu0 %v784_v34  ;;  %1174 = vmatpush.msrb.mxu1 %v816_v35  ;;  %v1252_v34 = vld [vmem:[%s3108_s6 + $0xc8] sm:$0xff] }
 0x123   :  { %1191 = vmatpush.msrb.mxu2 %v854_v36  ;;  %1211 = vmatpush.msrb.mxu3 %v886_v29  ;;  %v1251_v29 = vld [vmem:[%s3108_s6 + $0xc0] sm:$0xff] }
 0x124   :  { %1155 = vmatpush.msrb.mxu0 %v782_v30  ;;  %1175 = vmatpush.msrb.mxu1 %v814_v31  ;;  %v1250_v31 = vld [vmem:[%s3108_s6 + $0xb8] sm:$0xff] }
 0x125   :  { %1192 = vmatpush.msrb.mxu2 %v852_v32  ;;  %1212 = vmatpush.msrb.mxu3 %v884_v37  ;;  %v1249_v32 = vld [vmem:[%s3108_s6 + $0xb0] sm:$0xff] }
 0x126   :  { %1156 = vmatpush.msrb.mxu0 %v780_v38  ;;  %1176 = vmatpush.msrb.mxu1 %v812_v39  ;;  %v1248_v38 = vld [vmem:[%s3108_s6 + $0xa8] sm:$0xff] }
 0x127   :  { %1193 = vmatpush.msrb.mxu2 %v850_v40  ;;  %1213 = vmatpush.msrb.mxu3 %v882_v7  ;;  %v1247_v40 = vld [vmem:[%s3108_s6 + $0xa0] sm:$0xff] }
 0x128   :  { %1157 = vmatpush.msrb.mxu0 %v778_v42  ;;  %1177 = vmatpush.msrb.mxu1 %v810_v43 }
 0x129   :  { %1194 = vmatpush.msrb.mxu2 %v848_v46  ;;  %1214 = vmatpush.msrb.mxu3 %v880_v47  ;;  %v1246_v47 = vld [vmem:[%s3108_s6 + $0x98] sm:$0xff] }
 0x12a   :  { %1158 = vmatpush.msrb.mxu0 %v776_v48  ;;  %1178 = vmatpush.msrb.mxu1 %v808_v49  ;;  %v1245_v49 = vld [vmem:[%s3108_s6 + $0x90] sm:$0xff] }
 0x12b   :  { %1195 = vmatpush.msrb.mxu2 %v846_v50  ;;  %1215 = vmatpush.msrb.mxu3 %v878_v51  ;;  %v1244_v51 = vld [vmem:[%s3108_s6 + $0x88] sm:$0xff] }
 0x12c   :  { %1159 = vmatpush.msrb.mxu0 %v774_v52  ;;  %1179 = vmatpush.msrb.mxu1 %v806_v53  ;;  %v1243_v52 = vld [vmem:[%s3108_s6 + $0x80] sm:$0xff]  ;;  %v13_v53 = vstv %s3110_s7 }
 0x12d   :  { %1196 = vmatpush.msrb.mxu2 %v844_v9  ;;  %1216 = vmatpush.msrb.mxu3 %v876_v54  ;;  %14 = vst [vmem:[#allocation2] sm:$0x1] %v13_v53  ;;  %v902_v9 = vperm.slane %v899_v17, 1 }
 0x12e   :  { %1160 = vmatpush.msrb.mxu0 %v772_v55  ;;  %1180 = vmatpush.msrb.mxu1 %v804_v56 }
 0x12f   :  { %1197 = vmatpush.msrb.mxu2 %v842_v57  ;;  %1217 = vmatpush.msrb.mxu3 %v874_v58 }
 0x130   :  { %1161 = vmatmul.f32.vlgmr.msrb.gmra.mxu0 %v639_v44  ;;  %1181 = vmatmul.f32.vlgmr.msrb.gmra.mxu1 %v640_v45  ;;  %v1241_v44 = vld [vmem:[%s3108_s6 + $0x70] sm:$0xff]  ;;  %v1240_v45 = vld [vmem:[%s3108_s6 + $0x68] sm:$0xff] }
 0x131   :  { %1198 = vmatpush.msrb.mxu2 %v840_v59  ;;  %1218 = vmatpush.msrb.mxu3 %v872_v10 }
 0x132   :  { %1263 = vmatpush.msra.mxu0 %v1242_v41  ;;  %1283 = vmatpush.msra.mxu1 %v1258_v16 }
 0x133   :  { %1199 = vmatpush.msrb.mxu2 %v838_v61  ;;  %1219 = vmatpush.msrb.mxu3 %v870_v62 }
 0x134   :  { %1264 = vmatpush.msra.mxu0 %v1241_v44  ;;  %1284 = vmatpush.msra.mxu1 %v1257_v20 }
 0x135   :  { %1200 = vmatpush.msrb.mxu2 %v836_v2  ;;  %1220 = vmatpush.msrb.mxu3 %v868_v8 }
 0x136   :  { %1201 = vmatmul.f32.vlgmr.msrb.gmra.mxu2 %v641_v63  ;;  %1221 = vmatmul.f32.vlgmr.msrb.gmra.mxu3 %v642_v0  ;;  %v1237_v63 = vld [vmem:[%s3108_s6 + $0x50] sm:$0xff]  ;;  %v1236_v0 = vld [vmem:[%s3108_s6 + $0x48] sm:$0xff] }
 0x137   :  { %1265 = vmatpush.msra.mxu0 %v1240_v45  ;;  %1285 = vmatpush.msra.mxu1 %v1256_v21 }
 0x139   :  { %1266 = vmatpush.msra.mxu0 %v1239_v1  ;;  %1286 = vmatpush.msra.mxu1 %v1255_v22 }
 0x13b   :  { %1267 = vmatpush.msra.mxu0 %v1238_v60  ;;  %1287 = vmatpush.msra.mxu1 %v1254_v24 }
 0x13d   :  { %1268 = vmatpush.msra.mxu0 %v1237_v63  ;;  %1288 = vmatpush.msra.mxu1 %v1253_v27 }
 0x13f   :  { %1269 = vmatpush.msra.mxu0 %v1236_v0  ;;  %1289 = vmatpush.msra.mxu1 %v1252_v34  ;;  %v1309_v0 = vld [vmem:[#allocation2] ss:$0 sm:$0xff] }
 0x141   :  { %1270 = vmatpush.msra.mxu0 %v1235_v3  ;;  %1290 = vmatpush.msra.mxu1 %v1251_v29 }
 0x143   :  { %1271 = vmatpush.msra.mxu0 %v1234_v4  ;;  %1291 = vmatpush.msra.mxu1 %v1250_v31 }
 0x145   :  { %1272 = vmatpush.msra.mxu0 %v1233_v5  ;;  %1292 = vmatpush.msra.mxu1 %v1249_v32 }
 0x147   :  { %1273 = vmatpush.msra.mxu0 %v1232_v6  ;;  %1293 = vmatpush.msra.mxu1 %v1248_v38 }
 0x149   :  { %1274 = vmatpush.msra.mxu0 %v1231_v11  ;;  %1294 = vmatpush.msra.mxu1 %v1247_v40 }
 0x14b   :  { %1275 = vmatpush.msra.mxu0 %v1230_v12  ;;  %1295 = vmatpush.msra.mxu1 %v1246_v47 }
 0x14d   :  { %1276 = vmatpush.msra.mxu0 %v1229_v13  ;;  %1296 = vmatpush.msra.mxu1 %v1245_v49 }
 0x14f   :  { %1277 = vmatpush.msra.mxu0 %v1228_v14  ;;  %1297 = vmatpush.msra.mxu1 %v1244_v51 }
 0x151   :  { %1278 = vmatpush.msra.mxu0 %v1227_v15  ;;  %1298 = vmatpush.msra.mxu1 %v1243_v52 }
 0x167   :  { %v922_v19 = vpop.f32.mrf.mxu0  ;;  %v942_v25 = vpop.f32.mrf.mxu1 }
 0x168   :  { %v923_v23 = vadd.f32 %v922_v19, %v901_v18 }
 0x16a   :  { %v943_v28 = vadd.f32 %v942_v25, %v923_v23 }
 0x174   :  { %v962_v26 = vpop.f32.mrf.mxu2  ;;  %v982_v35 = vpop.f32.mrf.mxu3 }
 0x175   :  { %v963_v33 = vadd.f32 %v962_v26, %v943_v28 }
 0x177   :  { %v983_v30 = vadd.f32 %v982_v35, %v963_v33 }
 0x189   :  { %v1002_v36 = vpop.f32.mrf.mxu0  ;;  %v1022_v39 = vpop.f32.mrf.mxu1 }
 0x18a   :  { %v1003_v37 = vadd.f32 %v1002_v36, %v983_v30 }
 0x18c   :  { %v1023_v7 = vadd.f32 %v1022_v39, %v1003_v37 }
 0x193   :  { %v1082_v54 = vpop.f32.mrf.mxu0  ;;  %v1102_v56 = vpop.f32.mrf.mxu1 }
 0x194   :  { %v1083_v55 = vadd.f32 %v1082_v54, %v902_v9 }
 0x196   :  { %v1042_v42 = vpop.f32.mrf.mxu2  ;;  %v1062_v46 = vpop.f32.mrf.mxu3  ;;  %v1103_v58 = vadd.f32 %v1102_v56, %v1083_v55 }
 0x197   :  { %v1043_v43 = vadd.f32 %v1042_v42, %v1023_v7 }
 0x199   :  { %v1063_v48 = vadd.f32 %v1062_v46, %v1043_v43 }
 0x19b   :  { %v1225_v50 = vmax.f32 %v1063_v48, 0.0 }
 0x19d   :  { %1279 = vmatmul.f32.vlgmr.msra.gmra.mxu0 %v1225_v50 }
 0x1a0   :  { %v1122_v57 = vpop.f32.mrf.mxu2  ;;  %v1142_v10 = vpop.f32.mrf.mxu3 }
 0x1a1   :  { %v1123_v59 = vadd.f32 %v1122_v57, %v1103_v58 }
 0x1a3   :  { %v1143_v62 = vadd.f32 %v1142_v10, %v1123_v59 }
 0x1ad   :  { %v1162_v61 = vpop.f32.mrf.mxu0  ;;  %v1182_v8 = vpop.f32.mrf.mxu1 }
 0x1ae   :  { %v1163_v2 = vadd.f32 %v1162_v61, %v1143_v62 }
 0x1b0   :  { %v1183_v41 = vadd.f32 %v1182_v8, %v1163_v2 }
 0x1b9   :  { %v1202_v44 = vpop.f32.mrf.mxu2  ;;  %v1222_v1 = vpop.f32.mrf.mxu3 }
 0x1ba   :  { %v1203_v45 = vadd.f32 %v1202_v44, %v1183_v41 }
 0x1bc   :  { %v1223_v60 = vadd.f32 %v1222_v1, %v1203_v45 }
 0x1be   :  { %v1226_v63 = vmax.f32 %v1223_v60, 0.0 }
 0x1c0   :  { %1299 = vmatmul.f32.vlgmr.msra.gmra.mxu1 %v1226_v63 }
 0x21a   :  { %v1280_v3 = vpop.f32.mrf.mxu0 }
 0x21b   :  { %v1281_v4 = vadd.f32 %v1309_v0, %v1280_v3 }
 0x23d   :  { %v1300_v5 = vpop.f32.mrf.mxu1 }
 0x23e   :  { %v1301_v6 = vadd.f32 %v1300_v5, %v1281_v4 }
 0x240   :  { %1304 = vst.msk [vmem:[%s3111_s8] sm:$0x3] %vm1303_vm0, %v1301_v6 }

// kernel: gin_forward.4
= control target key start
LH: loop header
LB: loop body
LE: loop exit
PB: predicated region body
PF: predicated region fallthrough
CT: control target
= control target key end

     0   :  { %s6151_s15 = smov 0   ;;  %s9747_s0 = inlined_call_operand.vmem [shape: bf16[2,1000,128], index: 0, kind: input, shape index: {}]   ;;  %s9748_s1 = inlined_call_operand.vmem [shape: bf16[8,32,1000], index: 1, kind: input, shape index: {}]   ;;  %s9749_s2 = inlined_call_operand.vmem [shape: f32[32,121,128], index: 2, kind: input, shape index: {}]   ;;  %s9750_s3 = inlined_call_operand.vmem [shape: f32[1,128], index: 3, kind: input, shape index: {}]   ;;  %s9751_s4 = inlined_call_operand.vmem [shape: f32[2,1,128], index: 4, kind: output, shape index: {}]  }
   0x1 LB: > { %s4325_s16 = sadd.s32 4294967295, %s6117_s15   ;;  %p4329_p0 = scmp.ge.s32.totalorder %s6117_s15, 1  ;;  %s6117_s15 = sphi %s6151_s15, %s14_s15  }
   0x2   : > { %p162_p1 = scmp.lt.s32.totalorder %s6117_s15, 3 }
   0x4   : > { %p163_p2 = pnand %p4329_p0, %p162_p1 }
   0x6   : > { %166 = sbr.rel (%p163_p2) target bundleno = 1136 (0x470), region = 36 }
   0xb   : > { %p186_p3 = scmp.lt.s32.totalorder %s4325_s16, 1  ;;  %v4333_v29 = vld [vmem:[%s9748_s1] sm:$0xf]  ;;  %v5843_v31 = vld [vmem:[%s9748_s1 + $0x4] sm:$0xf]  ;;  %vm796_vm0 = vcmask 1043456  }
   0xc   : > { %v5847_v30 = vld [vmem:[%s9748_s1 + $0x1c] sm:$0xf0]  ;;  %v4335_v37 = vld [vmem:[%s9748_s1 + $0x20] sm:$0xf0]  ;;  %v4341_v38 = vld [vmem:[%s9748_s1 + $0x8] sm:$0xf] }
   0xd   : > { %s9998_s16 = smov (!%p186_p3, %s4325_s16), 1  ;;  %v5848_v39 = vld [vmem:[%s9748_s1 + $0x24] sm:$0xf0]  ;;  %v5844_v40 = vld [vmem:[%s9748_s1 + $0xc] sm:$0xf]  ;;  %v4334_v45 = vor.u32 %v5847_v30, %v4333_v29  ;;  %v4338_v46 = vor.u32 %v5843_v31, %v4335_v37  ;;  %vm789_vm1 = vcmask 850944  }
   0xe   : > { %s5971_s17 = smul.u32 500, %s9998_s16  ;;  %v4343_v41 = vld [vmem:[%s9748_s1 + $0x28] sm:$0xf0]  ;;  %v4342_v47 = vor.u32 %v5848_v39, %v4341_v38  ;;  %v4365_v62 = vld [vmem:[%s9748_s1 + $0x40] sm:$0xf]  ;;  %s6119_s9 = smov 127  }
   0xf   : > { %v4346_v48 = vor.u32 %v5844_v40, %v4343_v41  ;;  %v5855_v63 = vld [vmem:[%s9748_s1 + $0x5c] sm:$0xf0]  ;;  %v4367_v29 = vld [vmem:[%s9748_s1 + $0x60] sm:$0xf0]  ;;  %v4373_v30 = vld [vmem:[%s9748_s1 + $0x48] sm:$0xf]  ;;  %s193_s5 = scalar_lea.vmem %s9751_s4, %s9998_s16 }
  0x10   : > { %s6165_s20 = scalar_lea.vmem %s9747_s0, %s5971_s17  ;;  %v5856_v31 = vld [vmem:[%s9748_s1 + $0x64] sm:$0xf0]  ;;  %v4375_v37 = vld [vmem:[%s9748_s1 + $0x68] sm:$0xf0]  ;;  %v4366_v41 = vor.u32 %v5855_v63, %v4365_v62  ;;  %s6120_s7 = smov 126   ;;  %vm2888_vm2 = vcmask 1040384  }
  0x11   : > { %v6168_v0 = vld [vmem:[%s6165_s20 + $0x38] sm:$0xff]  ;;  %v6182_v4 = vld [vmem:[%s6165_s20 + $0x30] sm:$0xff]  ;;  %v6198_v8 = vld [vmem:[%s6165_s20 + $0x28] sm:$0xff]  ;;  %s6121_s10 = smov 125   ;;  %s6122_s17 = smov 124   ;;  %vm2884_vm3 = vcmask 990208  }
  0x12   : > { %v6171_v1 = vld [vmem:[%s6165_s20 + $0x78] sm:$0xff]  ;;  %800 = vmatpush.bf16.msra.mxu0 %v6168_v0  ;;  %v6185_v5 = vld [vmem:[%s6165_s20 + $0x70] sm:$0xff]  ;;  %v6201_v9 = vld [vmem:[%s6165_s20 + $0x68] sm:$0xff]  ;;  %s6123_s25 = smov 123   ;;  %s6124_s14 = smov 122  }
  0x13   : > { %v6174_v2 = vld [vmem:[%s6165_s20 + $0xb8] sm:$0xff]  ;;  %819 = vmatpush.bf16.msra.mxu1 %v6171_v1  ;;  %v6190_v6 = vld [vmem:[%s6165_s20 + $0xb0] sm:$0xff]  ;;  %v6206_v10 = vld [vmem:[%s6165_s20 + $0xa8] sm:$0xff]  ;;  %s6125_s18 = smov 121  }
  0x14   : > { %v6177_v3 = vld [vmem:[%s6165_s20 + $0xf8] sm:$0xff]  ;;  %838 = vmatpush.bf16.msra.mxu2 %v6174_v2  ;;  %v6193_v7 = vld [vmem:[%s6165_s20 + $0xf0] sm:$0xff]  ;;  %v6209_v11 = vld [vmem:[%s6165_s20 + $0xe8] sm:$0xff] }
  0x15   : > { %9842 = vst [vmem:[#allocation2_spill] sm:$0xff] %v6177_v3  ;;  %857 = vmatpush.bf16.msra.mxu3 %v6177_v3  ;;  %v6214_v12 = vld [vmem:[%s6165_s20 + $0x20] sm:$0xff]  ;;  %v6230_v16 = vld [vmem:[%s6165_s20 + $0x18] sm:$0xff]  ;;  %v6246_v20 = vld [vmem:[%s6165_s20 + $0x10] sm:$0xff] }
  0x16   : > { %801 = vmatpush.bf16.msra.mxu0 %v6182_v4  ;;  %v6217_v13 = vld [vmem:[%s6165_s20 + $0x60] sm:$0xff]  ;;  %v6233_v17 = vld [vmem:[%s6165_s20 + $0x58] sm:$0xff]  ;;  %v6249_v21 = vld [vmem:[%s6165_s20 + $0x50] sm:$0xff] }
  0x17   : > { %820 = vmatpush.bf16.msra.mxu1 %v6185_v5  ;;  %v6222_v14 = vld [vmem:[%s6165_s20 + $0xa0] sm:$0xff]  ;;  %v6238_v18 = vld [vmem:[%s6165_s20 + $0x98] sm:$0xff]  ;;  %v6254_v22 = vld [vmem:[%s6165_s20 + $0x90] sm:$0xff] }
  0x18   : > { %839 = vmatpush.bf16.msra.mxu2 %v6190_v6  ;;  %v6225_v15 = vld [vmem:[%s6165_s20 + $0xe0] sm:$0xff]  ;;  %v6241_v19 = vld [vmem:[%s6165_s20 + $0xd8] sm:$0xff]  ;;  %v6257_v23 = vld [vmem:[%s6165_s20 + $0xd0] sm:$0xff] }
  0x19   : > { %858 = vmatpush.bf16.msra.mxu3 %v6193_v7  ;;  %v319_v24 = vld [vmem:[%s6165_s20 + $0x1f0] sm:$0xf]  ;;  %v6263_v25 = vld [vmem:[%s6165_s20 + $0x8] sm:$0xff]  ;;  %v6286_v33 = vld [vmem:[%s6165_s20] sm:$0xff] }
  0x1a   : > { %802 = vmatpush.bf16.msra.mxu0 %v6198_v8  ;;  %v6266_v26 = vld [vmem:[%s6165_s20 + $0x48] sm:$0xff]  ;;  %v663_v32 = vunpack.c.l.b16 %v319_v24  ;;  %v6289_v34 = vld [vmem:[%s6165_s20 + $0x40] sm:$0xff]  ;;  %v6317_v42 = vld [vmem:[%s6165_s20 + $0x138] sm:$0xff] }
  0x1b   : > { %821 = vmatpush.bf16.msra.mxu1 %v6201_v9  ;;  %v6271_v27 = vld [vmem:[%s6165_s20 + $0x88] sm:$0xff]  ;;  %9843 = vst [vmem:[#allocation3_spill] sm:$0xff] %v6289_v34  ;;  %v6292_v35 = vld [vmem:[%s6165_s20 + $0x80] sm:$0xff]  ;;  %v6320_v43 = vld [vmem:[%s6165_s20 + $0x178] sm:$0xff] }
  0x1c   : > { %840 = vmatpush.bf16.msra.mxu2 %v6206_v10  ;;  %v6274_v28 = vld [vmem:[%s6165_s20 + $0xc8] sm:$0xff]  ;;  %9844 = vst [vmem:[#allocation4_spill] sm:$0xff] %v6292_v35  ;;  %v6297_v36 = vld [vmem:[%s6165_s20 + $0xc0] sm:$0xff]  ;;  %v726_v44 = vpack.c.b16 %v663_v32, %v663_v32  ;;  %v6327_v49 = vld [vmem:[%s6165_s20 + $0x1b8] sm:$0xff] }
  0x1d   : > { %859 = vmatpush.bf16.msra.mxu3 %v6209_v11  ;;  %9845 = vst [vmem:[#allocation5_spill] sm:$0xff] %v6317_v42  ;;  %v6332_v50 = vld [vmem:[%s6165_s20 + $0x130] sm:$0xff]  ;;  %v6345_v54 = vld [vmem:[%s6165_s20 + $0x1e8] sm:$0xff]  ;;  %v6361_v58 = vld [vmem:[%s6165_s20 + $0x1e0] sm:$0xff] }
  0x1e   : > { %803 = vmatpush.bf16.msra.mxu0 %v6214_v12  ;;  %v6335_v51 = vld [vmem:[%s6165_s20 + $0x170] sm:$0xff]  ;;  %v6337_v52 = vsel %vm796_vm0, %v726_v44, 0  ;;  %v6350_v55 = vld [vmem:[%s6165_s20 + $0x128] sm:$0xff]  ;;  %9851 = vst [vmem:[#allocation11_spill] sm:$0xff] %v6361_v58  ;;  %v6366_v59 = vld [vmem:[%s6165_s20 + $0x120] sm:$0xff] }
  0x1f   : > { %822 = vmatpush.bf16.msra.mxu1 %v6217_v13  ;;  %9846 = vst [vmem:[#allocation6_spill] sm:$0xff] %v6335_v51  ;;  %v6341_v53 = vld [vmem:[%s6165_s20 + $0x1b0] sm:$0xff]  ;;  %v6353_v56 = vld [vmem:[%s6165_s20 + $0x168] sm:$0xff]  ;;  %v6369_v60 = vld [vmem:[%s6165_s20 + $0x160] sm:$0xff] }
  0x20   : > { %841 = vmatpush.bf16.msra.mxu2 %v6222_v14  ;;  %9847 = vst [vmem:[#allocation7_spill] sm:$0xff] %v6341_v53  ;;  %v6357_v57 = vld [vmem:[%s6165_s20 + $0x1a8] sm:$0xff]  ;;  %v6372_v61 = vld [vmem:[%s6165_s20 + $0x1a0] sm:$0xff]  ;;  %v6401_v38 = vld [vmem:[%s6165_s20 + $0x1d8] sm:$0xff] }
  0x21   : > { %860 = vmatpush.bf16.msra.mxu3 %v6225_v15  ;;  %9848 = vst [vmem:[#allocation8_spill] sm:$0xff] %v6350_v55  ;;  %v5851_v24 = vld [vmem:[%s9748_s1 + $0x44] sm:$0xf]  ;;  %v5852_v32 = vld [vmem:[%s9748_s1 + $0x4c] sm:$0xf]  ;;  %v6406_v39 = vld [vmem:[%s6165_s20 + $0x118] sm:$0xff] }
  0x22   : > { %804 = vmatpush.bf16.msra.mxu0 %v6230_v16  ;;  %9849 = vst [vmem:[#allocation9_spill] sm:$0xff] %v6353_v56  ;;  %v6409_v40 = vld [vmem:[%s6165_s20 + $0x158] sm:$0xff]  ;;  %v4370_v44 = vor.u32 %v5851_v24, %v4367_v29  ;;  %v6422_v62 = vld [vmem:[%s6165_s20 + $0x110] sm:$0xff]  ;;  %v6433_v29 = vld [vmem:[%s6165_s20 + $0x1c8] sm:$0xff] }
  0x23   : > { %823 = vmatpush.bf16.msra.mxu1 %v6233_v17  ;;  %9850 = vst [vmem:[#allocation10_spill] sm:$0xff] %v6357_v57  ;;  %v6425_v63 = vld [vmem:[%s6165_s20 + $0x150] sm:$0xff] }
  0x24   : > { %842 = vmatpush.bf16.msra.mxu2 %v6238_v18  ;;  %9852 = vst [vmem:[#allocation12_spill] sm:$0xff] %v6366_v59  ;;  %v6429_v24 = vld [vmem:[%s6165_s20 + $0x190] sm:$0xff] }
  0x25   : > { %861 = vmatpush.bf16.msra.mxu3 %v6241_v19  ;;  %9853 = vst [vmem:[#allocation13_spill] sm:$0xff] %v6369_v60 }
  0x26   : > { %805 = vmatpush.bf16.msra.mxu0 %v6246_v20  ;;  %9854 = vst [vmem:[#allocation14_spill] sm:$0xff] %v6372_v61 }
  0x27   : > { %824 = vmatpush.bf16.msra.mxu1 %v6249_v21  ;;  %9855 = vst [vmem:[#allocation15_spill] sm:$0xff] %v6401_v38 }
  0x28   : > { %843 = vmatpush.bf16.msra.mxu2 %v6254_v22  ;;  %9856 = vst [vmem:[#allocation16_spill] sm:$0xff] %v6406_v39 }
  0x29   : > { %862 = vmatpush.bf16.msra.mxu3 %v6257_v23  ;;  %9857 = vst [vmem:[#allocation17_spill] sm:$0xff] %v6409_v40 }
  0x2a   : > { %806 = vmatpush.bf16.msra.mxu0 %v6263_v25  ;;  %9860 = vst [vmem:[#allocation20_spill] sm:$0xff] %v6422_v62 }
  0x2b   : > { %825 = vmatpush.bf16.msra.mxu1 %v6266_v26  ;;  %9861 = vst [vmem:[#allocation21_spill] sm:$0xff] %v6425_v63 }
  0x2c   : > { %844 = vmatpush.bf16.msra.mxu2 %v6271_v27  ;;  %9862 = vst [vmem:[#allocation22_spill] sm:$0xff] %v6429_v24 }
  0x2d   : > { %863 = vmatpush.bf16.msra.mxu3 %v6274_v28  ;;  %9863 = vst [vmem:[#allocation23_spill] sm:$0xff] %v6433_v29 }
  0x2e   : > { %807 = vmatpush.bf16.msra.mxu0 %v6286_v33 }
  0x2f   : > { %826 = vmatpush.bf16.msra.mxu1 %v6289_v34 }
  0x30   : > { %845 = vmatpush.bf16.msra.mxu2 %v6292_v35 }
  0x31   : > { %864 = vmatpush.bf16.msra.mxu3 %v6297_v36  ;;  %808 = vmatmul.bf16.vlgmr.msra.gmra.mxu0 %v4334_v45  ;;  %v4374_v45 = vor.u32 %v5856_v31, %v4373_v30  ;;  %v6438_v30 = vld [vmem:[%s6165_s20 + $0x108] sm:$0xff] }
  0x32   : > { %876 = vmatpush.bf16.msrb.mxu0 %v6317_v42  ;;  %827 = vmatmul.bf16.vlgmr.msra.gmra.mxu1 %v4338_v46  ;;  %v4378_v46 = vor.u32 %v5852_v32, %v4375_v37  ;;  %9864 = vst [vmem:[#allocation24_spill] sm:$0xff] %v6438_v30  ;;  %v6441_v31 = vld [vmem:[%s6165_s20 + $0x148] sm:$0xff]  ;;  %v6449_v37 = vld [vmem:[%s6165_s20 + $0x1c0] sm:$0xff] }
  0x33   : > { %895 = vmatpush.bf16.msrb.mxu1 %v6320_v43  ;;  %846 = vmatmul.bf16.vlgmr.msra.gmra.mxu2 %v4342_v47  ;;  %v6413_v47 = vld [vmem:[%s6165_s20 + $0x198] sm:$0xff]  ;;  %9865 = vst [vmem:[#allocation25_spill] sm:$0xff] %v6441_v31  ;;  %v6445_v32 = vld [vmem:[%s6165_s20 + $0x188] sm:$0xff] }
  0x34   : > { %865 = vmatmul.bf16.vlgmr.msra.gmra.mxu3 %v4346_v48  ;;  %914 = vmatpush.bf16.msrb.mxu2 %v6327_v49  ;;  %9858 = vst [vmem:[#allocation18_spill] sm:$0xff] %v6413_v47  ;;  %v6417_v48 = vld [vmem:[%s6165_s20 + $0x1d0] sm:$0xff] }
  0x35   : > { %934 = vmatpush.bf16.msrb.mxu3 %v6337_v52  ;;  %9859 = vst [vmem:[#allocation19_spill] sm:$0xff] %v6417_v48 }
  0x36   : > { %877 = vmatpush.bf16.msrb.mxu0 %v6332_v50  ;;  %9866 = vst [vmem:[#allocation26_spill] sm:$0xff] %v6445_v32 }
  0x37   : > { %896 = vmatpush.bf16.msrb.mxu1 %v6335_v51  ;;  %9867 = vst [vmem:[#allocation27_spill] sm:$0xff] %v6449_v37 }
  0x38   : > { %915 = vmatpush.bf16.msrb.mxu2 %v6341_v53 }
  0x39   : > { %935 = vmatpush.bf16.msrb.mxu3 %v6345_v54 }
  0x3a   : > { %878 = vmatpush.bf16.msrb.mxu0 %v6350_v55 }
  0x3b   : > { %897 = vmatpush.bf16.msrb.mxu1 %v6353_v56 }
  0x3c   : > { %916 = vmatpush.bf16.msrb.mxu2 %v6357_v57 }
  0x3d   : > { %936 = vmatpush.bf16.msrb.mxu3 %v6361_v58 }
  0x3e   : > { %879 = vmatpush.bf16.msrb.mxu0 %v6366_v59 }
  0x3f   : > { %898 = vmatpush.bf16.msrb.mxu1 %v6369_v60 }
  0x40   : > { %917 = vmatpush.bf16.msrb.mxu2 %v6372_v61 }
  0x41   : > { %937 = vmatpush.bf16.msrb.mxu3 %v6401_v38  ;;  %813 = vmatmul.bf16.gmra.mxu0 %v4366_v41  ;;  %v6454_v41 = vld [vmem:[%s6165_s20 + $0x100] sm:$0xff] }
  0x42   : > { %880 = vmatpush.bf16.msrb.mxu0 %v6406_v39  ;;  %832 = vmatmul.bf16.gmra.mxu1 %v4370_v44  ;;  %9868 = vst [vmem:[#allocation28_spill] sm:$0xff] %v6454_v41  ;;  %v6457_v44 = vld [vmem:[%s6165_s20 + $0x140] sm:$0xff] }
  0x43   : > { %899 = vmatpush.bf16.msrb.mxu1 %v6409_v40  ;;  %851 = vmatmul.bf16.gmra.mxu2 %v4374_v45  ;;  %9869 = vst [vmem:[#allocation29_spill] sm:$0xff] %v6457_v44  ;;  %v6460_v45 = vld [vmem:[%s6165_s20 + $0x180] sm:$0xff] }
  0x44   : > { %870 = vmatmul.bf16.gmra.mxu3 %v4378_v46  ;;  %918 = vmatpush.bf16.msrb.mxu2 %v6413_v47  ;;  %9870 = vst [vmem:[#allocation30_spill] sm:$0xff] %v6460_v45  ;;  %v4349_v46 = vld [vmem:[%s9748_s1 + $0x10] sm:$0xf] }
  0x45   : > { %938 = vmatpush.bf16.msrb.mxu3 %v6417_v48  ;;  %v4359_v48 = vld [vmem:[%s9748_s1 + $0x38] sm:$0xf0] }
  0x46   : > { %881 = vmatpush.bf16.msrb.mxu0 %v6422_v62  ;;  %v5846_v62 = vld [vmem:[%s9748_s1 + $0x1c] sm:$0xf] }
  0x47   : > { %900 = vmatpush.bf16.msrb.mxu1 %v6425_v63  ;;  %v5850_v63 = vld [vmem:[%s9748_s1 + $0x34] sm:$0xf0]  ;;  %v4362_v40 = vor.u32 %v5846_v62, %v4359_v48  ;;  %v5853_v48 = vld [vmem:[%s9748_s1 + $0x54] sm:$0xf] }
  0x48   : > { %919 = vmatpush.bf16.msrb.mxu2 %v6429_v24  ;;  %v4357_v24 = vld [vmem:[%s9748_s1 + $0x18] sm:$0xf]  ;;  %v4383_v62 = vld [vmem:[%s9748_s1 + $0x70] sm:$0xf0] }
  0x49   : > { %939 = vmatpush.bf16.msrb.mxu3 %v6433_v29  ;;  %v5849_v29 = vld [vmem:[%s9748_s1 + $0x2c] sm:$0xf0] }
  0x4a   : > { %882 = vmatpush.bf16.msrb.mxu0 %v6438_v30  ;;  %v5845_v30 = vld [vmem:[%s9748_s1 + $0x14] sm:$0xf]  ;;  %v4350_v47 = vor.u32 %v5849_v29, %v4349_v46  ;;  %v5854_v29 = vld [vmem:[%s9748_s1 + $0x5c] sm:$0xf] }
  0x4b   : > { %901 = vmatpush.bf16.msrb.mxu1 %v6441_v31  ;;  %v4351_v31 = vld [vmem:[%s9748_s1 + $0x30] sm:$0xf0] }
  0x4c   : > { %920 = vmatpush.bf16.msrb.mxu2 %v6445_v32  ;;  %v4354_v32 = vor.u32 %v5845_v30, %v4351_v31  ;;  %v4391_v30 = vld [vmem:[%s9748_s1 + $0x78] sm:$0xf0] }
  0x4d   : > { %940 = vmatpush.bf16.msrb.mxu3 %v6449_v37  ;;  %v4358_v37 = vor.u32 %v5850_v63, %v4357_v24  ;;  %v4389_v63 = vld [vmem:[%s9748_s1 + $0x58] sm:$0xf]  ;;  %v4394_v46 = vor.u32 %v5854_v29, %v4391_v30  ;;  %v5860_v29 = vld [vmem:[%s9748_s1 + $0x8c] sm:$0xf] }
  0x4e   : > { %883 = vmatpush.bf16.msrb.mxu0 %v6454_v41  ;;  %v5858_v24 = vld [vmem:[%s9748_s1 + $0x74] sm:$0xf0]  ;;  %v4673_v30 = vld [vmem:[%s9748_s1 + $0xa8] sm:$0xf0] }
  0x4f   : > { %902 = vmatpush.bf16.msrb.mxu1 %v6457_v44 }
  0x50   : > { %921 = vmatpush.bf16.msrb.mxu2 %v6460_v45 }
  0x51   : > { %1114 = vmatpush.bf16.msra.mxu3 %v6177_v3  ;;  %884 = vmatmul.bf16.vlgmr.msrb.gmra.mxu0 %v4350_v47  ;;  %v5857_v47 = vld [vmem:[%s9748_s1 + $0x6c] sm:$0xf0] }
  0x52   : > { %1057 = vmatpush.bf16.msra.mxu0 %v6168_v0  ;;  %903 = vmatmul.bf16.vlgmr.msrb.gmra.mxu1 %v4354_v32  ;;  %v4386_v32 = vor.u32 %v5853_v48, %v4383_v62  ;;  %v5859_v48 = vld [vmem:[%s9748_s1 + $0x84] sm:$0xf] }
  0x53   : > { %1076 = vmatpush.bf16.msra.mxu1 %v6171_v1  ;;  %922 = vmatmul.bf16.vlgmr.msrb.gmra.mxu2 %v4358_v37  ;;  %v4390_v37 = vor.u32 %v5858_v24, %v4389_v63  ;;  %v4665_v62 = vld [vmem:[%s9748_s1 + $0xa0] sm:$0xf0]  ;;  %v4671_v63 = vld [vmem:[%s9748_s1 + $0x88] sm:$0xf] }
  0x54   : > { %1095 = vmatpush.bf16.msra.mxu2 %v6174_v2  ;;  %4643 = vmatmul.msk.bf16.vlgmr.msrb.gmra.mxu3 %vm789_vm1, %v4362_v40  ;;  %v4381_v40 = vld [vmem:[%s9748_s1 + $0x50] sm:$0xf]  ;;  %v5864_v24 = vld [vmem:[%s9748_s1 + $0xa4] sm:$0xf0] }
  0x55   : > { %1115 = vmatpush.bf16.msra.mxu3 %v6193_v7  ;;  %v4382_v31 = vor.u32 %v5857_v47, %v4381_v40  ;;  %v4663_v40 = vld [vmem:[%s9748_s1 + $0x80] sm:$0xf] }
  0x56   : > { %1058 = vmatpush.bf16.msra.mxu0 %v6182_v4  ;;  %v5863_v47 = vld [vmem:[%s9748_s1 + $0x9c] sm:$0xf0] }
  0x57   : > { %1077 = vmatpush.bf16.msra.mxu1 %v6185_v5 }
  0x58   : > { %1096 = vmatpush.bf16.msra.mxu2 %v6190_v6 }
  0x59   : > { %1116 = vmatpush.bf16.msra.mxu3 %v6209_v11 }
  0x5a   : > { %1059 = vmatpush.bf16.msra.mxu0 %v6198_v8 }
  0x5b   : > { %1078 = vmatpush.bf16.msra.mxu1 %v6201_v9 }
  0x5c   : > { %1097 = vmatpush.bf16.msra.mxu2 %v6206_v10 }
  0x5d   : > { %1117 = vmatpush.bf16.msra.mxu3 %v6225_v15 }
  0x5e   : > { %1060 = vmatpush.bf16.msra.mxu0 %v6214_v12 }
  0x5f   : > { %1079 = vmatpush.bf16.msra.mxu1 %v6217_v13 }
  0x60   : > { %1098 = vmatpush.bf16.msra.mxu2 %v6222_v14 }
  0x61   : > { %1118 = vmatpush.bf16.msra.mxu3 %v6241_v19  ;;  %889 = vmatmul.bf16.gmra.mxu0 %v4382_v31  ;;  %v4664_v31 = vor.u32 %v5863_v47, %v4663_v40  ;;  %v4695_v40 = vld [vmem:[%s9748_s1 + $0xc0] sm:$0xf] }
  0x62   : > { %1061 = vmatpush.bf16.msra.mxu0 %v6230_v16  ;;  %908 = vmatmul.bf16.gmra.mxu1 %v4386_v32  ;;  %v4668_v32 = vor.u32 %v5859_v48, %v4665_v62  ;;  %v5871_v47 = vld [vmem:[%s9748_s1 + $0xdc] sm:$0xf0]  ;;  %v5867_v48 = vld [vmem:[%s9748_s1 + $0xc4] sm:$0xf] }
  0x63   : > { %1080 = vmatpush.bf16.msra.mxu1 %v6233_v17  ;;  %927 = vmatmul.bf16.gmra.mxu2 %v4390_v37  ;;  %v4672_v37 = vor.u32 %v5864_v24, %v4671_v63  ;;  %v4697_v62 = vld [vmem:[%s9748_s1 + $0xe0] sm:$0xf0]  ;;  %v4703_v63 = vld [vmem:[%s9748_s1 + $0xc8] sm:$0xf] }
  0x64   : > { %1099 = vmatpush.bf16.msra.mxu2 %v6238_v18  ;;  %4644 = vmatmul.msk.bf16.gmra.mxu3 %vm789_vm1, %v4394_v46  ;;  %v4676_v46 = vor.u32 %v5860_v29, %v4673_v30  ;;  %v5872_v24 = vld [vmem:[%s9748_s1 + $0xe4] sm:$0xf0]  ;;  %v5868_v29 = vld [vmem:[%s9748_s1 + $0xcc] sm:$0xf] }
  0x65   : > { %1119 = vmatpush.bf16.msra.mxu3 %v6257_v23  ;;  %v4705_v30 = vld [vmem:[%s9748_s1 + $0xe8] sm:$0xf0] }
  0x66   : > { %1062 = vmatpush.bf16.msra.mxu0 %v6246_v20 }
  0x67   : > { %1081 = vmatpush.bf16.msra.mxu1 %v6249_v21 }
  0x68   : > { %1100 = vmatpush.bf16.msra.mxu2 %v6254_v22 }
  0x69   : > { %1120 = vmatpush.bf16.msra.mxu3 %v6274_v28 }
  0x6a   : > { %1063 = vmatpush.bf16.msra.mxu0 %v6263_v25 }
  0x6b   : > { %1082 = vmatpush.bf16.msra.mxu1 %v6266_v26 }
  0x6c   : > { %1101 = vmatpush.bf16.msra.mxu2 %v6271_v27 }
  0x6d   : > { %1121 = vmatpush.bf16.msra.mxu3 %v6297_v36 }
  0x6e   : > { %1064 = vmatpush.bf16.msra.mxu0 %v6286_v33 }
  0x6f   : > { %1083 = vmatpush.bf16.msra.mxu1 %v6289_v34 }
  0x70   : > { %1102 = vmatpush.bf16.msra.mxu2 %v6292_v35 }
  0x71   : > { %1191 = vmatpush.bf16.msrb.mxu3 %v6337_v52  ;;  %1065 = vmatmul.bf16.vlgmr.msra.gmra.mxu0 %v4664_v31  ;;  %v4696_v31 = vor.u32 %v5871_v47, %v4695_v40  ;;  %v9876_v40 = vld [vmem:[#allocation22_spill] sm:$0xff]  ;;  %v9877_v47 = vld [vmem:[#allocation23_spill] sm:$0xff] }
  0x72   : > { %1133 = vmatpush.bf16.msrb.mxu0 %v6317_v42  ;;  %1084 = vmatmul.bf16.vlgmr.msra.gmra.mxu1 %v4668_v32  ;;  %v4700_v32 = vor.u32 %v5867_v48, %v4697_v62  ;;  %v9878_v48 = vld [vmem:[#allocation24_spill] sm:$0xff]  ;;  %v9879_v62 = vld [vmem:[#allocation25_spill] sm:$0xff] }
  0x73   : > { %1152 = vmatpush.bf16.msrb.mxu1 %v6320_v43  ;;  %1103 = vmatmul.bf16.vlgmr.msra.gmra.mxu2 %v4672_v37  ;;  %v4704_v37 = vor.u32 %v5872_v24, %v4703_v63  ;;  %v9880_v63 = vld [vmem:[#allocation26_spill] sm:$0xff]  ;;  %v9881_v24 = vld [vmem:[#allocation27_spill] sm:$0xff] }
  0x74   : > { %1171 = vmatpush.bf16.msrb.mxu2 %v6327_v49  ;;  %1122 = vmatmul.bf16.vlgmr.msra.gmra.mxu3 %v4676_v46  ;;  %v4708_v46 = vor.u32 %v5868_v29, %v4705_v30  ;;  %v4679_v29 = vld [vmem:[%s9748_s1 + $0x90] sm:$0xf] }
  0x75   : > { %1192 = vmatpush.bf16.msrb.mxu3 %v6345_v54  ;;  %v5865_v30 = vld [vmem:[%s9748_s1 + $0xac] sm:$0xf0] }
  0x76   : > { %1134 = vmatpush.bf16.msrb.mxu0 %v6332_v50 }
  0x77   : > { %1153 = vmatpush.bf16.msrb.mxu1 %v6335_v51 }
  0x78   : > { %1172 = vmatpush.bf16.msrb.mxu2 %v6341_v53 }
  0x79   : > { %1193 = vmatpush.bf16.msrb.mxu3 %v6361_v58 }
  0x7a   : > { %1135 = vmatpush.bf16.msrb.mxu0 %v6350_v55 }
  0x7b   : > { %1154 = vmatpush.bf16.msrb.mxu1 %v6353_v56  ;;  %v9874_v56 = vld [vmem:[#allocation20_spill] sm:$0xff] }
  0x7c   : > { %1173 = vmatpush.bf16.msrb.mxu2 %v6357_v57  ;;  %v9873_v57 = vld [vmem:[#allocation19_spill] sm:$0xff] }
  0x7d   : > { %1194 = vmatpush.bf16.msrb.mxu3 %v6401_v38 }
  0x7e   : > { %1136 = vmatpush.bf16.msrb.mxu0 %v6366_v59  ;;  %v9872_v59 = vld [vmem:[#allocation18_spill] sm:$0xff] }
  0x7f   : > { %1155 = vmatpush.bf16.msrb.mxu1 %v6369_v60  ;;  %v9871_v60 = vld [vmem:[#allocation17_spill] sm:$0xff] }
  0x80   : > { %1174 = vmatpush.bf16.msrb.mxu2 %v6372_v61  ;;  %v9875_v61 = vld [vmem:[#allocation21_spill] sm:$0xff] }
  0x81   : > { %1195 = vmatpush.bf16.msrb.mxu3 %v9873_v57  ;;  %1070 = vmatmul.bf16.gmra.mxu0 %v4696_v31  ;;  %v5861_v31 = vld [vmem:[%s9748_s1 + $0x94] sm:$0xf] }
  0x82   : > { %1137 = vmatpush.bf16.msrb.mxu0 %v6406_v39  ;;  %1089 = vmatmul.bf16.gmra.mxu1 %v4700_v32  ;;  %v4681_v32 = vld [vmem:[%s9748_s1 + $0xb0] sm:$0xf0] }
  0x83   : > { %1156 = vmatpush.bf16.msrb.mxu1 %v9871_v60  ;;  %1108 = vmatmul.bf16.gmra.mxu2 %v4704_v37  ;;  %v4687_v37 = vld [vmem:[%s9748_s1 + $0x98] sm:$0xf] }
  0x84   : > { %1175 = vmatpush.bf16.msrb.mxu2 %v9872_v59  ;;  %1127 = vmatmul.bf16.gmra.mxu3 %v4708_v46  ;;  %v5866_v46 = vld [vmem:[%s9748_s1 + $0xb4] sm:$0xf0] }
  0x85   : > { %1196 = vmatpush.bf16.msrb.mxu3 %v9877_v47 }
  0x86   : > { %1138 = vmatpush.bf16.msrb.mxu0 %v9874_v56 }
  0x87   : > { %1157 = vmatpush.bf16.msrb.mxu1 %v9875_v61 }
  0x88   : > { %1176 = vmatpush.bf16.msrb.mxu2 %v9876_v40 }
  0x89   : > { %1197 = vmatpush.bf16.msrb.mxu3 %v9881_v24 }
  0x8a   : > { %1139 = vmatpush.bf16.msrb.mxu0 %v9878_v48 }
  0x8b   : > { %1158 = vmatpush.bf16.msrb.mxu1 %v9879_v62  ;;  %v4680_v62 = vor.u32 %v5865_v30, %v4679_v29  ;;  %v5870_v29 = vld [vmem:[%s9748_s1 + $0xdc] sm:$0xf] }
  0x8c   : > { %1177 = vmatpush.bf16.msrb.mxu2 %v9880_v63  ;;  %v4689_v63 = vld [vmem:[%s9748_s1 + $0xb8] sm:$0xf0] }
  0x8d   : > { %1387 = vmatpush.bf16.msra.mxu3 %v6177_v3  ;;  %v5862_v3 = vld [vmem:[%s9748_s1 + $0x9c] sm:$0xf] }
  0x8e   : > { %1140 = vmatpush.bf16.msrb.mxu0 %v6454_v41  ;;  %v4684_v41 = vor.u32 %v5861_v31, %v4681_v32  ;;  %v4692_v24 = vor.u32 %v5862_v3, %v4689_v63  ;;  %v4711_v3 = vld [vmem:[%s9748_s1 + $0xd0] sm:$0xf]  ;;  %v4719_v63 = vld [vmem:[%s9748_s1 + $0xd8] sm:$0xf]  ;;  %v4721_v30 = vld [vmem:[%s9748_s1 + $0xf8] sm:$0xf0] }
  0x8f   : > { %1159 = vmatpush.bf16.msrb.mxu1 %v6457_v44  ;;  %v4688_v44 = vor.u32 %v5866_v46, %v4687_v37  ;;  %v4724_v46 = vor.u32 %v5870_v29, %v4721_v30  ;;  %v5876_v29 = vld [vmem:[%s9748_s1 + $0x10c] sm:$0xf] }
  0x90   : > { %1178 = vmatpush.bf16.msrb.mxu2 %v6460_v45  ;;  %v4755_v30 = vld [vmem:[%s9748_s1 + $0x128] sm:$0xf0] }
  0x91   : > { %1388 = vmatpush.bf16.msra.mxu3 %v6193_v7  ;;  %1141 = vmatmul.bf16.vlgmr.msrb.gmra.mxu0 %v4680_v62  ;;  %v4713_v62 = vld [vmem:[%s9748_s1 + $0xf0] sm:$0xf0] }
  0x92   : > { %1330 = vmatpush.bf16.msra.mxu0 %v6168_v0  ;;  %1160 = vmatmul.bf16.vlgmr.msrb.gmra.mxu1 %v4684_v41  ;;  %v5873_v41 = vld [vmem:[%s9748_s1 + $0xec] sm:$0xf0] }
  0x93   : > { %1349 = vmatpush.bf16.msra.mxu1 %v6171_v1  ;;  %1179 = vmatmul.bf16.vlgmr.msrb.gmra.mxu2 %v4688_v44  ;;  %v5869_v44 = vld [vmem:[%s9748_s1 + $0xd4] sm:$0xf]  ;;  %v4712_v31 = vor.u32 %v5873_v41, %v4711_v3  ;;  %v4745_v3 = vld [vmem:[%s9748_s1 + $0x100] sm:$0xf] }
  0x94   : > { %1368 = vmatpush.bf16.msra.mxu2 %v6174_v2  ;;  %4725 = vmatmul.msk.bf16.vlgmr.msrb.gmra.mxu3 %vm789_vm1, %v4692_v24  ;;  %v5874_v24 = vld [vmem:[%s9748_s1 + $0xf4] sm:$0xf0]  ;;  %v4716_v32 = vor.u32 %v5869_v44, %v4713_v62  ;;  %v5879_v41 = vld [vmem:[%s9748_s1 + $0x11c] sm:$0xf0]  ;;  %v5875_v44 = vld [vmem:[%s9748_s1 + $0x104] sm:$0xf] }
  0x95   : > { %1389 = vmatpush.bf16.msra.mxu3 %v6209_v11  ;;  %v4720_v37 = vor.u32 %v5874_v24, %v4719_v63  ;;  %v4747_v62 = vld [vmem:[%s9748_s1 + $0x120] sm:$0xf0]  ;;  %v4753_v63 = vld [vmem:[%s9748_s1 + $0x108] sm:$0xf] }
  0x96   : > { %1331 = vmatpush.bf16.msra.mxu0 %v6182_v4  ;;  %v5880_v24 = vld [vmem:[%s9748_s1 + $0x124] sm:$0xf0] }
  0x97   : > { %1350 = vmatpush.bf16.msra.mxu1 %v6185_v5 }
  0x98   : > { %1369 = vmatpush.bf16.msra.mxu2 %v6190_v6 }
  0x99   : > { %1390 = vmatpush.bf16.msra.mxu3 %v6225_v15 }
  0x9a   : > { %1332 = vmatpush.bf16.msra.mxu0 %v6198_v8 }
  0x9b   : > { %1351 = vmatpush.bf16.msra.mxu1 %v6201_v9 }
  0x9c   : > { %1370 = vmatpush.bf16.msra.mxu2 %v6206_v10 }
  0x9d   : > { %1391 = vmatpush.bf16.msra.mxu3 %v6241_v19 }
  0x9e   : > { %1333 = vmatpush.bf16.msra.mxu0 %v6214_v12 }
  0x9f   : > { %1352 = vmatpush.bf16.msra.mxu1 %v6217_v13 }
  0xa0   : > { %1371 = vmatpush.bf16.msra.mxu2 %v6222_v14 }
  0xa1   : > { %1392 = vmatpush.bf16.msra.mxu3 %v6257_v23  ;;  %1146 = vmatmul.bf16.gmra.mxu0 %v4712_v31  ;;  %v4746_v31 = vor.u32 %v5879_v41, %v4745_v3  ;;  %v9882_v3 = vld [vmem:[#allocation9_spill] sm:$0xff]  ;;  %v9883_v41 = vld [vmem:[#allocation10_spill] sm:$0xff] }
  0xa2   : > { %1334 = vmatpush.bf16.msra.mxu0 %v6230_v16  ;;  %1165 = vmatmul.bf16.gmra.mxu1 %v4716_v32  ;;  %v4750_v32 = vor.u32 %v5875_v44, %v4747_v62 }
  0xa3   : > { %1353 = vmatpush.bf16.msra.mxu1 %v6233_v17  ;;  %1184 = vmatmul.bf16.gmra.mxu2 %v4720_v37 }
  0xa4   : > { %1372 = vmatpush.bf16.msra.mxu2 %v6238_v18  ;;  %4726 = vmatmul.msk.bf16.gmra.mxu3 %vm789_vm1, %v4724_v46 }
  0xa5   : > { %1393 = vmatpush.bf16.msra.mxu3 %v6274_v28 }
  0xa6   : > { %1335 = vmatpush.bf16.msra.mxu0 %v6246_v20 }
  0xa7   : > { %1354 = vmatpush.bf16.msra.mxu1 %v6249_v21 }
  0xa8   : > { %1373 = vmatpush.bf16.msra.mxu2 %v6254_v22 }
  0xa9   : > { %1394 = vmatpush.bf16.msra.mxu3 %v6297_v36 }
  0xaa   : > { %1336 = vmatpush.bf16.msra.mxu0 %v6263_v25 }
  0xab   : > { %1355 = vmatpush.bf16.msra.mxu1 %v6266_v26 }
  0xac   : > { %1374 = vmatpush.bf16.msra.mxu2 %v6271_v27 }
  0xad   : > { %1464 = vmatpush.bf16.msrb.mxu3 %v6337_v52 }
  0xae   : > { %1337 = vmatpush.bf16.msra.mxu0 %v6286_v33  ;;  %v809_v37 = vpop.f32.mrf.mxu0 }
  0xaf   : > { %1356 = vmatpush.bf16.msra.mxu1 %v6289_v34  ;;  %v828_v46 = vpop.f32.mrf.mxu1 }
  0xb0   : > { %1375 = vmatpush.bf16.msra.mxu2 %v6292_v35  ;;  %v4758_v35 = vor.u32 %v5876_v29, %v4755_v30  ;;  %v829_v34 = vadd.f32 %v828_v46, %v809_v37  ;;  %v9884_v37 = vld [vmem:[#allocation12_spill] sm:$0xff]  ;;  %v5883_v46 = vld [vmem:[%s9748_s1 + $0x144] sm:$0xf] }
  0xb1   : > { %1465 = vmatpush.bf16.msrb.mxu3 %v6345_v54  ;;  %1338 = vmatmul.bf16.vlgmr.msra.gmra.mxu0 %v4746_v31  ;;  %v9886_v31 = vld [vmem:[#allocation14_spill] sm:$0xff] }
  0xb2   : > { %1406 = vmatpush.bf16.msrb.mxu0 %v6317_v42  ;;  %v4754_v42 = vor.u32 %v5880_v24, %v4753_v63  ;;  %1357 = vmatmul.bf16.vlgmr.msra.gmra.mxu1 %v4750_v32  ;;  %v4777_v32 = vld [vmem:[%s9748_s1 + $0x140] sm:$0xf] }
  0xb3   : > { %1425 = vmatpush.bf16.msrb.mxu1 %v6320_v43 }
  0xb4   : > { %1444 = vmatpush.bf16.msrb.mxu2 %v6327_v49  ;;  %1395 = vmatmul.bf16.vlgmr.msra.gmra.mxu3 %v4758_v35  ;;  %v9885_v35 = vld [vmem:[#allocation13_spill] sm:$0xff] }
  0xb5   : > { %1376 = vmatmul.bf16.vlgmr.msra.gmra.mxu2 %v4754_v42  ;;  %1466 = vmatpush.bf16.msrb.mxu3 %v6361_v58 }
  0xb6   : > { %1407 = vmatpush.bf16.msrb.mxu0 %v6332_v50  ;;  %v847_v44 = vpop.f32.mrf.mxu2  ;;  %v811_v24 = vpop.f32.mrf.mxu0 }
  0xb7   : > { %1426 = vmatpush.bf16.msrb.mxu1 %v6335_v51  ;;  %v866_v62 = vpop.f32.mrf.mxu3  ;;  %v848_v63 = vadd.f32 %v847_v44, %v829_v34  ;;  %v830_v29 = vpop.f32.mrf.mxu1  ;;  %v5887_v34 = vld [vmem:[%s9748_s1 + $0x15c] sm:$0xf0]  ;;  %v4779_v44 = vld [vmem:[%s9748_s1 + $0x160] sm:$0xf0] }
  0xb8   : > { %1445 = vmatpush.bf16.msrb.mxu2 %v6341_v53  ;;  %v831_v30 = vadd.f32 %v830_v29, %v811_v24  ;;  %v5884_v24 = vld [vmem:[%s9748_s1 + $0x14c] sm:$0xf] }
  0xb9   : > { %1467 = vmatpush.bf16.msrb.mxu3 %v6401_v38  ;;  %v6748_v42 = vadd.f32 %v866_v62, %v848_v63  ;;  %v4785_v62 = vld [vmem:[%s9748_s1 + $0x148] sm:$0xf]  ;;  %v4787_v29 = vld [vmem:[%s9748_s1 + $0x168] sm:$0xf0]  ;;  %v4778_v38 = vor.u32 %v5887_v34, %v4777_v32 }
  0xba   : > { %1408 = vmatpush.bf16.msrb.mxu0 %v6350_v55  ;;  %v5888_v63 = vld [vmem:[%s9748_s1 + $0x164] sm:$0xf0]  ;;  %v4790_v53 = vor.u32 %v5884_v24, %v4787_v29  ;;  %v4769_v24 = vld [vmem:[%s9748_s1 + $0x118] sm:$0xf]  ;;  %v4771_v29 = vld [vmem:[%s9748_s1 + $0x138] sm:$0xf0] }
  0xbb   : > { %1427 = vmatpush.bf16.msrb.mxu1 %v9882_v3  ;;  %v4786_v58 = vor.u32 %v5888_v63, %v4785_v62  ;;  %v5881_v62 = vld [vmem:[%s9748_s1 + $0x12c] sm:$0xf0]  ;;  %v4763_v63 = vld [vmem:[%s9748_s1 + $0x130] sm:$0xf0] }
  0xbc   : > { %1446 = vmatpush.bf16.msrb.mxu2 %v9883_v41 }
  0xbd   : > { %1468 = vmatpush.bf16.msrb.mxu3 %v9873_v57 }
  0xbe   : > { %1409 = vmatpush.bf16.msrb.mxu0 %v9884_v37  ;;  %v4782_v37 = vor.u32 %v5883_v46, %v4779_v44  ;;  %v814_v3 = vpop.f32.mrf.mxu0 }
  0xbf   : > { %1428 = vmatpush.bf16.msrb.mxu1 %v9885_v35  ;;  %v868_v35 = vpop.f32.mrf.mxu3  ;;  %v833_v55 = vpop.f32.mrf.mxu1 }
  0xc0   : > { %1447 = vmatpush.bf16.msrb.mxu2 %v9886_v31  ;;  %v849_v31 = vpop.f32.mrf.mxu2  ;;  %v834_v51 = vadd.f32 %v833_v55, %v814_v3  ;;  %v9889_v55 = vld [vmem:[#allocation26_spill] sm:$0xff] }
  0xc1   : > { %v850_v41 = vadd.f32 %v849_v31, %v831_v30  ;;  %1469 = vmatpush.bf16.msrb.mxu3 %v9877_v47  ;;  %1343 = vmatmul.bf16.gmra.mxu0 %v4778_v38  ;;  %v9887_v30 = vld [vmem:[#allocation27_spill] sm:$0xff]  ;;  %v9888_v31 = vld [vmem:[#allocation25_spill] sm:$0xff]  ;;  %v9891_v38 = vld [vmem:[#allocation28_spill] sm:$0xff] }
  0xc2   : > { %1410 = vmatpush.bf16.msrb.mxu0 %v6406_v39  ;;  %1362 = vmatmul.bf16.gmra.mxu1 %v4782_v37  ;;  %v4761_v37 = vld [vmem:[%s9748_s1 + $0x110] sm:$0xf] }
  0xc3   : > { %1429 = vmatpush.bf16.msrb.mxu1 %v9871_v60  ;;  %v6782_v39 = vadd.f32 %v868_v35, %v850_v41  ;;  %v9890_v41 = vld [vmem:[#allocation2_spill] sm:$0xff] }
  0xc4   : > { %1448 = vmatpush.bf16.msrb.mxu2 %v9872_v59  ;;  %1400 = vmatmul.bf16.gmra.mxu3 %v4790_v53  ;;  %v9892_v53 = vld [vmem:[#allocation29_spill] sm:$0xff] }
  0xc5   : > { %1381 = vmatmul.bf16.gmra.mxu2 %v4786_v58  ;;  %1470 = vmatpush.bf16.msrb.mxu3 %v9887_v30 }
  0xc6   : > { %1411 = vmatpush.bf16.msrb.mxu0 %v9874_v56  ;;  %v816_v34 = vpop.f32.mrf.mxu0 }
  0xc7   : > { %1430 = vmatpush.bf16.msrb.mxu1 %v9875_v61  ;;  %v871_v32 = vpop.f32.mrf.mxu3  ;;  %v835_v46 = vpop.f32.mrf.mxu1 }
  0xc8   : > { %1449 = vmatpush.bf16.msrb.mxu2 %v9876_v40  ;;  %v852_v3 = vpop.f32.mrf.mxu2  ;;  %v836_v44 = vadd.f32 %v835_v46, %v816_v34 }
  0xc9   : > { %1660 = vmatpush.bf16.msra.mxu3 %v9890_v41  ;;  %v853_v35 = vadd.f32 %v852_v3, %v834_v51  ;;  %v5877_v51 = vld [vmem:[%s9748_s1 + $0x114] sm:$0xf]  ;;  %v4762_v41 = vor.u32 %v5881_v62, %v4761_v37 }
  0xca   : > { %1412 = vmatpush.bf16.msrb.mxu0 %v9878_v48 }
  0xcb   : > { %1431 = vmatpush.bf16.msrb.mxu1 %v9888_v31  ;;  %v6792_v58 = vadd.f32 %v871_v32, %v853_v35  ;;  %v4766_v35 = vor.u32 %v5877_v51, %v4763_v63 }
  0xcc   : > { %1450 = vmatpush.bf16.msrb.mxu2 %v9889_v55 }
  0xcd   : > { %1661 = vmatpush.bf16.msra.mxu3 %v6193_v7 }
  0xce   : > { %1413 = vmatpush.bf16.msrb.mxu0 %v9891_v38  ;;  %v885_v7 = vpop.f32.mrf.mxu0 }
  0xcf   : > { %1432 = vmatpush.bf16.msrb.mxu1 %v9892_v53  ;;  %v873_v32 = vpop.f32.mrf.mxu3  ;;  %v904_v34 = vpop.f32.mrf.mxu1  ;;  %v886_v53 = vadd.f32 %v885_v7, %v6748_v42 }
  0xd0   : > { %1451 = vmatpush.bf16.msrb.mxu2 %v6460_v45  ;;  %v854_v3 = vpop.f32.mrf.mxu2 }
  0xd1   : > { %1662 = vmatpush.bf16.msra.mxu3 %v6209_v11  ;;  %v905_v55 = vadd.f32 %v904_v34, %v886_v53  ;;  %1414 = vmatmul.bf16.vlgmr.msrb.gmra.mxu0 %v4762_v41  ;;  %v4835_v41 = vld [vmem:[%s9748_s1 + $0x188] sm:$0xf] }
  0xd2   : > { %1603 = vmatpush.bf16.msra.mxu0 %v6168_v0  ;;  %v5882_v0 = vld [vmem:[%s9748_s1 + $0x134] sm:$0xf0]  ;;  %1433 = vmatmul.bf16.vlgmr.msrb.gmra.mxu1 %v4766_v35  ;;  %v4837_v35 = vld [vmem:[%s9748_s1 + $0x1a8] sm:$0xf0] }
  0xd3   : > { %1622 = vmatpush.bf16.msra.mxu1 %v6171_v1  ;;  %v5878_v1 = vld [vmem:[%s9748_s1 + $0x11c] sm:$0xf]  ;;  %v4770_v46 = vor.u32 %v5882_v0, %v4769_v24 }
  0xd4   : > { %1641 = vmatpush.bf16.msra.mxu2 %v6174_v2  ;;  %v855_v2 = vadd.f32 %v854_v3, %v836_v44  ;;  %v4774_v45 = vor.u32 %v5878_v1, %v4771_v29  ;;  %v4827_v3 = vld [vmem:[%s9748_s1 + $0x180] sm:$0xf] }
  0xd5   : > { %1452 = vmatmul.bf16.vlgmr.msrb.gmra.mxu2 %v4770_v46  ;;  %1663 = vmatpush.bf16.msra.mxu3 %v6225_v15  ;;  %v5890_v15 = vld [vmem:[%s9748_s1 + $0x174] sm:$0xf0] }
  0xd6   : > { %1604 = vmatpush.bf16.msra.mxu0 %v6182_v4  ;;  %v6829_v38 = vadd.f32 %v873_v32, %v855_v2  ;;  %4807 = vmatmul.msk.bf16.vlgmr.msrb.gmra.mxu3 %vm789_vm1, %v4774_v45  ;;  %v887_v11 = vpop.f32.mrf.mxu0  ;;  %v5895_v32 = vld [vmem:[%s9748_s1 + $0x19c] sm:$0xf0] }
  0xd7   : > { %1623 = vmatpush.bf16.msra.mxu1 %v6185_v5  ;;  %v942_v5 = vpop.f32.mrf.mxu3  ;;  %v906_v42 = vpop.f32.mrf.mxu1  ;;  %v888_v44 = vadd.f32 %v887_v11, %v6782_v39  ;;  %v4803_v39 = vld [vmem:[%s9748_s1 + $0x178] sm:$0xf0]  ;;  %v4828_v34 = vor.u32 %v5895_v32, %v4827_v3 }
  0xd8   : > { %1642 = vmatpush.bf16.msra.mxu2 %v6190_v6  ;;  %v923_v4 = vpop.f32.mrf.mxu2 }
  0xd9   : > { %v924_v6 = vadd.f32 %v923_v4, %v905_v55  ;;  %1664 = vmatpush.bf16.msra.mxu3 %v6241_v19  ;;  %v5886_v19 = vld [vmem:[%s9748_s1 + $0x15c] sm:$0xf]  ;;  %v9899_v4 = vld [vmem:[#allocation6_spill] sm:$0xff] }
  0xda   : > { %1605 = vmatpush.bf16.msra.mxu0 %v6198_v8  ;;  %v907_v8 = vadd.f32 %v906_v42, %v888_v44  ;;  %v4806_v1 = vor.u32 %v5886_v19, %v4803_v39 }
  0xdb   : > { %1624 = vmatpush.bf16.msra.mxu1 %v6201_v9  ;;  %v6839_v45 = vadd.f32 %v942_v5, %v924_v6  ;;  %v4793_v9 = vld [vmem:[%s9748_s1 + $0x150] sm:$0xf] }
  0xdc   : > { %1643 = vmatpush.bf16.msra.mxu2 %v6206_v10  ;;  %v5889_v10 = vld [vmem:[%s9748_s1 + $0x16c] sm:$0xf0] }
  0xdd   : > { %9893 = vst [vmem:[#allocation17_spill] sm:$0xff] %v6839_v45  ;;  %1665 = vmatpush.bf16.msra.mxu3 %v6257_v23  ;;  %v4794_v37 = vor.u32 %v5889_v10, %v4793_v9  ;;  %v9904_v10 = vld [vmem:[#allocation9_spill] sm:$0xff]  ;;  %v4943_v45 = vld [vmem:[%s9748_s1 + $0x260] sm:$0xf0] }
  0xde   : > { %1606 = vmatpush.bf16.msra.mxu0 %v6214_v12  ;;  %v5885_v12 = vld [vmem:[%s9748_s1 + $0x154] sm:$0xf]  ;;  %v890_v63 = vpop.f32.mrf.mxu0 }
  0xdf   : > { %1625 = vmatpush.bf16.msra.mxu1 %v6217_v13  ;;  %v4795_v13 = vld [vmem:[%s9748_s1 + $0x170] sm:$0xf0]  ;;  %v944_v53 = vpop.f32.mrf.mxu3  ;;  %v909_v24 = vpop.f32.mrf.mxu1  ;;  %v891_v29 = vadd.f32 %v890_v63, %v6792_v58  ;;  %v9895_v58 = vld [vmem:[#allocation3_spill] sm:$0xff]  ;;  %v4859_v63 = vld [vmem:[%s9748_s1 + $0x1c0] sm:$0xf] }
  0xe0   : > { %1644 = vmatpush.bf16.msra.mxu2 %v6222_v14  ;;  %v4801_v14 = vld [vmem:[%s9748_s1 + $0x158] sm:$0xf]  ;;  %v925_v55 = vpop.f32.mrf.mxu2  ;;  %v4798_v62 = vor.u32 %v5885_v12, %v4795_v13  ;;  %v9905_v12 = vld [vmem:[#allocation10_spill] sm:$0xff]  ;;  %v9906_v13 = vld [vmem:[#allocation12_spill] sm:$0xff] }
  0xe1   : > { %v926_v51 = vadd.f32 %v925_v55, %v907_v8  ;;  %v4802_v0 = vor.u32 %v5890_v15, %v4801_v14  ;;  %1666 = vmatpush.bf16.msra.mxu3 %v6274_v28  ;;  %1419 = vmatmul.bf16.gmra.mxu0 %v4794_v37  ;;  %v9901_v8 = vld [vmem:[#allocation11_spill] sm:$0xff]  ;;  %v9908_v37 = vld [vmem:[#allocation13_spill] sm:$0xff] }
  0xe2   : > { %1607 = vmatpush.bf16.msra.mxu0 %v6230_v16  ;;  %1438 = vmatmul.bf16.gmra.mxu1 %v4798_v62  ;;  %v9907_v14 = vld [vmem:[#allocation15_spill] sm:$0xff]  ;;  %v9909_v62 = vld [vmem:[#allocation14_spill] sm:$0xff] }
  0xe3   : > { %1626 = vmatpush.bf16.msra.mxu1 %v6233_v17  ;;  %v6874_v16 = vadd.f32 %v944_v53, %v926_v51  ;;  %v910_v17 = vadd.f32 %v909_v24, %v891_v29  ;;  %v9910_v51 = vld [vmem:[#allocation16_spill] sm:$0xff]  ;;  %v5903_v24 = vld [vmem:[%s9748_s1 + $0x1dc] sm:$0xf0]  ;;  %v5904_v29 = vld [vmem:[%s9748_s1 + $0x1e4] sm:$0xf0] }
  0xe4   : > { %1645 = vmatpush.bf16.msra.mxu2 %v6238_v18 }
  0xe5   : > { %9894 = vst [vmem:[#allocation18_spill] sm:$0xff] %v6874_v16  ;;  %1457 = vmatmul.bf16.gmra.mxu2 %v4802_v0  ;;  %1667 = vmatpush.bf16.msra.mxu3 %v6297_v36  ;;  %v5899_v0 = vld [vmem:[%s9748_s1 + $0x1c4] sm:$0xf] }
  0xe6   : > { %1608 = vmatpush.bf16.msra.mxu0 %v6246_v20  ;;  %4808 = vmatmul.msk.bf16.gmra.mxu3 %vm789_vm1, %v4806_v1  ;;  %v4861_v1 = vld [vmem:[%s9748_s1 + $0x1e0] sm:$0xf0] }
  0xe7   : > { %1627 = vmatpush.bf16.msra.mxu1 %v6249_v21  ;;  %v947_v20 = vpop.f32.mrf.mxu3  ;;  %v911_v23 = vpop.f32.mrf.mxu1  ;;  %v5915_v16 = vld [vmem:[%s9748_s1 + $0x244] sm:$0xf] }
  0xe8   : > { %1646 = vmatpush.bf16.msra.mxu2 %v6254_v22  ;;  %v928_v18 = vpop.f32.mrf.mxu2  ;;  %v892_v22 = vpop.f32.mrf.mxu0 }
  0xe9   : > { %1737 = vmatpush.bf16.msrb.mxu3 %v6337_v52  ;;  %v929_v21 = vadd.f32 %v928_v18, %v910_v17  ;;  %v893_v28 = vadd.f32 %v892_v22, %v6829_v38  ;;  %v4829_v38 = vld [vmem:[%s9748_s1 + $0x1a0] sm:$0xf0]  ;;  %v5900_v17 = vld [vmem:[%s9748_s1 + $0x1cc] sm:$0xf]  ;;  %v4860_v22 = vor.u32 %v5903_v24, %v4859_v63 }
  0xea   : > { %1609 = vmatpush.bf16.msra.mxu0 %v6263_v25  ;;  %v4869_v18 = vld [vmem:[%s9748_s1 + $0x1e8] sm:$0xf0] }
  0xeb   : > { %1628 = vmatpush.bf16.msra.mxu1 %v6266_v26  ;;  %v6887_v25 = vadd.f32 %v947_v20, %v929_v21  ;;  %v9897_v26 = vld [vmem:[#allocation4_spill] sm:$0xff]  ;;  %v912_v36 = vadd.f32 %v911_v23, %v893_v28  ;;  %v4864_v23 = vor.u32 %v5899_v0, %v4861_v1 }
  0xec   : > { %1647 = vmatpush.bf16.msra.mxu2 %v6271_v27  ;;  %v9898_v27 = vld [vmem:[#allocation5_spill] sm:$0xff] }
  0xed   : > { %9896 = vst [vmem:[#allocation19_spill] sm:$0xff] %v6887_v25  ;;  %1738 = vmatpush.bf16.msrb.mxu3 %v6345_v54  ;;  %v9900_v54 = vld [vmem:[#allocation7_spill] sm:$0xff] }
  0xee   : > { %1610 = vmatpush.bf16.msra.mxu0 %v6286_v33  ;;  %v5891_v33 = vld [vmem:[%s9748_s1 + $0x184] sm:$0xf] }
  0xef   : > { %1629 = vmatpush.bf16.msra.mxu1 %v9895_v58  ;;  %v949_v7 = vpop.f32.mrf.mxu3  ;;  %v4832_v46 = vor.u32 %v5891_v33, %v4829_v38  ;;  %v6923_v11 = vpop.f32.mrf.mxu1  ;;  %v9914_v38 = vld [vmem:[#allocation29_spill] sm:$0xff] }
  0xf0   : > { %1648 = vmatpush.bf16.msra.mxu2 %v9897_v26  ;;  %v930_v2 = vpop.f32.mrf.mxu2  ;;  %v6921_v6 = vpop.f32.mrf.mxu0 }
  0xf1   : > { %v931_v5 = vadd.f32 %v930_v2, %v912_v36  ;;  %1739 = vmatpush.bf16.msrb.mxu3 %v9901_v8  ;;  %1611 = vmatmul.bf16.vlgmr.msra.gmra.mxu0 %v4828_v34  ;;  %v4872_v36 = vor.u32 %v5900_v17, %v4869_v18  ;;  %v6997_v2 = vld [vmem:[%s6165_s20 + $0xb8] sm:$0xff]  ;;  %v5897_v34 = vld [vmem:[%s9748_s1 + $0x1ac] sm:$0xf0]  ;;  %v7066_v17 = vld [vmem:[%s6165_s20 + $0xe0] sm:$0xff] }
  0xf2   : > { %1679 = vmatpush.bf16.msrb.mxu0 %v9898_v27  ;;  %1630 = vmatmul.bf16.vlgmr.msra.gmra.mxu1 %v4832_v46  ;;  %v7007_v46 = vld [vmem:[%s6165_s20 + $0x30] sm:$0xff]  ;;  %v4853_v8 = vld [vmem:[%s9748_s1 + $0x1b8] sm:$0xf0] }
  0xf3   : > { %1698 = vmatpush.bf16.msrb.mxu1 %v6320_v43  ;;  %v5896_v43 = vld [vmem:[%s9748_s1 + $0x1a4] sm:$0xf0]  ;;  %v6926_v9 = vadd.f32 %v949_v7, %v931_v5  ;;  %v4843_v7 = vld [vmem:[%s9748_s1 + $0x190] sm:$0xf]  ;;  %9916 = vst [vmem:[#allocation22_spill] sm:$0xff] %v7007_v46 }
  0xf4   : > { %1717 = vmatpush.bf16.msrb.mxu2 %v6327_v49  ;;  %v5892_v49 = vld [vmem:[%s9748_s1 + $0x18c] sm:$0xf]  ;;  %v4836_v42 = vor.u32 %v5896_v43, %v4835_v41  ;;  %v9915_v41 = vld [vmem:[#allocation30_spill] sm:$0xff]  ;;  %v1086_v43 = vadd.f32 %v6923_v11, %v6921_v6  ;;  %v5893_v5 = vld [vmem:[%s9748_s1 + $0x194] sm:$0xf] }
  0xf5   : > { %v4840_v44 = vor.u32 %v5892_v49, %v4837_v35  ;;  %9902 = vst [vmem:[#allocation20_spill] sm:$0xff] %v6926_v9  ;;  %1740 = vmatpush.bf16.msrb.mxu3 %v9907_v14  ;;  %v6993_v35 = vld [vmem:[%s6165_s20 + $0x78] sm:$0xff]  ;;  %v4845_v6 = vld [vmem:[%s9748_s1 + $0x1b0] sm:$0xf0]  ;;  %v4844_v14 = vor.u32 %v5897_v34, %v4843_v7 }
  0xf6   : > { %1680 = vmatpush.bf16.msrb.mxu0 %v6332_v50  ;;  %v9903_v50 = vld [vmem:[#allocation8_spill] sm:$0xff]  ;;  %1649 = vmatmul.bf16.vlgmr.msra.gmra.mxu2 %v4836_v42  ;;  %v4851_v11 = vld [vmem:[%s9748_s1 + $0x198] sm:$0xf] }
  0xf7   : > { %1699 = vmatpush.bf16.msrb.mxu1 %v9899_v4  ;;  %1668 = vmatmul.bf16.vlgmr.msra.gmra.mxu3 %v4840_v44  ;;  %v6935_v19 = vpop.f32.mrf.mxu3  ;;  %v1087_v55 = vpop.f32.mrf.mxu1  ;;  %v7011_v4 = vld [vmem:[%s6165_s20 + $0xf0] sm:$0xff]  ;;  %v5898_v42 = vld [vmem:[%s9748_s1 + $0x1b4] sm:$0xf0]  ;;  %v5894_v44 = vld [vmem:[%s9748_s1 + $0x19c] sm:$0xf] }
  0xf8   : > { %1718 = vmatpush.bf16.msrb.mxu2 %v9900_v54  ;;  %v6933_v15 = vpop.f32.mrf.mxu2  ;;  %v1068_v39 = vpop.f32.mrf.mxu0  ;;  %9917 = vst [vmem:[#allocation23_spill] sm:$0xff] %v7011_v4  ;;  %v4852_v63 = vor.u32 %v5898_v42, %v4851_v11  ;;  %v4856_v24 = vor.u32 %v5894_v44, %v4853_v8  ;;  %v7120_v7 = vld [vmem:[%s6165_s20 + $0x10] sm:$0xff] }
  0xf9   : > { %v1088_v53 = vadd.f32 %v1087_v55, %v1068_v39  ;;  %1741 = vmatpush.bf16.msrb.mxu3 %v9873_v57  ;;  %v4867_v57 = vld [vmem:[%s9748_s1 + $0x1c8] sm:$0xf]  ;;  %v1105_v54 = vadd.f32 %v6933_v15, %v1086_v43  ;;  %v4848_v15 = vor.u32 %v5893_v5, %v4845_v6  ;;  %v4885_v43 = vld [vmem:[%s9748_s1 + $0x1f8] sm:$0xf0]  ;;  %v7124_v34 = vld [vmem:[%s6165_s20 + $0xd0] sm:$0xff] }
  0xfa   : > { %1681 = vmatpush.bf16.msrb.mxu0 %v9903_v50  ;;  %v4868_v27 = vor.u32 %v5904_v29, %v4867_v57  ;;  %v7034_v50 = vld [vmem:[%s6165_s20 + $0x70] sm:$0xff]  ;;  %v7042_v39 = vld [vmem:[%s6165_s20 + $0x28] sm:$0xff] }
  0xfb   : > { %1700 = vmatpush.bf16.msrb.mxu1 %v9904_v10  ;;  %9918 = vst [vmem:[#allocation24_spill] sm:$0xff] %v7034_v50  ;;  %v7038_v10 = vld [vmem:[%s6165_s20 + $0xb0] sm:$0xff]  ;;  %v7046_v55 = vld [vmem:[%s6165_s20 + $0xe8] sm:$0xff] }
  0xfc   : > { %1719 = vmatpush.bf16.msrb.mxu2 %v9905_v12  ;;  %9919 = vst [vmem:[#allocation27_spill] sm:$0xff] %v7038_v10  ;;  %v7053_v57 = vld [vmem:[%s6165_s20 + $0x68] sm:$0xff]  ;;  %v7132_v5 = vld [vmem:[%s6165_s20 + $0x90] sm:$0xff] }
  0xfd   : > { %1742 = vmatpush.bf16.msrb.mxu3 %v9877_v47  ;;  %9920 = vst [vmem:[#allocation25_spill] sm:$0xff] %v7042_v39  ;;  %v7057_v29 = vld [vmem:[%s6165_s20 + $0xa8] sm:$0xff] }
  0xfe   : > { %1682 = vmatpush.bf16.msrb.mxu0 %v9906_v13 }
  0xff   : > { %1701 = vmatpush.bf16.msrb.mxu1 %v9908_v37  ;;  %v1125_v21 = vpop.f32.mrf.mxu3  ;;  %v1090_v26 = vpop.f32.mrf.mxu1 }
 0x100   : > { %1720 = vmatpush.bf16.msrb.mxu2 %v9909_v62  ;;  %v1106_v20 = vpop.f32.mrf.mxu2  ;;  %v1071_v58 = vpop.f32.mrf.mxu0 }
 0x101   : > { %v1107_v28 = vadd.f32 %v1106_v20, %v1088_v53  ;;  %v1091_v3 = vadd.f32 %v1090_v26, %v1071_v58  ;;  %1743 = vmatpush.bf16.msrb.mxu3 %v9887_v30  ;;  %1616 = vmatmul.bf16.gmra.mxu0 %v4860_v22  ;;  %v1124_v53 = vadd.f32 %v6935_v19, %v1105_v54  ;;  %v7062_v19 = vld [vmem:[%s6165_s20 + $0x20] sm:$0xff]  ;;  %v7128_v54 = vld [vmem:[%s6165_s20 + $0x50] sm:$0xff] }
 0x102   : > { %1683 = vmatpush.bf16.msrb.mxu0 %v9910_v51  ;;  %1635 = vmatmul.bf16.gmra.mxu1 %v4864_v23  ;;  %v7070_v20 = vld [vmem:[%s6165_s20 + $0x60] sm:$0xff] }
 0x103   : > { %1702 = vmatpush.bf16.msrb.mxu1 %v9871_v60  ;;  %v9912_v60 = vld [vmem:[#allocation28_spill] sm:$0xff] }
 0x104   : > { %1721 = vmatpush.bf16.msrb.mxu2 %v9872_v59  ;;  %v6971_v59 = vadd.f32 %v1125_v21, %v1107_v28  ;;  %v7074_v21 = vld [vmem:[%s6165_s20 + $0xa0] sm:$0xff] }
 0x106   : > { %1684 = vmatpush.bf16.msrb.mxu0 %v9874_v56  ;;  %1654 = vmatmul.bf16.gmra.mxu2 %v4868_v27  ;;  %v9911_v56 = vld [vmem:[#allocation26_spill] sm:$0xff] }
 0x107   : > { %1703 = vmatpush.bf16.msrb.mxu1 %v9875_v61  ;;  %1673 = vmatmul.bf16.gmra.mxu3 %v4872_v36  ;;  %v6979_v61 = vld [vmem:[%s6165_s20 + $0xf8] sm:$0xff]  ;;  %v1128_v47 = vpop.f32.mrf.mxu3  ;;  %v1092_v32 = vpop.f32.mrf.mxu1 }
 0x108   : > { %1722 = vmatpush.bf16.msrb.mxu2 %v9876_v40  ;;  %9913 = vst [vmem:[#allocation21_spill] sm:$0xff] %v6979_v61  ;;  %1933 = vmatpush.bf16.msra.mxu3 %v6979_v61  ;;  %v1109_v40 = vpop.f32.mrf.mxu2  ;;  %v7079_v36 = vld [vmem:[%s6165_s20 + $0x18] sm:$0xff] }
 0x109   : > { %v1110_v30 = vadd.f32 %v1109_v40, %v1091_v3  ;;  %v7083_v3 = vld [vmem:[%s6165_s20 + $0xd8] sm:$0xff] }
 0x10a   : > { %1685 = vmatpush.bf16.msrb.mxu0 %v9878_v48  ;;  %v6983_v48 = vld [vmem:[%s6165_s20 + $0x38] sm:$0xff] }
 0x10b   : > { %1704 = vmatpush.bf16.msrb.mxu1 %v9888_v31  ;;  %v1073_v31 = vpop.f32.mrf.mxu0  ;;  %v6990_v49 = vadd.f32 %v1128_v47, %v1110_v30  ;;  %v7091_v40 = vld [vmem:[%s6165_s20 + $0x98] sm:$0xff]  ;;  %v4875_v47 = vld [vmem:[%s9748_s1 + $0x1d0] sm:$0xf] }
 0x10c   : > { %1723 = vmatpush.bf16.msrb.mxu2 %v9911_v56  ;;  %v1093_v33 = vadd.f32 %v1092_v32, %v1073_v31  ;;  %1934 = vmatpush.bf16.msra.mxu3 %v7011_v4  ;;  %v5905_v30 = vld [vmem:[%s9748_s1 + $0x1ec] sm:$0xf0]  ;;  %v5901_v31 = vld [vmem:[%s9748_s1 + $0x1d4] sm:$0xf] }
 0x10d   : > { %v4877_v32 = vld [vmem:[%s9748_s1 + $0x1f0] sm:$0xf0]  ;;  %v4876_v42 = vor.u32 %v5905_v30, %v4875_v47  ;;  %v7180_v30 = vld [vmem:[%s6165_s20 + $0x1b8] sm:$0xff] }
 0x10e   : > { %1686 = vmatpush.bf16.msrb.mxu0 %v9912_v60  ;;  %v7087_v60 = vld [vmem:[%s6165_s20 + $0x58] sm:$0xff]  ;;  %v4880_v44 = vor.u32 %v5901_v31, %v4877_v32 }
 0x10f   : > { %1705 = vmatpush.bf16.msrb.mxu1 %v9914_v38  ;;  %v1130_v13 = vpop.f32.mrf.mxu3  ;;  %v1161_v51 = vpop.f32.mrf.mxu1  ;;  %v5906_v38 = vld [vmem:[%s9748_s1 + $0x1f4] sm:$0xf0] }
 0x110   : > { %1724 = vmatpush.bf16.msrb.mxu2 %v9915_v41  ;;  %v1111_v12 = vpop.f32.mrf.mxu2  ;;  %1935 = vmatpush.bf16.msra.mxu3 %v7046_v55  ;;  %v5902_v41 = vld [vmem:[%s9748_s1 + $0x1dc] sm:$0xf] }
 0x111   : > { %v1112_v37 = vadd.f32 %v1111_v12, %v1093_v33  ;;  %1687 = vmatmul.bf16.vlgmr.msrb.gmra.mxu0 %v4844_v14  ;;  %v4883_v33 = vld [vmem:[%s9748_s1 + $0x1d8] sm:$0xf] }
 0x112   : > { %1876 = vmatpush.bf16.msra.mxu0 %v6983_v48  ;;  %1706 = vmatmul.bf16.vlgmr.msrb.gmra.mxu1 %v4848_v15  ;;  %v4884_v14 = vor.u32 %v5906_v38, %v4883_v33  ;;  %v4888_v15 = vor.u32 %v5902_v41, %v4885_v43  ;;  %v4909_v38 = vld [vmem:[%s9748_s1 + $0x200] sm:$0xf]  ;;  %v7194_v43 = vld [vmem:[%s6165_s20 + $0x130] sm:$0xff] }
 0x113   : > { %1895 = vmatpush.bf16.msra.mxu1 %v6993_v35  ;;  %v1142_v62 = vpop.f32.mrf.mxu0  ;;  %v7050_v0 = vadd.f32 %v1130_v13, %v1112_v37  ;;  %v7137_v37 = vld [vmem:[%s6165_s20 + $0x8] sm:$0xff]  ;;  %v5911_v41 = vld [vmem:[%s9748_s1 + $0x21c] sm:$0xf0] }
 0x114   : > { %1914 = vmatpush.bf16.msra.mxu2 %v6997_v2  ;;  %v1143_v1 = vadd.f32 %v1142_v62, %v1124_v53  ;;  %1936 = vmatpush.bf16.msra.mxu3 %v7066_v17  ;;  %v7141_v62 = vld [vmem:[%s6165_s20 + $0xc8] sm:$0xff] }
 0x116   : > { %1877 = vmatpush.bf16.msra.mxu0 %v7007_v46  ;;  %1725 = vmatmul.bf16.vlgmr.msrb.gmra.mxu2 %v4852_v63  ;;  %v1162_v18 = vadd.f32 %v1161_v51, %v1143_v1  ;;  %v7147_v63 = vld [vmem:[%s6165_s20 + $0x48] sm:$0xff]  ;;  %v7156_v1 = vld [vmem:[%s6165_s20] sm:$0xff] }
 0x117   : > { %1896 = vmatpush.bf16.msra.mxu1 %v7034_v50  ;;  %4889 = vmatmul.msk.bf16.vlgmr.msrb.gmra.mxu3 %vm789_vm1, %v4856_v24  ;;  %v1199_v23 = vpop.f32.mrf.mxu3  ;;  %v1163_v26 = vpop.f32.mrf.mxu1  ;;  %v7151_v24 = vld [vmem:[%s6165_s20 + $0x88] sm:$0xff] }
 0x118   : > { %1915 = vmatpush.bf16.msra.mxu2 %v7038_v10  ;;  %v1180_v22 = vpop.f32.mrf.mxu2  ;;  %1937 = vmatpush.bf16.msra.mxu3 %v7083_v3 }
 0x119   : > { %v1181_v28 = vadd.f32 %v1180_v22, %v1162_v18  ;;  %v7160_v18 = vld [vmem:[%s6165_s20 + $0xc0] sm:$0xff] }
 0x11a   : > { %1878 = vmatpush.bf16.msra.mxu0 %v7042_v39  ;;  %v7164_v22 = vld [vmem:[%s6165_s20 + $0x40] sm:$0xff] }
 0x11b   : > { %1897 = vmatpush.bf16.msra.mxu1 %v7053_v57  ;;  %v1144_v58 = vpop.f32.mrf.mxu0  ;;  %v1200_v56 = vadd.f32 %v1199_v23, %v1181_v28  ;;  %v7168_v23 = vld [vmem:[%s6165_s20 + $0x80] sm:$0xff] }
 0x11c   : > { %1916 = vmatpush.bf16.msra.mxu2 %v7057_v29  ;;  %v1145_v27 = vadd.f32 %v1144_v58, %v6971_v59  ;;  %1938 = vmatpush.bf16.msra.mxu3 %v7124_v34 }
 0x11d   : > { %1213 = vrot.lane.b32.xlu0 %v1200_v56, %s6119_s9 }
 0x11e   : > { %1879 = vmatpush.bf16.msra.mxu0 %v7062_v19  ;;  %v1164_v59 = vadd.f32 %v1163_v26, %v1145_v27  ;;  %v7172_v26 = vld [vmem:[%s6165_s20 + $0x138] sm:$0xff] }
 0x11f   : > { %1898 = vmatpush.bf16.msra.mxu1 %v7070_v20  ;;  %v1201_v11 = vpop.f32.mrf.mxu3  ;;  %v1166_v13 = vpop.f32.mrf.mxu1  ;;  %v7176_v27 = vld [vmem:[%s6165_s20 + $0x178] sm:$0xff] }
 0x120   : > { %1917 = vmatpush.bf16.msra.mxu2 %v7074_v21  ;;  %v1182_v6 = vpop.f32.mrf.mxu2  ;;  %1939 = vmatpush.bf16.msra.mxu3 %v7141_v62 }
 0x121   : > { %v1183_v8 = vadd.f32 %v1182_v6, %v1164_v59  ;;  %1692 = vmatmul.bf16.gmra.mxu0 %v4876_v42  ;;  %v7198_v6 = vld [vmem:[%s6165_s20 + $0x170] sm:$0xff]  ;;  %v4917_v42 = vld [vmem:[%s9748_s1 + $0x208] sm:$0xf] }
 0x122   : > { %1880 = vmatpush.bf16.msra.mxu0 %v7079_v36  ;;  %1711 = vmatmul.bf16.gmra.mxu1 %v4880_v44  ;;  %9923 = vst [vmem:[#allocation4_spill] sm:$0xff] %v7198_v6  ;;  %v7211_v44 = vld [vmem:[%s6165_s20 + $0x1b0] sm:$0xff] }
 0x123   : > { %1899 = vmatpush.bf16.msra.mxu1 %v7087_v60  ;;  %v1147_v12 = vpop.f32.mrf.mxu0  ;;  %v7144_v51 = vadd.f32 %v1201_v11, %v1183_v8  ;;  %v4911_v11 = vld [vmem:[%s9748_s1 + $0x220] sm:$0xf0]  ;;  %9924 = vst [vmem:[#allocation5_spill] sm:$0xff] %v7211_v44  ;;  %v7215_v8 = vld [vmem:[%s6165_s20 + $0x1e8] sm:$0xff] }
 0x124   : > { %1918 = vmatpush.bf16.msra.mxu2 %v7091_v40  ;;  %v1148_v53 = vadd.f32 %v1147_v12, %v6990_v49  ;;  %1940 = vmatpush.bf16.msra.mxu3 %v7160_v18  ;;  %9925 = vst [vmem:[#allocation6_spill] sm:$0xff] %v7215_v8  ;;  %v5912_v12 = vld [vmem:[%s9748_s1 + $0x224] sm:$0xf0] }
 0x125   : > { %9921 = vst [vmem:[#allocation2_spill] sm:$0xff] %v7144_v51  ;;  %v4918_v9 = vor.u32 %v5912_v12, %v4917_v42  ;;  %v7258_v42 = vld [vmem:[%s6165_s20 + $0x1a0] sm:$0xff]  ;;  %v7262_v12 = vld [vmem:[%s6165_s20 + $0x1d8] sm:$0xff]  ;;  %v5916_v51 = vld [vmem:[%s9748_s1 + $0x24c] sm:$0xf] }
 0x126   : > { %1881 = vmatpush.bf16.msra.mxu0 %v7120_v7  ;;  %v1167_v49 = vadd.f32 %v1166_v13, %v1148_v53  ;;  %1730 = vmatmul.bf16.gmra.mxu2 %v4884_v14  ;;  %v5908_v13 = vld [vmem:[%s9748_s1 + $0x20c] sm:$0xf]  ;;  %9933 = vst [vmem:[#allocation13_spill] sm:$0xff] %v7258_v42 }
 0x127   : > { %1900 = vmatpush.bf16.msra.mxu1 %v7128_v54  ;;  %4890 = vmatmul.msk.bf16.gmra.mxu3 %vm789_vm1, %v4888_v15  ;;  %v1204_v58 = vpop.f32.mrf.mxu3  ;;  %v1168_v47 = vpop.f32.mrf.mxu1  ;;  %v4919_v14 = vld [vmem:[%s9748_s1 + $0x228] sm:$0xf0]  ;;  %9934 = vst [vmem:[#allocation14_spill] sm:$0xff] %v7262_v12 }
 0x128   : > { %1919 = vmatpush.bf16.msra.mxu2 %v7132_v5  ;;  %v1185_v28 = vpop.f32.mrf.mxu2  ;;  %2010 = vmatpush.bf16.msrb.mxu3 %v6337_v52  ;;  %v4922_v25 = vor.u32 %v5908_v13, %v4919_v14 }
 0x129   : > { %v1186_v56 = vadd.f32 %v1185_v28, %v1167_v49  ;;  %v4910_v49 = vor.u32 %v5911_v41, %v4909_v38  ;;  %v7240_v38 = vld [vmem:[%s6165_s20 + $0x1a8] sm:$0xff]  ;;  %v7244_v41 = vld [vmem:[%s6165_s20 + $0x1e0] sm:$0xff] }
 0x12a   : > { %1882 = vmatpush.bf16.msra.mxu0 %v7137_v37  ;;  %9928 = vst [vmem:[#allocation8_spill] sm:$0xff] %v7240_v38 }
 0x12b   : > { %1901 = vmatpush.bf16.msra.mxu1 %v7147_v63  ;;  %v1149_v59 = vpop.f32.mrf.mxu0  ;;  %v7185_v32 = vadd.f32 %v1204_v58, %v1186_v56  ;;  %v7228_v58 = vld [vmem:[%s6165_s20 + $0x128] sm:$0xff]  ;;  %9929 = vst [vmem:[#allocation9_spill] sm:$0xff] %v7244_v41 }
 0x12c   : > { %1920 = vmatpush.bf16.msra.mxu2 %v7151_v24  ;;  %v1150_v31 = vadd.f32 %v1149_v59, %v7050_v0  ;;  %v5907_v0 = vld [vmem:[%s9748_s1 + $0x204] sm:$0xf]  ;;  %2011 = vmatpush.bf16.msrb.mxu3 %v7215_v8  ;;  %9926 = vst [vmem:[#allocation7_spill] sm:$0xff] %v7228_v58  ;;  %v7232_v56 = vld [vmem:[%s6165_s20 + $0x168] sm:$0xff] }
 0x12d   : > { %9922 = vst [vmem:[#allocation3_spill] sm:$0xff] %v7185_v32  ;;  %v4914_v28 = vor.u32 %v5907_v0, %v4911_v11  ;;  %v7254_v11 = vld [vmem:[%s6165_s20 + $0x160] sm:$0xff]  ;;  %v5920_v32 = vld [vmem:[%s9748_s1 + $0x264] sm:$0xf0] }
 0x12e   : > { %1883 = vmatpush.bf16.msra.mxu0 %v7156_v1  ;;  %v1169_v33 = vadd.f32 %v1168_v47, %v1150_v31  ;;  %9927 = vst [vmem:[#allocation11_spill] sm:$0xff] %v7232_v56 }
 0x12f   : > { %1902 = vmatpush.bf16.msra.mxu1 %v7164_v22  ;;  %v1206_v53 = vpop.f32.mrf.mxu3  ;;  %v7237_v31 = vpop.f32.mrf.mxu1  ;;  %9932 = vst [vmem:[#allocation15_spill] sm:$0xff] %v7254_v11 }
 0x130   : > { %1921 = vmatpush.bf16.msra.mxu2 %v7168_v23  ;;  %v1187_v15 = vpop.f32.mrf.mxu2  ;;  %2012 = vmatpush.bf16.msrb.mxu3 %v7244_v41 }
 0x131   : > { %v1188_v59 = vadd.f32 %v1187_v15, %v1169_v33  ;;  %1884 = vmatmul.bf16.vlgmr.msra.gmra.mxu0 %v4910_v49  ;;  %v7250_v33 = vld [vmem:[%s6165_s20 + $0x120] sm:$0xff]  ;;  %v7274_v49 = vld [vmem:[%s6165_s20 + $0x158] sm:$0xff] }
 0x132   : > { %1952 = vmatpush.bf16.msrb.mxu0 %v7172_v26  ;;  %1903 = vmatmul.bf16.vlgmr.msra.gmra.mxu1 %v4914_v28  ;;  %9931 = vst [vmem:[#allocation12_spill] sm:$0xff] %v7250_v33  ;;  %v7278_v28 = vld [vmem:[%s6165_s20 + $0x198] sm:$0xff] }
 0x133   : > { %1971 = vmatpush.bf16.msrb.mxu1 %v7176_v27  ;;  %v7235_v47 = vpop.f32.mrf.mxu0  ;;  %v7247_v0 = vadd.f32 %v1206_v53, %v1188_v59  ;;  %v7270_v53 = vld [vmem:[%s6165_s20 + $0x118] sm:$0xff]  ;;  %9936 = vst [vmem:[#allocation26_spill] sm:$0xff] %v7274_v49  ;;  %v7282_v59 = vld [vmem:[%s6165_s20 + $0x1d0] sm:$0xff] }
 0x134   : > { %1990 = vmatpush.bf16.msrb.mxu2 %v7180_v30  ;;  %2013 = vmatpush.bf16.msrb.mxu3 %v7262_v12  ;;  %9935 = vst [vmem:[#allocation16_spill] sm:$0xff] %v7270_v53  ;;  %v7318_v12 = vld [vmem:[%s6165_s20 + $0x190] sm:$0xff] }
 0x135   : > { %9930 = vst [vmem:[#allocation10_spill] sm:$0xff] %v7247_v0  ;;  %v4949_v0 = vld [vmem:[%s9748_s1 + $0x248] sm:$0xf] }
 0x136   : > { %1953 = vmatpush.bf16.msrb.mxu0 %v7194_v43  ;;  %1922 = vmatmul.bf16.vlgmr.msra.gmra.mxu2 %v4918_v9  ;;  %9937 = vst [vmem:[#allocation28_spill] sm:$0xff] %v7278_v28 }
 0x137   : > { %1972 = vmatpush.bf16.msrb.mxu1 %v7198_v6  ;;  %1941 = vmatmul.bf16.vlgmr.msra.gmra.mxu3 %v4922_v25  ;;  %v7267_v9 = vpop.f32.mrf.mxu3  ;;  %v1360_v14 = vpop.f32.mrf.mxu1  ;;  %9938 = vst [vmem:[#allocation29_spill] sm:$0xff] %v7282_v59 }
 0x138   : > { %1991 = vmatpush.bf16.msrb.mxu2 %v7211_v44  ;;  %v7265_v25 = vpop.f32.mrf.mxu2  ;;  %2014 = vmatpush.bf16.msrb.mxu3 %v7282_v59  ;;  %v4951_v59 = vld [vmem:[%s9748_s1 + $0x268] sm:$0xf0]  ;;  %9941 = vst [vmem:[#allocation32_spill] sm:$0xff] %v7318_v12 }
 0x139   : > { %v7326_v44 = vld [vmem:[%s6165_s20 + $0x108] sm:$0xff] }
 0x13a   : > { %1954 = vmatpush.bf16.msrb.mxu0 %v7228_v58  ;;  %v4950_v58 = vor.u32 %v5920_v32, %v4949_v0  ;;  %v7348_v32 = vld [vmem:[%s6165_s20 + $0x140] sm:$0xff] }
 0x13b   : > { %1973 = vmatpush.bf16.msrb.mxu1 %v7232_v56  ;;  %v1341_v13 = vpop.f32.mrf.mxu0 }
 0x13c   : > { %1992 = vmatpush.bf16.msrb.mxu2 %v7240_v38  ;;  %v1361_v15 = vadd.f32 %v1360_v14, %v1341_v13  ;;  %v4941_v13 = vld [vmem:[%s9748_s1 + $0x240] sm:$0xf] }
 0x13d   : > { %v5919_v14 = vld [vmem:[%s9748_s1 + $0x25c] sm:$0xf0] }
 0x13e   : > { %1955 = vmatpush.bf16.msrb.mxu0 %v7250_v33  ;;  %v4942_v33 = vor.u32 %v5919_v14, %v4941_v13  ;;  %v5914_v13 = vld [vmem:[%s9748_s1 + $0x234] sm:$0xf0]  ;;  %v4935_v14 = vld [vmem:[%s9748_s1 + $0x238] sm:$0xf0] }
 0x13f   : > { %1974 = vmatpush.bf16.msrb.mxu1 %v7254_v11  ;;  %v1398_v11 = vpop.f32.mrf.mxu3  ;;  %v1363_v56 = vpop.f32.mrf.mxu1 }
 0x140   : > { %1993 = vmatpush.bf16.msrb.mxu2 %v7258_v42  ;;  %v1379_v42 = vpop.f32.mrf.mxu2 }
 0x141   : > { %v1380_v41 = vadd.f32 %v1379_v42, %v1361_v15  ;;  %1889 = vmatmul.bf16.gmra.mxu0 %v4942_v33  ;;  %v1359_v42 = vadd.f32 %v7237_v31, %v7235_v47  ;;  %v5909_v47 = vld [vmem:[%s9748_s1 + $0x214] sm:$0xf] }
 0x142   : > { %1956 = vmatpush.bf16.msrb.mxu0 %v7270_v53  ;;  %v7322_v53 = vld [vmem:[%s6165_s20 + $0x1c8] sm:$0xff]  ;;  %v4927_v31 = vld [vmem:[%s9748_s1 + $0x230] sm:$0xf0] }
 0x143   : > { %1975 = vmatpush.bf16.msrb.mxu1 %v7274_v49  ;;  %v7314_v49 = vld [vmem:[%s6165_s20 + $0x150] sm:$0xff]  ;;  %9942 = vst [vmem:[#allocation33_spill] sm:$0xff] %v7322_v53  ;;  %2015 = vmatpush.bf16.msrb.mxu3 %v7322_v53  ;;  %v1344_v38 = vpop.f32.mrf.mxu0  ;;  %v7330_v53 = vld [vmem:[%s6165_s20 + $0x148] sm:$0xff] }
 0x144   : > { %1994 = vmatpush.bf16.msrb.mxu2 %v7278_v28  ;;  %v7310_v28 = vld [vmem:[%s6165_s20 + $0x110] sm:$0xff]  ;;  %9940 = vst [vmem:[#allocation31_spill] sm:$0xff] %v7314_v49  ;;  %v1364_v8 = vadd.f32 %v1363_v56, %v1344_v38  ;;  %v7352_v56 = vld [vmem:[%s6165_s20 + $0x180] sm:$0xff] }
 0x145   : > { %9939 = vst [vmem:[#allocation30_spill] sm:$0xff] %v7310_v28 }
 0x146   : > { %1957 = vmatpush.bf16.msrb.mxu0 %v7310_v28  ;;  %v4946_v28 = vor.u32 %v5915_v16, %v4943_v45  ;;  %v7336_v45 = vld [vmem:[%s6165_s20 + $0x188] sm:$0xff]  ;;  %v7340_v16 = vld [vmem:[%s6165_s20 + $0x1c0] sm:$0xff]  ;;  %1927 = vmatmul.bf16.gmra.mxu2 %v4950_v58 }
 0x147   : > { %1976 = vmatpush.bf16.msrb.mxu1 %v7314_v49  ;;  %v4954_v49 = vor.u32 %v5916_v51, %v4951_v59  ;;  %2016 = vmatpush.bf16.msrb.mxu3 %v7340_v16  ;;  %v7344_v51 = vld [vmem:[%s6165_s20 + $0x100] sm:$0xff]  ;;  %v1365_v33 = vpop.f32.mrf.mxu1  ;;  %v4933_v59 = vld [vmem:[%s9748_s1 + $0x218] sm:$0xf] }
 0x148   : > { %1995 = vmatpush.bf16.msrb.mxu2 %v7318_v12  ;;  %v7333_v12 = vadd.f32 %v1398_v11, %v1380_v41  ;;  %1908 = vmatmul.bf16.gmra.mxu1 %v4946_v28  ;;  %v1382_v38 = vpop.f32.mrf.mxu2  ;;  %v1401_v41 = vpop.f32.mrf.mxu3  ;;  %v1378_v28 = vadd.f32 %v7265_v25, %v1359_v42  ;;  %v5910_v25 = vld [vmem:[%s9748_s1 + $0x21c] sm:$0xf] }
 0x149   : > { %1946 = vmatmul.bf16.gmra.mxu3 %v4954_v49  ;;  %v1383_v58 = vadd.f32 %v1382_v38, %v1364_v8  ;;  %v4925_v49 = vld [vmem:[%s9748_s1 + $0x210] sm:$0xf] }
 0x14a   : > { %1958 = vmatpush.bf16.msrb.mxu0 %v7326_v44  ;;  %v5913_v8 = vld [vmem:[%s9748_s1 + $0x22c] sm:$0xf0] }
 0x14b   : > { %1977 = vmatpush.bf16.msrb.mxu1 %v7330_v53  ;;  %v1346_v0 = vpop.f32.mrf.mxu0  ;;  %2206 = vmatpush.bf16.msra.mxu3 %v6979_v61  ;;  %v7361_v15 = vadd.f32 %v1401_v41, %v1383_v58  ;;  %v4926_v58 = vor.u32 %v5913_v8, %v4925_v49 }
 0x14c   : > { %1996 = vmatpush.bf16.msrb.mxu2 %v7336_v45  ;;  %v1366_v11 = vadd.f32 %v1365_v33, %v1346_v0  ;;  %v4930_v0 = vor.u32 %v5909_v47, %v4927_v31  ;;  %v1397_v33 = vadd.f32 %v7267_v9, %v1378_v28  ;;  %v4959_v31 = vld [vmem:[%s9748_s1 + $0x270] sm:$0xf0] }
 0x14e   : > { %1959 = vmatpush.bf16.msrb.mxu0 %v7344_v51 }
 0x14f   : > { %1978 = vmatpush.bf16.msrb.mxu1 %v7348_v32  ;;  %2207 = vmatpush.bf16.msra.mxu3 %v7011_v4 }
 0x150   : > { %1997 = vmatpush.bf16.msrb.mxu2 %v7352_v56  ;;  %v1384_v38 = vpop.f32.mrf.mxu2  ;;  %v1403_v41 = vpop.f32.mrf.mxu3 }
 0x151   : > { %v1385_v42 = vadd.f32 %v1384_v38, %v1366_v11  ;;  %1960 = vmatmul.bf16.vlgmr.msrb.gmra.mxu0 %v4926_v58 }
 0x152   : > { %2149 = vmatpush.bf16.msra.mxu0 %v6983_v48 }
 0x153   : > { %2168 = vmatpush.bf16.msra.mxu1 %v6993_v35  ;;  %v1415_v4 = vpop.f32.mrf.mxu0  ;;  %2208 = vmatpush.bf16.msra.mxu3 %v7046_v55  ;;  %v7397_v61 = vadd.f32 %v1403_v41, %v1385_v42 }
 0x154   : > { %2187 = vmatpush.bf16.msra.mxu2 %v6997_v2 }
 0x156   : > { %2150 = vmatpush.bf16.msra.mxu0 %v7007_v46  ;;  %v4938_v46 = vor.u32 %v5910_v25, %v4935_v14  ;;  %v5918_v25 = vld [vmem:[%s9748_s1 + $0x25c] sm:$0xf] }
 0x157   : > { %2169 = vmatpush.bf16.msra.mxu1 %v7034_v50  ;;  %v4934_v50 = vor.u32 %v5914_v13, %v4933_v59  ;;  %2209 = vmatpush.bf16.msra.mxu3 %v7066_v17  ;;  %v4965_v59 = vld [vmem:[%s9748_s1 + $0x258] sm:$0xf]  ;;  %v4967_v14 = vld [vmem:[%s9748_s1 + $0x278] sm:$0xf0] }
 0x158   : > { %2188 = vmatpush.bf16.msra.mxu2 %v7038_v10  ;;  %v1434_v10 = vpop.f32.mrf.mxu1  ;;  %1979 = vmatmul.bf16.vlgmr.msrb.gmra.mxu1 %v4930_v0  ;;  %v1453_v11 = vpop.f32.mrf.mxu2  ;;  %v5922_v13 = vld [vmem:[%s9748_s1 + $0x274] sm:$0xf0] }
 0x159   : > { %1998 = vmatmul.bf16.vlgmr.msrb.gmra.mxu2 %v4934_v50  ;;  %4971 = vmatmul.msk.bf16.vlgmr.msrb.gmra.mxu3 %vm789_vm1, %v4938_v46  ;;  %v1472_v49 = vpop.f32.mrf.mxu3 }
 0x15a   : > { %2151 = vmatpush.bf16.msra.mxu0 %v7042_v39  ;;  %v1416_v39 = vadd.f32 %v1415_v4, %v1397_v33 }
 0x15b   : > { %2170 = vmatpush.bf16.msra.mxu1 %v7053_v57  ;;  %v1417_v4 = vpop.f32.mrf.mxu0  ;;  %2210 = vmatpush.bf16.msra.mxu3 %v7083_v3 }
 0x15c   : > { %2189 = vmatpush.bf16.msra.mxu2 %v7057_v29  ;;  %v1435_v9 = vadd.f32 %v1434_v10, %v1416_v39  ;;  %v1418_v47 = vadd.f32 %v1417_v4, %v7333_v12  ;;  %v4957_v10 = vld [vmem:[%s9748_s1 + $0x250] sm:$0xf]  ;;  %v5917_v12 = vld [vmem:[%s9748_s1 + $0x254] sm:$0xf] }
 0x15d   : > { %v5921_v39 = vld [vmem:[%s9748_s1 + $0x26c] sm:$0xf0]  ;;  %v4962_v0 = vor.u32 %v5917_v12, %v4959_v31 }
 0x15e   : > { %2152 = vmatpush.bf16.msra.mxu0 %v7062_v19  ;;  %v1454_v8 = vadd.f32 %v1453_v11, %v1435_v9  ;;  %v4958_v58 = vor.u32 %v5921_v39, %v4957_v10  ;;  %v4966_v11 = vor.u32 %v5922_v13, %v4965_v59  ;;  %v4991_v59 = vld [vmem:[%s9748_s1 + $0x280] sm:$0xf] }
 0x15f   : > { %2171 = vmatpush.bf16.msra.mxu1 %v7070_v20  ;;  %2211 = vmatpush.bf16.msra.mxu3 %v7124_v34  ;;  %v5927_v13 = vld [vmem:[%s9748_s1 + $0x29c] sm:$0xf0] }
 0x160   : > { %2190 = vmatpush.bf16.msra.mxu2 %v7074_v21  ;;  %v1436_v28 = vpop.f32.mrf.mxu1  ;;  %v1473_v46 = vadd.f32 %v1472_v49, %v1454_v8  ;;  %v1455_v38 = vpop.f32.mrf.mxu2  ;;  %v4970_v49 = vor.u32 %v5918_v25, %v4967_v14  ;;  %v9945_v25 = vld [vmem:[#allocation5_spill] sm:$0xff]  ;;  %v4993_v14 = vld [vmem:[%s9748_s1 + $0x2a0] sm:$0xf0] }
 0x161   : > { %v1437_v50 = vadd.f32 %v1436_v28, %v1418_v47  ;;  %v1474_v41 = vpop.f32.mrf.mxu3  ;;  %1965 = vmatmul.bf16.gmra.mxu0 %v4958_v58  ;;  %v5928_v58 = vld [vmem:[%s9748_s1 + $0x2a4] sm:$0xf0] }
 0x162   : > { %2153 = vmatpush.bf16.msra.mxu0 %v7079_v36  ;;  %1486 = vrot.lane.b32.xlu0 %v1473_v46, %s6120_s7 }
 0x163   : > { %2172 = vmatpush.bf16.msra.mxu1 %v7087_v60  ;;  %v1456_v33 = vadd.f32 %v1455_v38, %v1437_v50  ;;  %v1420_v42 = vpop.f32.mrf.mxu0  ;;  %2212 = vmatpush.bf16.msra.mxu3 %v7141_v62  ;;  %v4999_v38 = vld [vmem:[%s9748_s1 + $0x288] sm:$0xf] }
 0x164   : > { %2191 = vmatpush.bf16.msra.mxu2 %v7091_v40  ;;  %v1421_v8 = vadd.f32 %v1420_v42, %v7361_v15  ;;  %v9947_v42 = vld [vmem:[#allocation7_spill] sm:$0xff] }
 0x165   : > { %v7442_v4 = vadd.f32 %v1474_v41, %v1456_v33  ;;  %v9946_v41 = vld [vmem:[#allocation6_spill] sm:$0xff]  ;;  %v5001_v33 = vld [vmem:[%s9748_s1 + $0x2a8] sm:$0xf0] }
 0x166   : > { %2154 = vmatpush.bf16.msra.mxu0 %v7120_v7 }
 0x167   : > { %2173 = vmatpush.bf16.msra.mxu1 %v7128_v54  ;;  %9943 = vst [vmem:[#allocation34_spill] sm:$0xff] %v7442_v4  ;;  %2213 = vmatpush.bf16.msra.mxu3 %v7160_v18 }
 0x168   : > { %2192 = vmatpush.bf16.msra.mxu2 %v7132_v5  ;;  %v1439_v9 = vpop.f32.mrf.mxu1  ;;  %1984 = vmatmul.bf16.gmra.mxu1 %v4962_v0  ;;  %v1458_v15 = vpop.f32.mrf.mxu2  ;;  %v5924_v0 = vld [vmem:[%s9748_s1 + $0x28c] sm:$0xf] }
 0x169   : > { %v1440_v28 = vadd.f32 %v1439_v9, %v1421_v8  ;;  %2003 = vmatmul.bf16.gmra.mxu2 %v4966_v11  ;;  %4972 = vmatmul.msk.bf16.gmra.mxu3 %vm789_vm1, %v4970_v49  ;;  %v1477_v47 = vpop.f32.mrf.mxu3  ;;  %v4992_v49 = vor.u32 %v5927_v13, %v4991_v59  ;;  %v9953_v59 = vld [vmem:[#allocation15_spill] sm:$0xff]  ;;  %v9954_v13 = vld [vmem:[#allocation13_spill] sm:$0xff] }
 0x16a   : > { %2155 = vmatpush.bf16.msra.mxu0 %v7137_v37 }
 0x16b   : > { %2174 = vmatpush.bf16.msra.mxu1 %v7147_v63  ;;  %v1459_v46 = vadd.f32 %v1458_v15, %v1440_v28  ;;  %v1422_v50 = vpop.f32.mrf.mxu0  ;;  %2283 = vmatpush.bf16.msrb.mxu3 %v6337_v52  ;;  %v9948_v28 = vld [vmem:[#allocation11_spill] sm:$0xff]  ;;  %v9949_v15 = vld [vmem:[#allocation8_spill] sm:$0xff] }
 0x16c   : > { %2193 = vmatpush.bf16.msra.mxu2 %v7151_v24  ;;  %v1423_v39 = vadd.f32 %v1422_v50, %v7397_v61  ;;  %v5923_v61 = vld [vmem:[%s9748_s1 + $0x284] sm:$0xf] }
 0x16d   : > { %v7455_v12 = vadd.f32 %v1477_v47, %v1459_v46  ;;  %v4996_v8 = vor.u32 %v5923_v61, %v4993_v14  ;;  %v9956_v61 = vld [vmem:[#allocation14_spill] sm:$0xff] }
 0x16e   : > { %2156 = vmatpush.bf16.msra.mxu0 %v7156_v1 }
 0x16f   : > { %2175 = vmatpush.bf16.msra.mxu1 %v7164_v22  ;;  %9944 = vst [vmem:[#allocation35_spill] sm:$0xff] %v7455_v12  ;;  %2284 = vmatpush.bf16.msrb.mxu3 %v9946_v41  ;;  %v9950_v12 = vld [vmem:[#allocation9_spill] sm:$0xff] }
 0x170   : > { %2194 = vmatpush.bf16.msra.mxu2 %v7168_v23  ;;  %v1441_v10 = vpop.f32.mrf.mxu1  ;;  %v1460_v9 = vpop.f32.mrf.mxu2 }
 0x171   : > { %v1442_v31 = vadd.f32 %v1441_v10, %v1423_v39  ;;  %v1479_v11 = vpop.f32.mrf.mxu3  ;;  %v5000_v10 = vor.u32 %v5928_v58, %v4999_v38  ;;  %v5004_v39 = vor.u32 %v5924_v0, %v5001_v33  ;;  %2157 = vmatmul.bf16.vlgmr.msra.gmra.mxu0 %v4992_v49  ;;  %v9959_v49 = vld [vmem:[#allocation30_spill] sm:$0xff] }
 0x172   : > { %2225 = vmatpush.bf16.msrb.mxu0 %v7172_v26 }
 0x173   : > { %2244 = vmatpush.bf16.msrb.mxu1 %v7176_v27  ;;  %v1461_v47 = vadd.f32 %v1460_v9, %v1442_v31  ;;  %v7488_v46 = vpop.f32.mrf.mxu0  ;;  %2285 = vmatpush.bf16.msrb.mxu3 %v9950_v12  ;;  %v9955_v31 = vld [vmem:[#allocation16_spill] sm:$0xff]  ;;  %v9957_v9 = vld [vmem:[#allocation26_spill] sm:$0xff] }
 0x174   : > { %2263 = vmatpush.bf16.msrb.mxu2 %v7180_v30 }
 0x175   : > { %v7493_v4 = vadd.f32 %v1479_v11, %v1461_v47  ;;  %v9958_v11 = vld [vmem:[#allocation28_spill] sm:$0xff]  ;;  %v5023_v47 = vld [vmem:[%s9748_s1 + $0x2c0] sm:$0xf] }
 0x176   : > { %2226 = vmatpush.bf16.msrb.mxu0 %v7194_v43 }
 0x177   : > { %2245 = vmatpush.bf16.msrb.mxu1 %v7198_v6  ;;  %9951 = vst [vmem:[#allocation36_spill] sm:$0xff] %v7493_v4  ;;  %2286 = vmatpush.bf16.msrb.mxu3 %v9956_v61  ;;  %v5936_v4 = vld [vmem:[%s9748_s1 + $0x2e4] sm:$0xf0] }
 0x178   : > { %2264 = vmatpush.bf16.msrb.mxu2 %v9945_v25  ;;  %v7490_v50 = vpop.f32.mrf.mxu1  ;;  %2176 = vmatmul.bf16.vlgmr.msra.gmra.mxu1 %v4996_v8  ;;  %v9960_v8 = vld [vmem:[#allocation29_spill] sm:$0xff] }
 0x179   : > { %2195 = vmatmul.bf16.vlgmr.msra.gmra.mxu2 %v5000_v10  ;;  %2214 = vmatmul.bf16.vlgmr.msra.gmra.mxu3 %v5004_v39  ;;  %v1650_v14 = vpop.f32.mrf.mxu2  ;;  %v5935_v10 = vld [vmem:[%s9748_s1 + $0x2dc] sm:$0xf0]  ;;  %v5931_v39 = vld [vmem:[%s9748_s1 + $0x2c4] sm:$0xf] }
 0x17a   : > { %2227 = vmatpush.bf16.msrb.mxu0 %v9947_v42  ;;  %v9952_v42 = vld [vmem:[#allocation12_spill] sm:$0xff]  ;;  %v7500_v38 = vpop.f32.mrf.mxu3 }
 0x17b   : > { %2246 = vmatpush.bf16.msrb.mxu1 %v9948_v28  ;;  %v1614_v58 = vpop.f32.mrf.mxu0  ;;  %2287 = vmatpush.bf16.msrb.mxu3 %v9960_v8  ;;  %v5033_v8 = vld [vmem:[%s9748_s1 + $0x2e8] sm:$0xf0] }
 0x17c   : > { %2265 = vmatpush.bf16.msrb.mxu2 %v9949_v15 }
 0x17e   : > { %2228 = vmatpush.bf16.msrb.mxu0 %v9952_v42 }
 0x17f   : > { %2247 = vmatpush.bf16.msrb.mxu1 %v9953_v59  ;;  %v5024_v59 = vor.u32 %v5935_v10, %v5023_v47  ;;  %v5930_v47 = vld [vmem:[%s9748_s1 + $0x2b4] sm:$0xf0]  ;;  %v5017_v10 = vld [vmem:[%s9748_s1 + $0x2b8] sm:$0xf0] }
 0x180   : > { %2266 = vmatpush.bf16.msrb.mxu2 %v9954_v13  ;;  %v1633_v0 = vpop.f32.mrf.mxu1 }
 0x181   : > { %v1634_v33 = vadd.f32 %v1633_v0, %v1614_v58  ;;  %v5025_v58 = vld [vmem:[%s9748_s1 + $0x2e0] sm:$0xf0]  ;;  %v5031_v0 = vld [vmem:[%s9748_s1 + $0x2c8] sm:$0xf]  ;;  %v1652_v61 = vpop.f32.mrf.mxu2  ;;  %2162 = vmatmul.bf16.gmra.mxu0 %v5024_v59 }
 0x182   : > { %2229 = vmatpush.bf16.msrb.mxu0 %v9955_v31  ;;  %v9963_v31 = vld [vmem:[#allocation33_spill] sm:$0xff]  ;;  %v1671_v13 = vpop.f32.mrf.mxu3  ;;  %v5028_v42 = vor.u32 %v5931_v39, %v5025_v58  ;;  %v5032_v41 = vor.u32 %v5936_v4, %v5031_v0 }
 0x183   : > { %2248 = vmatpush.bf16.msrb.mxu1 %v9957_v9  ;;  %v9962_v9 = vld [vmem:[#allocation32_spill] sm:$0xff]  ;;  %2288 = vmatpush.bf16.msrb.mxu3 %v9963_v31  ;;  %v1653_v12 = vadd.f32 %v1652_v61, %v1634_v33  ;;  %v1617_v15 = vpop.f32.mrf.mxu0  ;;  %v9965_v61 = vld [vmem:[#allocation22_spill] sm:$0xff]  ;;  %v9968_v33 = vld [vmem:[#allocation23_spill] sm:$0xff] }
 0x184   : > { %2267 = vmatpush.bf16.msrb.mxu2 %v9958_v11  ;;  %v9961_v11 = vld [vmem:[#allocation31_spill] sm:$0xff]  ;;  %v9969_v39 = vld [vmem:[#allocation25_spill] sm:$0xff] }
 0x186   : > { %2230 = vmatpush.bf16.msrb.mxu0 %v9959_v49  ;;  %v5932_v49 = vld [vmem:[%s9748_s1 + $0x2cc] sm:$0xf] }
 0x187   : > { %2249 = vmatpush.bf16.msrb.mxu1 %v9961_v11  ;;  %v5036_v25 = vor.u32 %v5932_v49, %v5033_v8  ;;  %v7536_v11 = vadd.f32 %v1671_v13, %v1653_v12  ;;  %2289 = vmatpush.bf16.msrb.mxu3 %v7340_v16  ;;  %v9964_v12 = vld [vmem:[#allocation21_spill] sm:$0xff] }
 0x188   : > { %2268 = vmatpush.bf16.msrb.mxu2 %v9962_v9  ;;  %v1636_v28 = vpop.f32.mrf.mxu1  ;;  %2181 = vmatmul.bf16.gmra.mxu1 %v5028_v42  ;;  %v5015_v8 = vld [vmem:[%s9748_s1 + $0x298] sm:$0xf] }
 0x189   : > { %v1637_v6 = vadd.f32 %v1636_v28, %v1617_v15  ;;  %2200 = vmatmul.bf16.gmra.mxu2 %v5032_v41  ;;  %2219 = vmatmul.bf16.gmra.mxu3 %v5036_v25  ;;  %v1655_v4 = vpop.f32.mrf.mxu2  ;;  %v1632_v25 = vadd.f32 %v7490_v50, %v7488_v46  ;;  %v5925_v46 = vld [vmem:[%s9748_s1 + $0x294] sm:$0xf] }
 0x18a   : > { %2231 = vmatpush.bf16.msrb.mxu0 %v7326_v44  ;;  %v1674_v28 = vpop.f32.mrf.mxu3  ;;  %v5009_v50 = vld [vmem:[%s9748_s1 + $0x2b0] sm:$0xf0] }
 0x18b   : > { %2250 = vmatpush.bf16.msrb.mxu1 %v7330_v53  ;;  %2479 = vmatpush.bf16.msra.mxu3 %v9964_v12  ;;  %v1656_v15 = vadd.f32 %v1655_v4, %v1637_v6  ;;  %v1619_v13 = vpop.f32.mrf.mxu0  ;;  %v9967_v6 = vld [vmem:[#allocation27_spill] sm:$0xff]  ;;  %v1651_v49 = vadd.f32 %v1650_v14, %v1632_v25  ;;  %v5926_v14 = vld [vmem:[%s9748_s1 + $0x29c] sm:$0xf]  ;;  %v5016_v25 = vor.u32 %v5930_v47, %v5015_v8 }
 0x18c   : > { %2269 = vmatpush.bf16.msrb.mxu2 %v7336_v45 }
 0x18d   : > { %v7548_v41 = vadd.f32 %v1674_v28, %v1656_v15  ;;  %v5012_v28 = vor.u32 %v5925_v46, %v5009_v50  ;;  %v1670_v12 = vadd.f32 %v7500_v38, %v1651_v49 }
 0x18e   : > { %2232 = vmatpush.bf16.msrb.mxu0 %v7344_v51 }
 0x18f   : > { %2251 = vmatpush.bf16.msrb.mxu1 %v7348_v32  ;;  %2480 = vmatpush.bf16.msra.mxu3 %v9968_v33 }
 0x190   : > { %2270 = vmatpush.bf16.msrb.mxu2 %v7352_v56  ;;  %v1638_v59 = vpop.f32.mrf.mxu1 }
 0x191   : > { %v1639_v42 = vadd.f32 %v1638_v59, %v1619_v13  ;;  %v1657_v58 = vpop.f32.mrf.mxu2 }
 0x192   : > { %2422 = vmatpush.bf16.msra.mxu0 %v6983_v48  ;;  %v9966_v48 = vld [vmem:[#allocation24_spill] sm:$0xff]  ;;  %v1676_v0 = vpop.f32.mrf.mxu3 }
 0x193   : > { %2441 = vmatpush.bf16.msra.mxu1 %v6993_v35  ;;  %v5007_v35 = vld [vmem:[%s9748_s1 + $0x290] sm:$0xf]  ;;  %2481 = vmatpush.bf16.msra.mxu3 %v7046_v55  ;;  %v1658_v15 = vadd.f32 %v1657_v58, %v1639_v42  ;;  %v1688_v13 = vpop.f32.mrf.mxu0  ;;  %v9972_v58 = vld [vmem:[#allocation6_spill] sm:$0xff] }
 0x194   : > { %2460 = vmatpush.bf16.msra.mxu2 %v6997_v2  ;;  %v5929_v2 = vld [vmem:[%s9748_s1 + $0x2ac] sm:$0xf0] }
 0x195   : > { %v5008_v4 = vor.u32 %v5929_v2, %v5007_v35 }
 0x196   : > { %2423 = vmatpush.bf16.msra.mxu0 %v9965_v61  ;;  %v5020_v61 = vor.u32 %v5926_v14, %v5017_v10 }
 0x197   : > { %2442 = vmatpush.bf16.msra.mxu1 %v9966_v48  ;;  %v7583_v48 = vadd.f32 %v1676_v0, %v1658_v15  ;;  %2233 = vmatmul.bf16.vlgmr.msrb.gmra.mxu0 %v5008_v4  ;;  %v5939_v0 = vld [vmem:[%s9748_s1 + $0x304] sm:$0xf]  ;;  %v5081_v4 = vld [vmem:[%s9748_s1 + $0x308] sm:$0xf]  ;;  %v5083_v15 = vld [vmem:[%s9748_s1 + $0x328] sm:$0xf0] }
 0x198   : > { %2461 = vmatpush.bf16.msra.mxu2 %v9967_v6  ;;  %v1707_v59 = vpop.f32.mrf.mxu1  ;;  %v1689_v6 = vadd.f32 %v1688_v13, %v1670_v12  ;;  %2252 = vmatmul.bf16.vlgmr.msrb.gmra.mxu1 %v5012_v28  ;;  %v5944_v28 = vld [vmem:[%s9748_s1 + $0x324] sm:$0xf0]  ;;  %v5940_v12 = vld [vmem:[%s9748_s1 + $0x30c] sm:$0xf] }
 0x199   : > { %2271 = vmatmul.bf16.vlgmr.msrb.gmra.mxu2 %v5016_v25  ;;  %5053 = vmatmul.msk.bf16.vlgmr.msrb.gmra.mxu3 %vm789_vm1, %v5020_v61  ;;  %v9973_v13 = vld [vmem:[#allocation7_spill] sm:$0xff] }
 0x19a   : > { %2424 = vmatpush.bf16.msra.mxu0 %v9969_v39  ;;  %2482 = vmatpush.bf16.msra.mxu3 %v7066_v17  ;;  %v1708_v55 = vadd.f32 %v1707_v59, %v1689_v6  ;;  %v9974_v59 = vld [vmem:[#allocation11_spill] sm:$0xff] }
 0x19b   : > { %2443 = vmatpush.bf16.msra.mxu1 %v7053_v57  ;;  %v1726_v57 = vpop.f32.mrf.mxu2 }
 0x19c   : > { %2462 = vmatpush.bf16.msra.mxu2 %v7057_v29  ;;  %v1745_v29 = vpop.f32.mrf.mxu3  ;;  %v1727_v38 = vadd.f32 %v1726_v57, %v1708_v55  ;;  %v9975_v55 = vld [vmem:[#allocation8_spill] sm:$0xff]  ;;  %v9976_v57 = vld [vmem:[#allocation9_spill] sm:$0xff] }
 0x19e   : > { %2425 = vmatpush.bf16.msra.mxu0 %v7062_v19  ;;  %v1690_v19 = vpop.f32.mrf.mxu0  ;;  %2483 = vmatpush.bf16.msra.mxu3 %v7083_v3  ;;  %v1746_v35 = vadd.f32 %v1745_v29, %v1727_v38  ;;  %v5933_v3 = vld [vmem:[%s9748_s1 + $0x2d4] sm:$0xf] }
 0x19f   : > { %2444 = vmatpush.bf16.msra.mxu1 %v7070_v20  ;;  %v1691_v20 = vadd.f32 %v1690_v19, %v7536_v11  ;;  %v5049_v11 = vld [vmem:[%s9748_s1 + $0x2f8] sm:$0xf0] }
 0x1a0   : > { %2463 = vmatpush.bf16.msra.mxu2 %v7074_v21  ;;  %v1709_v42 = vpop.f32.mrf.mxu1  ;;  %v5039_v21 = vld [vmem:[%s9748_s1 + $0x2d0] sm:$0xf]  ;;  %1759 = vrot.lane.b32.xlu1 %v1746_v35, %s6121_s10 }
 0x1a1   : > { %v1710_v17 = vadd.f32 %v1709_v42, %v1691_v20  ;;  %v5082_v42 = vor.u32 %v5944_v28, %v5081_v4  ;;  %v5086_v20 = vor.u32 %v5940_v12, %v5083_v15  ;;  %v6054_v28 = vld [vmem:[%s6165_s20 + $0x70] sm:$0xff] }
 0x1a2   : > { %2426 = vmatpush.bf16.msra.mxu0 %v7079_v36  ;;  %v5937_v36 = vld [vmem:[%s9748_s1 + $0x2ec] sm:$0xf0]  ;;  %2484 = vmatpush.bf16.msra.mxu3 %v7124_v34 }
 0x1a3   : > { %2445 = vmatpush.bf16.msra.mxu1 %v7087_v60  ;;  %v5041_v60 = vld [vmem:[%s9748_s1 + $0x2f0] sm:$0xf0]  ;;  %v1728_v2 = vpop.f32.mrf.mxu2  ;;  %v5040_v49 = vor.u32 %v5937_v36, %v5039_v21  ;;  %v9978_v21 = vld [vmem:[#allocation15_spill] sm:$0xff]  ;;  %v9979_v36 = vld [vmem:[#allocation13_spill] sm:$0xff] }
 0x1a4   : > { %2464 = vmatpush.bf16.msra.mxu2 %v7091_v40  ;;  %v5047_v40 = vld [vmem:[%s9748_s1 + $0x2d8] sm:$0xf]  ;;  %v1747_v33 = vpop.f32.mrf.mxu3  ;;  %v5044_v46 = vor.u32 %v5933_v3, %v5041_v60  ;;  %v1729_v50 = vadd.f32 %v1728_v2, %v1710_v17  ;;  %v9977_v17 = vld [vmem:[#allocation12_spill] sm:$0xff]  ;;  %v9980_v3 = vld [vmem:[#allocation14_spill] sm:$0xff] }
 0x1a5   : > { %v9981_v60 = vld [vmem:[#allocation16_spill] sm:$0xff] }
 0x1a6   : > { %2427 = vmatpush.bf16.msra.mxu0 %v7120_v7  ;;  %v5938_v7 = vld [vmem:[%s9748_s1 + $0x2f4] sm:$0xf0]  ;;  %v1693_v8 = vpop.f32.mrf.mxu0  ;;  %2485 = vmatpush.bf16.msra.mxu3 %v7141_v62  ;;  %v7629_v34 = vadd.f32 %v1747_v33, %v1729_v50  ;;  %v9983_v33 = vld [vmem:[#allocation28_spill] sm:$0xff]  ;;  %v9986_v50 = vld [vmem:[#allocation31_spill] sm:$0xff] }
 0x1a7   : > { %2446 = vmatpush.bf16.msra.mxu1 %v7128_v54  ;;  %v5934_v54 = vld [vmem:[%s9748_s1 + $0x2dc] sm:$0xf]  ;;  %v5048_v14 = vor.u32 %v5938_v7, %v5047_v40  ;;  %v1694_v39 = vadd.f32 %v1693_v8, %v7548_v41  ;;  %2238 = vmatmul.bf16.gmra.mxu0 %v5040_v49  ;;  %v9982_v40 = vld [vmem:[#allocation26_spill] sm:$0xff]  ;;  %v6055_v12 = vld [vmem:[%s6165_s20 + $0xb0] sm:$0xff] }
 0x1a8   : > { %2465 = vmatpush.bf16.msra.mxu2 %v7132_v5  ;;  %v1712_v47 = vpop.f32.mrf.mxu1  ;;  %v5052_v10 = vor.u32 %v5934_v54, %v5049_v11  ;;  %2257 = vmatmul.bf16.gmra.mxu1 %v5044_v46  ;;  %v9984_v49 = vld [vmem:[#allocation29_spill] sm:$0xff]  ;;  %v9985_v46 = vld [vmem:[#allocation30_spill] sm:$0xff]  ;;  %v5089_v15 = vld [vmem:[%s9748_s1 + $0x310] sm:$0xf] }
 0x1a9   : > { %v1713_v5 = vadd.f32 %v1712_v47, %v1694_v39  ;;  %2276 = vmatmul.bf16.gmra.mxu2 %v5048_v14  ;;  %v5105_v8 = vld [vmem:[%s9748_s1 + $0x340] sm:$0xf]  ;;  %v5947_v14 = vld [vmem:[%s9748_s1 + $0x344] sm:$0xf]  ;;  %v5113_v39 = vld [vmem:[%s9748_s1 + $0x348] sm:$0xf] }
 0x1aa   : > { %2428 = vmatpush.bf16.msra.mxu0 %v7137_v37  ;;  %5054 = vmatmul.msk.bf16.gmra.mxu3 %vm789_vm1, %v5052_v10  ;;  %v5951_v47 = vld [vmem:[%s9748_s1 + $0x35c] sm:$0xf0]  ;;  %v5107_v10 = vld [vmem:[%s9748_s1 + $0x360] sm:$0xf0] }
 0x1ab   : > { %2447 = vmatpush.bf16.msra.mxu1 %v7147_v63  ;;  %2486 = vmatpush.bf16.msra.mxu3 %v7160_v18  ;;  %v1731_v37 = vpop.f32.mrf.mxu2  ;;  %v9970_v18 = vld [vmem:[#allocation4_spill] sm:$0xff] }
 0x1ac   : > { %2466 = vmatpush.bf16.msra.mxu2 %v7151_v24  ;;  %v1750_v62 = vpop.f32.mrf.mxu3  ;;  %v1732_v63 = vadd.f32 %v1731_v37, %v1713_v5  ;;  %v5952_v5 = vld [vmem:[%s9748_s1 + $0x364] sm:$0xf0]  ;;  %v5948_v37 = vld [vmem:[%s9748_s1 + $0x34c] sm:$0xf] }
 0x1ae   : > { %2429 = vmatpush.bf16.msra.mxu0 %v7156_v1  ;;  %v1695_v24 = vpop.f32.mrf.mxu0  ;;  %v7641_v41 = vadd.f32 %v1750_v62, %v1732_v63  ;;  %v5115_v62 = vld [vmem:[%s9748_s1 + $0x368] sm:$0xf0] }
 0x1af   : > { %2448 = vmatpush.bf16.msra.mxu1 %v7164_v22  ;;  %2556 = vmatpush.bf16.msrb.mxu3 %v6337_v52  ;;  %v1696_v22 = vadd.f32 %v1695_v24, %v7583_v48 }
 0x1b0   : > { %2467 = vmatpush.bf16.msra.mxu2 %v7168_v23  ;;  %v1714_v1 = vpop.f32.mrf.mxu1 }
 0x1b1   : > { %v1715_v23 = vadd.f32 %v1714_v1, %v1696_v22  ;;  %v5106_v1 = vor.u32 %v5951_v47, %v5105_v8  ;;  %v5110_v22 = vor.u32 %v5947_v14, %v5107_v10  ;;  %v6062_v14 = vld [vmem:[%s6165_s20 + $0x60] sm:$0xff] }
 0x1b2   : > { %2498 = vmatpush.bf16.msrb.mxu0 %v7172_v26  ;;  %v5073_v26 = vld [vmem:[%s9748_s1 + $0x300] sm:$0xf] }
 0x1b3   : > { %2517 = vmatpush.bf16.msrb.mxu1 %v7176_v27  ;;  %v5943_v27 = vld [vmem:[%s9748_s1 + $0x31c] sm:$0xf0]  ;;  %2557 = vmatpush.bf16.msrb.mxu3 %v9972_v58  ;;  %v1733_v25 = vpop.f32.mrf.mxu2 }
 0x1b4   : > { %2536 = vmatpush.bf16.msrb.mxu2 %v7180_v30  ;;  %v9971_v30 = vld [vmem:[#allocation5_spill] sm:$0xff]  ;;  %v1752_v61 = vpop.f32.mrf.mxu3  ;;  %v5074_v48 = vor.u32 %v5943_v27, %v5073_v26  ;;  %v1734_v29 = vadd.f32 %v1733_v25, %v1715_v23  ;;  %v5114_v26 = vor.u32 %v5952_v5, %v5113_v39  ;;  %v5118_v27 = vor.u32 %v5948_v37, %v5115_v62  ;;  %v6063_v10 = vld [vmem:[%s6165_s20 + $0xa0] sm:$0xff] }
 0x1b5   : > { %v6065_v39 = vld [vmem:[%s6165_s20 + $0x18] sm:$0xff] }
 0x1b6   : > { %2499 = vmatpush.bf16.msrb.mxu0 %v7194_v43  ;;  %v5075_v43 = vld [vmem:[%s9748_s1 + $0x320] sm:$0xf0]  ;;  %v7675_v38 = vpop.f32.mrf.mxu0  ;;  %v7679_v35 = vadd.f32 %v1752_v61, %v1734_v29  ;;  %v5941_v61 = vld [vmem:[%s9748_s1 + $0x314] sm:$0xf]  ;;  %v5099_v29 = vld [vmem:[%s9748_s1 + $0x338] sm:$0xf0] }
 0x1b7   : > { %2518 = vmatpush.bf16.msrb.mxu1 %v9970_v18  ;;  %v5078_v6 = vor.u32 %v5939_v0, %v5075_v43  ;;  %2558 = vmatpush.bf16.msrb.mxu3 %v9976_v57  ;;  %v6053_v43 = vld [vmem:[%s6165_s20 + $0x30] sm:$0xff]  ;;  %v5942_v57 = vld [vmem:[%s9748_s1 + $0x31c] sm:$0xf] }
 0x1b8   : > { %2537 = vmatpush.bf16.msrb.mxu2 %v9971_v30  ;;  %v7677_v19 = vpop.f32.mrf.mxu1  ;;  %2430 = vmatmul.bf16.vlgmr.msra.gmra.mxu0 %v5074_v48  ;;  %v5091_v48 = vld [vmem:[%s9748_s1 + $0x330] sm:$0xf0]  ;;  %v6066_v37 = vld [vmem:[%s6165_s20 + $0x58] sm:$0xff] }
 0x1b9   : > { %2449 = vmatmul.bf16.vlgmr.msra.gmra.mxu1 %v5078_v6  ;;  %2468 = vmatmul.bf16.vlgmr.msra.gmra.mxu2 %v5082_v42  ;;  %v5097_v6 = vld [vmem:[%s9748_s1 + $0x318] sm:$0xf]  ;;  %v6059_v42 = vld [vmem:[%s6165_s20 + $0xa8] sm:$0xff] }
 0x1ba   : > { %2500 = vmatpush.bf16.msrb.mxu0 %v9973_v13  ;;  %2487 = vmatmul.bf16.vlgmr.msra.gmra.mxu3 %v5086_v20  ;;  %v5945_v13 = vld [vmem:[%s9748_s1 + $0x32c] sm:$0xf0]  ;;  %v6067_v62 = vld [vmem:[%s6165_s20 + $0x98] sm:$0xff] }
 0x1bb   : > { %2519 = vmatpush.bf16.msrb.mxu1 %v9974_v59  ;;  %2559 = vmatpush.bf16.msrb.mxu3 %v9980_v3  ;;  %v7687_v7 = vpop.f32.mrf.mxu2  ;;  %v6056_v59 = vld [vmem:[%s6165_s20 + $0xf0] sm:$0xff]  ;;  %v6060_v3 = vld [vmem:[%s6165_s20 + $0xe8] sm:$0xff] }
 0x1bc   : > { %2538 = vmatpush.bf16.msrb.mxu2 %v9975_v55  ;;  %v7689_v54 = vpop.f32.mrf.mxu3  ;;  %v5946_v55 = vld [vmem:[%s9748_s1 + $0x334] sm:$0xf0] }
 0x1be   : > { %2501 = vmatpush.bf16.msrb.mxu0 %v9977_v17  ;;  %v7691_v11 = vpop.f32.mrf.mxu0 }
 0x1bf   : > { %2520 = vmatpush.bf16.msrb.mxu1 %v9978_v21  ;;  %2560 = vmatpush.bf16.msrb.mxu3 %v9984_v49  ;;  %v5090_v21 = vor.u32 %v5945_v13, %v5089_v15  ;;  %v5098_v49 = vor.u32 %v5946_v55, %v5097_v6 }
 0x1c0   : > { %2539 = vmatpush.bf16.msrb.mxu2 %v9979_v36  ;;  %v7693_v2 = vpop.f32.mrf.mxu1  ;;  %v5094_v36 = vor.u32 %v5941_v61, %v5091_v48 }
 0x1c2   : > { %2502 = vmatpush.bf16.msrb.mxu0 %v9981_v60 }
 0x1c3   : > { %2521 = vmatpush.bf16.msrb.mxu1 %v9982_v40  ;;  %2561 = vmatpush.bf16.msrb.mxu3 %v9963_v31  ;;  %v7727_v63 = vpop.f32.mrf.mxu2 }
 0x1c4   : > { %2540 = vmatpush.bf16.msrb.mxu2 %v9983_v33  ;;  %v7729_v24 = vpop.f32.mrf.mxu3 }
 0x1c6   : > { %2503 = vmatpush.bf16.msrb.mxu0 %v9985_v46  ;;  %v1890_v18 = vpop.f32.mrf.mxu0  ;;  %v5102_v46 = vor.u32 %v5942_v57, %v5099_v29 }
 0x1c7   : > { %2522 = vmatpush.bf16.msrb.mxu1 %v9986_v50  ;;  %2562 = vmatpush.bf16.msrb.mxu3 %v7340_v16  ;;  %v6061_v50 = vld [vmem:[%s6165_s20 + $0x20] sm:$0xff] }
 0x1c8   : > { %2541 = vmatpush.bf16.msrb.mxu2 %v9962_v9  ;;  %v1909_v23 = vpop.f32.mrf.mxu1  ;;  %2435 = vmatmul.bf16.gmra.mxu0 %v5106_v1 }
 0x1c9   : > { %v1910_v9 = vadd.f32 %v1909_v23, %v1890_v18  ;;  %2454 = vmatmul.bf16.gmra.mxu1 %v5110_v22  ;;  %2473 = vmatmul.bf16.gmra.mxu2 %v5114_v26 }
 0x1ca   : > { %2504 = vmatpush.bf16.msrb.mxu0 %v7326_v44  ;;  %2492 = vmatmul.bf16.gmra.mxu3 %v5118_v27  ;;  %v6049_v44 = vld [vmem:[%s6165_s20 + $0x38] sm:$0xff]  ;;  %v1907_v27 = vadd.f32 %v7693_v2, %v7691_v11  ;;  %v5953_v11 = vld [vmem:[%s9748_s1 + $0x36c] sm:$0xf0]  ;;  %v5949_v2 = vld [vmem:[%s9748_s1 + $0x354] sm:$0xf] }
 0x1cb   : > { %2523 = vmatpush.bf16.msrb.mxu1 %v7330_v53  ;;  %v6050_v53 = vld [vmem:[%s6165_s20 + $0x78] sm:$0xff]  ;;  %v1928_v16 = vpop.f32.mrf.mxu2 }
 0x1cc   : > { %2542 = vmatpush.bf16.msrb.mxu2 %v7336_v45  ;;  %v6051_v45 = vld [vmem:[%s6165_s20 + $0xb8] sm:$0xff]  ;;  %v1947_v31 = vpop.f32.mrf.mxu3 }
 0x1ce   : > { %2505 = vmatpush.bf16.msrb.mxu0 %v7344_v51  ;;  %v6052_v51 = vld [vmem:[%s6165_s20 + $0xf8] sm:$0xff]  ;;  %v1892_v30 = vpop.f32.mrf.mxu0 }
 0x1cf   : > { %2524 = vmatpush.bf16.msrb.mxu1 %v7348_v32  ;;  %2752 = vmatpush.bf16.msra.mxu3 %v6052_v51  ;;  %v1929_v32 = vadd.f32 %v1928_v16, %v1910_v9  ;;  %v6068_v9 = vld [vmem:[%s6165_s20 + $0xd8] sm:$0xff]  ;;  %v6071_v16 = vld [vmem:[%s6165_s20 + $0x90] sm:$0xff] }
 0x1d0   : > { %2543 = vmatpush.bf16.msrb.mxu2 %v7352_v56  ;;  %v1911_v58 = vpop.f32.mrf.mxu1  ;;  %v1905_v56 = vadd.f32 %v7677_v19, %v7675_v38  ;;  %v6057_v38 = vld [vmem:[%s6165_s20 + $0x28] sm:$0xff]  ;;  %v5121_v51 = vld [vmem:[%s9748_s1 + $0x350] sm:$0xf] }
 0x1d1   : > { %v1912_v0 = vadd.f32 %v1911_v58, %v1892_v30  ;;  %v7743_v4 = vadd.f32 %v1947_v31, %v1929_v32  ;;  %v6058_v19 = vld [vmem:[%s6165_s20 + $0x68] sm:$0xff]  ;;  %v1926_v31 = vadd.f32 %v7727_v63, %v1907_v27  ;;  %v5123_v63 = vld [vmem:[%s9748_s1 + $0x370] sm:$0xf0]  ;;  %v5129_v32 = vld [vmem:[%s9748_s1 + $0x358] sm:$0xf] }
 0x1d2   : > { %2695 = vmatpush.bf16.msra.mxu0 %v6049_v44  ;;  %v1924_v25 = vadd.f32 %v7687_v7, %v1905_v56  ;;  %v6069_v44 = vld [vmem:[%s6165_s20 + $0x10] sm:$0xff]  ;;  %v5954_v30 = vld [vmem:[%s9748_s1 + $0x374] sm:$0xf0]  ;;  %v5950_v58 = vld [vmem:[%s9748_s1 + $0x35c] sm:$0xf]  ;;  %v5126_v61 = vor.u32 %v5949_v2, %v5123_v63 }
 0x1d3   : > { %2714 = vmatpush.bf16.msra.mxu1 %v6050_v53  ;;  %2753 = vmatpush.bf16.msra.mxu3 %v6056_v59  ;;  %v1930_v20 = vpop.f32.mrf.mxu2  ;;  %v6073_v56 = vld [vmem:[%s6165_s20 + $0x8] sm:$0xff]  ;;  %v1945_v15 = vadd.f32 %v7729_v24, %v1926_v31  ;;  %v5130_v55 = vor.u32 %v5954_v30, %v5129_v32  ;;  %v6078_v24 = vld [vmem:[%s6165_s20 + $0x40] sm:$0xff] }
 0x1d4   : > { %2733 = vmatpush.bf16.msra.mxu2 %v6051_v45  ;;  %v1949_v17 = vpop.f32.mrf.mxu3  ;;  %v1943_v60 = vadd.f32 %v7689_v54, %v1924_v25  ;;  %v1931_v40 = vadd.f32 %v1930_v20, %v1912_v0  ;;  %v6064_v54 = vld [vmem:[%s6165_s20 + $0xe0] sm:$0xff]  ;;  %v6070_v45 = vld [vmem:[%s6165_s20 + $0x50] sm:$0xff]  ;;  %v5131_v0 = vld [vmem:[%s9748_s1 + $0x378] sm:$0xf0]  ;;  %v5122_v25 = vor.u32 %v5953_v11, %v5121_v51 }
 0x1d5   : > { %v5134_v57 = vor.u32 %v5950_v58, %v5131_v0  ;;  %v6079_v20 = vld [vmem:[%s6165_s20 + $0x80] sm:$0xff]  ;;  %v5956_v27 = vld [vmem:[%s9748_s1 + $0x38c] sm:$0xf] }
 0x1d6   : > { %2696 = vmatpush.bf16.msra.mxu0 %v6053_v43  ;;  %v1961_v7 = vpop.f32.mrf.mxu0  ;;  %v7779_v8 = vadd.f32 %v1949_v17, %v1931_v40  ;;  %v6072_v43 = vld [vmem:[%s6165_s20 + $0xd0] sm:$0xff]  ;;  %v6090_v11 = vld [vmem:[%s6165_s20 + $0x1a8] sm:$0xff]  ;;  %v6091_v2 = vld [vmem:[%s6165_s20 + $0x1e0] sm:$0xff] }
 0x1d7   : > { %2715 = vmatpush.bf16.msra.mxu1 %v6054_v28  ;;  %2754 = vmatpush.bf16.msra.mxu3 %v6060_v3  ;;  %v1962_v47 = vadd.f32 %v1961_v7, %v1943_v60  ;;  %v6074_v28 = vld [vmem:[%s6165_s20 + $0x48] sm:$0xff]  ;;  %v6081_v3 = vld [vmem:[%s6165_s20 + $0x138] sm:$0xff] }
 0x1d8   : > { %2734 = vmatpush.bf16.msra.mxu2 %v6055_v12  ;;  %v1980_v33 = vpop.f32.mrf.mxu1  ;;  %2506 = vmatmul.bf16.vlgmr.msrb.gmra.mxu0 %v5090_v21  ;;  %v6075_v12 = vld [vmem:[%s6165_s20 + $0x88] sm:$0xff]  ;;  %v6082_v60 = vld [vmem:[%s6165_s20 + $0x178] sm:$0xff] }
 0x1d9   : > { %2525 = vmatmul.bf16.vlgmr.msrb.gmra.mxu1 %v5094_v36  ;;  %2544 = vmatmul.bf16.vlgmr.msrb.gmra.mxu2 %v5098_v49  ;;  %v1981_v5 = vadd.f32 %v1980_v33, %v1962_v47  ;;  %v6080_v36 = vld [vmem:[%s6165_s20 + $0xc0] sm:$0xff]  ;;  %v6083_v49 = vld [vmem:[%s6165_s20 + $0x1b8] sm:$0xff] }
 0x1da   : > { %2697 = vmatpush.bf16.msra.mxu0 %v6057_v38  ;;  %5135 = vmatmul.msk.bf16.vlgmr.msrb.gmra.mxu3 %vm789_vm1, %v5102_v46 }
 0x1db   : > { %2716 = vmatpush.bf16.msra.mxu1 %v6058_v19  ;;  %2755 = vmatpush.bf16.msra.mxu3 %v6064_v54  ;;  %v6076_v19 = vld [vmem:[%s6165_s20 + $0xc8] sm:$0xff]  ;;  %v6084_v54 = vld [vmem:[%s6165_s20 + $0x130] sm:$0xff] }
 0x1dc   : > { %2735 = vmatpush.bf16.msra.mxu2 %v6059_v42  ;;  %v1999_v1 = vpop.f32.mrf.mxu2  ;;  %v2018_v22 = vpop.f32.mrf.mxu3  ;;  %v6077_v42 = vld [vmem:[%s6165_s20] sm:$0xff] }
 0x1dd   : > { %v2000_v18 = vadd.f32 %v1999_v1, %v1981_v5  ;;  %v6086_v1 = vld [vmem:[%s6165_s20 + $0x1b0] sm:$0xff] }
 0x1de   : > { %2698 = vmatpush.bf16.msra.mxu0 %v6061_v50  ;;  %v1963_v23 = vpop.f32.mrf.mxu0 }
 0x1df   : > { %2717 = vmatpush.bf16.msra.mxu1 %v6062_v14  ;;  %2756 = vmatpush.bf16.msra.mxu3 %v6068_v9  ;;  %v2019_v53 = vadd.f32 %v2018_v22, %v2000_v18  ;;  %v1964_v29 = vadd.f32 %v1963_v23, %v1945_v15  ;;  %v5955_v22 = vld [vmem:[%s9748_s1 + $0x384] sm:$0xf]  ;;  %v5163_v23 = vld [vmem:[%s9748_s1 + $0x388] sm:$0xf]  ;;  %v5165_v9 = vld [vmem:[%s9748_s1 + $0x3a8] sm:$0xf0] }
 0x1e0   : > { %2736 = vmatpush.bf16.msra.mxu2 %v6063_v10  ;;  %v1982_v26 = vpop.f32.mrf.mxu1  ;;  %v5157_v18 = vld [vmem:[%s9748_s1 + $0x3a0] sm:$0xf0]  ;;  %v5168_v0 = vor.u32 %v5956_v27, %v5165_v9  ;;  %v6095_v15 = vld [vmem:[%s6165_s20 + $0x1d8] sm:$0xff]  ;;  %v5171_v27 = vld [vmem:[%s9748_s1 + $0x390] sm:$0xf] }
 0x1e1   : > { %2032 = vrot.lane.b32.xlu1 %v2019_v53, %s6122_s17  ;;  %v1983_v21 = vadd.f32 %v1982_v26, %v1964_v29  ;;  %v5960_v26 = vld [vmem:[%s9748_s1 + $0x3a4] sm:$0xf0]  ;;  %v5160_v51 = vor.u32 %v5955_v22, %v5157_v18  ;;  %v6100_v29 = vld [vmem:[%s6165_s20 + $0x110] sm:$0xff] }
 0x1e2   : > { %2699 = vmatpush.bf16.msra.mxu0 %v6065_v39  ;;  %v6085_v39 = vld [vmem:[%s6165_s20 + $0x170] sm:$0xff]  ;;  %v6089_v53 = vld [vmem:[%s6165_s20 + $0x168] sm:$0xff]  ;;  %v5164_v58 = vor.u32 %v5960_v26, %v5163_v23 }
 0x1e3   : > { %2718 = vmatpush.bf16.msra.mxu1 %v6066_v37  ;;  %2757 = vmatpush.bf16.msra.mxu3 %v6072_v43  ;;  %v5961_v9 = vld [vmem:[%s9748_s1 + $0x3ac] sm:$0xf0] }
 0x1e4   : > { %2737 = vmatpush.bf16.msra.mxu2 %v6067_v62  ;;  %v2001_v13 = vpop.f32.mrf.mxu2  ;;  %v2020_v59 = vpop.f32.mrf.mxu3  ;;  %v5959_v62 = vld [vmem:[%s9748_s1 + $0x39c] sm:$0xf0] }
 0x1e5   : > { %v2002_v40 = vadd.f32 %v2001_v13, %v1983_v21  ;;  %v6096_v13 = vld [vmem:[%s6165_s20 + $0x118] sm:$0xff]  ;;  %v5968_v21 = vld [vmem:[%s9748_s1 + $0x3e4] sm:$0xf0] }
 0x1e6   : > { %2700 = vmatpush.bf16.msra.mxu0 %v6069_v44  ;;  %v1966_v48 = vpop.f32.mrf.mxu0  ;;  %v6088_v44 = vld [vmem:[%s6165_s20 + $0x128] sm:$0xff] }
 0x1e7   : > { %2719 = vmatpush.bf16.msra.mxu1 %v6070_v45  ;;  %v1967_v38 = vadd.f32 %v1966_v48, %v7743_v4  ;;  %2758 = vmatpush.bf16.msra.mxu3 %v6076_v19  ;;  %v9987_v4 = vld [vmem:[#allocation2_spill] sm:$0xff]  ;;  %v2021_v5 = vadd.f32 %v2020_v59, %v2002_v40  ;;  %v6097_v59 = vld [vmem:[%s6165_s20 + $0x158] sm:$0xff]  ;;  %v6104_v40 = vld [vmem:[%s6165_s20 + $0x108] sm:$0xff] }
 0x1e8   : > { %2738 = vmatpush.bf16.msra.mxu2 %v6071_v16  ;;  %v1985_v6 = vpop.f32.mrf.mxu1  ;;  %2511 = vmatmul.bf16.gmra.mxu0 %v5122_v25  ;;  %v5187_v19 = vld [vmem:[%s9748_s1 + $0x3c0] sm:$0xf] }
 0x1e9   : > { %v1986_v17 = vadd.f32 %v1985_v6, %v1967_v38  ;;  %2530 = vmatmul.bf16.gmra.mxu1 %v5126_v61  ;;  %2549 = vmatmul.bf16.gmra.mxu2 %v5130_v55  ;;  %v6098_v55 = vld [vmem:[%s6165_s20 + $0x198] sm:$0xff]  ;;  %v6101_v38 = vld [vmem:[%s6165_s20 + $0x150] sm:$0xff] }
 0x1ea   : > { %2701 = vmatpush.bf16.msra.mxu0 %v6073_v56  ;;  %5136 = vmatmul.msk.bf16.gmra.mxu3 %vm789_vm1, %v5134_v57  ;;  %v6092_v56 = vld [vmem:[%s6165_s20 + $0x120] sm:$0xff]  ;;  %v6099_v57 = vld [vmem:[%s6165_s20 + $0x1d0] sm:$0xff] }
 0x1eb   : > { %2720 = vmatpush.bf16.msra.mxu1 %v6074_v28  ;;  %1215 = vrot.lane.b32.xlu1 %v9987_v4, %s6119_s9  ;;  %v6093_v28 = vld [vmem:[%s6165_s20 + $0x160] sm:$0xff]  ;;  %v5964_v4 = vld [vmem:[%s9748_s1 + $0x3cc] sm:$0xf] }
 0x1ec   : > { %2739 = vmatpush.bf16.msra.mxu2 %v6075_v12  ;;  %2759 = vmatpush.bf16.msra.mxu3 %v6080_v36  ;;  %v2004_v7 = vpop.f32.mrf.mxu2  ;;  %v2023_v33 = vpop.f32.mrf.mxu3  ;;  %v6094_v12 = vld [vmem:[%s6165_s20 + $0x1a0] sm:$0xff]  ;;  %v5197_v36 = vld [vmem:[%s9748_s1 + $0x3e8] sm:$0xf0] }
 0x1ed   : > { %v2005_v46 = vadd.f32 %v2004_v7, %v1986_v17  ;;  %v5195_v17 = vld [vmem:[%s9748_s1 + $0x3c8] sm:$0xf] }
 0x1ee   : > { %2702 = vmatpush.bf16.msra.mxu0 %v6077_v42  ;;  %v1968_v50 = vpop.f32.mrf.mxu0  ;;  %v5967_v42 = vld [vmem:[%s9748_s1 + $0x3dc] sm:$0xf0]  ;;  %v6105_v7 = vld [vmem:[%s6165_s20 + $0x148] sm:$0xff] }
 0x1ef   : > { %2721 = vmatpush.bf16.msra.mxu1 %v6078_v24  ;;  %v1969_v14 = vadd.f32 %v1968_v50, %v7779_v8  ;;  %v7839_v10 = vadd.f32 %v2023_v33, %v2005_v46  ;;  %v6087_v8 = vld [vmem:[%s6165_s20 + $0x1e8] sm:$0xff]  ;;  %v5963_v24 = vld [vmem:[%s9748_s1 + $0x3c4] sm:$0xf]  ;;  %v5188_v46 = vor.u32 %v5967_v42, %v5187_v19  ;;  %v5969_v19 = vld [vmem:[%s9748_s1 + $0x3ec] sm:$0xf0] }
 0x1f0   : > { %2740 = vmatpush.bf16.msra.mxu2 %v6079_v20  ;;  %2829 = vmatpush.bf16.msrb.mxu3 %v6337_v52  ;;  %v1987_v47 = vpop.f32.mrf.mxu1  ;;  %v5155_v52 = vld [vmem:[%s9748_s1 + $0x380] sm:$0xf]  ;;  %v5189_v20 = vld [vmem:[%s9748_s1 + $0x3e0] sm:$0xf0]  ;;  %v5211_v42 = vld [vmem:[%s9748_s1 + $0x3d8] sm:$0xf] }
 0x1f1   : > { %v1988_v37 = vadd.f32 %v1987_v47, %v1969_v14  ;;  %v5156_v31 = vor.u32 %v5959_v62, %v5155_v52  ;;  %v5192_v50 = vor.u32 %v5963_v24, %v5189_v20  ;;  %v6108_v52 = vld [vmem:[%s6165_s20 + $0x100] sm:$0xff]  ;;  %v5965_v24 = vld [vmem:[%s9748_s1 + $0x3d4] sm:$0xf] }
 0x1f2   : > { %2771 = vmatpush.bf16.msrb.mxu0 %v6081_v3  ;;  %v6102_v3 = vld [vmem:[%s6165_s20 + $0x190] sm:$0xff]  ;;  %v6109_v62 = vld [vmem:[%s6165_s20 + $0x140] sm:$0xff] }
 0x1f3   : > { %2790 = vmatpush.bf16.msrb.mxu1 %v6082_v60  ;;  %2034 = vrot.lane.b32.xlu1 %v2021_v5, %s6122_s17  ;;  %v6103_v60 = vld [vmem:[%s6165_s20 + $0x1c8] sm:$0xff]  ;;  %v5205_v20 = vld [vmem:[%s9748_s1 + $0x3f0] sm:$0xf0] }
 0x1f4   : > { %2809 = vmatpush.bf16.msrb.mxu2 %v6083_v49  ;;  %2830 = vmatpush.bf16.msrb.mxu3 %v6087_v8  ;;  %v2006_v45 = vpop.f32.mrf.mxu2  ;;  %v2025_v16 = vpop.f32.mrf.mxu3  ;;  %v6106_v5 = vld [vmem:[%s6165_s20 + $0x188] sm:$0xff] }
 0x1f5   : > { %v2007_v63 = vadd.f32 %v2006_v45, %v1988_v37  ;;  %v6107_v37 = vld [vmem:[%s6165_s20 + $0x1c0] sm:$0xff]  ;;  %v5173_v45 = vld [vmem:[%s9748_s1 + $0x3b0] sm:$0xf0] }
 0x1f6   : > { %2772 = vmatpush.bf16.msrb.mxu0 %v6084_v54  ;;  %v7874_v32 = vpop.f32.mrf.mxu0  ;;  %v5196_v54 = vor.u32 %v5968_v21, %v5195_v17  ;;  %v5970_v17 = vld [vmem:[%s9748_s1 + $0x3f4] sm:$0xf0]  ;;  %v5966_v21 = vld [vmem:[%s9748_s1 + $0x3dc] sm:$0xf] }
 0x1f7   : > { %2791 = vmatpush.bf16.msrb.mxu1 %v6085_v39  ;;  %v7878_v43 = vadd.f32 %v2025_v16, %v2007_v63  ;;  %v5200_v39 = vor.u32 %v5964_v4, %v5197_v36  ;;  %v5179_v16 = vld [vmem:[%s9748_s1 + $0x398] sm:$0xf]  ;;  %v5213_v4 = vld [vmem:[%s9748_s1 + $0x3f8] sm:$0xf0] }
 0x1f8   : > { %2810 = vmatpush.bf16.msrb.mxu2 %v6086_v1  ;;  %2831 = vmatpush.bf16.msrb.mxu3 %v6091_v2  ;;  %v7876_v30 = vpop.f32.mrf.mxu1  ;;  %v6110_v1 = vld [vmem:[%s6165_s20 + $0x180] sm:$0xff] }
 0x1f9   : > { %2703 = vmatmul.bf16.vlgmr.msra.gmra.mxu0 %v5156_v31  ;;  %2722 = vmatmul.bf16.vlgmr.msra.gmra.mxu1 %v5160_v51  ;;  %v2178_v26 = vadd.f32 %v7876_v30, %v7874_v32  ;;  %v5962_v31 = vld [vmem:[%s9748_s1 + $0x3b4] sm:$0xf0]  ;;  %v5958_v51 = vld [vmem:[%s9748_s1 + $0x39c] sm:$0xf]  ;;  %v5172_v32 = vor.u32 %v5961_v9, %v5171_v27 }
 0x1fa   : > { %2773 = vmatpush.bf16.msrb.mxu0 %v6088_v44  ;;  %2741 = vmatmul.bf16.vlgmr.msra.gmra.mxu2 %v5164_v58 }
 0x1fb   : > { %2792 = vmatpush.bf16.msrb.mxu1 %v6089_v53  ;;  %2760 = vmatmul.bf16.vlgmr.msra.gmra.mxu3 %v5168_v0  ;;  %v5957_v53 = vld [vmem:[%s9748_s1 + $0x394] sm:$0xf] }
 0x1fc   : > { %2811 = vmatpush.bf16.msrb.mxu2 %v6090_v11  ;;  %2832 = vmatpush.bf16.msrb.mxu3 %v6095_v15  ;;  %v2196_v25 = vpop.f32.mrf.mxu2  ;;  %v7886_v61 = vpop.f32.mrf.mxu3  ;;  %v5181_v11 = vld [vmem:[%s9748_s1 + $0x3b8] sm:$0xf0]  ;;  %v5176_v30 = vor.u32 %v5957_v53, %v5173_v45 }
 0x1fd   : > { %v2197_v44 = vadd.f32 %v2196_v25, %v2178_v26 }
 0x1fe   : > { %2774 = vmatpush.bf16.msrb.mxu0 %v6092_v56  ;;  %v7888_v48 = vpop.f32.mrf.mxu0 }
 0x1ff   : > { %2793 = vmatpush.bf16.msrb.mxu1 %v6093_v28  ;;  %v2216_v58 = vadd.f32 %v7886_v61, %v2197_v44  ;;  %v5180_v28 = vor.u32 %v5962_v31, %v5179_v16  ;;  %v5203_v61 = vld [vmem:[%s9748_s1 + $0x3d0] sm:$0xf] }
 0x200   : > { %2812 = vmatpush.bf16.msrb.mxu2 %v6094_v12  ;;  %v7890_v6 = vpop.f32.mrf.mxu1  ;;  %2833 = vmatpush.bf16.msrb.mxu3 %v6099_v57  ;;  %v5184_v12 = vor.u32 %v5958_v51, %v5181_v11 }
 0x202   : > { %2775 = vmatpush.bf16.msrb.mxu0 %v6096_v13 }
 0x203   : > { %2794 = vmatpush.bf16.msrb.mxu1 %v6097_v59 }
 0x204   : > { %2813 = vmatpush.bf16.msrb.mxu2 %v6098_v55  ;;  %2834 = vmatpush.bf16.msrb.mxu3 %v6103_v60  ;;  %v7924_v33 = vpop.f32.mrf.mxu2  ;;  %v7926_v49 = vpop.f32.mrf.mxu3  ;;  %v5204_v60 = vor.u32 %v5969_v19, %v5203_v61 }
 0x206   : > { %2776 = vmatpush.bf16.msrb.mxu0 %v6100_v29  ;;  %v7928_v47 = vpop.f32.mrf.mxu0 }
 0x207   : > { %2795 = vmatpush.bf16.msrb.mxu1 %v6101_v38 }
 0x208   : > { %2814 = vmatpush.bf16.msrb.mxu2 %v6102_v3  ;;  %v7930_v14 = vpop.f32.mrf.mxu1  ;;  %2835 = vmatpush.bf16.msrb.mxu3 %v6107_v37 }
 0x209   : > { %2708 = vmatmul.bf16.gmra.mxu0 %v5188_v46  ;;  %2727 = vmatmul.bf16.gmra.mxu1 %v5192_v50  ;;  %v5212_v50 = vor.u32 %v5970_v17, %v5211_v42 }
 0x20a   : > { %2777 = vmatpush.bf16.msrb.mxu0 %v6104_v40  ;;  %2746 = vmatmul.bf16.gmra.mxu2 %v5196_v54  ;;  %v5208_v40 = vor.u32 %v5965_v24, %v5205_v20  ;;  %v5216_v54 = vor.u32 %v5966_v21, %v5213_v4 }
 0x20b   : > { %2796 = vmatpush.bf16.msrb.mxu1 %v6105_v7  ;;  %2765 = vmatmul.bf16.gmra.mxu3 %v5200_v39 }
 0x20c   : > { %2815 = vmatpush.bf16.msrb.mxu2 %v6106_v5  ;;  %v7937_v8 = vpop.f32.mrf.mxu2  ;;  %v7939_v22 = vpop.f32.mrf.mxu3 }
 0x20e   : > { %2778 = vmatpush.bf16.msrb.mxu0 %v6108_v52  ;;  %v7941_v18 = vpop.f32.mrf.mxu0 }
 0x20f   : > { %2797 = vmatpush.bf16.msrb.mxu1 %v6109_v62 }
 0x210   : > { %2816 = vmatpush.bf16.msrb.mxu2 %v6110_v1  ;;  %v7943_v23 = vpop.f32.mrf.mxu1 }
 0x214   : > { %v7971_v2 = vpop.f32.mrf.mxu2  ;;  %v7973_v63 = vpop.f32.mrf.mxu3 }
 0x216   : > { %v2234_v0 = vpop.f32.mrf.mxu0 }
 0x217   : > { %v2235_v15 = vadd.f32 %v2234_v0, %v2216_v58 }
 0x218   : > { %v2253_v56 = vpop.f32.mrf.mxu1 }
 0x219   : > { %2779 = vmatmul.bf16.vlgmr.msrb.gmra.mxu0 %v5172_v32  ;;  %2798 = vmatmul.bf16.vlgmr.msrb.gmra.mxu1 %v5176_v30  ;;  %v2254_v13 = vadd.f32 %v2253_v56, %v2235_v15 }
 0x21a   : > { %2817 = vmatmul.bf16.vlgmr.msrb.gmra.mxu2 %v5180_v28 }
 0x21b   : > { %5217 = vmatmul.msk.bf16.vlgmr.msrb.gmra.mxu3 %vm789_vm1, %v5184_v12 }
 0x21c   : > { %v2272_v59 = vpop.f32.mrf.mxu2  ;;  %v2291_v25 = vpop.f32.mrf.mxu3 }
 0x21d   : > { %v2273_v55 = vadd.f32 %v2272_v59, %v2254_v13 }
 0x21e   : > { %v7977_v57 = vpop.f32.mrf.mxu0 }
 0x21f   : > { %v2292_v38 = vadd.f32 %v2291_v25, %v2273_v55 }
 0x220   : > { %v7979_v29 = vpop.f32.mrf.mxu1 }
 0x221   : > { %2305 = vrot.lane.b32.xlu2 %v2292_v38, %s6123_s25 }
 0x224   : > { %v8006_v36 = vpop.f32.mrf.mxu2  ;;  %v8008_v3 = vpop.f32.mrf.mxu3 }
 0x226   : > { %v8010_v7 = vpop.f32.mrf.mxu0 }
 0x228   : > { %v8012_v46 = vpop.f32.mrf.mxu1 }
 0x229   : > { %2784 = vmatmul.bf16.gmra.mxu0 %v5204_v60  ;;  %2803 = vmatmul.bf16.gmra.mxu1 %v5208_v40 }
 0x22a   : > { %2822 = vmatmul.bf16.gmra.mxu2 %v5212_v50  ;;  %v2180_v50 = vadd.f32 %v7890_v6, %v7888_v48 }
 0x22b   : > { %5218 = vmatmul.msk.bf16.gmra.mxu3 %vm789_vm1, %v5216_v54 }
 0x22c   : > { %v8015_v39 = vpop.f32.mrf.mxu2 }
 0x22d   : > { %v8017_v5 = vpop.f32.mrf.mxu3 }
 0x22e   : > { %v8019_v37 = vpop.f32.mrf.mxu0 }
 0x230   : > { %v8021_v52 = vpop.f32.mrf.mxu1 }
 0x234   : > { %v8023_v62 = vpop.f32.mrf.mxu2 }
 0x235   : > { %v8025_v1 = vpop.f32.mrf.mxu3 }
 0x236   : > { %v2431_v26 = vpop.f32.mrf.mxu0 }
 0x238   : > { %v2450_v27 = vpop.f32.mrf.mxu1 }
 0x239   : > { %v2451_v25 = vadd.f32 %v2450_v27, %v2431_v26  ;;  %v2199_v27 = vadd.f32 %v7924_v33, %v2180_v50 }
 0x23c   : > { %v2469_v9 = vpop.f32.mrf.mxu2 }
 0x23d   : > { %v2488_v44 = vpop.f32.mrf.mxu3  ;;  %v2470_v38 = vadd.f32 %v2469_v9, %v2451_v25 }
 0x23e   : > { %v2433_v53 = vpop.f32.mrf.mxu0 }
 0x23f   : > { %v2489_v42 = vadd.f32 %v2488_v44, %v2470_v38  ;;  %v2218_v44 = vadd.f32 %v7926_v49, %v2199_v27 }
 0x240   : > { %v2452_v45 = vpop.f32.mrf.mxu1 }
 0x241   : > { %v2453_v16 = vadd.f32 %v2452_v45, %v2433_v53 }
 0x244   : > { %v2471_v31 = vpop.f32.mrf.mxu2 }
 0x245   : > { %v2490_v51 = vpop.f32.mrf.mxu3  ;;  %v2472_v11 = vadd.f32 %v2471_v31, %v2453_v16 }
 0x246   : > { %v2436_v32 = vpop.f32.mrf.mxu0 }
 0x247   : > { %v2491_v0 = vadd.f32 %v2490_v51, %v2472_v11  ;;  %v2237_v11 = vadd.f32 %v7977_v57, %v2218_v44 }
 0x248   : > { %v2455_v30 = vpop.f32.mrf.mxu1 }
 0x249   : > { %v2456_v58 = vadd.f32 %v2455_v30, %v2436_v32  ;;  %v2256_v33 = vadd.f32 %v7979_v29, %v2237_v11 }
 0x24c   : > { %v2474_v56 = vpop.f32.mrf.mxu2 }
 0x24d   : > { %v2493_v28 = vpop.f32.mrf.mxu3  ;;  %v2475_v12 = vadd.f32 %v2474_v56, %v2456_v58 }
 0x24e   : > { %v2438_v15 = vpop.f32.mrf.mxu0 }
 0x24f   : > { %v2494_v55 = vadd.f32 %v2493_v28, %v2475_v12  ;;  %v9988_v28 = vld [vmem:[#allocation34_spill] sm:$0xff]  ;;  %v2275_v12 = vadd.f32 %v8006_v36, %v2256_v33  ;;  %v9989_v36 = vld [vmem:[#allocation3_spill] sm:$0xff] }
 0x250   : > { %v2457_v13 = vpop.f32.mrf.mxu1 }
 0x251   : > { %v2458_v59 = vadd.f32 %v2457_v13, %v2438_v15  ;;  %v2294_v38 = vadd.f32 %v8008_v3, %v2275_v12 }
 0x254   : > { %v2476_v61 = vpop.f32.mrf.mxu2 }
 0x255   : > { %v2495_v19 = vpop.f32.mrf.mxu3  ;;  %v2477_v24 = vadd.f32 %v2476_v61, %v2458_v59 }
 0x256   : > { %v2507_v20 = vpop.f32.mrf.mxu0 }
 0x257   : > { %v2496_v21 = vadd.f32 %v2495_v19, %v2477_v24  ;;  %v2508_v4 = vadd.f32 %v2507_v20, %v2489_v42 }
 0x258   : > { %v2526_v17 = vpop.f32.mrf.mxu1 }
 0x259   : > { %v2527_v60 = vadd.f32 %v2526_v17, %v2508_v4 }
 0x25c   : > { %v2545_v40 = vpop.f32.mrf.mxu2 }
 0x25d   : > { %v2546_v54 = vadd.f32 %v2545_v40, %v2527_v60  ;;  %v2564_v53 = vpop.f32.mrf.mxu3 }
 0x25e   : > { %v2509_v45 = vpop.f32.mrf.mxu0 }
 0x25f   : > { %v2510_v16 = vadd.f32 %v2509_v45, %v2491_v0  ;;  %v2565_v9 = vadd.f32 %v2564_v53, %v2546_v54 }
 0x260   : > { %v2528_v26 = vpop.f32.mrf.mxu1 }
 0x261   : > { %v2529_v31 = vadd.f32 %v2528_v26, %v2510_v16  ;;  %2578 = vrot.lane.b32.xlu2 %v2565_v9, %s6124_s14 }
 0x264   : > { %v2547_v51 = vpop.f32.mrf.mxu2 }
 0x265   : > { %v2548_v32 = vadd.f32 %v2547_v51, %v2529_v31  ;;  %v2566_v30 = vpop.f32.mrf.mxu3 }
 0x266   : > { %v2512_v48 = vpop.f32.mrf.mxu0 }
 0x267   : > { %v2513_v6 = vadd.f32 %v2512_v48, %v2494_v55  ;;  %v8033_v56 = vadd.f32 %v2566_v30, %v2548_v32 }
 0x268   : > { %v2531_v58 = vpop.f32.mrf.mxu1 }
 0x269   : > { %v2532_v0 = vadd.f32 %v2531_v58, %v2513_v6  ;;  %1488 = vrot.lane.b32.xlu2 %v9988_v28, %s6120_s7 }
 0x26c   : > { %v2550_v15 = vpop.f32.mrf.mxu2 }
 0x26d   : > { %v2551_v49 = vadd.f32 %v2550_v15, %v2532_v0  ;;  %v2569_v13 = vpop.f32.mrf.mxu3 }
 0x26e   : > { %v2514_v59 = vpop.f32.mrf.mxu0 }
 0x26f   : > { %v2515_v57 = vadd.f32 %v2514_v59, %v2496_v21  ;;  %v8040_v55 = vadd.f32 %v2569_v13, %v2551_v49 }
 0x270   : > { %v2533_v25 = vpop.f32.mrf.mxu1 }
 0x271   : > { %v2534_v61 = vadd.f32 %v2533_v25, %v2515_v57  ;;  %2307 = vrot.lane.b32.xlu2 %v2294_v38, %s6123_s25 }
 0x274   : > { %v2552_v19 = vpop.f32.mrf.mxu2 }
 0x275   : > { %v2553_v29 = vadd.f32 %v2552_v19, %v2534_v61  ;;  %v2571_v42 = vpop.f32.mrf.mxu3 }
 0x276   : > { %v2704_v24 = vpop.f32.mrf.mxu0 }
 0x277   : > { %v8043_v17 = vadd.f32 %v2571_v42, %v2553_v29 }
 0x278   : > { %v2723_v20 = vpop.f32.mrf.mxu1 }
 0x279   : > { %1217 = vrot.lane.b32.xlu2 %v9989_v36, %s6119_s9  ;;  %v2724_v9 = vadd.f32 %v2723_v20, %v2704_v24 }
 0x27d   : > { %v2742_v4 = vpop.f32.mrf.mxu2 }
 0x27e   : > { %v2761_v21 = vpop.f32.mrf.mxu3  ;;  %v2706_v60 = vpop.f32.mrf.mxu0  ;;  %v2743_v31 = vadd.f32 %v2742_v4, %v2724_v9  ;;  %v2880_v9 = vld [vmem:[%s9749_s2 + $0x60] sm:$0xff] }
 0x280   : > { %v2725_v40 = vpop.f32.mrf.mxu1  ;;  %v2762_v51 = vadd.f32 %v2761_v21, %v2743_v31 }
 0x281   : > { %2036 = vrot.lane.b32.xlu2 %v7839_v10, %s6122_s17  ;;  %v2726_v10 = vadd.f32 %v2725_v40, %v2706_v60 }
 0x285   : > { %v2744_v3 = vpop.f32.mrf.mxu2 }
 0x286   : > { %v2763_v50 = vpop.f32.mrf.mxu3  ;;  %v2709_v54 = vpop.f32.mrf.mxu0  ;;  %v2745_v6 = vadd.f32 %v2744_v3, %v2726_v10  ;;  %v5233_v10 = vld [vmem:[%s9749_s2 + $0xe0] sm:$0xff] }
 0x288   : > { %v2728_v53 = vpop.f32.mrf.mxu1  ;;  %v2764_v33 = vadd.f32 %v2763_v50, %v2745_v6  ;;  %v2183_v50 = vadd.f32 %v7930_v14, %v7928_v47  ;;  %v2185_v47 = vadd.f32 %v7943_v23, %v7941_v18  ;;  %v2882_v18 = vld [vmem:[%s9749_s2 + $0x70] sm:$0xff]  ;;  %v5236_v23 = vld [vmem:[%s9749_s2 + $0xf8] sm:$0x1] }
 0x289   : > { %v2729_v49 = vadd.f32 %v2728_v53, %v2709_v54  ;;  %5237 = vmatpush.msk.msra.mxu1 %vm2888_vm2, %v5236_v23  ;;  %v5261_v23 = vld [vmem:[%s9749_s2 + $0x1a0] sm:$0xff] }
 0x28a   : > { %v2202_v53 = vadd.f32 %v7937_v8, %v2183_v50  ;;  %v2204_v8 = vadd.f32 %v7971_v2, %v2185_v47  ;;  %v5263_v50 = vld [vmem:[%s9749_s2 + $0x1b0] sm:$0xff]  ;;  %v5262_v47 = vld [vmem:[%s9749_s2 + $0x1a8] sm:$0xff] }
 0x28c   : > { %v2223_v2 = vadd.f32 %v7973_v63, %v2204_v8  ;;  %v5253_v63 = vld [vmem:[%s9749_s2 + $0x170] sm:$0xff]  ;;  %v2871_v8 = vld [vmem:[%s9749_s2 + $0x18] sm:$0xff] }
 0x28d   : > { %v2747_v45 = vpop.f32.mrf.mxu2 }
 0x28e   : > { %v2766_v16 = vpop.f32.mrf.mxu3  ;;  %v8049_v26 = vpop.f32.mrf.mxu0  ;;  %v2748_v25 = vadd.f32 %v2747_v45, %v2729_v49  ;;  %v2883_v45 = vld [vmem:[%s9749_s2 + $0x78] sm:$0x1]  ;;  %v2242_v31 = vadd.f32 %v8019_v37, %v2223_v2  ;;  %v5267_v49 = vld [vmem:[%s9749_s2 + $0x1d0] sm:$0xff] }
 0x28f   : > { %5219 = vmatpush.msk.msra.mxu0 %vm2888_vm2, %v2883_v45  ;;  %v2879_v37 = vld [vmem:[%s9749_s2 + $0x58] sm:$0xff]  ;;  %v5244_v45 = vld [vmem:[%s9749_s2 + $0x128] sm:$0xff] }
 0x290   : > { %v8051_v27 = vpop.f32.mrf.mxu1  ;;  %v2767_v19 = vadd.f32 %v2766_v16, %v2748_v25  ;;  %v5271_v16 = vld [vmem:[%s9749_s2 + $0x1f0] sm:$0xff]  ;;  %v2261_v6 = vadd.f32 %v8021_v52, %v2242_v31  ;;  %v5232_v52 = vld [vmem:[%s9749_s2 + $0xd8] sm:$0xff]  ;;  %v2868_v31 = vld [vmem:[%s9749_s2] sm:$0xff] }
 0x291   : > { %2893 = vmatpush.msra.mxu0 %v2882_v18  ;;  %v5243_v18 = vld [vmem:[%s9749_s2 + $0x120] sm:$0xff]  ;;  %v5224_v2 = vld [vmem:[%s9749_s2 + $0x98] sm:$0xff] }
 0x295   : > { %v8053_v44 = vpop.f32.mrf.mxu2 }
 0x296   : > { %v8055_v11 = vpop.f32.mrf.mxu3  ;;  %v2780_v32 = vpop.f32.mrf.mxu0 }
 0x297   : > { %v2781_v48 = vadd.f32 %v2780_v32, %v2762_v51  ;;  %v5252_v51 = vld [vmem:[%s9749_s2 + $0x168] sm:$0xff] }
 0x298   : > { %v2799_v30 = vpop.f32.mrf.mxu1  ;;  %v5270_v32 = vld [vmem:[%s9749_s2 + $0x1e8] sm:$0xff] }
 0x299   : > { %v2800_v58 = vadd.f32 %v2799_v30, %v2781_v48  ;;  %v5251_v48 = vld [vmem:[%s9749_s2 + $0x160] sm:$0xff] }
 0x29d   : > { %v2818_v0 = vpop.f32.mrf.mxu2 }
 0x29e   : > { %v2819_v28 = vadd.f32 %v2818_v0, %v2800_v58  ;;  %v2837_v12 = vpop.f32.mrf.mxu3  ;;  %v2782_v15 = vpop.f32.mrf.mxu0  ;;  %v9991_v58 = vld [vmem:[#allocation36_spill] sm:$0xff] }
 0x29f   : > { %v2783_v59 = vadd.f32 %v2782_v15, %v2764_v33  ;;  %v2878_v0 = vld [vmem:[%s9749_s2 + $0x50] sm:$0xff]  ;;  %v2280_v33 = vadd.f32 %v8023_v62, %v2261_v6  ;;  %v5257_v6 = vld [vmem:[%s9749_s2 + $0x180] sm:$0xff] }
 0x2a0   : > { %v2838_v13 = vadd.f32 %v2837_v12, %v2819_v28  ;;  %v2801_v57 = vpop.f32.mrf.mxu1  ;;  %v5268_v28 = vld [vmem:[%s9749_s2 + $0x1d8] sm:$0xff]  ;;  %v2877_v12 = vld [vmem:[%s9749_s2 + $0x48] sm:$0xff]  ;;  %v5231_v15 = vld [vmem:[%s9749_s2 + $0xd0] sm:$0xff] }
 0x2a1   : > { %v2802_v38 = vadd.f32 %v2801_v57, %v2783_v59  ;;  %v5249_v62 = vld [vmem:[%s9749_s2 + $0x150] sm:$0xff]  ;;  %v2731_v59 = vadd.f32 %v8051_v27, %v8049_v26  ;;  %v5230_v57 = vld [vmem:[%s9749_s2 + $0xc8] sm:$0xff]  ;;  %v2299_v25 = vadd.f32 %v8025_v1, %v2280_v33  ;;  %v2875_v27 = vld [vmem:[%s9749_s2 + $0x38] sm:$0xff] }
 0x2a2   : > { %2851 = vrot.lane.b32.xlu0 %v2838_v13, %s6125_s18  ;;  %v2876_v13 = vld [vmem:[%s9749_s2 + $0x40] sm:$0xff]  ;;  %v5266_v26 = vld [vmem:[%s9749_s2 + $0x1c8] sm:$0xff]  ;;  %v5307_v33 = vld [vmem:[%s9749_s2 + $0x2f0] sm:$0xff] }
 0x2a3   : > { %v5229_v1 = vld [vmem:[%s9749_s2 + $0xc0] sm:$0xff] }
 0x2a5   : > { %v2820_v61 = vpop.f32.mrf.mxu2 }
 0x2a6   : > { %v2821_v29 = vadd.f32 %v2820_v61, %v2802_v38  ;;  %v2839_v42 = vpop.f32.mrf.mxu3  ;;  %v2785_v24 = vpop.f32.mrf.mxu0  ;;  %v5248_v38 = vld [vmem:[%s9749_s2 + $0x148] sm:$0xff]  ;;  %v2750_v61 = vadd.f32 %v8053_v44, %v2731_v59  ;;  %v5247_v44 = vld [vmem:[%s9749_s2 + $0x140] sm:$0xff]  ;;  %v5286_v59 = vld [vmem:[%s9749_s2 + $0x258] sm:$0xff] }
 0x2a7   : > { %v2786_v36 = vadd.f32 %v2785_v24, %v2767_v19  ;;  %v9992_v19 = vld [vmem:[#allocation10_spill] sm:$0xff] }
 0x2a8   : > { %v2840_v20 = vadd.f32 %v2839_v42, %v2821_v29  ;;  %v2804_v4 = vpop.f32.mrf.mxu1  ;;  %v5265_v29 = vld [vmem:[%s9749_s2 + $0x1c0] sm:$0xff]  ;;  %v2874_v42 = vld [vmem:[%s9749_s2 + $0x30] sm:$0xff] }
 0x2a9   : > { %v2805_v21 = vadd.f32 %v2804_v4, %v2786_v36  ;;  %v5246_v36 = vld [vmem:[%s9749_s2 + $0x138] sm:$0xff]  ;;  %v2769_v4 = vadd.f32 %v8055_v11, %v2750_v61  ;;  %v5245_v11 = vld [vmem:[%s9749_s2 + $0x130] sm:$0xff] }
 0x2aa   : > { %2853 = vrot.lane.b32.xlu1 %v2840_v20, %s6125_s18  ;;  %1761 = vrot.lane.b32.xlu0 %v7629_v34, %s6121_s10  ;;  %v2221_v34 = vadd.f32 %v7939_v22, %v2202_v53  ;;  %v9990_v22 = vld [vmem:[#allocation35_spill] sm:$0xff]  ;;  %v5228_v20 = vld [vmem:[%s9749_s2 + $0xb8] sm:$0xff]  ;;  %v5285_v61 = vld [vmem:[%s9749_s2 + $0x250] sm:$0xff] }
 0x2ac   : > { %v2240_v14 = vadd.f32 %v8010_v7, %v2221_v34  ;;  %v5272_v7 = vld [vmem:[%s9749_s2 + $0x1f8] sm:$0x1]  ;;  %v5226_v34 = vld [vmem:[%s9749_s2 + $0xa8] sm:$0xff] }
 0x2ad   : > { %v2823_v60 = vpop.f32.mrf.mxu2  ;;  %5273 = vmatpush.msk.msra.mxu3 %vm2888_vm2, %v5272_v7  ;;  %v5242_v7 = vld [vmem:[%s9749_s2 + $0x118] sm:$0xff] }
 0x2ae   : > { %v2824_v40 = vadd.f32 %v2823_v60, %v2805_v21  ;;  %v2842_v3 = vpop.f32.mrf.mxu3  ;;  %v2787_v24 = vpop.f32.mrf.mxu0  ;;  %v5264_v21 = vld [vmem:[%s9749_s2 + $0x1b8] sm:$0xff]  ;;  %v2873_v60 = vld [vmem:[%s9749_s2 + $0x28] sm:$0xff] }
 0x2af   : > { %3025 = vmatpush.msra.mxu3 %v5271_v16  ;;  %v5241_v16 = vld [vmem:[%s9749_s2 + $0x110] sm:$0xff] }
 0x2b0   : > { %v2843_v54 = vadd.f32 %v2842_v3, %v2824_v40  ;;  %v5227_v40 = vld [vmem:[%s9749_s2 + $0xb0] sm:$0xff]  ;;  %v2788_v3 = vadd.f32 %v2787_v24, %v2769_v4  ;;  %v2806_v53 = vpop.f32.mrf.mxu1  ;;  %v5283_v24 = vld [vmem:[%s9749_s2 + $0x240] sm:$0xff]  ;;  %v5338_v4 = vld [vmem:[%s9749_s2 + $0x3c8] sm:$0xff] }
 0x2b1   : > { %3026 = vmatpush.msra.mxu3 %v5270_v32  ;;  %v5240_v32 = vld [vmem:[%s9749_s2 + $0x108] sm:$0xff] }
 0x2b2   : > { %2855 = vrot.lane.b32.xlu2 %v2843_v54, %s6125_s18  ;;  %1763 = vrot.lane.b32.xlu1 %v7641_v41, %s6121_s10  ;;  %v2259_v41 = vadd.f32 %v8012_v46, %v2240_v14  ;;  %v2881_v46 = vld [vmem:[%s9749_s2 + $0x68] sm:$0xff]  ;;  %v2872_v54 = vld [vmem:[%s9749_s2 + $0x20] sm:$0xff] }
 0x2b3   : > { %2580 = vrot.lane.b32.xlu0 %v8033_v56, %s6124_s14  ;;  %v5235_v56 = vld [vmem:[%s9749_s2 + $0xf0] sm:$0xff]  ;;  %2894 = vmatpush.msra.mxu0 %v2881_v46  ;;  %v5260_v46 = vld [vmem:[%s9749_s2 + $0x198] sm:$0xff] }
 0x2b4   : > { %2937 = vmatpush.msra.mxu1 %v5235_v56 }
 0x2b5   : > { %2895 = vmatpush.msra.mxu0 %v2880_v9  ;;  %v2825_v14 = vpop.f32.mrf.mxu2  ;;  %v5259_v9 = vld [vmem:[%s9749_s2 + $0x190] sm:$0xff] }
 0x2b6   : > { %v2844_v56 = vpop.f32.mrf.mxu3 }
 0x2b7   : > { %2896 = vmatpush.msra.mxu0 %v2879_v37  ;;  %v5258_v37 = vld [vmem:[%s9749_s2 + $0x188] sm:$0xff] }
 0x2b9   : > { %2897 = vmatpush.msra.mxu0 %v2878_v0  ;;  %v5326_v0 = vld [vmem:[%s9749_s2 + $0x378] sm:$0x1] }
 0x2ba   : > { %1765 = vrot.lane.b32.xlu2 %v7679_v35, %s6121_s10  ;;  %2582 = vrot.lane.b32.xlu1 %v8040_v55, %s6124_s14  ;;  %v5254_v35 = vld [vmem:[%s9749_s2 + $0x178] sm:$0x1]  ;;  %v2278_v55 = vadd.f32 %v8015_v39, %v2259_v41  ;;  %v5234_v39 = vld [vmem:[%s9749_s2 + $0xe8] sm:$0xff] }
 0x2bb   : > { %1490 = vrot.lane.b32.xlu0 %v9990_v22, %s6120_s7  ;;  %5255 = vmatpush.msk.msra.mxu2 %vm2888_vm2, %v5254_v35  ;;  %v5225_v41 = vld [vmem:[%s9749_s2 + $0xa0] sm:$0xff]  ;;  %v2807_v22 = vadd.f32 %v2806_v53, %v2788_v3  ;;  %v2870_v35 = vld [vmem:[%s9749_s2 + $0x10] sm:$0xff]  ;;  %v5336_v53 = vld [vmem:[%s9749_s2 + $0x3b8] sm:$0xff] }
 0x2bc   : > { %2938 = vmatpush.msra.mxu1 %v5234_v39  ;;  %v2297_v30 = vadd.f32 %v8017_v5, %v2278_v55  ;;  %v5269_v5 = vld [vmem:[%s9749_s2 + $0x1e0] sm:$0xff]  ;;  %2898 = vmatpush.msra.mxu0 %v2877_v12  ;;  %v2869_v55 = vld [vmem:[%s9749_s2 + $0x8] sm:$0xff]  ;;  %v5343_v12 = vld [vmem:[%s9749_s2 + $0x3f0] sm:$0xff] }
 0x2bd   : > { %2981 = vmatpush.msra.mxu2 %v5253_v63  ;;  %3027 = vmatpush.msra.mxu3 %v5269_v5  ;;  %v5223_v63 = vld [vmem:[%s9749_s2 + $0x90] sm:$0xff]  ;;  %v5308_v5 = vld [vmem:[%s9749_s2 + $0x2f8] sm:$0x1] }
 0x2be   : > { %2939 = vmatpush.msra.mxu1 %v5233_v10  ;;  %2899 = vmatpush.msra.mxu0 %v2876_v13  ;;  %v5221_v10 = vld [vmem:[%s9749_s2 + $0x80] sm:$0xff]  ;;  %v5342_v13 = vld [vmem:[%s9749_s2 + $0x3e8] sm:$0xff]  ;;  %v5281_v3 = vld [vmem:[%s9749_s2 + $0x230] sm:$0xff] }
 0x2bf   : > { %2982 = vmatpush.msra.mxu2 %v5252_v51  ;;  %3028 = vmatpush.msra.mxu3 %v5268_v28  ;;  %v5222_v51 = vld [vmem:[%s9749_s2 + $0x88] sm:$0xff]  ;;  %v5325_v28 = vld [vmem:[%s9749_s2 + $0x370] sm:$0xff] }
 0x2c0   : > { %2940 = vmatpush.msra.mxu1 %v5232_v52  ;;  %2900 = vmatpush.msra.mxu0 %v2875_v27  ;;  %v5344_v52 = vld [vmem:[%s9749_s2 + $0x3f8] sm:$0x1] }
 0x2c1   : > { %2983 = vmatpush.msra.mxu2 %v5251_v48  ;;  %3029 = vmatpush.msra.mxu3 %v5267_v49  ;;  %v5239_v48 = vld [vmem:[%s9749_s2 + $0x100] sm:$0xff]  ;;  %v5324_v49 = vld [vmem:[%s9749_s2 + $0x368] sm:$0xff]  ;;  %v5322_v27 = vld [vmem:[%s9749_s2 + $0x358] sm:$0xff] }
 0x2c2   : > { %2584 = vrot.lane.b32.xlu2 %v8043_v17, %s6124_s14  ;;  %1492 = vrot.lane.b32.xlu1 %v9991_v58, %s6120_s7  ;;  %v5250_v17 = vld [vmem:[%s9749_s2 + $0x158] sm:$0xff]  ;;  %v5289_v58 = vld [vmem:[%s9749_s2 + $0x270] sm:$0xff] }
 0x2c3   : > { %2309 = vrot.lane.b32.xlu0 %v2297_v30, %s6123_s25  ;;  %2984 = vmatpush.msra.mxu2 %v5250_v17  ;;  %v5290_v30 = vld [vmem:[%s9749_s2 + $0x278] sm:$0x1]  ;;  %v5288_v17 = vld [vmem:[%s9749_s2 + $0x268] sm:$0xff] }
 0x2c4   : > { %2941 = vmatpush.msra.mxu1 %v5231_v15  ;;  %3030 = vmatpush.msra.mxu3 %v5266_v26  ;;  %v5287_v15 = vld [vmem:[%s9749_s2 + $0x260] sm:$0xff]  ;;  %v5304_v26 = vld [vmem:[%s9749_s2 + $0x2d8] sm:$0xff] }
 0x2c5   : > { %2985 = vmatpush.msra.mxu2 %v5249_v62  ;;  %2901 = vmatpush.msra.mxu0 %v2874_v42  ;;  %v5306_v62 = vld [vmem:[%s9749_s2 + $0x2e8] sm:$0xff]  ;;  %v5339_v42 = vld [vmem:[%s9749_s2 + $0x3d0] sm:$0xff] }
 0x2c6   : > { %2942 = vmatpush.msra.mxu1 %v5230_v57  ;;  %3031 = vmatpush.msra.mxu3 %v5265_v29  ;;  %v5305_v57 = vld [vmem:[%s9749_s2 + $0x2e0] sm:$0xff]  ;;  %v5321_v29 = vld [vmem:[%s9749_s2 + $0x350] sm:$0xff] }
 0x2c7   : > { %2986 = vmatpush.msra.mxu2 %v5248_v38  ;;  %2902 = vmatpush.msra.mxu0 %v2873_v60  ;;  %v5341_v38 = vld [vmem:[%s9749_s2 + $0x3e0] sm:$0xff] }
 0x2c8   : > { %2943 = vmatpush.msra.mxu1 %v5229_v1  ;;  %3032 = vmatpush.msra.mxu3 %v5264_v21  ;;  %v5340_v1 = vld [vmem:[%s9749_s2 + $0x3d8] sm:$0xff]  ;;  %v5301_v60 = vld [vmem:[%s9749_s2 + $0x2c0] sm:$0xff] }
 0x2c9   : > { %2987 = vmatpush.msra.mxu2 %v5247_v44  ;;  %2903 = vmatpush.msra.mxu0 %v2872_v54  ;;  %v5284_v44 = vld [vmem:[%s9749_s2 + $0x248] sm:$0xff]  ;;  %v5282_v21 = vld [vmem:[%s9749_s2 + $0x238] sm:$0xff] }
 0x2ca   : > { %2311 = vrot.lane.b32.xlu1 %v2299_v25, %s6123_s25  ;;  %2944 = vmatpush.msra.mxu1 %v5228_v20  ;;  %v5323_v25 = vld [vmem:[%s9749_s2 + $0x360] sm:$0xff]  ;;  %v5302_v20 = vld [vmem:[%s9749_s2 + $0x2c8] sm:$0xff]  ;;  %v5318_v54 = vld [vmem:[%s9749_s2 + $0x338] sm:$0xff] }
 0x2cb   : > { %1219 = vrot.lane.b32.xlu0 %v9992_v19, %s6119_s9  ;;  %2988 = vmatpush.msra.mxu2 %v5246_v36  ;;  %v5303_v19 = vld [vmem:[%s9749_s2 + $0x2d0] sm:$0xff]  ;;  %v5320_v36 = vld [vmem:[%s9749_s2 + $0x348] sm:$0xff] }
 0x2cc   : > { %2945 = vmatpush.msra.mxu1 %v5227_v40  ;;  %3033 = vmatpush.msra.mxu3 %v5263_v50  ;;  %v5319_v40 = vld [vmem:[%s9749_s2 + $0x340] sm:$0xff]  ;;  %v5300_v50 = vld [vmem:[%s9749_s2 + $0x2b8] sm:$0xff] }
 0x2cd   : > { %2989 = vmatpush.msra.mxu2 %v5245_v11  ;;  %2904 = vmatpush.msra.mxu0 %v2871_v8  ;;  %v5337_v11 = vld [vmem:[%s9749_s2 + $0x3c0] sm:$0xff] }
 0x2ce   : > { %2946 = vmatpush.msra.mxu1 %v5226_v34  ;;  %3034 = vmatpush.msra.mxu3 %v5262_v47  ;;  %v5280_v34 = vld [vmem:[%s9749_s2 + $0x228] sm:$0xff]  ;;  %v5317_v47 = vld [vmem:[%s9749_s2 + $0x330] sm:$0xff]  ;;  %v5279_v8 = vld [vmem:[%s9749_s2 + $0x220] sm:$0xff] }
 0x2cf   : > { %2990 = vmatpush.msra.mxu2 %v5244_v45  ;;  %2905 = vmatpush.msra.mxu0 %v2870_v35  ;;  %v5299_v45 = vld [vmem:[%s9749_s2 + $0x2b0] sm:$0xff]  ;;  %v5297_v35 = vld [vmem:[%s9749_s2 + $0x2a0] sm:$0xff] }
 0x2d0   : > { %2947 = vmatpush.msra.mxu1 %v5225_v41  ;;  %3035 = vmatpush.msra.mxu3 %v5261_v23  ;;  %v5298_v41 = vld [vmem:[%s9749_s2 + $0x2a8] sm:$0xff]  ;;  %v5278_v23 = vld [vmem:[%s9749_s2 + $0x218] sm:$0xff] }
 0x2d1   : > { %2991 = vmatpush.msra.mxu2 %v5243_v18  ;;  %2906 = vmatpush.msra.mxu0 %v2869_v55  ;;  %v5334_v18 = vld [vmem:[%s9749_s2 + $0x3a8] sm:$0xff]  ;;  %v5332_v55 = vld [vmem:[%s9749_s2 + $0x398] sm:$0xff] }
 0x2d2   : > { %2948 = vmatpush.msra.mxu1 %v5224_v2  ;;  %3036 = vmatpush.msra.mxu3 %v5260_v46  ;;  %v5315_v2 = vld [vmem:[%s9749_s2 + $0x320] sm:$0xff]  ;;  %v5296_v46 = vld [vmem:[%s9749_s2 + $0x298] sm:$0xff] }
 0x2d3   : > { %2038 = vrot.lane.b32.xlu0 %v7878_v43, %s6122_s17  ;;  %v2826_v43 = vadd.f32 %v2825_v14, %v2807_v22  ;;  %2992 = vmatpush.msra.mxu2 %v5242_v7  ;;  %v5335_v14 = vld [vmem:[%s9749_s2 + $0x3b0] sm:$0xff]  ;;  %v5316_v22 = vld [vmem:[%s9749_s2 + $0x328] sm:$0xff] }
 0x2d4   : > { %2949 = vmatpush.msra.mxu1 %v5223_v63  ;;  %3037 = vmatpush.msra.mxu3 %v5259_v9  ;;  %v5277_v7 = vld [vmem:[%s9749_s2 + $0x210] sm:$0xff]  ;;  %v5276_v63 = vld [vmem:[%s9749_s2 + $0x208] sm:$0xff] }
 0x2d5   : > { %v2845_v39 = vadd.f32 %v2844_v56, %v2826_v43  ;;  %2993 = vmatpush.msra.mxu2 %v5241_v16  ;;  %2907 = vmatpush.msra.mxu0 %v2868_v31  ;;  %v5333_v43 = vld [vmem:[%s9749_s2 + $0x3a0] sm:$0xff]  ;;  %v5314_v56 = vld [vmem:[%s9749_s2 + $0x318] sm:$0xff]  ;;  %v5295_v16 = vld [vmem:[%s9749_s2 + $0x290] sm:$0xff] }
 0x2d6   : > { %2950 = vmatpush.msra.mxu1 %v5222_v51  ;;  %3038 = vmatpush.msra.mxu3 %v5258_v37  ;;  %v5313_v9 = vld [vmem:[%s9749_s2 + $0x310] sm:$0xff]  ;;  %v5294_v51 = vld [vmem:[%s9749_s2 + $0x288] sm:$0xff] }
 0x2d7   : > { %2994 = vmatpush.msra.mxu2 %v5240_v32  ;;  %5291 = vmatpush.msk.msrb.mxu0 %vm2888_vm2, %v5290_v30  ;;  %v5331_v31 = vld [vmem:[%s9749_s2 + $0x390] sm:$0xff]  ;;  %v5312_v32 = vld [vmem:[%s9749_s2 + $0x308] sm:$0xff]  ;;  %v5293_v30 = vld [vmem:[%s9749_s2 + $0x280] sm:$0xff] }
 0x2d8   : > { %2951 = vmatpush.msra.mxu1 %v5221_v10  ;;  %3039 = vmatpush.msra.mxu3 %v5257_v6  ;;  %v5330_v37 = vld [vmem:[%s9749_s2 + $0x388] sm:$0xff]  ;;  %v5311_v10 = vld [vmem:[%s9749_s2 + $0x300] sm:$0xff]  ;;  %v1214_v6 = vpop.permute.xlu0 %1213 }
 0x2d9   : > { %2995 = vmatpush.msra.mxu2 %v5239_v48  ;;  %3069 = vmatpush.msrb.mxu0 %v5289_v58  ;;  %v5329_v48 = vld [vmem:[%s9749_s2 + $0x380] sm:$0xff]  ;;  %v1760_v58 = vpop.permute.xlu1 %1759 }
 0x2da   : > { %5309 = vmatpush.msk.msrb.mxu1 %vm2888_vm2, %v5308_v5  ;;  %5345 = vmatpush.msk.msrb.mxu3 %vm2888_vm2, %v5344_v52  ;;  %v9993_v52 = vld [vmem:[#allocation17_spill] sm:$0xff] }
 0x2db   : > { %2857 = vrot.lane.b32.xlu0 %v2845_v39, %s6125_s18  ;;  %5327 = vmatpush.msk.msrb.mxu2 %vm2888_vm2, %v5326_v0  ;;  %v5275_v39 = vld [vmem:[%s9749_s2 + $0x200] sm:$0xff]  ;;  %v2306_v0 = vpop.permute.xlu2 %2305 }
 0x2dc   : > { %3070 = vmatpush.msrb.mxu0 %v5288_v17  ;;  %3113 = vmatpush.msrb.mxu1 %v5307_v33  ;;  %v1225_v17 = vadd.f32 %v1214_v6, %v9993_v52  ;;  %v5390_v6 = vld [vmem:[%s9749_s2 + $0x538] sm:$0xff]  ;;  %v5371_v52 = vld [vmem:[%s9749_s2 + $0x4b0] sm:$0xff] }
 0x2dd   : > { %3157 = vmatpush.msrb.mxu2 %v5325_v28  ;;  %3201 = vmatpush.msrb.mxu3 %v5343_v12 }
 0x2de   : > { %3071 = vmatpush.msrb.mxu0 %v5287_v15  ;;  %3114 = vmatpush.msrb.mxu1 %v5306_v62 }
 0x2df   : > { %3158 = vmatpush.msrb.mxu2 %v5324_v49  ;;  %3202 = vmatpush.msrb.mxu3 %v5342_v13 }
 0x2e0   : > { %3072 = vmatpush.msrb.mxu0 %v5286_v59  ;;  %3115 = vmatpush.msrb.mxu1 %v5305_v57  ;;  %v1487_v5 = vpop.permute.xlu0 %1486 }
 0x2e1   : > { %3159 = vmatpush.msrb.mxu2 %v5323_v25  ;;  %3203 = vmatpush.msrb.mxu3 %v5341_v38  ;;  %v1498_v33 = vadd.f32 %v1487_v5, %v1225_v17  ;;  %v2033_v28 = vpop.permute.xlu1 %2032  ;;  %v5362_v25 = vld [vmem:[%s9749_s2 + $0x478] sm:$0x1]  ;;  %v5352_v5 = vld [vmem:[%s9749_s2 + $0x428] sm:$0xff]  ;;  %v5389_v17 = vld [vmem:[%s9749_s2 + $0x530] sm:$0xff] }
 0x2e2   : > { %3073 = vmatpush.msrb.mxu0 %v5285_v61  ;;  %3116 = vmatpush.msrb.mxu1 %v5304_v26 }
 0x2e3   : > { %3160 = vmatpush.msrb.mxu2 %v5322_v27  ;;  %3204 = vmatpush.msrb.mxu3 %v5340_v1  ;;  %v1771_v12 = vadd.f32 %v1760_v58, %v1498_v33  ;;  %v2579_v62 = vpop.permute.xlu2 %2578  ;;  %v5361_v27 = vld [vmem:[%s9749_s2 + $0x470] sm:$0xff]  ;;  %v5380_v1 = vld [vmem:[%s9749_s2 + $0x4f8] sm:$0x1] }
 0x2e4   : > { %3074 = vmatpush.msrb.mxu0 %v5284_v44  ;;  %3117 = vmatpush.msrb.mxu1 %v5303_v19  ;;  %v5398_v44 = vld [vmem:[%s9749_s2 + $0x578] sm:$0x1] }
 0x2e5   : > { %3161 = vmatpush.msrb.mxu2 %v5321_v29  ;;  %3205 = vmatpush.msrb.mxu3 %v5339_v42  ;;  %v2044_v15 = vadd.f32 %v2033_v28, %v1771_v12  ;;  %v5416_v19 = vld [vmem:[%s9749_s2 + $0x5f8] sm:$0x1]  ;;  %v5360_v29 = vld [vmem:[%s9749_s2 + $0x468] sm:$0xff]  ;;  %v5379_v42 = vld [vmem:[%s9749_s2 + $0x4f0] sm:$0xff] }
 0x2e6   : > { %3075 = vmatpush.msrb.mxu0 %v5283_v24  ;;  %3118 = vmatpush.msrb.mxu1 %v5302_v20  ;;  %v5397_v24 = vld [vmem:[%s9749_s2 + $0x570] sm:$0xff]  ;;  %v5408_v58 = vld [vmem:[%s9749_s2 + $0x5b8] sm:$0xff]  ;;  %v5351_v12 = vld [vmem:[%s9749_s2 + $0x420] sm:$0xff] }
 0x2e7   : > { %3162 = vmatpush.msrb.mxu2 %v5320_v36  ;;  %3206 = vmatpush.msrb.mxu3 %v5338_v4  ;;  %v2317_v49 = vadd.f32 %v2306_v0, %v2044_v15  ;;  %v5415_v20 = vld [vmem:[%s9749_s2 + $0x5f0] sm:$0xff]  ;;  %v5359_v36 = vld [vmem:[%s9749_s2 + $0x460] sm:$0xff]  ;;  %v5378_v4 = vld [vmem:[%s9749_s2 + $0x4e8] sm:$0xff] }
 0x2e8   : > { %3076 = vmatpush.msrb.mxu0 %v5282_v21  ;;  %3119 = vmatpush.msrb.mxu1 %v5301_v60  ;;  %v5396_v21 = vld [vmem:[%s9749_s2 + $0x568] sm:$0xff]  ;;  %v5407_v28 = vld [vmem:[%s9749_s2 + $0x5b0] sm:$0xff] }
 0x2e9   : > { %3163 = vmatpush.msrb.mxu2 %v5319_v40  ;;  %3207 = vmatpush.msrb.mxu3 %v5337_v11  ;;  %v2590_v13 = vadd.f32 %v2579_v62, %v2317_v49  ;;  %v5414_v60 = vld [vmem:[%s9749_s2 + $0x5e8] sm:$0xff]  ;;  %v5358_v11 = vld [vmem:[%s9749_s2 + $0x458] sm:$0xff] }
 0x2ea   : > { %3077 = vmatpush.msrb.mxu0 %v5281_v3  ;;  %3120 = vmatpush.msrb.mxu1 %v5300_v50  ;;  %v5377_v3 = vld [vmem:[%s9749_s2 + $0x4e0] sm:$0xff]  ;;  %v5370_v15 = vld [vmem:[%s9749_s2 + $0x4a8] sm:$0xff] }
 0x2eb   : > { %3164 = vmatpush.msrb.mxu2 %v5318_v54  ;;  %3208 = vmatpush.msrb.mxu3 %v5336_v53  ;;  %v5395_v50 = vld [vmem:[%s9749_s2 + $0x560] sm:$0xff]  ;;  %v5388_v62 = vld [vmem:[%s9749_s2 + $0x528] sm:$0xff] }
 0x2ec   : > { %3078 = vmatpush.msrb.mxu0 %v5280_v34  ;;  %3121 = vmatpush.msrb.mxu1 %v5299_v45  ;;  %v5413_v54 = vld [vmem:[%s9749_s2 + $0x5e0] sm:$0xff]  ;;  %v5357_v45 = vld [vmem:[%s9749_s2 + $0x450] sm:$0xff]  ;;  %v5406_v49 = vld [vmem:[%s9749_s2 + $0x5a8] sm:$0xff] }
 0x2ed   : > { %3165 = vmatpush.msrb.mxu2 %v5317_v47  ;;  %3209 = vmatpush.msrb.mxu3 %v5335_v14  ;;  %v1216_v47 = vpop.permute.xlu1 %1215 }
 0x2ee   : > { %3079 = vmatpush.msrb.mxu0 %v5279_v8  ;;  %3122 = vmatpush.msrb.mxu1 %v5298_v41  ;;  %v5376_v8 = vld [vmem:[%s9749_s2 + $0x4d8] sm:$0xff] }
 0x2ef   : > { %3166 = vmatpush.msrb.mxu2 %v5316_v22  ;;  %3210 = vmatpush.msrb.mxu3 %v5334_v18  ;;  %v5394_v41 = vld [vmem:[%s9749_s2 + $0x558] sm:$0xff]  ;;  %v5356_v18 = vld [vmem:[%s9749_s2 + $0x448] sm:$0xff] }
 0x2f0   : > { %3080 = vmatpush.msrb.mxu0 %v5278_v23  ;;  %3123 = vmatpush.msrb.mxu1 %v5297_v35  ;;  %v5412_v22 = vld [vmem:[%s9749_s2 + $0x5d8] sm:$0xff]  ;;  %v1489_v23 = vpop.permute.xlu2 %1488  ;;  %v5375_v35 = vld [vmem:[%s9749_s2 + $0x4d0] sm:$0xff] }
 0x2f1   : > { %3167 = vmatpush.msrb.mxu2 %v5315_v2  ;;  %3211 = vmatpush.msrb.mxu3 %v5333_v43  ;;  %v5393_v2 = vld [vmem:[%s9749_s2 + $0x550] sm:$0xff]  ;;  %v9994_v43 = vld [vmem:[#allocation18_spill] sm:$0xff] }
 0x2f2   : > { %3081 = vmatpush.msrb.mxu0 %v5277_v7  ;;  %3124 = vmatpush.msrb.mxu1 %v5296_v46  ;;  %v1226_v7 = vadd.f32 %v1216_v47, %v9994_v43  ;;  %v5411_v46 = vld [vmem:[%s9749_s2 + $0x5d0] sm:$0xff] }
 0x2f3   : > { %3168 = vmatpush.msrb.mxu2 %v5314_v56  ;;  %3212 = vmatpush.msrb.mxu3 %v5332_v55  ;;  %v5355_v56 = vld [vmem:[%s9749_s2 + $0x440] sm:$0xff]  ;;  %v5487_v43 = vld [vmem:[%s9749_s2 + $0x7f0] sm:$0xff] }
 0x2f4   : > { %3082 = vmatpush.msrb.mxu0 %v5276_v63  ;;  %3125 = vmatpush.msrb.mxu1 %v5295_v16  ;;  %v5374_v63 = vld [vmem:[%s9749_s2 + $0x4c8] sm:$0xff] }
 0x2f5   : > { %3169 = vmatpush.msrb.mxu2 %v5313_v9  ;;  %3213 = vmatpush.msrb.mxu3 %v5331_v31  ;;  %v5392_v16 = vld [vmem:[%s9749_s2 + $0x548] sm:$0xff]  ;;  %v1499_v9 = vadd.f32 %v1489_v23, %v1226_v7  ;;  %v2035_v0 = vpop.permute.xlu1 %2034  ;;  %v5431_v7 = vld [vmem:[%s9749_s2 + $0x660] sm:$0xff] }
 0x2f6   : > { %3083 = vmatpush.msrb.mxu0 %v5275_v39  ;;  %3126 = vmatpush.msrb.mxu1 %v5294_v51  ;;  %v5410_v31 = vld [vmem:[%s9749_s2 + $0x5c8] sm:$0xff]  ;;  %v5354_v39 = vld [vmem:[%s9749_s2 + $0x438] sm:$0xff]  ;;  %v5373_v51 = vld [vmem:[%s9749_s2 + $0x4c0] sm:$0xff] }
 0x2f7   : > { %3170 = vmatpush.msrb.mxu2 %v5312_v32  ;;  %3214 = vmatpush.msrb.mxu3 %v5330_v37  ;;  %v5391_v32 = vld [vmem:[%s9749_s2 + $0x540] sm:$0xff]  ;;  %v5432_v23 = vld [vmem:[%s9749_s2 + $0x668] sm:$0xff] }
 0x2f8   : > { %3127 = vmatpush.msrb.mxu1 %v5293_v30  ;;  %v5409_v30 = vld [vmem:[%s9749_s2 + $0x5c0] sm:$0xff] }
 0x2f9   : > { %3171 = vmatpush.msrb.mxu2 %v5311_v10  ;;  %3215 = vmatpush.msrb.mxu3 %v5329_v48  ;;  %v5353_v10 = vld [vmem:[%s9749_s2 + $0x430] sm:$0xff]  ;;  %v5372_v48 = vld [vmem:[%s9749_s2 + $0x4b8] sm:$0xff] }
 0x314   : > { %v2852_v59 = vpop.permute.xlu0 %2851 }
 0x315   : > { %v2863_v57 = vadd.f32 %v2852_v59, %v2590_v13  ;;  %v5350_v13 = vld [vmem:[%s9749_s2 + $0x418] sm:$0xff]  ;;  %v2308_v59 = vpop.permute.xlu2 %2307 }
 0x317   : > { %5220 = vmatmul.msk.f32.vlgmr.msra.gmra.mxu0 %vm2884_vm3, %v2863_v57  ;;  %v2930_v38 = vrot.slane %v2863_v57, 1  ;;  %v2974_v61 = vrot.slane %v2863_v57, 2  ;;  %v3018_v26 = vrot.slane %v2863_v57, 3  ;;  %v3062_v40 = vrot.slane %v2863_v57, 4 }
 0x318   : > { %5363 = vmatpush.msk.msra.mxu0 %vm2888_vm2, %v5362_v25  ;;  %v3106_v53 = vrot.slane %v2863_v57, 5  ;;  %v3150_v34 = vrot.slane %v2863_v57, 6  ;;  %v3194_v14 = vrot.slane %v2863_v57, 7  ;;  %v5369_v25 = vld [vmem:[%s9749_s2 + $0x4a0] sm:$0xff] }
 0x319   : > { %5238 = vmatmul.msk.f32.vlgmr.msra.gmra.mxu1 %vm2884_vm3, %v2930_v38  ;;  %5256 = vmatmul.msk.f32.vlgmr.msra.gmra.mxu2 %vm2884_vm3, %v2974_v61  ;;  %v5387_v38 = vld [vmem:[%s9749_s2 + $0x520] sm:$0xff] }
 0x31a   : > { %5274 = vmatmul.msk.f32.vlgmr.msra.gmra.mxu3 %vm2884_vm3, %v3018_v26  ;;  %3245 = vmatpush.msra.mxu0 %v5361_v27  ;;  %v5405_v26 = vld [vmem:[%s9749_s2 + $0x5a0] sm:$0xff]  ;;  %v5349_v27 = vld [vmem:[%s9749_s2 + $0x410] sm:$0xff] }
 0x31b   : > { %5381 = vmatpush.msk.msra.mxu1 %vm2888_vm2, %v5380_v1  ;;  %5399 = vmatpush.msk.msra.mxu2 %vm2888_vm2, %v5398_v44  ;;  %v5368_v1 = vld [vmem:[%s9749_s2 + $0x498] sm:$0xff] }
 0x31c   : > { %5417 = vmatpush.msk.msra.mxu3 %vm2888_vm2, %v5416_v19  ;;  %3246 = vmatpush.msra.mxu0 %v5360_v29  ;;  %v1762_v55 = vpop.permute.xlu0 %1761  ;;  %v5386_v44 = vld [vmem:[%s9749_s2 + $0x518] sm:$0xff] }
 0x31d   : > { %3289 = vmatpush.msra.mxu1 %v5379_v42  ;;  %3333 = vmatpush.msra.mxu2 %v5397_v24  ;;  %v1772_v37 = vadd.f32 %v1762_v55, %v1499_v9  ;;  %v5404_v29 = vld [vmem:[%s9749_s2 + $0x598] sm:$0xff]  ;;  %v5348_v42 = vld [vmem:[%s9749_s2 + $0x408] sm:$0xff]  ;;  %v5367_v24 = vld [vmem:[%s9749_s2 + $0x490] sm:$0xff] }
 0x31e   : > { %3377 = vmatpush.msra.mxu3 %v5415_v20  ;;  %3247 = vmatpush.msra.mxu0 %v5359_v36  ;;  %v5385_v20 = vld [vmem:[%s9749_s2 + $0x510] sm:$0xff]  ;;  %v5486_v55 = vld [vmem:[%s9749_s2 + $0x7e8] sm:$0xff]  ;;  %v5467_v9 = vld [vmem:[%s9749_s2 + $0x760] sm:$0xff] }
 0x31f   : > { %3290 = vmatpush.msra.mxu1 %v5378_v4  ;;  %3334 = vmatpush.msra.mxu2 %v5396_v21  ;;  %v2045_v33 = vadd.f32 %v2035_v0, %v1772_v37  ;;  %v5403_v36 = vld [vmem:[%s9749_s2 + $0x590] sm:$0xff]  ;;  %v5347_v4 = vld [vmem:[%s9749_s2 + $0x400] sm:$0xff]  ;;  %v2854_v21 = vpop.permute.xlu1 %2853  ;;  %v5484_v37 = vld [vmem:[%s9749_s2 + $0x7d8] sm:$0xff] }
 0x320   : > { %3378 = vmatpush.msra.mxu3 %v5414_v60  ;;  %5292 = vmatmul.msk.f32.vlgmr.msrb.gmra.mxu0 %vm2884_vm3, %v3062_v40  ;;  %v5366_v60 = vld [vmem:[%s9749_s2 + $0x488] sm:$0xff] }
 0x321   : > { %3248 = vmatpush.msra.mxu0 %v5358_v11  ;;  %3291 = vmatpush.msra.mxu1 %v5377_v3  ;;  %v2318_v61 = vadd.f32 %v2308_v59, %v2045_v33  ;;  %v5384_v40 = vld [vmem:[%s9749_s2 + $0x508] sm:$0xff]  ;;  %v5445_v33 = vld [vmem:[%s9749_s2 + $0x6c0] sm:$0xff] }
 0x322   : > { %3335 = vmatpush.msra.mxu2 %v5395_v50  ;;  %3379 = vmatpush.msra.mxu3 %v5413_v54  ;;  %v5402_v3 = vld [vmem:[%s9749_s2 + $0x588] sm:$0xff]  ;;  %v5434_v50 = vld [vmem:[%s9749_s2 + $0x678] sm:$0x1]  ;;  %v5365_v54 = vld [vmem:[%s9749_s2 + $0x480] sm:$0xff] }
 0x323   : > { %5310 = vmatmul.msk.f32.vlgmr.msrb.gmra.mxu1 %vm2884_vm3, %v3106_v53  ;;  %5328 = vmatmul.msk.f32.vlgmr.msrb.gmra.mxu2 %vm2884_vm3, %v3150_v34  ;;  %v5383_v53 = vld [vmem:[%s9749_s2 + $0x500] sm:$0xff]  ;;  %v5464_v0 = vld [vmem:[%s9749_s2 + $0x748] sm:$0xff] }
 0x324   : > { %5346 = vmatmul.msk.f32.vlgmr.msrb.gmra.mxu3 %vm2884_vm3, %v3194_v14  ;;  %3249 = vmatpush.msra.mxu0 %v5357_v45  ;;  %v5401_v34 = vld [vmem:[%s9749_s2 + $0x580] sm:$0xff]  ;;  %v5433_v14 = vld [vmem:[%s9749_s2 + $0x670] sm:$0xff]  ;;  %v5424_v59 = vld [vmem:[%s9749_s2 + $0x628] sm:$0xff] }
 0x325   : > { %3292 = vmatpush.msra.mxu1 %v5376_v8  ;;  %3336 = vmatpush.msra.mxu2 %v5394_v41  ;;  %v2581_v57 = vpop.permute.xlu0 %2580  ;;  %v5452_v41 = vld [vmem:[%s9749_s2 + $0x6f8] sm:$0x1] }
 0x326   : > { %3380 = vmatpush.msra.mxu3 %v5412_v22  ;;  %3250 = vmatpush.msra.mxu0 %v5356_v18  ;;  %v2591_v19 = vadd.f32 %v2581_v57, %v2318_v61  ;;  %v5470_v22 = vld [vmem:[%s9749_s2 + $0x778] sm:$0x1]  ;;  %v5443_v57 = vld [vmem:[%s9749_s2 + $0x6b0] sm:$0xff]  ;;  %v5423_v61 = vld [vmem:[%s9749_s2 + $0x620] sm:$0xff] }
 0x327   : > { %3293 = vmatpush.msra.mxu1 %v5375_v35  ;;  %3337 = vmatpush.msra.mxu2 %v5393_v2  ;;  %v5488_v18 = vld [vmem:[%s9749_s2 + $0x7f8] sm:$0x1]  ;;  %v5451_v35 = vld [vmem:[%s9749_s2 + $0x6f0] sm:$0xff] }
 0x328   : > { %3381 = vmatpush.msra.mxu3 %v5411_v46  ;;  %3251 = vmatpush.msra.mxu0 %v5355_v56  ;;  %v8689_v11 = vadd.f32 %v2854_v21, %v2591_v19  ;;  %v5469_v2 = vld [vmem:[%s9749_s2 + $0x770] sm:$0xff]  ;;  %v5450_v46 = vld [vmem:[%s9749_s2 + $0x6e8] sm:$0xff]  ;;  %v5441_v19 = vld [vmem:[%s9749_s2 + $0x6a0] sm:$0xff] }
 0x329   : > { %3294 = vmatpush.msra.mxu1 %v5374_v63  ;;  %3338 = vmatpush.msra.mxu2 %v5392_v16  ;;  %v5468_v56 = vld [vmem:[%s9749_s2 + $0x768] sm:$0xff]  ;;  %v5430_v63 = vld [vmem:[%s9749_s2 + $0x658] sm:$0xff]  ;;  %v5449_v16 = vld [vmem:[%s9749_s2 + $0x6e0] sm:$0xff] }
 0x32a   : > { %3382 = vmatpush.msra.mxu3 %v5410_v31  ;;  %3252 = vmatpush.msra.mxu0 %v5354_v39  ;;  %v3282_v45 = vrot.slane %v8689_v11, 1  ;;  %v3326_v47 = vrot.slane %v8689_v11, 2  ;;  %v3370_v8 = vrot.slane %v8689_v11, 3  ;;  %v5485_v31 = vld [vmem:[%s9749_s2 + $0x7e0] sm:$0xff]  ;;  %v5429_v39 = vld [vmem:[%s9749_s2 + $0x650] sm:$0xff]  ;;  %v5420_v21 = vld [vmem:[%s9749_s2 + $0x608] sm:$0xff] }
 0x32b   : > { %3295 = vmatpush.msra.mxu1 %v5373_v51  ;;  %3339 = vmatpush.msra.mxu2 %v5391_v32  ;;  %v5448_v51 = vld [vmem:[%s9749_s2 + $0x6d8] sm:$0xff] }
 0x32c   : > { %3383 = vmatpush.msra.mxu3 %v5409_v30  ;;  %3253 = vmatpush.msra.mxu0 %v5353_v10  ;;  %v5466_v32 = vld [vmem:[%s9749_s2 + $0x758] sm:$0xff]  ;;  %v5428_v30 = vld [vmem:[%s9749_s2 + $0x648] sm:$0xff]  ;;  %v5447_v10 = vld [vmem:[%s9749_s2 + $0x6d0] sm:$0xff] }
 0x32d   : > { %3296 = vmatpush.msra.mxu1 %v5372_v48  ;;  %3340 = vmatpush.msra.mxu2 %v5390_v6  ;;  %v5465_v48 = vld [vmem:[%s9749_s2 + $0x750] sm:$0xff] }
 0x32e   : > { %3384 = vmatpush.msra.mxu3 %v5408_v58  ;;  %3254 = vmatpush.msra.mxu0 %v5352_v5  ;;  %v5483_v6 = vld [vmem:[%s9749_s2 + $0x7d0] sm:$0xff]  ;;  %v5427_v58 = vld [vmem:[%s9749_s2 + $0x640] sm:$0xff]  ;;  %v5446_v5 = vld [vmem:[%s9749_s2 + $0x6c8] sm:$0xff] }
 0x32f   : > { %3297 = vmatpush.msra.mxu1 %v5371_v52  ;;  %3341 = vmatpush.msra.mxu2 %v5389_v17  ;;  %v5482_v52 = vld [vmem:[%s9749_s2 + $0x7c8] sm:$0xff]  ;;  %v5426_v17 = vld [vmem:[%s9749_s2 + $0x638] sm:$0xff] }
 0x330   : > { %3385 = vmatpush.msra.mxu3 %v5407_v28  ;;  %3255 = vmatpush.msra.mxu0 %v5351_v12  ;;  %v5463_v28 = vld [vmem:[%s9749_s2 + $0x740] sm:$0xff] }
 0x331   : > { %3298 = vmatpush.msra.mxu1 %v5370_v15  ;;  %3342 = vmatpush.msra.mxu2 %v5388_v62  ;;  %v5481_v12 = vld [vmem:[%s9749_s2 + $0x7c0] sm:$0xff]  ;;  %v5425_v15 = vld [vmem:[%s9749_s2 + $0x630] sm:$0xff]  ;;  %v5444_v62 = vld [vmem:[%s9749_s2 + $0x6b8] sm:$0xff] }
 0x332   : > { %3386 = vmatpush.msra.mxu3 %v5406_v49  ;;  %3256 = vmatpush.msra.mxu0 %v5350_v13  ;;  %v5462_v49 = vld [vmem:[%s9749_s2 + $0x738] sm:$0xff] }
 0x333   : > { %3299 = vmatpush.msra.mxu1 %v5369_v25  ;;  %3343 = vmatpush.msra.mxu2 %v5387_v38  ;;  %v5480_v13 = vld [vmem:[%s9749_s2 + $0x7b8] sm:$0xff]  ;;  %v5461_v25 = vld [vmem:[%s9749_s2 + $0x730] sm:$0xff] }
 0x334   : > { %3387 = vmatpush.msra.mxu3 %v5405_v26  ;;  %3257 = vmatpush.msra.mxu0 %v5349_v27  ;;  %v5479_v38 = vld [vmem:[%s9749_s2 + $0x7b0] sm:$0xff]  ;;  %v5442_v26 = vld [vmem:[%s9749_s2 + $0x6a8] sm:$0xff] }
 0x335   : > { %3300 = vmatpush.msra.mxu1 %v5368_v1  ;;  %3344 = vmatpush.msra.mxu2 %v5386_v44  ;;  %v5460_v27 = vld [vmem:[%s9749_s2 + $0x728] sm:$0xff]  ;;  %v5422_v44 = vld [vmem:[%s9749_s2 + $0x618] sm:$0xff] }
 0x336   : > { %3388 = vmatpush.msra.mxu3 %v5404_v29  ;;  %3258 = vmatpush.msra.mxu0 %v5348_v42  ;;  %v5478_v1 = vld [vmem:[%s9749_s2 + $0x7a8] sm:$0xff]  ;;  %v5459_v29 = vld [vmem:[%s9749_s2 + $0x720] sm:$0xff] }
 0x337   : > { %3301 = vmatpush.msra.mxu1 %v5367_v24  ;;  %3345 = vmatpush.msra.mxu2 %v5385_v20  ;;  %v5477_v42 = vld [vmem:[%s9749_s2 + $0x7a0] sm:$0xff]  ;;  %v5421_v24 = vld [vmem:[%s9749_s2 + $0x610] sm:$0xff]  ;;  %v5440_v20 = vld [vmem:[%s9749_s2 + $0x698] sm:$0xff] }
 0x338   : > { %3389 = vmatpush.msra.mxu3 %v5403_v36  ;;  %3259 = vmatpush.msra.mxu0 %v5347_v4  ;;  %v5458_v36 = vld [vmem:[%s9749_s2 + $0x718] sm:$0xff] }
 0x339   : > { %3302 = vmatpush.msra.mxu1 %v5366_v60  ;;  %3346 = vmatpush.msra.mxu2 %v5384_v40  ;;  %v5476_v4 = vld [vmem:[%s9749_s2 + $0x798] sm:$0xff]  ;;  %v5439_v60 = vld [vmem:[%s9749_s2 + $0x690] sm:$0xff] }
 0x33a   : > { %3390 = vmatpush.msra.mxu3 %v5402_v3  ;;  %5364 = vmatmul.msk.f32.vlgmr.msra.gmra.mxu0 %vm2884_vm3, %v8689_v11  ;;  %v5457_v40 = vld [vmem:[%s9749_s2 + $0x710] sm:$0xff] }
 0x33b   : > { %5435 = vmatpush.msk.msrb.mxu0 %vm2888_vm2, %v5434_v50  ;;  %3303 = vmatpush.msra.mxu1 %v5365_v54  ;;  %v5475_v3 = vld [vmem:[%s9749_s2 + $0x790] sm:$0xff]  ;;  %v5419_v50 = vld [vmem:[%s9749_s2 + $0x600] sm:$0xff]  ;;  %v5438_v54 = vld [vmem:[%s9749_s2 + $0x688] sm:$0xff] }
 0x33c   : > { %3347 = vmatpush.msra.mxu2 %v5383_v53  ;;  %3391 = vmatpush.msra.mxu3 %v5401_v34  ;;  %v5456_v53 = vld [vmem:[%s9749_s2 + $0x708] sm:$0xff] }
 0x33d   : > { %5382 = vmatmul.msk.f32.vlgmr.msra.gmra.mxu1 %vm2884_vm3, %v3282_v45  ;;  %5400 = vmatmul.msk.f32.vlgmr.msra.gmra.mxu2 %vm2884_vm3, %v3326_v47  ;;  %v5474_v34 = vld [vmem:[%s9749_s2 + $0x788] sm:$0xff]  ;;  %v3414_v45 = vrot.slane %v8689_v11, 4  ;;  %v5506_v47 = vld [vmem:[%s9749_s2 + $0x878] sm:$0x1] }
 0x33e   : > { %5418 = vmatmul.msk.f32.vlgmr.msra.gmra.mxu3 %vm2884_vm3, %v3370_v8  ;;  %3421 = vmatpush.msrb.mxu0 %v5433_v14  ;;  %v5437_v14 = vld [vmem:[%s9749_s2 + $0x680] sm:$0xff] }
 0x33f   : > { %5453 = vmatpush.msk.msrb.mxu1 %vm2888_vm2, %v5452_v41  ;;  %5471 = vmatpush.msk.msrb.mxu2 %vm2888_vm2, %v5470_v22  ;;  %v5455_v8 = vld [vmem:[%s9749_s2 + $0x700] sm:$0xff]  ;;  %v3458_v22 = vrot.slane %v8689_v11, 5 }
 0x340   : > { %5489 = vmatpush.msk.msrb.mxu3 %vm2888_vm2, %v5488_v18  ;;  %3422 = vmatpush.msrb.mxu0 %v5432_v23  ;;  %v5473_v41 = vld [vmem:[%s9749_s2 + $0x780] sm:$0xff]  ;;  %v3502_v18 = vrot.slane %v8689_v11, 6  ;;  %v5505_v23 = vld [vmem:[%s9749_s2 + $0x870] sm:$0xff] }
 0x341   : > { %3465 = vmatpush.msrb.mxu1 %v5451_v35  ;;  %3509 = vmatpush.msrb.mxu2 %v5469_v2  ;;  %v3546_v35 = vrot.slane %v8689_v11, 7  ;;  %v5524_v2 = vld [vmem:[%s9749_s2 + $0x8f8] sm:$0x1]  ;;  %v5504_v11 = vld [vmem:[%s9749_s2 + $0x868] sm:$0xff] }
 0x342   : > { %3553 = vmatpush.msrb.mxu3 %v5487_v43  ;;  %3423 = vmatpush.msrb.mxu0 %v5431_v7  ;;  %v5542_v43 = vld [vmem:[%s9749_s2 + $0x978] sm:$0x1] }
 0x343   : > { %3466 = vmatpush.msrb.mxu1 %v5450_v46  ;;  %3510 = vmatpush.msrb.mxu2 %v5468_v56  ;;  %v5560_v7 = vld [vmem:[%s9749_s2 + $0x9f8] sm:$0x1]  ;;  %v5523_v46 = vld [vmem:[%s9749_s2 + $0x8f0] sm:$0xff] }
 0x344   : > { %3554 = vmatpush.msrb.mxu3 %v5486_v55  ;;  %3424 = vmatpush.msrb.mxu0 %v5430_v63  ;;  %v5541_v56 = vld [vmem:[%s9749_s2 + $0x970] sm:$0xff]  ;;  %v5503_v63 = vld [vmem:[%s9749_s2 + $0x860] sm:$0xff] }
 0x345   : > { %3467 = vmatpush.msrb.mxu1 %v5449_v16  ;;  %3511 = vmatpush.msrb.mxu2 %v5467_v9  ;;  %v5559_v55 = vld [vmem:[%s9749_s2 + $0x9f0] sm:$0xff]  ;;  %v5522_v16 = vld [vmem:[%s9749_s2 + $0x8e8] sm:$0xff] }
 0x346   : > { %3555 = vmatpush.msrb.mxu3 %v5485_v31  ;;  %3425 = vmatpush.msrb.mxu0 %v5429_v39  ;;  %v5540_v9 = vld [vmem:[%s9749_s2 + $0x968] sm:$0xff]  ;;  %v5502_v39 = vld [vmem:[%s9749_s2 + $0x858] sm:$0xff] }
 0x347   : > { %3468 = vmatpush.msrb.mxu1 %v5448_v51  ;;  %3512 = vmatpush.msrb.mxu2 %v5466_v32  ;;  %v5558_v31 = vld [vmem:[%s9749_s2 + $0x9e8] sm:$0xff]  ;;  %v1218_v51 = vpop.permute.xlu2 %1217  ;;  %v5521_v32 = vld [vmem:[%s9749_s2 + $0x8e0] sm:$0xff] }
 0x348   : > { %3556 = vmatpush.msrb.mxu3 %v5484_v37  ;;  %3426 = vmatpush.msrb.mxu0 %v5428_v30  ;;  %v5539_v37 = vld [vmem:[%s9749_s2 + $0x960] sm:$0xff] }
 0x349   : > { %3469 = vmatpush.msrb.mxu1 %v5447_v10  ;;  %3513 = vmatpush.msrb.mxu2 %v5465_v48  ;;  %v5557_v30 = vld [vmem:[%s9749_s2 + $0x9e0] sm:$0xff]  ;;  %v5501_v10 = vld [vmem:[%s9749_s2 + $0x850] sm:$0xff]  ;;  %v1491_v48 = vpop.permute.xlu0 %1490 }
 0x34a   : > { %3557 = vmatpush.msrb.mxu3 %v5483_v6  ;;  %3427 = vmatpush.msrb.mxu0 %v5427_v58  ;;  %v5520_v6 = vld [vmem:[%s9749_s2 + $0x8d8] sm:$0xff] }
 0x34b   : > { %3470 = vmatpush.msrb.mxu1 %v5446_v5  ;;  %3514 = vmatpush.msrb.mxu2 %v5464_v0  ;;  %v5538_v58 = vld [vmem:[%s9749_s2 + $0x958] sm:$0xff]  ;;  %v9995_v5 = vld [vmem:[#allocation19_spill] sm:$0xff] }
 0x34c   : > { %3558 = vmatpush.msrb.mxu3 %v5482_v52  ;;  %3428 = vmatpush.msrb.mxu0 %v5426_v17  ;;  %v1227_v0 = vadd.f32 %v1218_v51, %v9995_v5  ;;  %v5556_v52 = vld [vmem:[%s9749_s2 + $0x9d8] sm:$0xff]  ;;  %v5500_v17 = vld [vmem:[%s9749_s2 + $0x848] sm:$0xff]  ;;  %v5527_v51 = vld [vmem:[%s9749_s2 + $0x900] sm:$0xff] }
 0x34d   : > { %3471 = vmatpush.msrb.mxu1 %v5445_v33  ;;  %3515 = vmatpush.msrb.mxu2 %v5463_v28  ;;  %v5519_v33 = vld [vmem:[%s9749_s2 + $0x8d0] sm:$0xff]  ;;  %v5632_v5 = vld [vmem:[%s9749_s2 + $0xbf8] sm:$0x1] }
 0x34e   : > { %3559 = vmatpush.msrb.mxu3 %v5481_v12  ;;  %3429 = vmatpush.msrb.mxu0 %v5425_v15  ;;  %v5537_v28 = vld [vmem:[%s9749_s2 + $0x950] sm:$0xff]  ;;  %v1500_v12 = vadd.f32 %v1491_v48, %v1227_v0  ;;  %v5576_v0 = vld [vmem:[%s9749_s2 + $0xa68] sm:$0xff] }
 0x34f   : > { %3472 = vmatpush.msrb.mxu1 %v5444_v62  ;;  %3516 = vmatpush.msrb.mxu2 %v5462_v49  ;;  %v5555_v15 = vld [vmem:[%s9749_s2 + $0x9d0] sm:$0xff]  ;;  %v5499_v62 = vld [vmem:[%s9749_s2 + $0x840] sm:$0xff]  ;;  %v5518_v49 = vld [vmem:[%s9749_s2 + $0x8c8] sm:$0xff] }
 0x350   : > { %3560 = vmatpush.msrb.mxu3 %v5480_v13  ;;  %3430 = vmatpush.msrb.mxu0 %v5424_v59  ;;  %v5536_v13 = vld [vmem:[%s9749_s2 + $0x948] sm:$0xff] }
 0x351   : > { %3473 = vmatpush.msrb.mxu1 %v5443_v57  ;;  %3517 = vmatpush.msrb.mxu2 %v5461_v25  ;;  %v5554_v59 = vld [vmem:[%s9749_s2 + $0x9c8] sm:$0xff]  ;;  %v5498_v57 = vld [vmem:[%s9749_s2 + $0x838] sm:$0xff]  ;;  %v1764_v25 = vpop.permute.xlu1 %1763 }
 0x352   : > { %3561 = vmatpush.msrb.mxu3 %v5479_v38  ;;  %3431 = vmatpush.msrb.mxu0 %v5423_v61  ;;  %v5517_v38 = vld [vmem:[%s9749_s2 + $0x8c0] sm:$0xff] }
 0x353   : > { %3474 = vmatpush.msrb.mxu1 %v5442_v26  ;;  %3518 = vmatpush.msrb.mxu2 %v5460_v27  ;;  %v5535_v61 = vld [vmem:[%s9749_s2 + $0x940] sm:$0xff]  ;;  %v1773_v26 = vadd.f32 %v1764_v25, %v1500_v12  ;;  %v5594_v12 = vld [vmem:[%s9749_s2 + $0xae8] sm:$0xff]  ;;  %v5573_v25 = vld [vmem:[%s9749_s2 + $0xa50] sm:$0xff] }
 0x354   : > { %3562 = vmatpush.msrb.mxu3 %v5478_v1  ;;  %3432 = vmatpush.msrb.mxu0 %v5422_v44  ;;  %v5553_v27 = vld [vmem:[%s9749_s2 + $0x9c0] sm:$0xff]  ;;  %v5497_v1 = vld [vmem:[%s9749_s2 + $0x830] sm:$0xff]  ;;  %v5516_v44 = vld [vmem:[%s9749_s2 + $0x8b8] sm:$0xff] }
 0x355   : > { %3475 = vmatpush.msrb.mxu1 %v5441_v19  ;;  %3519 = vmatpush.msrb.mxu2 %v5459_v29  ;;  %v5534_v19 = vld [vmem:[%s9749_s2 + $0x938] sm:$0xff] }
 0x356   : > { %3563 = vmatpush.msrb.mxu3 %v5477_v42  ;;  %3433 = vmatpush.msrb.mxu0 %v5421_v24  ;;  %v5552_v29 = vld [vmem:[%s9749_s2 + $0x9b8] sm:$0xff]  ;;  %v5496_v42 = vld [vmem:[%s9749_s2 + $0x828] sm:$0xff]  ;;  %v2037_v24 = vpop.permute.xlu2 %2036 }
 0x357   : > { %3476 = vmatpush.msrb.mxu1 %v5440_v20  ;;  %3520 = vmatpush.msrb.mxu2 %v5458_v36  ;;  %v2310_v20 = vpop.permute.xlu0 %2309  ;;  %v5515_v36 = vld [vmem:[%s9749_s2 + $0x8b0] sm:$0xff] }
 0x358   : > { %3564 = vmatpush.msrb.mxu3 %v5476_v4  ;;  %3434 = vmatpush.msrb.mxu0 %v5420_v21  ;;  %v5533_v4 = vld [vmem:[%s9749_s2 + $0x930] sm:$0xff]  ;;  %v2046_v21 = vadd.f32 %v2037_v24, %v1773_v26  ;;  %v5628_v26 = vld [vmem:[%s9749_s2 + $0xbd8] sm:$0xff]  ;;  %v5608_v24 = vld [vmem:[%s9749_s2 + $0xb48] sm:$0xff] }
 0x359   : > { %3477 = vmatpush.msrb.mxu1 %v5439_v60  ;;  %3521 = vmatpush.msrb.mxu2 %v5457_v40  ;;  %v5551_v60 = vld [vmem:[%s9749_s2 + $0x9b0] sm:$0xff]  ;;  %v5495_v40 = vld [vmem:[%s9749_s2 + $0x820] sm:$0xff] }
 0x35a   : > { %3565 = vmatpush.msrb.mxu3 %v5475_v3  ;;  %3435 = vmatpush.msrb.mxu0 %v5419_v50  ;;  %v5514_v3 = vld [vmem:[%s9749_s2 + $0x8a8] sm:$0xff] }
 0x35b   : > { %3478 = vmatpush.msrb.mxu1 %v5438_v54  ;;  %3522 = vmatpush.msrb.mxu2 %v5456_v53  ;;  %v5532_v50 = vld [vmem:[%s9749_s2 + $0x928] sm:$0xff]  ;;  %v2319_v54 = vadd.f32 %v2310_v20, %v2046_v21  ;;  %v5607_v21 = vld [vmem:[%s9749_s2 + $0xb40] sm:$0xff] }
 0x35c   : > { %3566 = vmatpush.msrb.mxu3 %v5474_v34  ;;  %5436 = vmatmul.msk.f32.vlgmr.msrb.gmra.mxu0 %vm2884_vm3, %v3414_v45  ;;  %v5550_v53 = vld [vmem:[%s9749_s2 + $0x9a8] sm:$0xff]  ;;  %v5494_v34 = vld [vmem:[%s9749_s2 + $0x818] sm:$0xff]  ;;  %v5513_v45 = vld [vmem:[%s9749_s2 + $0x8a0] sm:$0xff] }
 0x35d   : > { %5507 = vmatpush.msk.msra.mxu0 %vm2888_vm2, %v5506_v47  ;;  %3479 = vmatpush.msrb.mxu1 %v5437_v14  ;;  %v5531_v47 = vld [vmem:[%s9749_s2 + $0x920] sm:$0xff]  ;;  %v5626_v20 = vld [vmem:[%s9749_s2 + $0xbc8] sm:$0xff] }
 0x35e   : > { %3523 = vmatpush.msrb.mxu2 %v5455_v8  ;;  %3567 = vmatpush.msrb.mxu3 %v5473_v41  ;;  %v5549_v14 = vld [vmem:[%s9749_s2 + $0x9a0] sm:$0xff]  ;;  %v5493_v8 = vld [vmem:[%s9749_s2 + $0x810] sm:$0xff]  ;;  %v2583_v41 = vpop.permute.xlu1 %2582 }
 0x35f   : > { %5454 = vmatmul.msk.f32.vlgmr.msrb.gmra.mxu1 %vm2884_vm3, %v3458_v22  ;;  %5472 = vmatmul.msk.f32.vlgmr.msrb.gmra.mxu2 %vm2884_vm3, %v3502_v18  ;;  %v5512_v22 = vld [vmem:[%s9749_s2 + $0x898] sm:$0xff] }
 0x360   : > { %5490 = vmatmul.msk.f32.vlgmr.msrb.gmra.mxu3 %vm2884_vm3, %v3546_v35  ;;  %3597 = vmatpush.msra.mxu0 %v5505_v23  ;;  %v5530_v18 = vld [vmem:[%s9749_s2 + $0x918] sm:$0xff]  ;;  %v2592_v23 = vadd.f32 %v2583_v41, %v2319_v54  ;;  %v5604_v41 = vld [vmem:[%s9749_s2 + $0xb28] sm:$0xff] }
 0x361   : > { %5525 = vmatpush.msk.msra.mxu1 %vm2888_vm2, %v5524_v2  ;;  %5543 = vmatpush.msk.msra.mxu2 %vm2888_vm2, %v5542_v43  ;;  %v5548_v35 = vld [vmem:[%s9749_s2 + $0x998] sm:$0xff]  ;;  %v5492_v2 = vld [vmem:[%s9749_s2 + $0x808] sm:$0xff]  ;;  %v5511_v43 = vld [vmem:[%s9749_s2 + $0x890] sm:$0xff] }
 0x362   : > { %5561 = vmatpush.msk.msra.mxu3 %vm2888_vm2, %v5560_v7  ;;  %3598 = vmatpush.msra.mxu0 %v5504_v11  ;;  %v5529_v7 = vld [vmem:[%s9749_s2 + $0x910] sm:$0xff]  ;;  %v5624_v54 = vld [vmem:[%s9749_s2 + $0xbb8] sm:$0xff] }
 0x363   : > { %3641 = vmatpush.msra.mxu1 %v5523_v46  ;;  %3685 = vmatpush.msra.mxu2 %v5541_v56  ;;  %v5547_v11 = vld [vmem:[%s9749_s2 + $0x990] sm:$0xff]  ;;  %v5491_v46 = vld [vmem:[%s9749_s2 + $0x800] sm:$0xff]  ;;  %v2856_v56 = vpop.permute.xlu2 %2855 }
 0x364   : > { %3729 = vmatpush.msra.mxu3 %v5559_v55  ;;  %3599 = vmatpush.msra.mxu0 %v5503_v63  ;;  %v5510_v55 = vld [vmem:[%s9749_s2 + $0x888] sm:$0xff] }
 0x365   : > { %3642 = vmatpush.msra.mxu1 %v5522_v16  ;;  %3686 = vmatpush.msra.mxu2 %v5540_v9  ;;  %v5528_v63 = vld [vmem:[%s9749_s2 + $0x908] sm:$0xff]  ;;  %v9100_v16 = vadd.f32 %v2856_v56, %v2592_v23  ;;  %v5585_v23 = vld [vmem:[%s9749_s2 + $0xaa0] sm:$0xff] }
 0x366   : > { %3730 = vmatpush.msra.mxu3 %v5558_v31  ;;  %3600 = vmatpush.msra.mxu0 %v5502_v39  ;;  %v5546_v9 = vld [vmem:[%s9749_s2 + $0x988] sm:$0xff]  ;;  %v5578_v31 = vld [vmem:[%s9749_s2 + $0xa78] sm:$0x1]  ;;  %v5509_v39 = vld [vmem:[%s9749_s2 + $0x880] sm:$0xff] }
 0x367   : > { %3643 = vmatpush.msra.mxu1 %v5521_v32  ;;  %3687 = vmatpush.msra.mxu2 %v5539_v37  ;;  %v5545_v32 = vld [vmem:[%s9749_s2 + $0x980] sm:$0xff]  ;;  %v3634_v37 = vrot.slane %v9100_v16, 1  ;;  %v3722_v48 = vrot.slane %v9100_v16, 3  ;;  %v5564_v56 = vld [vmem:[%s9749_s2 + $0xa08] sm:$0xff] }
 0x368   : > { %3731 = vmatpush.msra.mxu3 %v5557_v30  ;;  %3601 = vmatpush.msra.mxu0 %v5501_v10  ;;  %v3678_v30 = vrot.slane %v9100_v16, 2  ;;  %v5577_v10 = vld [vmem:[%s9749_s2 + $0xa70] sm:$0xff] }
 0x369   : > { %3644 = vmatpush.msra.mxu1 %v5520_v6  ;;  %3688 = vmatpush.msra.mxu2 %v5538_v58  ;;  %v5596_v6 = vld [vmem:[%s9749_s2 + $0xaf8] sm:$0x1] }
 0x36a   : > { %3732 = vmatpush.msra.mxu3 %v5556_v52  ;;  %3602 = vmatpush.msra.mxu0 %v5500_v17  ;;  %v5614_v58 = vld [vmem:[%s9749_s2 + $0xb78] sm:$0x1]  ;;  %v5595_v52 = vld [vmem:[%s9749_s2 + $0xaf0] sm:$0xff] }
 0x36b   : > { %3645 = vmatpush.msra.mxu1 %v5519_v33  ;;  %3689 = vmatpush.msra.mxu2 %v5537_v28  ;;  %v5613_v17 = vld [vmem:[%s9749_s2 + $0xb70] sm:$0xff]  ;;  %v5575_v28 = vld [vmem:[%s9749_s2 + $0xa60] sm:$0xff] }
 0x36c   : > { %3733 = vmatpush.msra.mxu3 %v5555_v15  ;;  %3603 = vmatpush.msra.mxu0 %v5499_v62  ;;  %v5631_v33 = vld [vmem:[%s9749_s2 + $0xbf0] sm:$0xff]  ;;  %v5612_v15 = vld [vmem:[%s9749_s2 + $0xb68] sm:$0xff] }
 0x36d   : > { %3646 = vmatpush.msra.mxu1 %v5518_v49  ;;  %3690 = vmatpush.msra.mxu2 %v5536_v13  ;;  %v5630_v62 = vld [vmem:[%s9749_s2 + $0xbe8] sm:$0xff]  ;;  %v5574_v49 = vld [vmem:[%s9749_s2 + $0xa58] sm:$0xff]  ;;  %v5593_v13 = vld [vmem:[%s9749_s2 + $0xae0] sm:$0xff] }
 0x36e   : > { %3734 = vmatpush.msra.mxu3 %v5554_v59  ;;  %3604 = vmatpush.msra.mxu0 %v5498_v57  ;;  %v5611_v59 = vld [vmem:[%s9749_s2 + $0xb60] sm:$0xff] }
 0x36f   : > { %3647 = vmatpush.msra.mxu1 %v5517_v38  ;;  %3691 = vmatpush.msra.mxu2 %v5535_v61  ;;  %v5629_v57 = vld [vmem:[%s9749_s2 + $0xbe0] sm:$0xff]  ;;  %v5592_v38 = vld [vmem:[%s9749_s2 + $0xad8] sm:$0xff] }
 0x370   : > { %3735 = vmatpush.msra.mxu3 %v5553_v27  ;;  %3605 = vmatpush.msra.mxu0 %v5497_v1  ;;  %v5610_v61 = vld [vmem:[%s9749_s2 + $0xb58] sm:$0xff]  ;;  %v5572_v27 = vld [vmem:[%s9749_s2 + $0xa48] sm:$0xff]  ;;  %v5591_v1 = vld [vmem:[%s9749_s2 + $0xad0] sm:$0xff] }
 0x371   : > { %3648 = vmatpush.msra.mxu1 %v5516_v44  ;;  %3692 = vmatpush.msra.mxu2 %v5534_v19  ;;  %v5609_v44 = vld [vmem:[%s9749_s2 + $0xb50] sm:$0xff] }
 0x372   : > { %3736 = vmatpush.msra.mxu3 %v5552_v29  ;;  %3606 = vmatpush.msra.mxu0 %v5496_v42  ;;  %v5627_v19 = vld [vmem:[%s9749_s2 + $0xbd0] sm:$0xff]  ;;  %v5571_v29 = vld [vmem:[%s9749_s2 + $0xa40] sm:$0xff]  ;;  %v5590_v42 = vld [vmem:[%s9749_s2 + $0xac8] sm:$0xff] }
 0x373   : > { %3649 = vmatpush.msra.mxu1 %v5515_v36  ;;  %3693 = vmatpush.msra.mxu2 %v5533_v4  ;;  %v5570_v36 = vld [vmem:[%s9749_s2 + $0xa38] sm:$0xff]  ;;  %v5589_v4 = vld [vmem:[%s9749_s2 + $0xac0] sm:$0xff] }
 0x374   : > { %3737 = vmatpush.msra.mxu3 %v5551_v60  ;;  %3607 = vmatpush.msra.mxu0 %v5495_v40  ;;  %v5625_v60 = vld [vmem:[%s9749_s2 + $0xbc0] sm:$0xff]  ;;  %v5569_v40 = vld [vmem:[%s9749_s2 + $0xa30] sm:$0xff] }
 0x375   : > { %3650 = vmatpush.msra.mxu1 %v5514_v3  ;;  %3694 = vmatpush.msra.mxu2 %v5532_v50  ;;  %v5588_v3 = vld [vmem:[%s9749_s2 + $0xab8] sm:$0xff] }
 0x376   : > { %3738 = vmatpush.msra.mxu3 %v5550_v53  ;;  %3608 = vmatpush.msra.mxu0 %v5494_v34  ;;  %v5606_v50 = vld [vmem:[%s9749_s2 + $0xb38] sm:$0xff]  ;;  %v5568_v53 = vld [vmem:[%s9749_s2 + $0xa28] sm:$0xff]  ;;  %v5587_v34 = vld [vmem:[%s9749_s2 + $0xab0] sm:$0xff] }
 0x377   : > { %3651 = vmatpush.msra.mxu1 %v5513_v45  ;;  %3695 = vmatpush.msra.mxu2 %v5531_v47  ;;  %v5605_v45 = vld [vmem:[%s9749_s2 + $0xb30] sm:$0xff] }
 0x378   : > { %3739 = vmatpush.msra.mxu3 %v5549_v14  ;;  %3609 = vmatpush.msra.mxu0 %v5493_v8  ;;  %v5623_v47 = vld [vmem:[%s9749_s2 + $0xbb0] sm:$0xff]  ;;  %v5567_v14 = vld [vmem:[%s9749_s2 + $0xa20] sm:$0xff]  ;;  %v5586_v8 = vld [vmem:[%s9749_s2 + $0xaa8] sm:$0xff] }
 0x379   : > { %3652 = vmatpush.msra.mxu1 %v5512_v22  ;;  %3696 = vmatpush.msra.mxu2 %v5530_v18  ;;  %v5622_v22 = vld [vmem:[%s9749_s2 + $0xba8] sm:$0xff]  ;;  %v5566_v18 = vld [vmem:[%s9749_s2 + $0xa18] sm:$0xff] }
 0x37a   : > { %3740 = vmatpush.msra.mxu3 %v5548_v35  ;;  %3610 = vmatpush.msra.mxu0 %v5492_v2  ;;  %v5603_v35 = vld [vmem:[%s9749_s2 + $0xb20] sm:$0xff] }
 0x37b   : > { %3653 = vmatpush.msra.mxu1 %v5511_v43  ;;  %3697 = vmatpush.msra.mxu2 %v5529_v7  ;;  %v5621_v2 = vld [vmem:[%s9749_s2 + $0xba0] sm:$0xff]  ;;  %v5565_v43 = vld [vmem:[%s9749_s2 + $0xa10] sm:$0xff]  ;;  %v5584_v7 = vld [vmem:[%s9749_s2 + $0xa98] sm:$0xff] }
 0x37c   : > { %3741 = vmatpush.msra.mxu3 %v5547_v11  ;;  %3611 = vmatpush.msra.mxu0 %v5491_v46  ;;  %v5602_v11 = vld [vmem:[%s9749_s2 + $0xb18] sm:$0xff] }
 0x37d   : > { %3654 = vmatpush.msra.mxu1 %v5510_v55  ;;  %3698 = vmatpush.msra.mxu2 %v5528_v63  ;;  %v5620_v46 = vld [vmem:[%s9749_s2 + $0xb98] sm:$0xff]  ;;  %v5583_v55 = vld [vmem:[%s9749_s2 + $0xa90] sm:$0xff] }
 0x37e   : > { %3742 = vmatpush.msra.mxu3 %v5546_v9  ;;  %5508 = vmatmul.msk.f32.vlgmr.msra.gmra.mxu0 %vm2884_vm3, %v9100_v16  ;;  %v5601_v63 = vld [vmem:[%s9749_s2 + $0xb10] sm:$0xff] }
 0x37f   : > { %5579 = vmatpush.msk.msrb.mxu0 %vm2888_vm2, %v5578_v31  ;;  %3655 = vmatpush.msra.mxu1 %v5509_v39  ;;  %v5619_v9 = vld [vmem:[%s9749_s2 + $0xb90] sm:$0xff]  ;;  %v5563_v31 = vld [vmem:[%s9749_s2 + $0xa00] sm:$0xff]  ;;  %v5582_v39 = vld [vmem:[%s9749_s2 + $0xa88] sm:$0xff] }
 0x380   : > { %3699 = vmatpush.msra.mxu2 %v5527_v51  ;;  %3743 = vmatpush.msra.mxu3 %v5545_v32  ;;  %v5600_v51 = vld [vmem:[%s9749_s2 + $0xb08] sm:$0xff] }
 0x381   : > { %5526 = vmatmul.msk.f32.vlgmr.msra.gmra.mxu1 %vm2884_vm3, %v3634_v37  ;;  %5544 = vmatmul.msk.f32.vlgmr.msra.gmra.mxu2 %vm2884_vm3, %v3678_v30  ;;  %v5618_v32 = vld [vmem:[%s9749_s2 + $0xb88] sm:$0xff]  ;;  %v3766_v37 = vrot.slane %v9100_v16, 4  ;;  %v5650_v30 = vld [vmem:[%s9749_s2 + $0xc78] sm:$0x1] }
 0x382   : > { %5562 = vmatmul.msk.f32.vlgmr.msra.gmra.mxu3 %vm2884_vm3, %v3722_v48  ;;  %3773 = vmatpush.msrb.mxu0 %v5577_v10  ;;  %v5581_v10 = vld [vmem:[%s9749_s2 + $0xa80] sm:$0xff] }
 0x383   : > { %5597 = vmatpush.msk.msrb.mxu1 %vm2888_vm2, %v5596_v6  ;;  %5615 = vmatpush.msk.msrb.mxu2 %vm2888_vm2, %v5614_v58  ;;  %v5599_v48 = vld [vmem:[%s9749_s2 + $0xb00] sm:$0xff]  ;;  %v3810_v58 = vrot.slane %v9100_v16, 5 }
 0x384   : > { %5633 = vmatpush.msk.msrb.mxu3 %vm2888_vm2, %v5632_v5  ;;  %3774 = vmatpush.msrb.mxu0 %v5576_v0  ;;  %v5617_v6 = vld [vmem:[%s9749_s2 + $0xb80] sm:$0xff]  ;;  %v3854_v5 = vrot.slane %v9100_v16, 6  ;;  %v5649_v0 = vld [vmem:[%s9749_s2 + $0xc70] sm:$0xff] }
 0x385   : > { %3817 = vmatpush.msrb.mxu1 %v5595_v52  ;;  %3861 = vmatpush.msrb.mxu2 %v5613_v17  ;;  %v3898_v52 = vrot.slane %v9100_v16, 7  ;;  %v5668_v17 = vld [vmem:[%s9749_s2 + $0xcf8] sm:$0x1]  ;;  %v5648_v16 = vld [vmem:[%s9749_s2 + $0xc68] sm:$0xff] }
 0x386   : > { %3905 = vmatpush.msrb.mxu3 %v5631_v33  ;;  %3775 = vmatpush.msrb.mxu0 %v5575_v28  ;;  %v5686_v33 = vld [vmem:[%s9749_s2 + $0xd78] sm:$0x1] }
 0x387   : > { %3818 = vmatpush.msrb.mxu1 %v5594_v12  ;;  %3862 = vmatpush.msrb.mxu2 %v5612_v15  ;;  %v5704_v28 = vld [vmem:[%s9749_s2 + $0xdf8] sm:$0x1]  ;;  %v5667_v12 = vld [vmem:[%s9749_s2 + $0xcf0] sm:$0xff] }
 0x388   : > { %3906 = vmatpush.msrb.mxu3 %v5630_v62  ;;  %3776 = vmatpush.msrb.mxu0 %v5574_v49  ;;  %v5685_v15 = vld [vmem:[%s9749_s2 + $0xd70] sm:$0xff]  ;;  %v5647_v49 = vld [vmem:[%s9749_s2 + $0xc60] sm:$0xff] }
 0x389   : > { %3819 = vmatpush.msrb.mxu1 %v5593_v13  ;;  %3863 = vmatpush.msrb.mxu2 %v5611_v59  ;;  %v5703_v62 = vld [vmem:[%s9749_s2 + $0xdf0] sm:$0xff]  ;;  %v5666_v13 = vld [vmem:[%s9749_s2 + $0xce8] sm:$0xff] }
 0x38a   : > { %3907 = vmatpush.msrb.mxu3 %v5629_v57  ;;  %3777 = vmatpush.msrb.mxu0 %v5573_v25  ;;  %v5684_v59 = vld [vmem:[%s9749_s2 + $0xd68] sm:$0xff]  ;;  %v5646_v25 = vld [vmem:[%s9749_s2 + $0xc58] sm:$0xff] }
 0x38b   : > { %3820 = vmatpush.msrb.mxu1 %v5592_v38  ;;  %3864 = vmatpush.msrb.mxu2 %v5610_v61  ;;  %v5702_v57 = vld [vmem:[%s9749_s2 + $0xde8] sm:$0xff]  ;;  %v1220_v38 = vpop.permute.xlu0 %1219  ;;  %v5665_v61 = vld [vmem:[%s9749_s2 + $0xce0] sm:$0xff] }
 0x38c   : > { %3908 = vmatpush.msrb.mxu3 %v5628_v26  ;;  %3778 = vmatpush.msrb.mxu0 %v5572_v27  ;;  %v5683_v26 = vld [vmem:[%s9749_s2 + $0xd60] sm:$0xff] }
 0x38d   : > { %3821 = vmatpush.msrb.mxu1 %v5591_v1  ;;  %3865 = vmatpush.msrb.mxu2 %v5609_v44  ;;  %v5701_v27 = vld [vmem:[%s9749_s2 + $0xde0] sm:$0xff]  ;;  %v5645_v1 = vld [vmem:[%s9749_s2 + $0xc50] sm:$0xff]  ;;  %v5664_v44 = vld [vmem:[%s9749_s2 + $0xcd8] sm:$0xff] }
 0x38e   : > { %3909 = vmatpush.msrb.mxu3 %v5627_v19  ;;  %3779 = vmatpush.msrb.mxu0 %v5571_v29  ;;  %v5682_v19 = vld [vmem:[%s9749_s2 + $0xd58] sm:$0xff]  ;;  %v9996_v29 = vld [vmem:[#allocation20_spill] sm:$0xff] }
 0x38f   : > { %3822 = vmatpush.msrb.mxu1 %v5590_v42  ;;  %3866 = vmatpush.msrb.mxu2 %v5608_v24  ;;  %v1228_v42 = vadd.f32 %v1220_v38, %v9996_v29  ;;  %v5700_v24 = vld [vmem:[%s9749_s2 + $0xdd8] sm:$0xff]  ;;  %v5671_v38 = vld [vmem:[%s9749_s2 + $0xd00] sm:$0xff] }
 0x390   : > { %3910 = vmatpush.msrb.mxu3 %v5626_v20  ;;  %3780 = vmatpush.msrb.mxu0 %v5570_v36  ;;  %v5644_v20 = vld [vmem:[%s9749_s2 + $0xc48] sm:$0xff]  ;;  %v5663_v36 = vld [vmem:[%s9749_s2 + $0xcd0] sm:$0xff]  ;;  %v5758_v29 = vld [vmem:[%s9749_s2 + $0xf78] sm:$0x1] }
 0x391   : > { %3823 = vmatpush.msrb.mxu1 %v5589_v4  ;;  %3867 = vmatpush.msrb.mxu2 %v5607_v21  ;;  %v5681_v4 = vld [vmem:[%s9749_s2 + $0xd50] sm:$0xff] }
 0x392   : > { %3911 = vmatpush.msrb.mxu3 %v5625_v60  ;;  %3781 = vmatpush.msrb.mxu0 %v5569_v40  ;;  %v5699_v21 = vld [vmem:[%s9749_s2 + $0xdd0] sm:$0xff]  ;;  %v5643_v60 = vld [vmem:[%s9749_s2 + $0xc40] sm:$0xff]  ;;  %v1493_v40 = vpop.permute.xlu1 %1492 }
 0x393   : > { %3824 = vmatpush.msrb.mxu1 %v5588_v3  ;;  %3868 = vmatpush.msrb.mxu2 %v5606_v50  ;;  %v5662_v3 = vld [vmem:[%s9749_s2 + $0xcc8] sm:$0xff] }
 0x394   : > { %3912 = vmatpush.msrb.mxu3 %v5624_v54  ;;  %3782 = vmatpush.msrb.mxu0 %v5568_v53  ;;  %v5680_v50 = vld [vmem:[%s9749_s2 + $0xd48] sm:$0xff]  ;;  %v1501_v54 = vadd.f32 %v1493_v40, %v1228_v42  ;;  %v5776_v42 = vld [vmem:[%s9749_s2 + $0xff8] sm:$0x1] }
 0x395   : > { %3825 = vmatpush.msrb.mxu1 %v5587_v34  ;;  %3869 = vmatpush.msrb.mxu2 %v5605_v45  ;;  %v5698_v53 = vld [vmem:[%s9749_s2 + $0xdc8] sm:$0xff]  ;;  %v5642_v34 = vld [vmem:[%s9749_s2 + $0xc38] sm:$0xff]  ;;  %v5661_v45 = vld [vmem:[%s9749_s2 + $0xcc0] sm:$0xff] }
 0x396   : > { %3913 = vmatpush.msrb.mxu3 %v5623_v47  ;;  %3783 = vmatpush.msrb.mxu0 %v5567_v14  ;;  %v5679_v47 = vld [vmem:[%s9749_s2 + $0xd40] sm:$0xff]  ;;  %v5756_v40 = vld [vmem:[%s9749_s2 + $0xf68] sm:$0xff] }
 0x397   : > { %3826 = vmatpush.msrb.mxu1 %v5586_v8  ;;  %3870 = vmatpush.msrb.mxu2 %v5604_v41  ;;  %v5697_v14 = vld [vmem:[%s9749_s2 + $0xdc0] sm:$0xff]  ;;  %v5641_v8 = vld [vmem:[%s9749_s2 + $0xc30] sm:$0xff]  ;;  %v1766_v41 = vpop.permute.xlu2 %1765 }
 0x398   : > { %3914 = vmatpush.msrb.mxu3 %v5622_v22  ;;  %3784 = vmatpush.msrb.mxu0 %v5566_v18  ;;  %v2039_v22 = vpop.permute.xlu0 %2038  ;;  %v5660_v18 = vld [vmem:[%s9749_s2 + $0xcb8] sm:$0xff] }
 0x399   : > { %3827 = vmatpush.msrb.mxu1 %v5585_v23  ;;  %3871 = vmatpush.msrb.mxu2 %v5603_v35  ;;  %v5678_v23 = vld [vmem:[%s9749_s2 + $0xd38] sm:$0xff]  ;;  %v1774_v35 = vadd.f32 %v1766_v41, %v1501_v54  ;;  %v5737_v54 = vld [vmem:[%s9749_s2 + $0xee0] sm:$0xff]  ;;  %v5716_v41 = vld [vmem:[%s9749_s2 + $0xe48] sm:$0xff] }
 0x39a   : > { %3915 = vmatpush.msrb.mxu3 %v5621_v2  ;;  %3785 = vmatpush.msrb.mxu0 %v5565_v43  ;;  %v5696_v2 = vld [vmem:[%s9749_s2 + $0xdb8] sm:$0xff]  ;;  %v5640_v43 = vld [vmem:[%s9749_s2 + $0xc28] sm:$0xff] }
 0x39b   : > { %3828 = vmatpush.msrb.mxu1 %v5584_v7  ;;  %3872 = vmatpush.msrb.mxu2 %v5602_v11  ;;  %v5659_v7 = vld [vmem:[%s9749_s2 + $0xcb0] sm:$0xff] }
 0x39c   : > { %3916 = vmatpush.msrb.mxu3 %v5620_v46  ;;  %3786 = vmatpush.msrb.mxu0 %v5564_v56  ;;  %v5677_v11 = vld [vmem:[%s9749_s2 + $0xd30] sm:$0xff]  ;;  %v2047_v46 = vadd.f32 %v2039_v22, %v1774_v35  ;;  %v5715_v35 = vld [vmem:[%s9749_s2 + $0xe40] sm:$0xff] }
 0x39d   : > { %3829 = vmatpush.msrb.mxu1 %v5583_v55  ;;  %3873 = vmatpush.msrb.mxu2 %v5601_v63  ;;  %v5695_v56 = vld [vmem:[%s9749_s2 + $0xdb0] sm:$0xff]  ;;  %v5639_v55 = vld [vmem:[%s9749_s2 + $0xc20] sm:$0xff]  ;;  %v5658_v63 = vld [vmem:[%s9749_s2 + $0xca8] sm:$0xff] }
 0x39e   : > { %3917 = vmatpush.msrb.mxu3 %v5619_v9  ;;  %3787 = vmatpush.msrb.mxu0 %v5563_v31  ;;  %v5676_v9 = vld [vmem:[%s9749_s2 + $0xd28] sm:$0xff]  ;;  %v5735_v22 = vld [vmem:[%s9749_s2 + $0xed0] sm:$0xff] }
 0x39f   : > { %3830 = vmatpush.msrb.mxu1 %v5582_v39  ;;  %3874 = vmatpush.msrb.mxu2 %v5600_v51  ;;  %v5694_v31 = vld [vmem:[%s9749_s2 + $0xda8] sm:$0xff]  ;;  %v5638_v39 = vld [vmem:[%s9749_s2 + $0xc18] sm:$0xff]  ;;  %v2312_v51 = vpop.permute.xlu1 %2311 }
 0x3a0   : > { %3918 = vmatpush.msrb.mxu3 %v5618_v32  ;;  %5580 = vmatmul.msk.f32.vlgmr.msrb.gmra.mxu0 %vm2884_vm3, %v3766_v37  ;;  %v5657_v32 = vld [vmem:[%s9749_s2 + $0xca0] sm:$0xff] }
 0x3a1   : > { %5651 = vmatpush.msk.msra.mxu0 %vm2888_vm2, %v5650_v30  ;;  %3831 = vmatpush.msrb.mxu1 %v5581_v10  ;;  %v5675_v37 = vld [vmem:[%s9749_s2 + $0xd20] sm:$0xff]  ;;  %v2320_v30 = vadd.f32 %v2312_v51, %v2047_v46  ;;  %v5712_v51 = vld [vmem:[%s9749_s2 + $0xe28] sm:$0xff] }
 0x3a2   : > { %3875 = vmatpush.msrb.mxu2 %v5599_v48  ;;  %3919 = vmatpush.msrb.mxu3 %v5617_v6  ;;  %v5693_v10 = vld [vmem:[%s9749_s2 + $0xda0] sm:$0xff]  ;;  %v5637_v48 = vld [vmem:[%s9749_s2 + $0xc10] sm:$0xff]  ;;  %v5656_v6 = vld [vmem:[%s9749_s2 + $0xc98] sm:$0xff] }
 0x3a3   : > { %5598 = vmatmul.msk.f32.vlgmr.msrb.gmra.mxu1 %vm2884_vm3, %v3810_v58  ;;  %5616 = vmatmul.msk.f32.vlgmr.msrb.gmra.mxu2 %vm2884_vm3, %v3854_v5  ;;  %v5674_v58 = vld [vmem:[%s9749_s2 + $0xd18] sm:$0xff]  ;;  %v5733_v46 = vld [vmem:[%s9749_s2 + $0xec0] sm:$0xff] }
 0x3a4   : > { %5634 = vmatmul.msk.f32.vlgmr.msrb.gmra.mxu3 %vm2884_vm3, %v3898_v52  ;;  %3949 = vmatpush.msra.mxu0 %v5649_v0  ;;  %v5692_v5 = vld [vmem:[%s9749_s2 + $0xd98] sm:$0xff]  ;;  %v5636_v0 = vld [vmem:[%s9749_s2 + $0xc08] sm:$0xff]  ;;  %v2585_v52 = vpop.permute.xlu2 %2584 }
 0x3a5   : > { %5669 = vmatpush.msk.msra.mxu1 %vm2888_vm2, %v5668_v17  ;;  %5687 = vmatpush.msk.msra.mxu2 %vm2888_vm2, %v5686_v33  ;;  %v2858_v17 = vpop.permute.xlu0 %2857  ;;  %v5655_v33 = vld [vmem:[%s9749_s2 + $0xc90] sm:$0xff] }
 0x3a6   : > { %5705 = vmatpush.msk.msra.mxu3 %vm2888_vm2, %v5704_v28  ;;  %3950 = vmatpush.msra.mxu0 %v5648_v16  ;;  %v5673_v28 = vld [vmem:[%s9749_s2 + $0xd10] sm:$0xff]  ;;  %v2593_v16 = vadd.f32 %v2585_v52, %v2320_v30  ;;  %v5747_v52 = vld [vmem:[%s9749_s2 + $0xf20] sm:$0xff] }
 0x3a7   : > { %3993 = vmatpush.msra.mxu1 %v5667_v12  ;;  %4037 = vmatpush.msra.mxu2 %v5685_v15  ;;  %v5691_v12 = vld [vmem:[%s9749_s2 + $0xd90] sm:$0xff]  ;;  %v5635_v15 = vld [vmem:[%s9749_s2 + $0xc00] sm:$0xff] }
 0x3a8   : > { %4081 = vmatpush.msra.mxu3 %v5703_v62  ;;  %3951 = vmatpush.msra.mxu0 %v5647_v49  ;;  %v5654_v62 = vld [vmem:[%s9749_s2 + $0xc88] sm:$0xff]  ;;  %v5767_v30 = vld [vmem:[%s9749_s2 + $0xfb0] sm:$0xff] }
 0x3a9   : > { %3994 = vmatpush.msra.mxu1 %v5666_v13  ;;  %4038 = vmatpush.msra.mxu2 %v5684_v59  ;;  %v5672_v49 = vld [vmem:[%s9749_s2 + $0xd08] sm:$0xff]  ;;  %v9511_v13 = vadd.f32 %v2858_v17, %v2593_v16  ;;  %v5765_v17 = vld [vmem:[%s9749_s2 + $0xfa0] sm:$0xff]  ;;  %v5746_v16 = vld [vmem:[%s9749_s2 + $0xf18] sm:$0xff] }
 0x3aa   : > { %4082 = vmatpush.msra.mxu3 %v5702_v57  ;;  %3952 = vmatpush.msra.mxu0 %v5646_v25  ;;  %v5690_v59 = vld [vmem:[%s9749_s2 + $0xd88] sm:$0xff]  ;;  %v5722_v57 = vld [vmem:[%s9749_s2 + $0xe78] sm:$0x1]  ;;  %v5653_v25 = vld [vmem:[%s9749_s2 + $0xc80] sm:$0xff] }
 0x3ab   : > { %3995 = vmatpush.msra.mxu1 %v5665_v61  ;;  %4039 = vmatpush.msra.mxu2 %v5683_v26  ;;  %v5689_v61 = vld [vmem:[%s9749_s2 + $0xd80] sm:$0xff]  ;;  %v3986_v26 = vrot.slane %v9511_v13, 1 }
 0x3ac   : > { %4083 = vmatpush.msra.mxu3 %v5701_v27  ;;  %3953 = vmatpush.msra.mxu0 %v5645_v1  ;;  %v4030_v27 = vrot.slane %v9511_v13, 2  ;;  %v5721_v1 = vld [vmem:[%s9749_s2 + $0xe70] sm:$0xff] }
 0x3ad   : > { %3996 = vmatpush.msra.mxu1 %v5664_v44  ;;  %4040 = vmatpush.msra.mxu2 %v5682_v19  ;;  %v4074_v44 = vrot.slane %v9511_v13, 3  ;;  %v5740_v19 = vld [vmem:[%s9749_s2 + $0xef8] sm:$0x1] }
 0x3ae   : > { %4084 = vmatpush.msra.mxu3 %v5700_v24  ;;  %3954 = vmatpush.msra.mxu0 %v5644_v20  ;;  %v5720_v24 = vld [vmem:[%s9749_s2 + $0xe68] sm:$0xff]  ;;  %v5739_v20 = vld [vmem:[%s9749_s2 + $0xef0] sm:$0xff] }
 0x3af   : > { %3997 = vmatpush.msra.mxu1 %v5663_v36  ;;  %4041 = vmatpush.msra.mxu2 %v5681_v4  ;;  %v5757_v36 = vld [vmem:[%s9749_s2 + $0xf70] sm:$0xff] }
 0x3b0   : > { %4085 = vmatpush.msra.mxu3 %v5699_v21  ;;  %3955 = vmatpush.msra.mxu0 %v5643_v60  ;;  %v5775_v4 = vld [vmem:[%s9749_s2 + $0xff0] sm:$0xff]  ;;  %v5719_v21 = vld [vmem:[%s9749_s2 + $0xe60] sm:$0xff]  ;;  %v5738_v60 = vld [vmem:[%s9749_s2 + $0xee8] sm:$0xff] }
 0x3b1   : > { %3998 = vmatpush.msra.mxu1 %v5662_v3  ;;  %4042 = vmatpush.msra.mxu2 %v5680_v50  ;;  %v5774_v3 = vld [vmem:[%s9749_s2 + $0xfe8] sm:$0xff]  ;;  %v5718_v50 = vld [vmem:[%s9749_s2 + $0xe58] sm:$0xff] }
 0x3b2   : > { %4086 = vmatpush.msra.mxu3 %v5698_v53  ;;  %3956 = vmatpush.msra.mxu0 %v5642_v34  ;;  %v5755_v53 = vld [vmem:[%s9749_s2 + $0xf60] sm:$0xff] }
 0x3b3   : > { %3999 = vmatpush.msra.mxu1 %v5661_v45  ;;  %4043 = vmatpush.msra.mxu2 %v5679_v47  ;;  %v5773_v34 = vld [vmem:[%s9749_s2 + $0xfe0] sm:$0xff]  ;;  %v5717_v45 = vld [vmem:[%s9749_s2 + $0xe50] sm:$0xff]  ;;  %v5736_v47 = vld [vmem:[%s9749_s2 + $0xed8] sm:$0xff] }
 0x3b4   : > { %4087 = vmatpush.msra.mxu3 %v5697_v14  ;;  %3957 = vmatpush.msra.mxu0 %v5641_v8  ;;  %v5754_v14 = vld [vmem:[%s9749_s2 + $0xf58] sm:$0xff] }
 0x3b5   : > { %4000 = vmatpush.msra.mxu1 %v5660_v18  ;;  %4044 = vmatpush.msra.mxu2 %v5678_v23  ;;  %v5772_v8 = vld [vmem:[%s9749_s2 + $0xfd8] sm:$0xff]  ;;  %v5753_v18 = vld [vmem:[%s9749_s2 + $0xf50] sm:$0xff] }
 0x3b6   : > { %4088 = vmatpush.msra.mxu3 %v5696_v2  ;;  %3958 = vmatpush.msra.mxu0 %v5640_v43  ;;  %v5771_v23 = vld [vmem:[%s9749_s2 + $0xfd0] sm:$0xff]  ;;  %v5734_v2 = vld [vmem:[%s9749_s2 + $0xec8] sm:$0xff] }
 0x3b7   : > { %4001 = vmatpush.msra.mxu1 %v5659_v7  ;;  %4045 = vmatpush.msra.mxu2 %v5677_v11  ;;  %v5752_v43 = vld [vmem:[%s9749_s2 + $0xf48] sm:$0xff]  ;;  %v5714_v11 = vld [vmem:[%s9749_s2 + $0xe38] sm:$0xff] }
 0x3b8   : > { %4089 = vmatpush.msra.mxu3 %v5695_v56  ;;  %3959 = vmatpush.msra.mxu0 %v5639_v55  ;;  %v5770_v7 = vld [vmem:[%s9749_s2 + $0xfc8] sm:$0xff]  ;;  %v5751_v56 = vld [vmem:[%s9749_s2 + $0xf40] sm:$0xff] }
 0x3b9   : > { %4002 = vmatpush.msra.mxu1 %v5658_v63  ;;  %4046 = vmatpush.msra.mxu2 %v5676_v9  ;;  %v5769_v55 = vld [vmem:[%s9749_s2 + $0xfc0] sm:$0xff]  ;;  %v5713_v63 = vld [vmem:[%s9749_s2 + $0xe30] sm:$0xff]  ;;  %v5732_v9 = vld [vmem:[%s9749_s2 + $0xeb8] sm:$0xff] }
 0x3ba   : > { %4090 = vmatpush.msra.mxu3 %v5694_v31  ;;  %3960 = vmatpush.msra.mxu0 %v5638_v39  ;;  %v5750_v31 = vld [vmem:[%s9749_s2 + $0xf38] sm:$0xff] }
 0x3bb   : > { %4003 = vmatpush.msra.mxu1 %v5657_v32  ;;  %4047 = vmatpush.msra.mxu2 %v5675_v37  ;;  %v5768_v39 = vld [vmem:[%s9749_s2 + $0xfb8] sm:$0xff]  ;;  %v5731_v32 = vld [vmem:[%s9749_s2 + $0xeb0] sm:$0xff] }
 0x3bc   : > { %4091 = vmatpush.msra.mxu3 %v5693_v10  ;;  %3961 = vmatpush.msra.mxu0 %v5637_v48  ;;  %v5749_v37 = vld [vmem:[%s9749_s2 + $0xf30] sm:$0xff]  ;;  %v5711_v10 = vld [vmem:[%s9749_s2 + $0xe20] sm:$0xff]  ;;  %v5730_v48 = vld [vmem:[%s9749_s2 + $0xea8] sm:$0xff] }
 0x3bd   : > { %4004 = vmatpush.msra.mxu1 %v5656_v6  ;;  %4048 = vmatpush.msra.mxu2 %v5674_v58  ;;  %v5748_v6 = vld [vmem:[%s9749_s2 + $0xf28] sm:$0xff] }
 0x3be   : > { %4092 = vmatpush.msra.mxu3 %v5692_v5  ;;  %3962 = vmatpush.msra.mxu0 %v5636_v0  ;;  %v5766_v58 = vld [vmem:[%s9749_s2 + $0xfa8] sm:$0xff]  ;;  %v5710_v5 = vld [vmem:[%s9749_s2 + $0xe18] sm:$0xff]  ;;  %v5729_v0 = vld [vmem:[%s9749_s2 + $0xea0] sm:$0xff] }
 0x3bf   : > { %4005 = vmatpush.msra.mxu1 %v5655_v33  ;;  %4049 = vmatpush.msra.mxu2 %v5673_v28  ;;  %v5709_v33 = vld [vmem:[%s9749_s2 + $0xe10] sm:$0xff]  ;;  %v5728_v28 = vld [vmem:[%s9749_s2 + $0xe98] sm:$0xff] }
 0x3c0   : > { %4093 = vmatpush.msra.mxu3 %v5691_v12  ;;  %3963 = vmatpush.msra.mxu0 %v5635_v15  ;;  %v5764_v12 = vld [vmem:[%s9749_s2 + $0xf98] sm:$0xff]  ;;  %v5708_v15 = vld [vmem:[%s9749_s2 + $0xe08] sm:$0xff] }
 0x3c1   : > { %4006 = vmatpush.msra.mxu1 %v5654_v62  ;;  %4050 = vmatpush.msra.mxu2 %v5672_v49  ;;  %v5727_v62 = vld [vmem:[%s9749_s2 + $0xe90] sm:$0xff] }
 0x3c2   : > { %4094 = vmatpush.msra.mxu3 %v5690_v59  ;;  %5652 = vmatmul.msk.f32.vlgmr.msra.gmra.mxu0 %vm2884_vm3, %v9511_v13  ;;  %v5745_v49 = vld [vmem:[%s9749_s2 + $0xf10] sm:$0xff] }
 0x3c3   : > { %5723 = vmatpush.msk.msrb.mxu0 %vm2888_vm2, %v5722_v57  ;;  %4007 = vmatpush.msra.mxu1 %v5653_v25  ;;  %v5763_v59 = vld [vmem:[%s9749_s2 + $0xf90] sm:$0xff]  ;;  %v5707_v57 = vld [vmem:[%s9749_s2 + $0xe00] sm:$0xff]  ;;  %v5726_v25 = vld [vmem:[%s9749_s2 + $0xe88] sm:$0xff] }
 0x3c4   : > { %4051 = vmatpush.msra.mxu2 %v5671_v38  ;;  %4095 = vmatpush.msra.mxu3 %v5689_v61  ;;  %v5744_v38 = vld [vmem:[%s9749_s2 + $0xf08] sm:$0xff] }
 0x3c5   : > { %5670 = vmatmul.msk.f32.vlgmr.msra.gmra.mxu1 %vm2884_vm3, %v3986_v26  ;;  %5688 = vmatmul.msk.f32.vlgmr.msra.gmra.mxu2 %vm2884_vm3, %v4030_v27  ;;  %v5762_v61 = vld [vmem:[%s9749_s2 + $0xf88] sm:$0xff]  ;;  %v4118_v26 = vrot.slane %v9511_v13, 4  ;;  %v5725_v27 = vld [vmem:[%s9749_s2 + $0xe80] sm:$0xff] }
 0x3c6   : > { %5706 = vmatmul.msk.f32.vlgmr.msra.gmra.mxu3 %vm2884_vm3, %v4074_v44  ;;  %4125 = vmatpush.msrb.mxu0 %v5721_v1  ;;  %v5743_v1 = vld [vmem:[%s9749_s2 + $0xf00] sm:$0xff] }
 0x3c7   : > { %5741 = vmatpush.msk.msrb.mxu1 %vm2888_vm2, %v5740_v19  ;;  %5759 = vmatpush.msk.msrb.mxu2 %vm2888_vm2, %v5758_v29  ;;  %v5761_v44 = vld [vmem:[%s9749_s2 + $0xf80] sm:$0xff]  ;;  %v4162_v19 = vrot.slane %v9511_v13, 5  ;;  %v4206_v29 = vrot.slane %v9511_v13, 6 }
 0x3c8   : > { %5777 = vmatpush.msk.msrb.mxu3 %vm2888_vm2, %v5776_v42  ;;  %4126 = vmatpush.msrb.mxu0 %v5720_v24  ;;  %v4250_v42 = vrot.slane %v9511_v13, 7  ;;  %v2867_v24 = vld [vmem:[%s9750_s3] sm:$0x1] }
 0x3c9   : > { %4169 = vmatpush.msrb.mxu1 %v5739_v20  ;;  %4213 = vmatpush.msrb.mxu2 %v5757_v36  ;;  %v2909_v20 = vpop.f32.mrf.mxu0 }
 0x3ca   : > { %4257 = vmatpush.msrb.mxu3 %v5775_v4  ;;  %4127 = vmatpush.msrb.mxu0 %v5719_v21  ;;  %v2912_v36 = vadd.f32 %v2909_v20, %v2867_v24  ;;  %v2953_v4 = vpop.f32.mrf.mxu1  ;;  %v2997_v21 = vpop.f32.mrf.mxu2 }
 0x3cb   : > { %4170 = vmatpush.msrb.mxu1 %v5738_v60  ;;  %4214 = vmatpush.msrb.mxu2 %v5756_v40 }
 0x3cc   : > { %4258 = vmatpush.msrb.mxu3 %v5774_v3  ;;  %4128 = vmatpush.msrb.mxu0 %v5718_v50  ;;  %v2956_v60 = vadd.f32 %v2953_v4, %v2912_v36  ;;  %v3041_v3 = vpop.f32.mrf.mxu3 }
 0x3cd   : > { %4171 = vmatpush.msrb.mxu1 %v5737_v54  ;;  %4215 = vmatpush.msrb.mxu2 %v5755_v53 }
 0x3ce   : > { %4259 = vmatpush.msrb.mxu3 %v5773_v34  ;;  %4129 = vmatpush.msrb.mxu0 %v5717_v45  ;;  %v3000_v40 = vadd.f32 %v2997_v21, %v2956_v60 }
 0x3cf   : > { %4172 = vmatpush.msrb.mxu1 %v5736_v47  ;;  %4216 = vmatpush.msrb.mxu2 %v5754_v14 }
 0x3d0   : > { %4260 = vmatpush.msrb.mxu3 %v5772_v8  ;;  %4130 = vmatpush.msrb.mxu0 %v5716_v41  ;;  %v3044_v50 = vadd.f32 %v3041_v3, %v3000_v40 }
 0x3d1   : > { %4173 = vmatpush.msrb.mxu1 %v5735_v22  ;;  %4217 = vmatpush.msrb.mxu2 %v5753_v18  ;;  %v3085_v13 = vpop.f32.mrf.mxu0 }
 0x3d2   : > { %4261 = vmatpush.msrb.mxu3 %v5771_v23  ;;  %4131 = vmatpush.msrb.mxu0 %v5715_v35  ;;  %v3088_v54 = vadd.f32 %v3085_v13, %v3044_v50  ;;  %v3129_v53 = vpop.f32.mrf.mxu1  ;;  %v3173_v45 = vpop.f32.mrf.mxu2 }
 0x3d3   : > { %4174 = vmatpush.msrb.mxu1 %v5734_v2  ;;  %4218 = vmatpush.msrb.mxu2 %v5752_v43 }
 0x3d4   : > { %4262 = vmatpush.msrb.mxu3 %v5770_v7  ;;  %4132 = vmatpush.msrb.mxu0 %v5714_v11  ;;  %v3132_v34 = vadd.f32 %v3129_v53, %v3088_v54  ;;  %v3217_v14 = vpop.f32.mrf.mxu3 }
 0x3d5   : > { %4175 = vmatpush.msrb.mxu1 %v5733_v46  ;;  %4219 = vmatpush.msrb.mxu2 %v5751_v56 }
 0x3d6   : > { %4263 = vmatpush.msrb.mxu3 %v5769_v55  ;;  %4133 = vmatpush.msrb.mxu0 %v5713_v63  ;;  %v3176_v47 = vadd.f32 %v3173_v45, %v3132_v34 }
 0x3d7   : > { %4176 = vmatpush.msrb.mxu1 %v5732_v9  ;;  %4220 = vmatpush.msrb.mxu2 %v5750_v31 }
 0x3d8   : > { %4264 = vmatpush.msrb.mxu3 %v5768_v39  ;;  %4134 = vmatpush.msrb.mxu0 %v5712_v51  ;;  %v3220_v41 = vadd.f32 %v3217_v14, %v3176_v47 }
 0x3d9   : > { %4177 = vmatpush.msrb.mxu1 %v5731_v32  ;;  %4221 = vmatpush.msrb.mxu2 %v5749_v37  ;;  %v3261_v8 = vpop.f32.mrf.mxu0 }
 0x3da   : > { %4265 = vmatpush.msrb.mxu3 %v5767_v30  ;;  %4135 = vmatpush.msrb.mxu0 %v5711_v10  ;;  %v3264_v22 = vadd.f32 %v3261_v8, %v3220_v41  ;;  %v3305_v18 = vpop.f32.mrf.mxu1  ;;  %v3349_v23 = vpop.f32.mrf.mxu2 }
 0x3db   : > { %4178 = vmatpush.msrb.mxu1 %v5730_v48  ;;  %4222 = vmatpush.msrb.mxu2 %v5748_v6 }
 0x3dc   : > { %4266 = vmatpush.msrb.mxu3 %v5766_v58  ;;  %4136 = vmatpush.msrb.mxu0 %v5710_v5  ;;  %v3308_v35 = vadd.f32 %v3305_v18, %v3264_v22  ;;  %v3393_v43 = vpop.f32.mrf.mxu3 }
 0x3dd   : > { %4179 = vmatpush.msrb.mxu1 %v5729_v0  ;;  %4223 = vmatpush.msrb.mxu2 %v5747_v52 }
 0x3de   : > { %4267 = vmatpush.msrb.mxu3 %v5765_v17  ;;  %4137 = vmatpush.msrb.mxu0 %v5709_v33  ;;  %v3352_v2 = vadd.f32 %v3349_v23, %v3308_v35 }
 0x3df   : > { %4180 = vmatpush.msrb.mxu1 %v5728_v28  ;;  %4224 = vmatpush.msrb.mxu2 %v5746_v16 }
 0x3e0   : > { %4268 = vmatpush.msrb.mxu3 %v5764_v12  ;;  %4138 = vmatpush.msrb.mxu0 %v5708_v15  ;;  %v3396_v11 = vadd.f32 %v3393_v43, %v3352_v2 }
 0x3e1   : > { %4181 = vmatpush.msrb.mxu1 %v5727_v62  ;;  %4225 = vmatpush.msrb.mxu2 %v5745_v49  ;;  %v3437_v7 = vpop.f32.mrf.mxu0 }
 0x3e2   : > { %4269 = vmatpush.msrb.mxu3 %v5763_v59  ;;  %4139 = vmatpush.msrb.mxu0 %v5707_v57  ;;  %v3440_v46 = vadd.f32 %v3437_v7, %v3396_v11  ;;  %v3481_v56 = vpop.f32.mrf.mxu1  ;;  %v3525_v55 = vpop.f32.mrf.mxu2 }
 0x3e3   : > { %4182 = vmatpush.msrb.mxu1 %v5726_v25  ;;  %4226 = vmatpush.msrb.mxu2 %v5744_v38 }
 0x3e4   : > { %4270 = vmatpush.msrb.mxu3 %v5762_v61  ;;  %5724 = vmatmul.msk.f32.vlgmr.msrb.gmra.mxu0 %vm2884_vm3, %v4118_v26  ;;  %v3484_v63 = vadd.f32 %v3481_v56, %v3440_v46  ;;  %v3569_v31 = vpop.f32.mrf.mxu3 }
 0x3e5   : > { %4183 = vmatpush.msrb.mxu1 %v5725_v27  ;;  %4227 = vmatpush.msrb.mxu2 %v5743_v1 }
 0x3e6   : > { %4271 = vmatpush.msrb.mxu3 %v5761_v44  ;;  %5742 = vmatmul.msk.f32.vlgmr.msrb.gmra.mxu1 %vm2884_vm3, %v4162_v19  ;;  %v3528_v9 = vadd.f32 %v3525_v55, %v3484_v63 }
 0x3e7   : > { %5760 = vmatmul.msk.f32.vlgmr.msrb.gmra.mxu2 %vm2884_vm3, %v4206_v29  ;;  %5778 = vmatmul.msk.f32.vlgmr.msrb.gmra.mxu3 %vm2884_vm3, %v4250_v42 }
 0x3e8   : > { %v3572_v51 = vadd.f32 %v3569_v31, %v3528_v9 }
 0x3fb   : > { %v3613_v39 = vpop.f32.mrf.mxu0 }
 0x3fc   : > { %v3616_v32 = vadd.f32 %v3613_v39, %v3572_v51 }
 0x3fe   : > { %v3657_v37 = vpop.f32.mrf.mxu1 }
 0x3ff   : > { %v3660_v10 = vadd.f32 %v3657_v37, %v3616_v32 }
 0x404   : > { %v3701_v30 = vpop.f32.mrf.mxu2 }
 0x405   : > { %v3704_v48 = vadd.f32 %v3701_v30, %v3660_v10  ;;  %v3745_v6 = vpop.f32.mrf.mxu3 }
 0x407   : > { %v3748_v5 = vadd.f32 %v3745_v6, %v3704_v48 }
 0x41d   : > { %v3789_v58 = vpop.f32.mrf.mxu0 }
 0x41e   : > { %v3792_v0 = vadd.f32 %v3789_v58, %v3748_v5 }
 0x420   : > { %v3833_v52 = vpop.f32.mrf.mxu1 }
 0x421   : > { %v3836_v33 = vadd.f32 %v3833_v52, %v3792_v0 }
 0x426   : > { %v3877_v17 = vpop.f32.mrf.mxu2 }
 0x427   : > { %v3880_v28 = vadd.f32 %v3877_v17, %v3836_v33  ;;  %v3921_v16 = vpop.f32.mrf.mxu3 }
 0x429   : > { %v3924_v15 = vadd.f32 %v3921_v16, %v3880_v28 }
 0x43f   : > { %v3965_v12 = vpop.f32.mrf.mxu0 }
 0x440   : > { %v3968_v62 = vadd.f32 %v3965_v12, %v3924_v15 }
 0x442   : > { %v4009_v49 = vpop.f32.mrf.mxu1 }
 0x443   : > { %v4012_v57 = vadd.f32 %v4009_v49, %v3968_v62 }
 0x448   : > { %v4053_v59 = vpop.f32.mrf.mxu2 }
 0x449   : > { %v4056_v25 = vadd.f32 %v4053_v59, %v4012_v57  ;;  %v4097_v38 = vpop.f32.mrf.mxu3 }
 0x44b   : > { %v4100_v26 = vadd.f32 %v4097_v38, %v4056_v25 }
 0x461   : > { %v4141_v61 = vpop.f32.mrf.mxu0 }
 0x462   : > { %v4144_v27 = vadd.f32 %v4141_v61, %v4100_v26 }
 0x463   : > { %v4185_v1 = vpop.f32.mrf.mxu1 }
 0x464   : > { %v4188_v44 = vadd.f32 %v4185_v1, %v4144_v27 }
 0x46a   : > { %v4229_v19 = vpop.f32.mrf.mxu2  ;;  %v4273_v42 = vpop.f32.mrf.mxu3 }
 0x46b   : > { %v4232_v29 = vadd.f32 %v4229_v19, %v4188_v44 }
 0x46d   : > { %v4276_v24 = vadd.f32 %v4273_v42, %v4232_v29 }
 0x46f   : > { %4277 = vst [vmem:[%s193_s5] sm:$0x1] %v4276_v24 }
 0x470 PF: > { %s14_s15 = sadd.s32 1, %s6117_s15  }
 0x471   : > { %p11_p4 = scmp.ge.s32.totalorder %s14_s15, 4  }
 0x473   :  { %13 = sbr.rel (!%p11_p4) target bundleno = 1 (0x1), region = 104 }

</bundles_post_ra>
